<compile_context>
chip_gen: v7x
topology: tpu7x:2x2x1
jax: 0.10.0
libtpu: 0.0.40
codegen_flags: <defaults>
</compile_context>

<pallas_src>
import jax
import jax.numpy as jnp
from jax.experimental import pallas as pl
from jax.experimental.pallas import tpu as pltpu


_INV_SQRT2 = 0.7071067811865475


def _gelu_exact(x):
    # PyTorch nn.GELU default = exact (erf) formulation, computed in f32.
    return 0.5 * x * (1.0 + jax.lax.erf(x * _INV_SQRT2))


def dino_head_kernel(x_ref, w1_ref, b1_ref, w2_ref, b2_ref, w3_ref, b3_ref,
                     vt_ref, scale_ref, xproj_ref, logits_ref, xn_ref):
    j = pl.program_id(1)  # out_dim tile index (inner / "arbitrary" axis)

    # MLP branch + input normalization run once per batch tile (first out tile).
    @pl.when(j == 0)
    def _mlp_and_normalize():
        x = x_ref[...]                                           # (TM, IN) f32
        x_bf = x.astype(jnp.bfloat16)

        h = jnp.dot(x_bf, w1_ref[...],
                    preferred_element_type=jnp.float32) + b1_ref[...]
        h = _gelu_exact(h)
        h = jnp.dot(h.astype(jnp.bfloat16), w2_ref[...],
                    preferred_element_type=jnp.float32) + b2_ref[...]
        h = _gelu_exact(h)
        x_proj = jnp.dot(h.astype(jnp.bfloat16), w3_ref[...],
                         preferred_element_type=jnp.float32) + b3_ref[...]
        xproj_ref[...] = x_proj.astype(xproj_ref.dtype)

        # F.normalize(x, dim=-1): x / max(||x||, 1e-12)
        # == x * rsqrt(max(sum(x^2), 1e-24)); rsqrt goes to the EUP slot.
        ss = jnp.sum(x * x, axis=-1, keepdims=True)
        inv = jax.lax.rsqrt(jnp.maximum(ss, 1e-24))
        xn_ref[...] = (x * inv).astype(xn_ref.dtype)             # cached across j

    # logits branch: x_n @ v_t for this out_dim tile, then lane-wise
    # (g / ||v||_row) scale (weight_norm folded on the host, kept in f32).
    logits = jnp.dot(xn_ref[...], vt_ref[...],
                     preferred_element_type=jnp.float32)
    logits_ref[...] = (logits * scale_ref[...]).astype(logits_ref.dtype)


def _vmem_limit_bytes(tile_m, tile_n, in_dim, hidden, bottleneck,
                      single_buffer_weights):
    """Block-footprint-derived VMEM limit (bytes) with headroom."""
    bf16, f32 = 2, 4
    wbuf = 1 if single_buffer_weights else 2
    need = (
        2 * tile_m * in_dim * f32                                  # x (2 bufs)
        + 2 * in_dim * tile_n * bf16                               # v_t (2 bufs)
        + 2 * tile_n * f32                                         # scale
        + 2 * tile_m * bottleneck * f32                            # x_proj out
        + 2 * tile_m * tile_n * f32                                # logits out
        + wbuf * (in_dim * hidden + hidden * hidden
                  + hidden * bottleneck) * bf16                    # MLP weights
        + wbuf * (2 * hidden + bottleneck) * f32                   # biases
        + tile_m * in_dim * bf16                                   # xn scratch
    )
    # +30% and +6 MiB headroom for Mosaic internal scratch; floor at the default
    # scoped limit, cap under v6e's 128 MiB physical.  (On v7x, 64 MiB/TC: keep
    # tiles such that `need` stays <= ~48 MiB.)
    return int(min(max(1.3 * need + (6 << 20), 32 << 20), 96 << 20))


def dino_head_forward(x, prepped, *, tile_m=256, tile_n=512):
    """x: (B, in_dim) float32. prepped: output of prepare_params() (one-time).

    tile_m ~256 (v5e/v7x) or ~512 (v6e) amortizes v_t HBM streaming across rows;
    tile_n 512-1024 keeps per-grid-step overhead small for large out_dim.
    """
    B, in_dim = x.shape
    hidden = prepped["w1"].shape[1]
    bottleneck = prepped["w3"].shape[1]
    out_dim = prepped["v_t"].shape[1]

    tile_m = min(tile_m, B)
    tile_n = min(tile_n, out_dim)

    # Pad batch / out_dim up to tile multiples (no-op when already divisible).
    pad_m = (-B) % tile_m
    pad_n = (-out_dim) % tile_n
    x_p = x.astype(jnp.float32)
    if pad_m:
        x_p = jnp.pad(x_p, ((0, pad_m), (0, 0)))
    v_t, scale = prepped["v_t"], prepped["scale"]
    if pad_n:
        v_t = jnp.pad(v_t, ((0, 0), (0, pad_n)))
        scale = jnp.pad(scale, ((0, 0), (0, pad_n)))
    Bp, Np = B + pad_m, out_dim + pad_n

    grid = (Bp // tile_m, Np // tile_n)
    const = lambda i, j: (0, 0)

    out_shapes = (
        jax.ShapeDtypeStruct((Bp, bottleneck), jnp.float32),
        jax.ShapeDtypeStruct((Bp, Np), jnp.float32),
    )
    out_specs = (
        pl.BlockSpec((tile_m, bottleneck), lambda i, j: (i, 0)),   # x_proj
        pl.BlockSpec((tile_m, tile_n), lambda i, j: (i, j)),       # logits
    )

    def build(single_buffer_weights):
        # Grid-invariant operands (constant index_map): single-buffer to halve
        # their VMEM residency; streamed operands keep the default 2 buffers.
        wmode = ({"pipeline_mode": pl.Buffered(1)}
                 if single_buffer_weights else {})
        in_specs = [
            pl.BlockSpec((tile_m, in_dim), lambda i, j: (i, 0)),   # x (f32)
            pl.BlockSpec((in_dim, hidden), const, **wmode),        # w1 (bf16)
            pl.BlockSpec((1, hidden), const, **wmode),             # b1 (f32)
            pl.BlockSpec((hidden, hidden), const, **wmode),        # w2 (bf16)
            pl.BlockSpec((1, hidden), const, **wmode),             # b2 (f32)
            pl.BlockSpec((hidden, bottleneck), const, **wmode),    # w3 (bf16)
            pl.BlockSpec((1, bottleneck), const, **wmode),         # b3 (f32)
            pl.BlockSpec((in_dim, tile_n), lambda i, j: (0, j)),   # v_t (bf16)
            pl.BlockSpec((1, tile_n), lambda i, j: (0, j)),        # scale (f32)
        ]
        return pl.pallas_call(
            dino_head_kernel,
            out_shape=out_shapes,
            grid_spec=pltpu.PrefetchScalarGridSpec(
                num_scalar_prefetch=0,
                grid=grid,
                in_specs=in_specs,
                out_specs=out_specs,
                scratch_shapes=[
                    # normalized input cached across out_dim tiles
                    pltpu.VMEM((tile_m, in_dim), jnp.bfloat16),
                ],
            ),
            compiler_params=pltpu.CompilerParams(
                # batch tiles parallel (megacore); out_dim axis revisits x_proj
                # and the xn scratch -> arbitrary.
                dimension_semantics=("parallel", "arbitrary"),
                vmem_limit_bytes=_vmem_limit_bytes(
                    tile_m, tile_n, in_dim, hidden, bottleneck,
                    single_buffer_weights),
            ),
        )

    args = (x_p, prepped["w1"], prepped["b1"], prepped["w2"], prepped["b2"],
            prepped["w3"], prepped["b3"], v_t, scale)
    try:
        x_proj, logits = build(True)(*args)
    except Exception:
        # pipeline_mode=pl.Buffered(1) unavailable on this jax version ->
        # fall back to default double-buffered weights (correctness identical).
        x_proj, logits = build(False)(*args)

    if pad_m or pad_n:
        x_proj = x_proj[:B]
        logits = logits[:B, :out_dim]
    return x_proj, logits


def prepare_params(params):
    """One-time parameter prep (do NOT call per forward).

    Casts MLP weights to bf16, folds weight_norm (dim=0) into a (1, OUT) f32
    scale = g / max(||v||_row, 1e-12), and pre-transposes v to (in_dim, out_dim)
    so the kernel never recomputes ||v|| or transposes in HBM per call.
    """
    v = params["v"].astype(jnp.float32)                            # (OUT, IN)
    v_nrm = jnp.sqrt(jnp.sum(v * v, axis=-1))                      # (OUT,)
    scale = (params["g"].astype(jnp.float32)[None, :]
             / jnp.maximum(v_nrm[None, :], 1e-12))                 # (1, OUT)
    return {
        "w1": params["w1"].astype(jnp.bfloat16),
        "b1": params["b1"].astype(jnp.float32),
        "w2": params["w2"].astype(jnp.bfloat16),
        "b2": params["b2"].astype(jnp.float32),
        "w3": params["w3"].astype(jnp.bfloat16),
        "b3": params["b3"].astype(jnp.float32),
        "v_t": v.T.astype(jnp.bfloat16),                           # (IN, OUT)
        "scale": scale,
    }


def init_params(key, in_dim, out_dim, hidden_dim, bottleneck_dim):
    """Deterministic synthetic init (trunc_normal std=0.02, biases 0, weight_g=1)."""
    ks = jax.random.split(key, 4)
    tn = lambda k, shape: 0.02 * jax.random.truncated_normal(
        k, -2.0, 2.0, shape, jnp.float32)
    return {
        # MLP weights stored transposed (in, out) so the kernel does x @ W.
        "w1": tn(ks[0], (in_dim, hidden_dim)),
        "b1": jnp.zeros((1, hidden_dim), jnp.float32),
        "w2": tn(ks[1], (hidden_dim, hidden_dim)),
        "b2": jnp.zeros((1, hidden_dim), jnp.float32),
        "w3": tn(ks[2], (hidden_dim, bottleneck_dim)),
        "b3": jnp.zeros((1, bottleneck_dim), jnp.float32),
        # last_layer = weight_norm(Linear(in_dim, out_dim, bias=False)):
        # PyTorch (out, in) "v" layout; weight_g filled with 1.
        "v": tn(ks[3], (out_dim, in_dim)),
        "g": jnp.ones((out_dim,), jnp.float32),
    }


def reference_forward(x, p):
    """Pure-JAX reference mirroring the kernel's bf16-matmul / f32-accumulate path."""
    bf16, f32 = jnp.bfloat16, jnp.float32

    def gelu(v):
        return 0.5 * v * (1.0 + jax.lax.erf(v * _INV_SQRT2))

    def mm(a, b):
        return jnp.dot(a.astype(bf16), b.astype(bf16), preferred_element_type=f32)

    h = gelu(mm(x, p["w1"]) + p["b1"])
    h = gelu(mm(h, p["w2"]) + p["b2"])
    x_proj = mm(h, p["w3"]) + p["b3"]

    ss = jnp.sum(x * x, axis=-1, keepdims=True)
    x_n = x * jax.lax.rsqrt(jnp.maximum(ss, 1e-24))

    v = p["v"].astype(f32)
    v_nrm = jnp.sqrt(jnp.sum(v * v, axis=-1))
    scale = p["g"].reshape(1, -1) / jnp.maximum(v_nrm.reshape(1, -1), 1e-12)
    logits = mm(x_n, v.T) * scale
    return x_proj, logits


if __name__ == "__main__":
    key = jax.random.PRNGKey(0)
    kx, kp = jax.random.split(key)

    # Small but MXU/lane-friendly shapes (feature dims multiples of 128,
    # multiple batch- and out_dim-grid steps to exercise the xn scratch reuse).
    B, IN_DIM, HIDDEN, BOTTLENECK, OUT_DIM = 512, 128, 256, 128, 512

    x = jax.random.normal(kx, (B, IN_DIM), jnp.float32)
    params = init_params(kp, IN_DIM, OUT_DIM, HIDDEN, BOTTLENECK)
    prepped = prepare_params(params)            # one-time host-side prep

    x_proj, logits = dino_head_forward(x, prepped, tile_m=256, tile_n=256)
    jax.block_until_ready((x_proj, logits))

    assert x_proj.shape == (B, BOTTLENECK) and logits.shape == (B, OUT_DIM)
    x_proj_ref, logits_ref = reference_forward(x, params)
    assert jnp.allclose(x_proj, x_proj_ref, atol=1e-3, rtol=1e-3)
    assert jnp.allclose(logits, logits_ref, atol=1e-3, rtol=1e-3)

    print("KERNEL_OK")
</pallas_src>

<mosaic_0001>
module attributes {stable_mosaic.version = 11 : i64} {
  func.func @dino_head_kernel(%arg0: i32, %arg1: i32, %arg2: memref<256x128xf32, #tpu.memory_space<vmem>>, %arg3: memref<128x256xbf16, #tpu.memory_space<vmem>>, %arg4: memref<1x256xf32, #tpu.memory_space<vmem>>, %arg5: memref<256x256xbf16, #tpu.memory_space<vmem>>, %arg6: memref<1x256xf32, #tpu.memory_space<vmem>>, %arg7: memref<256x128xbf16, #tpu.memory_space<vmem>>, %arg8: memref<1x128xf32, #tpu.memory_space<vmem>>, %arg9: memref<128x256xbf16, #tpu.memory_space<vmem>>, %arg10: memref<1x256xf32, #tpu.memory_space<vmem>>, %arg11: memref<256x128xf32, #tpu.memory_space<vmem>>, %arg12: memref<256x256xf32, #tpu.memory_space<vmem>>, %arg13: memref<256x128xbf16, #tpu.memory_space<vmem>>) attributes {dimension_semantics = [#tpu.dimension_semantics<parallel>, #tpu.dimension_semantics<arbitrary>], iteration_bounds = array<i64: 2, 2>, scalar_prefetch = 0 : i64, scratch_operands = 1 : i64, tpu.core_type = #tpu.core_type<tc>, window_params = [{transform_indices = @transform_0, window_bounds = array<i64: 256, 128>}, {pipeline_mode = #tpu.pipeline_mode<synchronous>, transform_indices = @transform_1, window_bounds = array<i64: 128, 256>}, {pipeline_mode = #tpu.pipeline_mode<synchronous>, transform_indices = @transform_2, window_bounds = array<i64: 1, 256>}, {pipeline_mode = #tpu.pipeline_mode<synchronous>, transform_indices = @transform_3, window_bounds = array<i64: 256, 256>}, {pipeline_mode = #tpu.pipeline_mode<synchronous>, transform_indices = @transform_4, window_bounds = array<i64: 1, 256>}, {pipeline_mode = #tpu.pipeline_mode<synchronous>, transform_indices = @transform_5, window_bounds = array<i64: 256, 128>}, {pipeline_mode = #tpu.pipeline_mode<synchronous>, transform_indices = @transform_6, window_bounds = array<i64: 1, 128>}, {transform_indices = @transform_7, window_bounds = array<i64: 128, 256>}, {transform_indices = @transform_8, window_bounds = array<i64: 1, 256>}, {transform_indices = @transform_9, window_bounds = array<i64: 256, 128>}, {transform_indices = @transform_10, window_bounds = array<i64: 256, 256>}]} {
    %c0_i32 = arith.constant 0 : i32
    %0 = arith.cmpi eq, %arg1, %c0_i32 : i32
    %1 = arith.extui %0 : i1 to i32
    %c0_i32_0 = arith.constant 0 : i32
    %2 = arith.cmpi ne, %1, %c0_i32_0 : i32
    scf.if %2 {
      %c0_8 = arith.constant 0 : index
      %c0_9 = arith.constant 0 : index
      %10 = vector.load %arg2[%c0_8, %c0_9] : memref<256x128xf32, #tpu.memory_space<vmem>>, vector<256x128xf32>
      %11 = arith.truncf %10 : vector<256x128xf32> to vector<256x128xbf16>
      %c0_10 = arith.constant 0 : index
      %c0_11 = arith.constant 0 : index
      %12 = vector.load %arg3[%c0_10, %c0_11] : memref<128x256xbf16, #tpu.memory_space<vmem>>, vector<128x256xbf16>
      %cst_12 = arith.constant dense<0.000000e+00> : vector<256x256xf32>
      %13 = tpu.matmul %11, %12, %cst_12 {dimension_numbers = #tpu.dot_dimension_numbers<[1], [0], [0], [1], [0, 0, 1, 1], [], []>} : vector<256x128xbf16>, vector<128x256xbf16>, vector<256x256xf32> -> vector<256x256xf32>
      %c0_13 = arith.constant 0 : index
      %c0_14 = arith.constant 0 : index
      %14 = vector.load %arg4[%c0_13, %c0_14] : memref<1x256xf32, #tpu.memory_space<vmem>>, vector<1x256xf32>
      %15 = vector.broadcast %14 : vector<1x256xf32> to vector<256x256xf32>
      %16 = arith.addf %13, %15 : vector<256x256xf32>
      %cst_15 = arith.constant 5.000000e-01 : f32
      %17 = vector.broadcast %cst_15 : f32 to vector<256x256xf32>
      %18 = arith.mulf %17, %16 : vector<256x256xf32>
      %cst_16 = arith.constant 0.707106769 : f32
      %19 = vector.broadcast %cst_16 : f32 to vector<256x256xf32>
      %20 = arith.mulf %16, %19 : vector<256x256xf32>
      %21 = math.erf %20 : vector<256x256xf32>
      %cst_17 = arith.constant 1.000000e+00 : f32
      %22 = vector.broadcast %cst_17 : f32 to vector<256x256xf32>
      %23 = arith.addf %22, %21 : vector<256x256xf32>
      %24 = arith.mulf %18, %23 : vector<256x256xf32>
      %25 = arith.truncf %24 : vector<256x256xf32> to vector<256x256xbf16>
      %c0_18 = arith.constant 0 : index
      %c0_19 = arith.constant 0 : index
      %26 = vector.load %arg5[%c0_18, %c0_19] : memref<256x256xbf16, #tpu.memory_space<vmem>>, vector<256x256xbf16>
      %cst_20 = arith.constant dense<0.000000e+00> : vector<256x256xf32>
      %27 = tpu.matmul %25, %26, %cst_20 {dimension_numbers = #tpu.dot_dimension_numbers<[1], [0], [0], [1], [0, 0, 1, 1], [], []>} : vector<256x256xbf16>, vector<256x256xbf16>, vector<256x256xf32> -> vector<256x256xf32>
      %c0_21 = arith.constant 0 : index
      %c0_22 = arith.constant 0 : index
      %28 = vector.load %arg6[%c0_21, %c0_22] : memref<1x256xf32, #tpu.memory_space<vmem>>, vector<1x256xf32>
      %29 = vector.broadcast %28 : vector<1x256xf32> to vector<256x256xf32>
      %30 = arith.addf %27, %29 : vector<256x256xf32>
      %cst_23 = arith.constant 5.000000e-01 : f32
      %31 = vector.broadcast %cst_23 : f32 to vector<256x256xf32>
      %32 = arith.mulf %31, %30 : vector<256x256xf32>
      %cst_24 = arith.constant 0.707106769 : f32
      %33 = vector.broadcast %cst_24 : f32 to vector<256x256xf32>
      %34 = arith.mulf %30, %33 : vector<256x256xf32>
      %35 = math.erf %34 : vector<256x256xf32>
      %cst_25 = arith.constant 1.000000e+00 : f32
      %36 = vector.broadcast %cst_25 : f32 to vector<256x256xf32>
      %37 = arith.addf %36, %35 : vector<256x256xf32>
      %38 = arith.mulf %32, %37 : vector<256x256xf32>
      %39 = arith.truncf %38 : vector<256x256xf32> to vector<256x256xbf16>
      %c0_26 = arith.constant 0 : index
      %c0_27 = arith.constant 0 : index
      %40 = vector.load %arg7[%c0_26, %c0_27] : memref<256x128xbf16, #tpu.memory_space<vmem>>, vector<256x128xbf16>
      %cst_28 = arith.constant dense<0.000000e+00> : vector<256x128xf32>
      %41 = tpu.matmul %39, %40, %cst_28 {dimension_numbers = #tpu.dot_dimension_numbers<[1], [0], [0], [1], [0, 0, 1, 1], [], []>} : vector<256x256xbf16>, vector<256x128xbf16>, vector<256x128xf32> -> vector<256x128xf32>
      %c0_29 = arith.constant 0 : index
      %c0_30 = arith.constant 0 : index
      %42 = vector.load %arg8[%c0_29, %c0_30] : memref<1x128xf32, #tpu.memory_space<vmem>>, vector<1x128xf32>
      %43 = vector.broadcast %42 : vector<1x128xf32> to vector<256x128xf32>
      %44 = arith.addf %41, %43 : vector<256x128xf32>
      %c0_31 = arith.constant 0 : index
      %c0_32 = arith.constant 0 : index
      %45 = vector.load %arg11[%c0_31, %c0_32] : memref<256x128xf32, #tpu.memory_space<vmem>>, vector<256x128xf32>
      tpu.vector_store %arg11[%c0_31, %c0_32], %44 {strides = array<i32>} : memref<256x128xf32, #tpu.memory_space<vmem>>, vector<256x128xf32>,
      %46 = arith.mulf %10, %10 : vector<256x128xf32>
      %cst_33 = arith.constant dense<0.000000e+00> : vector<256xf32>
      %47 = vector.multi_reduction <add>, %46, %cst_33 [1] : vector<256x128xf32> to vector<256xf32>
      %48 = vector.shape_cast %47 : vector<256xf32> to vector<256x1xf32>
      %cst_34 = arith.constant 1.000000e-24 : f32
      %49 = vector.broadcast %cst_34 : f32 to vector<256x1xf32>
      %50 = arith.maximumf %48, %49 : vector<256x1xf32>
      %51 = math.rsqrt %50 : vector<256x1xf32>
      %52 = vector.broadcast %51 : vector<256x1xf32> to vector<256x128xf32>
      %53 = arith.mulf %10, %52 : vector<256x128xf32>
      %54 = arith.truncf %53 : vector<256x128xf32> to vector<256x128xbf16>
      %c0_35 = arith.constant 0 : index
      %c0_36 = arith.constant 0 : index
      %55 = vector.load %arg13[%c0_35, %c0_36] : memref<256x128xbf16, #tpu.memory_space<vmem>>, vector<256x128xbf16>
      tpu.vector_store %arg13[%c0_35, %c0_36], %54 {strides = array<i32>} : memref<256x128xbf16, #tpu.memory_space<vmem>>, vector<256x128xbf16>,
    } else {
    }
    %c0 = arith.constant 0 : index
    %c0_1 = arith.constant 0 : index
    %3 = vector.load %arg13[%c0, %c0_1] : memref<256x128xbf16, #tpu.memory_space<vmem>>, vector<256x128xbf16>
    %c0_2 = arith.constant 0 : index
    %c0_3 = arith.constant 0 : index
    %4 = vector.load %arg9[%c0_2, %c0_3] : memref<128x256xbf16, #tpu.memory_space<vmem>>, vector<128x256xbf16>
    %cst = arith.constant dense<0.000000e+00> : vector<256x256xf32>
    %5 = tpu.matmul %3, %4, %cst {dimension_numbers = #tpu.dot_dimension_numbers<[1], [0], [0], [1], [0, 0, 1, 1], [], []>} : vector<256x128xbf16>, vector<128x256xbf16>, vector<256x256xf32> -> vector<256x256xf32>
    %c0_4 = arith.constant 0 : index
    %c0_5 = arith.constant 0 : index
    %6 = vector.load %arg10[%c0_4, %c0_5] : memref<1x256xf32, #tpu.memory_space<vmem>>, vector<1x256xf32>
    %7 = vector.broadcast %6 : vector<1x256xf32> to vector<256x256xf32>
    %8 = arith.mulf %5, %7 : vector<256x256xf32>
    %c0_6 = arith.constant 0 : index
    %c0_7 = arith.constant 0 : index
    %9 = vector.load %arg12[%c0_6, %c0_7] : memref<256x256xf32, #tpu.memory_space<vmem>>, vector<256x256xf32>
    tpu.vector_store %arg12[%c0_6, %c0_7], %8 {strides = array<i32>} : memref<256x256xf32, #tpu.memory_space<vmem>>, vector<256x256xf32>,
    return
  }
  func.func @transform_0(%arg0: i32, %arg1: i32) -> (i32, i32) {
    %c0_i32 = arith.constant 0 : i32
    %c0_i32_0 = arith.constant 0 : i32
    return %arg0, %c0_i32 : i32, i32
  }
  func.func @transform_1(%arg0: i32, %arg1: i32) -> (i32, i32) {
    %c0_i32 = arith.constant 0 : i32
    %c0_i32_0 = arith.constant 0 : i32
    %c0_i32_1 = arith.constant 0 : i32
    return %c0_i32, %c0_i32_0 : i32, i32
  }
  func.func @transform_2(%arg0: i32, %arg1: i32) -> (i32, i32) {
    %c0_i32 = arith.constant 0 : i32
    %c0_i32_0 = arith.constant 0 : i32
    %c0_i32_1 = arith.constant 0 : i32
    return %c0_i32, %c0_i32_0 : i32, i32
  }
  func.func @transform_3(%arg0: i32, %arg1: i32) -> (i32, i32) {
    %c0_i32 = arith.constant 0 : i32
    %c0_i32_0 = arith.constant 0 : i32
    %c0_i32_1 = arith.constant 0 : i32
    return %c0_i32, %c0_i32_0 : i32, i32
  }
  func.func @transform_4(%arg0: i32, %arg1: i32) -> (i32, i32) {
    %c0_i32 = arith.constant 0 : i32
    %c0_i32_0 = arith.constant 0 : i32
    %c0_i32_1 = arith.constant 0 : i32
    return %c0_i32, %c0_i32_0 : i32, i32
  }
  func.func @transform_5(%arg0: i32, %arg1: i32) -> (i32, i32) {
    %c0_i32 = arith.constant 0 : i32
    %c0_i32_0 = arith.constant 0 : i32
    %c0_i32_1 = arith.constant 0 : i32
    return %c0_i32, %c0_i32_0 : i32, i32
  }
  func.func @transform_6(%arg0: i32, %arg1: i32) -> (i32, i32) {
    %c0_i32 = arith.constant 0 : i32
    %c0_i32_0 = arith.constant 0 : i32
    %c0_i32_1 = arith.constant 0 : i32
    return %c0_i32, %c0_i32_0 : i32, i32
  }
  func.func @transform_7(%arg0: i32, %arg1: i32) -> (i32, i32) {
    %c0_i32 = arith.constant 0 : i32
    %c0_i32_0 = arith.constant 0 : i32
    return %c0_i32, %arg1 : i32, i32
  }
  func.func @transform_8(%arg0: i32, %arg1: i32) -> (i32, i32) {
    %c0_i32 = arith.constant 0 : i32
    %c0_i32_0 = arith.constant 0 : i32
    return %c0_i32, %arg1 : i32, i32
  }
  func.func @transform_9(%arg0: i32, %arg1: i32) -> (i32, i32) {
    %c0_i32 = arith.constant 0 : i32
    %c0_i32_0 = arith.constant 0 : i32
    return %arg0, %c0_i32 : i32, i32
  }
  func.func @transform_10(%arg0: i32, %arg1: i32) -> (i32, i32) {
    %c0_i32 = arith.constant 0 : i32
    return %arg0, %arg1 : i32, i32
  }
}

module attributes {stable_mosaic.version = 11 : i64} {
  func.func @dino_head_kernel(%arg0: i32, %arg1: i32, %arg2: memref<256x128xf32, #tpu.memory_space<vmem>>, %arg3: memref<128x256xbf16, #tpu.memory_space<vmem>>, %arg4: memref<1x256xf32, #tpu.memory_space<vmem>>, %arg5: memref<256x256xbf16, #tpu.memory_space<vmem>>, %arg6: memref<1x256xf32, #tpu.memory_space<vmem>>, %arg7: memref<256x128xbf16, #tpu.memory_space<vmem>>, %arg8: memref<1x128xf32, #tpu.memory_space<vmem>>, %arg9: memref<128x256xbf16, #tpu.memory_space<vmem>>, %arg10: memref<1x256xf32, #tpu.memory_space<vmem>>, %arg11: memref<256x128xf32, #tpu.memory_space<vmem>>, %arg12: memref<256x256xf32, #tpu.memory_space<vmem>>, %arg13: memref<256x128xbf16, #tpu.memory_space<vmem>>) attributes {dimension_semantics = [#tpu.dimension_semantics<parallel>, #tpu.dimension_semantics<arbitrary>], iteration_bounds = array<i64: 2, 2>, scalar_prefetch = 0 : i64, scratch_operands = 1 : i64, tpu.core_type = #tpu.core_type<tc>, window_params = [{transform_indices = @transform_0, window_bounds = array<i64: 256, 128>}, {pipeline_mode = #tpu.pipeline_mode<synchronous>, transform_indices = @transform_1, window_bounds = array<i64: 128, 256>}, {pipeline_mode = #tpu.pipeline_mode<synchronous>, transform_indices = @transform_2, window_bounds = array<i64: 1, 256>}, {pipeline_mode = #tpu.pipeline_mode<synchronous>, transform_indices = @transform_3, window_bounds = array<i64: 256, 256>}, {pipeline_mode = #tpu.pipeline_mode<synchronous>, transform_indices = @transform_4, window_bounds = array<i64: 1, 256>}, {pipeline_mode = #tpu.pipeline_mode<synchronous>, transform_indices = @transform_5, window_bounds = array<i64: 256, 128>}, {pipeline_mode = #tpu.pipeline_mode<synchronous>, transform_indices = @transform_6, window_bounds = array<i64: 1, 128>}, {transform_indices = @transform_7, window_bounds = array<i64: 128, 256>}, {transform_indices = @transform_8, window_bounds = array<i64: 1, 256>}, {transform_indices = @transform_9, window_bounds = array<i64: 256, 128>}, {transform_indices = @transform_10, window_bounds = array<i64: 256, 256>}]} {
    %c0_i32 = arith.constant 0 : i32
    %0 = arith.cmpi eq, %arg1, %c0_i32 : i32
    %1 = arith.extui %0 : i1 to i32
    %c0_i32_0 = arith.constant 0 : i32
    %2 = arith.cmpi ne, %1, %c0_i32_0 : i32
    scf.if %2 {
      %c0_8 = arith.constant 0 : index
      %c0_9 = arith.constant 0 : index
      %10 = vector.load %arg2[%c0_8, %c0_9] : memref<256x128xf32, #tpu.memory_space<vmem>>, vector<256x128xf32>
      %11 = arith.truncf %10 : vector<256x128xf32> to vector<256x128xbf16>
      %c0_10 = arith.constant 0 : index
      %c0_11 = arith.constant 0 : index
      %12 = vector.load %arg3[%c0_10, %c0_11] : memref<128x256xbf16, #tpu.memory_space<vmem>>, vector<128x256xbf16>
      %cst_12 = arith.constant dense<0.000000e+00> : vector<256x256xf32>
      %13 = tpu.matmul %11, %12, %cst_12 {dimension_numbers = #tpu.dot_dimension_numbers<[1], [0], [0], [1], [0, 0, 1, 1], [], []>} : vector<256x128xbf16>, vector<128x256xbf16>, vector<256x256xf32> -> vector<256x256xf32>
      %c0_13 = arith.constant 0 : index
      %c0_14 = arith.constant 0 : index
      %14 = vector.load %arg4[%c0_13, %c0_14] : memref<1x256xf32, #tpu.memory_space<vmem>>, vector<1x256xf32>
      %15 = vector.broadcast %14 : vector<1x256xf32> to vector<256x256xf32>
      %16 = arith.addf %13, %15 : vector<256x256xf32>
      %cst_15 = arith.constant 5.000000e-01 : f32
      %17 = vector.broadcast %cst_15 : f32 to vector<256x256xf32>
      %18 = arith.mulf %17, %16 : vector<256x256xf32>
      %cst_16 = arith.constant 0.707106769 : f32
      %19 = vector.broadcast %cst_16 : f32 to vector<256x256xf32>
      %20 = arith.mulf %16, %19 : vector<256x256xf32>
      %21 = math.erf %20 : vector<256x256xf32>
      %cst_17 = arith.constant 1.000000e+00 : f32
      %22 = vector.broadcast %cst_17 : f32 to vector<256x256xf32>
      %23 = arith.addf %22, %21 : vector<256x256xf32>
      %24 = arith.mulf %18, %23 : vector<256x256xf32>
      %25 = arith.truncf %24 : vector<256x256xf32> to vector<256x256xbf16>
      %c0_18 = arith.constant 0 : index
      %c0_19 = arith.constant 0 : index
      %26 = vector.load %arg5[%c0_18, %c0_19] : memref<256x256xbf16, #tpu.memory_space<vmem>>, vector<256x256xbf16>
      %cst_20 = arith.constant dense<0.000000e+00> : vector<256x256xf32>
      %27 = tpu.matmul %25, %26, %cst_20 {dimension_numbers = #tpu.dot_dimension_numbers<[1], [0], [0], [1], [0, 0, 1, 1], [], []>} : vector<256x256xbf16>, vector<256x256xbf16>, vector<256x256xf32> -> vector<256x256xf32>
      %c0_21 = arith.constant 0 : index
      %c0_22 = arith.constant 0 : index
      %28 = vector.load %arg6[%c0_21, %c0_22] : memref<1x256xf32, #tpu.memory_space<vmem>>, vector<1x256xf32>
      %29 = vector.broadcast %28 : vector<1x256xf32> to vector<256x256xf32>
      %30 = arith.addf %27, %29 : vector<256x256xf32>
      %cst_23 = arith.constant 5.000000e-01 : f32
      %31 = vector.broadcast %cst_23 : f32 to vector<256x256xf32>
      %32 = arith.mulf %31, %30 : vector<256x256xf32>
      %cst_24 = arith.constant 0.707106769 : f32
      %33 = vector.broadcast %cst_24 : f32 to vector<256x256xf32>
      %34 = arith.mulf %30, %33 : vector<256x256xf32>
      %35 = math.erf %34 : vector<256x256xf32>
      %cst_25 = arith.constant 1.000000e+00 : f32
      %36 = vector.broadcast %cst_25 : f32 to vector<256x256xf32>
      %37 = arith.addf %36, %35 : vector<256x256xf32>
      %38 = arith.mulf %32, %37 : vector<256x256xf32>
      %39 = arith.truncf %38 : vector<256x256xf32> to vector<256x256xbf16>
      %c0_26 = arith.constant 0 : index
      %c0_27 = arith.constant 0 : index
      %40 = vector.load %arg7[%c0_26, %c0_27] : memref<256x128xbf16, #tpu.memory_space<vmem>>, vector<256x128xbf16>
      %cst_28 = arith.constant dense<0.000000e+00> : vector<256x128xf32>
      %41 = tpu.matmul %39, %40, %cst_28 {dimension_numbers = #tpu.dot_dimension_numbers<[1], [0], [0], [1], [0, 0, 1, 1], [], []>} : vector<256x256xbf16>, vector<256x128xbf16>, vector<256x128xf32> -> vector<256x128xf32>
      %c0_29 = arith.constant 0 : index
      %c0_30 = arith.constant 0 : index
      %42 = vector.load %arg8[%c0_29, %c0_30] : memref<1x128xf32, #tpu.memory_space<vmem>>, vector<1x128xf32>
      %43 = vector.broadcast %42 : vector<1x128xf32> to vector<256x128xf32>
      %44 = arith.addf %41, %43 : vector<256x128xf32>
      %c0_31 = arith.constant 0 : index
      %c0_32 = arith.constant 0 : index
      %45 = vector.load %arg11[%c0_31, %c0_32] : memref<256x128xf32, #tpu.memory_space<vmem>>, vector<256x128xf32>
      tpu.vector_store %arg11[%c0_31, %c0_32], %44 {strides = array<i32>} : memref<256x128xf32, #tpu.memory_space<vmem>>, vector<256x128xf32>,
      %46 = arith.mulf %10, %10 : vector<256x128xf32>
      %cst_33 = arith.constant dense<0.000000e+00> : vector<256xf32>
      %47 = vector.multi_reduction <add>, %46, %cst_33 [1] : vector<256x128xf32> to vector<256xf32>
      %48 = vector.shape_cast %47 : vector<256xf32> to vector<256x1xf32>
      %cst_34 = arith.constant 1.000000e-24 : f32
      %49 = vector.broadcast %cst_34 : f32 to vector<256x1xf32>
      %50 = arith.maximumf %48, %49 : vector<256x1xf32>
      %51 = math.rsqrt %50 : vector<256x1xf32>
      %52 = vector.broadcast %51 : vector<256x1xf32> to vector<256x128xf32>
      %53 = arith.mulf %10, %52 : vector<256x128xf32>
      %54 = arith.truncf %53 : vector<256x128xf32> to vector<256x128xbf16>
      %c0_35 = arith.constant 0 : index
      %c0_36 = arith.constant 0 : index
      %55 = vector.load %arg13[%c0_35, %c0_36] : memref<256x128xbf16, #tpu.memory_space<vmem>>, vector<256x128xbf16>
      tpu.vector_store %arg13[%c0_35, %c0_36], %54 {strides = array<i32>} : memref<256x128xbf16, #tpu.memory_space<vmem>>, vector<256x128xbf16>,
    } else {
    }
    %c0 = arith.constant 0 : index
    %c0_1 = arith.constant 0 : index
    %3 = vector.load %arg13[%c0, %c0_1] : memref<256x128xbf16, #tpu.memory_space<vmem>>, vector<256x128xbf16>
    %c0_2 = arith.constant 0 : index
    %c0_3 = arith.constant 0 : index
    %4 = vector.load %arg9[%c0_2, %c0_3] : memref<128x256xbf16, #tpu.memory_space<vmem>>, vector<128x256xbf16>
    %cst = arith.constant dense<0.000000e+00> : vector<256x256xf32>
    %5 = tpu.matmul %3, %4, %cst {dimension_numbers = #tpu.dot_dimension_numbers<[1], [0], [0], [1], [0, 0, 1, 1], [], []>} : vector<256x128xbf16>, vector<128x256xbf16>, vector<256x256xf32> -> vector<256x256xf32>
    %c0_4 = arith.constant 0 : index
    %c0_5 = arith.constant 0 : index
    %6 = vector.load %arg10[%c0_4, %c0_5] : memref<1x256xf32, #tpu.memory_space<vmem>>, vector<1x256xf32>
    %7 = vector.broadcast %6 : vector<1x256xf32> to vector<256x256xf32>
    %8 = arith.mulf %5, %7 : vector<256x256xf32>
    %c0_6 = arith.constant 0 : index
    %c0_7 = arith.constant 0 : index
    %9 = vector.load %arg12[%c0_6, %c0_7] : memref<256x256xf32, #tpu.memory_space<vmem>>, vector<256x256xf32>
    tpu.vector_store %arg12[%c0_6, %c0_7], %8 {strides = array<i32>} : memref<256x256xf32, #tpu.memory_space<vmem>>, vector<256x256xf32>,
    return
  }
  func.func @transform_0(%arg0: i32, %arg1: i32) -> (i32, i32) {
    %c0_i32 = arith.constant 0 : i32
    %c0_i32_0 = arith.constant 0 : i32
    return %arg0, %c0_i32 : i32, i32
  }
  func.func @transform_1(%arg0: i32, %arg1: i32) -> (i32, i32) {
    %c0_i32 = arith.constant 0 : i32
    %c0_i32_0 = arith.constant 0 : i32
    %c0_i32_1 = arith.constant 0 : i32
    return %c0_i32, %c0_i32_0 : i32, i32
  }
  func.func @transform_2(%arg0: i32, %arg1: i32) -> (i32, i32) {
    %c0_i32 = arith.constant 0 : i32
    %c0_i32_0 = arith.constant 0 : i32
    %c0_i32_1 = arith.constant 0 : i32
    return %c0_i32, %c0_i32_0 : i32, i32
  }
  func.func @transform_3(%arg0: i32, %arg1: i32) -> (i32, i32) {
    %c0_i32 = arith.constant 0 : i32
    %c0_i32_0 = arith.constant 0 : i32
    %c0_i32_1 = arith.constant 0 : i32
    return %c0_i32, %c0_i32_0 : i32, i32
  }
  func.func @transform_4(%arg0: i32, %arg1: i32) -> (i32, i32) {
    %c0_i32 = arith.constant 0 : i32
    %c0_i32_0 = arith.constant 0 : i32
    %c0_i32_1 = arith.constant 0 : i32
    return %c0_i32, %c0_i32_0 : i32, i32
  }
  func.func @transform_5(%arg0: i32, %arg1: i32) -> (i32, i32) {
    %c0_i32 = arith.constant 0 : i32
    %c0_i32_0 = arith.constant 0 : i32
    %c0_i32_1 = arith.constant 0 : i32
    return %c0_i32, %c0_i32_0 : i32, i32
  }
  func.func @transform_6(%arg0: i32, %arg1: i32) -> (i32, i32) {
    %c0_i32 = arith.constant 0 : i32
    %c0_i32_0 = arith.constant 0 : i32
    %c0_i32_1 = arith.constant 0 : i32
    return %c0_i32, %c0_i32_0 : i32, i32
  }
  func.func @transform_7(%arg0: i32, %arg1: i32) -> (i32, i32) {
    %c0_i32 = arith.constant 0 : i32
    %c0_i32_0 = arith.constant 0 : i32
    return %c0_i32, %arg1 : i32, i32
  }
  func.func @transform_8(%arg0: i32, %arg1: i32) -> (i32, i32) {
    %c0_i32 = arith.constant 0 : i32
    %c0_i32_0 = arith.constant 0 : i32
    return %c0_i32, %arg1 : i32, i32
  }
  func.func @transform_9(%arg0: i32, %arg1: i32) -> (i32, i32) {
    %c0_i32 = arith.constant 0 : i32
    %c0_i32_0 = arith.constant 0 : i32
    return %arg0, %c0_i32 : i32, i32
  }
  func.func @transform_10(%arg0: i32, %arg1: i32) -> (i32, i32) {
    %c0_i32 = arith.constant 0 : i32
    return %arg0, %arg1 : i32, i32
  }
}

</mosaic_0001>

<bundles_post_ra>
// kernel: tpu_custom_call.1
= control target key start
LH: loop header
LB: loop body
LE: loop exit
PB: predicated region body
PF: predicated region fallthrough
CT: control target
= control target key end

     0   :  { %s6023_s0 = inlined_call_operand.hbm [shape: f32[512,128], index: 0, kind: input, shape index: {}]   ;;  %s6024_s1 = inlined_call_operand.hbm [shape: bf16[128,256], index: 1, kind: input, shape index: {}]   ;;  %s6025_s2 = inlined_call_operand.vmem [shape: f32[1,256], index: 2, kind: input, shape index: {}]   ;;  %s6026_s3 = inlined_call_operand.hbm [shape: bf16[256,256], index: 3, kind: input, shape index: {}]   ;;  %s6027_s4 = inlined_call_operand.vmem [shape: f32[1,256], index: 4, kind: input, shape index: {}]   ;;  %s6028_s5 = inlined_call_operand.hbm [shape: bf16[256,128], index: 5, kind: input, shape index: {}]   ;;  %s6029_s6 = inlined_call_operand.vmem [shape: f32[1,128], index: 6, kind: input, shape index: {}]   ;;  %s6030_s7 = inlined_call_operand.hbm [shape: bf16[128,512], index: 7, kind: input, shape index: {}]   ;;  %s6031_s8 = inlined_call_operand.vmem [shape: f32[1,512], index: 8, kind: input, shape index: {}]   ;;  %s6032_s9 = inlined_call_operand.hbm [shape: f32[512,128], index: 9, kind: output, shape index: {0}]   ;;  %s6033_s10 = inlined_call_operand.hbm [shape: f32[512,512], index: 10, kind: output, shape index: {1}]  }
   0x1   :  { %6074 = sst [smem:[#allocation42_spill]] %s6023_s0 }
   0x2   :  { %6075 = sst [smem:[#allocation43_spill]] %s6024_s1 }
   0x3   :  { %6076 = sst [smem:[#allocation44_spill]] %s6025_s2 }
   0x4   :  { %6077 = sst [smem:[#allocation45_spill]] %s6027_s4 }
   0x5   :  { %6078 = sst [smem:[#allocation46_spill]] %s6029_s6 }
   0x6   :  { %6079 = sst [smem:[#allocation47_spill]] %s6031_s8 }
   0x7   :  { %6080 = sst [smem:[#allocation48_spill]] %s6032_s9 }
   0x8   :  { %6081 = sst [smem:[#allocation49_spill]] %s6033_s10 }
   0x9   :  { %16 = vsyncpa [#allocation4], 0 }
   0xa   :  { %18 = vsyncpa [#allocation4 + $0x1], 0 }
   0xb   :  { %19 = vsyncpa [#allocation7], 0 }
   0xc   :  { %20 = vsyncpa [#allocation10], 0 }
   0xd   :  { %21 = vsyncpa [#allocation5], 0 }
   0xe   :  { %23 = vsyncpa [#allocation5 + $0x1], 0 }
   0xf   :  { %24 = vsyncpa [#allocation14], 0 }
  0x10   :  { %26 = vsyncpa [#allocation14 + $0x1], 0  ;;  %s4518_s13 = smov 0   ;;  %s4520_s14 = smov 0  }
  0x11   :  { %s4522_s15 = smov 0   ;;  %s4524_s16 = smov 0  }
  0x12   :  { %s4526_s17 = smov 0   ;;  %s4528_s18 = smov 0  }
  0x13   :  { %s4530_s19 = smov 0   ;;  %s4532_s20 = smov 0  }
  0x14   :  { %s4534_s21 = smov 0   ;;  %s4536_s22 = smov 0  }
  0x15   :  { %s4538_s23 = smov 0   ;;  %s4540_s24 = smov 0  }
  0x16   :  { %s4542_s25 = smov 0   ;;  %s4544_s26 = smov 0  }
  0x17 LB: > { %6082 = sst [smem:[#allocation21_spill]] %s4390_s13  ;;  %s4587_s27 = sadd.s32 4294967295, %s4442_s26   ;;  %s4442_s26 = sphi %s4544_s26, %s32_s26   ;;  %s4438_s25 = sphi %s4542_s25, %s6181_s25   ;;  %s4434_s24 = sphi %s4540_s24, %s6180_s24   ;;  %s4430_s23 = sphi %s4538_s23, %s6170_s23   ;;  %s4426_s22 = sphi %s4536_s22, %s6179_s22   ;;  %s4422_s21 = sphi %s4534_s21, %s6178_s21   ;;  %s4418_s20 = sphi %s4532_s20, %s6177_s20   ;;  %s4414_s19 = sphi %s4530_s19, %s6169_s19   ;;  %s4410_s18 = sphi %s4528_s18, %s6176_s18   ;;  %s4406_s17 = sphi %s4526_s17, %s6175_s17   ;;  %s4402_s16 = sphi %s4524_s16, %s6167_s16   ;;  %s4398_s15 = sphi %s4522_s15, %s6174_s15   ;;  %s4394_s14 = sphi %s4520_s14, %s6173_s14   ;;  %s4390_s13 = sphi %s4518_s13, %s6165_s13  }
  0x18   : > { %6083 = sst [smem:[#allocation22_spill]] %s4394_s14  ;;  %s3176_s28 = sadd.s32 4294967294, %s4442_s26  }
  0x19   : > { %6084 = sst [smem:[#allocation23_spill]] %s4406_s17  ;;  %p64_p0 = scmp.ne.s32.totalorder %s4418_s20, %s4414_s19 }
  0x1a   : > { %6085 = sst [smem:[#allocation24_spill]] %s4414_s19  ;;  %p6043_p1 = scmp.eq.s32.totalorder %s4587_s27, 0 }
  0x1b   : > { %6086 = sst [smem:[#allocation25_spill]] %s4418_s20  ;;  %p216_p3 = scmp.ne.s32.totalorder %s4406_s17, %s4402_s16 }
  0x1c   : > { %6087 = sst [smem:[#allocation26_spill]] %s4426_s22  ;;  %p4598_p4 = por %p6043_p1, %p64_p0 }
  0x1d   : > { %6088 = sst [smem:[#allocation27_spill]] %s4430_s23  ;;  %p6044_p5 = scmp.eq.s32.totalorder %s4587_s27, 3 }
  0x1e   : > { %6089 = sst [smem:[#allocation28_spill]] %s4438_s25  ;;  %p4605_p6 = por %p216_p3, %p6043_p1 }
  0x1f   : > { %s6090_s29 = scalar_select %p4598_p4, 1, 0 }
  0x20   : > { %s6092_s30 = scalar_select %p4605_p6, 1, 0 }
  0x21   : > { %6091 = sst [smem:[#allocation29_spill]] %s6090_s29  ;;  %p272_p7 = scmp.eq.s32.totalorder %s3176_s28, 3 }
  0x22   : > { %6093 = sst [smem:[#allocation30_spill]] %s6092_s30  ;;  %p293_p8 = scmp.ne.s32.totalorder %s4398_s15, %s4394_s14 }
  0x23   : > { %p299_p9 = scmp.ne.s32.totalorder %s4394_s14, %s4390_s13  ;;  %p4613_p10 = por %p272_p7, %p64_p0 }
  0x24   : > { %p3177_p11 = scmp.ge.s32.totalorder %s4442_s26, 1  ;;  %p4620_p12 = por %p293_p8, %p6044_p5 }
  0x25   : > { %s6094_s11 = scalar_select %p4613_p10, 1, 0 }
  0x26   : > { %s6096_s12 = scalar_select %p4620_p12, 1, 0 }
  0x27   : > { %6095 = sst [smem:[#allocation31_spill]] %s6094_s11  ;;  %p4624_p13 = por %p299_p9, %p272_p7 }
  0x28   : > { %6097 = sst [smem:[#allocation32_spill]] %s6096_s12  ;;  %p307_p3 = scmp.lt.s32.totalorder %s4442_s26, 5 }
  0x29   : > { %s6098_s16 = scalar_select %p4624_p13, 1, 0 }
  0x2a   : > { %p4629_p2 = pnand %p3177_p11, %p307_p3  ;;  %s4444_s28 = smov [#allocation6]  }
  0x2b   : > { %6099 = sst [smem:[#allocation33_spill]] %s6098_s16  ;;  %s319_s13 = sshll.u32 %s4444_s28, 4  ;;  %s320_s13 = int_to_ptr.vmem [resolvable:$true] %s319_s13 }
  0x2c   : > { %s6100_s19 = scalar_select %p4629_p2, 1, 0 }
  0x2d   : > { %p3457_p0 = pneg %p4629_p2  ;;  %s6102_s1 = sld [smem:[#allocation43_spill]] }
  0x2f   : > { %p4637_p8 = pnand %p3457_p0, %p6043_p1 }
  0x31   : > { %s6101_s11 = scalar_select %p4637_p8, 1, 0 }
  0x32   : > { %p4649_p9 = pneg %p4637_p8 }
  0x33   : > { %s4108_s16 = scalar_lea.hbm %s6102_s1, 2048 }
  0x34   : > { %p4109_p7 = scmp.ne.s32.totalorder %s6102_s1, %s4108_s16  ;;  %p4115_p0 = scmp.lt.u32.totalorder %s4108_s16, %s6102_s1 }
  0x36   : > { %p4111_p11 = pnand %p4649_p9, %p4109_p7 }
  0x38   : > { %p4112_p3 = pneg %p4111_p11 }
  0x3a   : > { %p4117_p1 = pnand %p4115_p0, %p4112_p3 }
  0x3c   : > { %4120 = shalt.err (!%p4117_p1)
}
  0x3d   : > { %s4121_s10 = scalar_lea.vmem %s320_s13, 2048  ;;  %p4129_p12 = scmp.lt.s32.totalorder %s320_s13, %s320_s13 }
  0x3e   : > { %p4122_p5 = scmp.ne.s32.totalorder %s320_s13, %s4121_s10  ;;  %p4130_p6 = scmp.lt.s32.totalorder %s4121_s10, %s4121_s10 }
  0x40   : > { %p4124_p13 = pnand %p4122_p5, %p4649_p9  ;;  %p4131_p4 = por %p4130_p6, %p4129_p12 }
  0x42   : > { %p4125_p10 = pneg %p4124_p13 }
  0x44   : > { %p4132_p2 = pnand %p4131_p4, %p4125_p10 }
  0x46   : > { %4135 = shalt.err (!%p4132_p2)
}
  0x47   : > { %s6049_s9 = smov 128   ;;  %s6051_s4 = smov 8  }
  0x48   : > { %3460 = dma.hbm_to_vmem [thread:$0]  (!%p4637_p8), %s6102_s1, 2048, %s320_s13, [#allocation7], %s6049_s9, %s6049_s9, %s6051_s4  }
  0x49   : > { %s41_s12 = sadd.s32 1, %s4434_s24  ;;  %s44_s16 = sadd.s32 1, %s4438_s25 }
  0x4a   : > { %p42_p1 = scmp.ge.s32.totalorder %s41_s12, 2  ;;  %s51_s10 = sadd.s32 1, %s4422_s21 }
  0x4b   : > { %p58_p2 = scmp.ne.s32.totalorder %s4422_s21, %s4418_s20  ;;  %p59_p4 = scmp.eq.s32.totalorder %s4442_s26, 0 }
  0x4c   : > { %s6183_s12 = smov (%p42_p1, %s41_s12), 0  ;;  %s6185_s16 = smov (!%p42_p1, %s44_s16), %s4438_s25 }
  0x4d   : > { %6104 = sst [smem:[#allocation34_spill]] %s6183_s12  ;;  %p4680_p5 = por %p59_p4, %p58_p2 }
  0x4e   : > { %s200_s6 = ssub.s32 %s4434_s24, %s6183_s12  ;;  %p46_p6 = scmp.ge.s32.totalorder %s6185_s16, 2 }
  0x4f   : > { %p201_p10 = scmp.eq.s32.totalorder %s200_s6, 0  ;;  %s203_s23 = sadd.s32 1, %s4410_s18 }
  0x50   : > { %p6106_p12 = scmp.ne.s32.totalorder %s4410_s18, %s4406_s17  ;;  %s6187_s16 = smov (%p46_p6, %s6185_s16), 0 }
  0x51   : > { %6108 = sst [smem:[#allocation35_spill]] %s6187_s16  ;;  %s48_s1 = ssub.s32 %s4438_s25, %s6187_s16 }
  0x52   : > { %p4690_p13 = por %p6106_p12, %p59_p4  ;;  %p6110_p7 = scmp.eq.s32.totalorder %s4587_s27, 3 }
  0x53   : > { %s4697_s4 = scalar_select %p201_p10, %s4410_s18, %s203_s23  }
  0x54   : > { %p4706_p11 = por %p6110_p7, %p58_p2  ;;  %p49_p3 = scmp.eq.s32.totalorder %s48_s1, 0 }
  0x55   : > { %6109 = sst [smem:[#allocation36_spill]] %s4697_s4  ;;  %s280_s2 = sor.u32 %s200_s6, %s48_s1 }
  0x56   : > { %s6111_s12 = scalar_select %p4706_p11, 1, 0 }
  0x57   : > { %p281_p0 = scmp.eq.s32.totalorder %s280_s2, 0  ;;  %s283_s8 = sadd.s32 1, %s4398_s15 }
  0x58   : > { %s4712_s22 = scalar_select %p49_p3, %s4422_s21, %s51_s10  }
  0x59   : > { %s4715_s14 = scalar_select %p281_p0, %s4398_s15, %s283_s8  }
  0x5a   : > { %p3484_p1 = scmp.lt.s32.totalorder %s4442_s26, 4  ;;  %s368_s23 = sand.u32 1, %s4442_s26  }
  0x5b   : > { %s370_s4 = sand.u32 1, %s4422_s21   ;;  %s3289_s30 = sshll.u32 %s4438_s25, 12 }
  0x5c   : > { %s3182_s16 = sshll.u32 %s370_s4, 8  ;;  %s6112_s0 = sld [smem:[#allocation42_spill]] }
  0x5d   : > { %s372_s1 = scalar_lea.vmem [#allocation3], %s3182_s16  ;;  %p4728_p2 = pnand %p3484_p1, %p4680_p5 }
  0x5e   : > { %s379_s2 = sshll.u32 %s372_s1, 4  ;;  %p4736_p4 = pnand %p3484_p1, %p4690_p13  ;;  %s4732_s2 = int_to_ptr.vmem [resolvable:$true] %s379_s2 }
  0x5f   : > { %s4740_s29 = scalar_lea.sflag [#allocation4], %s368_s23  ;;  %p4138_p10 = pneg %p4728_p2 }
  0x60   : > { %s6114_s17 = scalar_select %p4736_p4, 1, 0 }
  0x62   : > { %s4724_s20 = scalar_lea.hbm %s6112_s0, %s3289_s30  ;;  %s4141_s10 = scalar_lea.hbm %s6112_s0, 8192 }
  0x63   : > { %s4136_s30 = scalar_lea.hbm %s4724_s20, 4096  ;;  %p4142_p13 = scmp.lt.u32.totalorder %s4724_s20, %s6112_s0 }
  0x64   : > { %p4137_p6 = scmp.ne.s32.totalorder %s4724_s20, %s4136_s30  ;;  %p4143_p7 = scmp.lt.u32.totalorder %s4141_s10, %s4136_s30 }
  0x65   : > { %p4145_p0 = scmp.lt.u32.totalorder %s4136_s30, %s4724_s20 }
  0x66   : > { %p4139_p5 = pnand %p4138_p10, %p4137_p6  ;;  %p4144_p3 = por %p4143_p7, %p4142_p13 }
  0x68   : > { %p4140_p12 = pneg %p4139_p5  ;;  %p4146_p1 = por %p4145_p0, %p4144_p3 }
  0x6a   : > { %p4147_p11 = pnand %p4146_p1, %p4140_p12 }
  0x6c   : > { %4150 = shalt.err (!%p4147_p11)
}
  0x6d   : > { %s4151_s6 = scalar_lea.vmem %s4732_s2, 4096  ;;  %s4447_s23 = smov [#allocation3]  }
  0x6e   : > { %p4152_p6 = scmp.ne.s32.totalorder %s4732_s2, %s4151_s6  ;;  %s4156_s1 = sshll.u32 %s4447_s23, 4  ;;  %s4157_s1 = int_to_ptr.vmem [resolvable:$false] %s4156_s1 }
  0x6f   : > { %s4158_s4 = scalar_lea.vmem %s4157_s1, 8192  ;;  %p4159_p8 = scmp.lt.s32.totalorder %s4732_s2, %s4157_s1 }
  0x70   : > { %p4154_p5 = pnand %p4152_p6, %p4138_p10  ;;  %p4160_p13 = scmp.lt.s32.totalorder %s4158_s4, %s4151_s6 }
  0x72   : > { %p4155_p4 = pneg %p4154_p5  ;;  %p4161_p7 = por %p4160_p13, %p4159_p8 }
  0x74   : > { %p4162_p3 = pnand %p4161_p7, %p4155_p4 }
  0x76   : > { %4165 = shalt.err (!%p4162_p3)
}
  0x77   : > { %s6115_s30 = smov 8   ;;  %s6116_s16 = smov 128  }
  0x78   : > { %3470 = dma.hbm_to_vmem [thread:$0]  (!%p4728_p2), %s4724_s20, 4096, %s4732_s2, %s4740_s29, %s6116_s16, %s6116_s16, %s6115_s30  }
  0x79   : > { %s4448_s10 = smov [#allocation8]   ;;  %s4166_s6 = scalar_lea.hbm %s6026_s3, 4096 }
  0x7a   : > { %s335_s13 = sshll.u32 %s4448_s10, 4  ;;  %p4167_p8 = scmp.ne.s32.totalorder %s6026_s3, %s4166_s6  ;;  %s336_s13 = int_to_ptr.vmem [resolvable:$true] %s335_s13 }
  0x7b   : > { %p4173_p10 = scmp.lt.u32.totalorder %s4166_s6, %s6026_s3 }
  0x7c   : > { %p4169_p11 = pnand %p4167_p8, %p4649_p9 }
  0x7e   : > { %p4170_p4 = pneg %p4169_p11 }
  0x80   : > { %p4175_p12 = pnand %p4173_p10, %p4170_p4 }
  0x82   : > { %4178 = shalt.err (!%p4175_p12)
}
  0x83   : > { %s4179_s20 = scalar_lea.vmem %s336_s13, 4096  ;;  %p4187_p6 = scmp.lt.s32.totalorder %s336_s13, %s336_s13 }
  0x84   : > { %p4180_p2 = scmp.ne.s32.totalorder %s336_s13, %s4179_s20  ;;  %p4188_p5 = scmp.lt.s32.totalorder %s4179_s20, %s4179_s20 }
  0x86   : > { %p4182_p0 = pnand %p4180_p2, %p4649_p9  ;;  %p4189_p13 = por %p4188_p5, %p4187_p6 }
  0x88   : > { %p4183_p1 = pneg %p4182_p0 }
  0x8a   : > { %p4190_p7 = pnand %p4189_p13, %p4183_p1 }
  0x8c   : > { %4193 = shalt.err (!%p4190_p7)
}
  0x8d   : > { %p6117_p3 = scmp.ne.s32.totalorder %s6101_s11, 0  ;;  %s4449_s10 = smov [#allocation9]  }
  0x8e   : > { %s351_s9 = sshll.u32 %s4449_s10, 4  ;;  %s4194_s1 = scalar_lea.hbm %s6028_s5, 2048  ;;  %s352_s9 = int_to_ptr.vmem [resolvable:$true] %s351_s9 }
  0x8f   : > { %3463 = dma.hbm_to_vmem [thread:$0]  (!%p6117_p3), %s6026_s3, 4096, %s336_s13, [#allocation7], %s6116_s16, %s6116_s16, %s6115_s30  }
  0x90   : > { %p4195_p8 = scmp.ne.s32.totalorder %s6028_s5, %s4194_s1  ;;  %p4201_p10 = scmp.lt.u32.totalorder %s4194_s1, %s6028_s5 }
  0x92   : > { %p4197_p11 = pnand %p4195_p8, %p4649_p9 }
  0x94   : > { %p4198_p4 = pneg %p4197_p11 }
  0x96   : > { %p4203_p12 = pnand %p4201_p10, %p4198_p4 }
  0x98   : > { %4206 = shalt.err (!%p4203_p12)
}
  0x99   : > { %s4207_s13 = scalar_lea.vmem %s352_s9, 2048  ;;  %p4215_p6 = scmp.lt.s32.totalorder %s352_s9, %s352_s9 }
  0x9a   : > { %p4208_p2 = scmp.ne.s32.totalorder %s352_s9, %s4207_s13  ;;  %p4216_p5 = scmp.lt.s32.totalorder %s4207_s13, %s4207_s13 }
  0x9c   : > { %p4210_p0 = pnand %p4208_p2, %p4649_p9  ;;  %p4217_p13 = por %p4216_p5, %p4215_p6 }
  0x9e   : > { %p4211_p1 = pneg %p4210_p0 }
  0xa0   : > { %p4218_p7 = pnand %p4217_p13, %p4211_p1 }
  0xa2   : > { %4221 = shalt.err (!%p4218_p7)
}
  0xa3   : > { %s4450_s0 = smov 64   ;;  %s4451_s25 = smov 4  }
  0xa4   : > { %3466 = dma.hbm_to_vmem [thread:$0]  (!%p6117_p3), %s6028_s5, 2048, %s352_s9, [#allocation10], %s4450_s0, %s4450_s0, %s4451_s25  }
  0xa5   : > { %s391_s28 = sand.u32 1, %s4410_s18   ;;  %s3290_s23 = sshll.u32 %s4434_s24, 7 }
  0xa6   : > { %s3185_s6 = sshll.u32 %s391_s28, 7  ;;  %s4815_s8 = scalar_lea.hbm %s6030_s7, %s3290_s23 }
  0xa7   : > { %s393_s20 = scalar_lea.vmem [#allocation11], %s3185_s6  ;;  %s4222_s11 = scalar_lea.hbm %s4815_s8, 2048 }
  0xa8   : > { %s400_s13 = sshll.u32 %s393_s20, 4  ;;  %p4223_p9 = scmp.ne.s32.totalorder %s4815_s8, %s4222_s11  ;;  %s4817_s13 = int_to_ptr.vmem [resolvable:$true] %s400_s13 }
  0xa9   : > { %p6118_p8 = scmp.ne.s32.totalorder %s6114_s17, 0  ;;  %s4227_s25 = scalar_lea.hbm %s6030_s7, 4096 }
  0xaa   : > { %p4228_p10 = scmp.lt.u32.totalorder %s4815_s8, %s6030_s7  ;;  %p4229_p12 = scmp.lt.u32.totalorder %s4227_s25, %s4222_s11 }
  0xab   : > { %p4224_p3 = pneg %p6118_p8  ;;  %p4231_p0 = scmp.lt.u32.totalorder %s4222_s11, %s4815_s8 }
  0xac   : > { %p4230_p2 = por %p4229_p12, %p4228_p10 }
  0xad   : > { %p4225_p11 = pnand %p4224_p3, %p4223_p9 }
  0xae   : > { %p4232_p1 = por %p4231_p0, %p4230_p2 }
  0xaf   : > { %p4226_p4 = pneg %p4225_p11 }
  0xb1   : > { %p4233_p6 = pnand %p4232_p1, %p4226_p4 }
  0xb3   : > { %4236 = shalt.err (!%p4233_p6)
}
  0xb4   : > { %s4237_s28 = scalar_lea.vmem %s4817_s13, 2048  ;;  %s4452_s23 = smov [#allocation11]  }
  0xb5   : > { %p4238_p5 = scmp.ne.s32.totalorder %s4817_s13, %s4237_s28  ;;  %s4242_s6 = sshll.u32 %s4452_s23, 4  ;;  %s4243_s6 = int_to_ptr.vmem [resolvable:$false] %s4242_s6 }
  0xb6   : > { %s4244_s1 = scalar_lea.vmem %s4243_s6, 4096  ;;  %p4245_p9 = scmp.lt.s32.totalorder %s4817_s13, %s4243_s6 }
  0xb7   : > { %p4240_p13 = pnand %p4238_p5, %p4224_p3  ;;  %p4246_p11 = scmp.lt.s32.totalorder %s4244_s1, %s4237_s28 }
  0xb9   : > { %p4241_p7 = pneg %p4240_p13  ;;  %p4247_p10 = por %p4246_p11, %p4245_p9 }
  0xbb   : > { %p4248_p12 = pnand %p4247_p10, %p4241_p7 }
  0xbd   : > { %4251 = shalt.err (!%p4248_p12)
}
  0xbe   : > { %s4453_s4 = smov 256   ;;  %p6119_p3 = scmp.ne.s32.totalorder %s6100_s19, 0 }
  0xbf   : > { %3473 = dma.hbm_to_vmem [thread:$0]  (!%p6118_p8), %s4815_s8, 2048, %s4817_s13, %s4740_s29, %s4453_s4, %s6116_s16, %s6115_s30  }
  0xc0   : > { %420 = sbr.rel (%p6119_p3) target bundleno = 1409 (0x581), region = 56  ;;  %s6120_s20 = sld [smem:[#allocation25_spill]] (!%p6119_p3) }
  0xc1   : > { %s6121_s11 = sld [smem:[#allocation29_spill]] (!%p6119_p3)  ;;  %s422_s9 = sand.u32 (!%p6119_p3), 1, %s4587_s27  }
  0xc2   : > { %s423_s2 = scalar_lea.sflag (!%p6119_p3), [#allocation4], %s422_s9 }
  0xc6   : > { %s424_s0 = sand.u32 (!%p6119_p3), 1, %s6120_s20  }
  0xc7   : > { %s3189_s25 = sshll.u32 %s424_s0, 8  ;;  %p6122_p4 = scmp.ne.s32.totalorder %s6121_s11, 0 }
  0xc8   : > { %s4853_s10 = scalar_lea.vmem [#allocation3], %s3189_s25 }
  0xc9   : > { %4365 = dma.done.wait (%p6122_p4), %s423_s2, 4096  }
  0xca   : > { %4367 = vsyncadd (%p6122_p4), %s423_s2, 4294963200  ;;  %p6123_p8 = scmp.eq.s32.totalorder %s4587_s27, 0 }
  0xcc   : > { %4369 = dma.done.wait (%p6123_p8), [#allocation7], 6144   ;;  %p6124_p2 = pmov %p6123_p8 }
  0xce   : > { %4371 = vsyncadd (%p6124_p2), [#allocation7], 4294961152  ;;  %p6125_p0 = pmov %p6124_p2 }
  0xd0   : > { %4373 = dma.done.wait (%p6125_p0), [#allocation10], 2048   ;;  %p6126_p1 = pmov %p6125_p0 }
  0xd1   : > { %s6127_s19 = sld [smem:[#allocation23_spill]]  ;;  %s6128_s17 = sld [smem:[#allocation30_spill]] }
  0xd2   : > { %4375 = vsyncadd (%p6126_p1), [#allocation10], 4294965248 }
  0xd7   : > { %s445_s29 = sand.u32 1, %s6127_s19   ;;  %p6129_p6 = scmp.ne.s32.totalorder %s6128_s17, 0 }
  0xd8   : > { %s3193_s30 = sshll.u32 %s445_s29, 7 }
  0xd9   : > { %s4868_s16 = scalar_lea.vmem [#allocation11], %s3193_s30 }
  0xda   : > { %4377 = dma.done.wait (%p6129_p6), %s423_s2, 2048  }
  0xdb   : > { %4379 = vsyncadd (%p6129_p6), %s423_s2, 4294965248  ;;  %s6130_s8 = sld [smem:[#allocation22_spill]]  ;;  %s6131_s13 = sld [smem:[#allocation26_spill]] }
  0xdc   : > { %s6132_s20 = sld [smem:[#allocation47_spill]]  ;;  %s4888_s9 = scalar_lea.vmem [#allocation12], %s3189_s25 }
  0xe1   : > { %s495_s28 = sand.u32 1, %s6130_s8   ;;  %s4878_s6 = sshll.u32 %s6131_s13, 1 }
  0xe2   : > { %s3195_s23 = sshll.u32 %s495_s28, 9  ;;  %p501_p5 = scmp.lt.s32.totalorder %s4878_s6, 3 }
  0xe3   : > { %s4890_s2 = scalar_lea.vmem [#allocation13], %s3195_s23  ;;  %p3197_p13 = scmp.ne.s32.totalorder %s6131_s13, 0 }
  0xe4   : > { %s4882_s27 = scalar_select %p501_p5, %s4878_s6, 3 }
  0xe5   : > { %512 = sbr.rel (%p3197_p13) target bundleno = 1086 (0x43e), region = 80 }
  0xe6   : > { %s503_s11 = scalar_lea.vmem %s6132_s20, %s4882_s27 }
  0xec   : > { %v3616_v0 = vld [vmem:[#allocation6 + $0x4] ss:$8 sps:$4 sm:$0xff]   ;;  %v3618_v1 = vld [vmem:[#allocation6] ss:$8 sps:$4 sm:$0xff]   ;;  %v4454_v2 = vmov 0   ;;  %v515_v25 = vld [vmem:[%s4853_s10 + $0x10] sm:$0xff] }
  0xed   : > { %701 = vmatprep.mubr.bf16.mxu0 %v4454_v2  ;;  %781 = vmatprep.mubr.bf16.mxu1 %v4454_v2  ;;  %v3619_v3 = vld [vmem:[#allocation6 + $0x14] ss:$8 sps:$4 sm:$0xff]   ;;  %v3621_v4 = vld [vmem:[#allocation6 + $0x10] ss:$8 sps:$4 sm:$0xff]   ;;  %v3622_v5 = vld [vmem:[#allocation6 + $0x24] ss:$8 sps:$4 sm:$0xff]  }
  0xee   : > { %669 = vmatprep.subr.bf16.mxu0 %v3616_v0  ;;  %3405 = vmatprep.subr.bf16.mxu1 %v3616_v0  ;;  %v3624_v6 = vld [vmem:[#allocation6 + $0x20] ss:$8 sps:$4 sm:$0xff]   ;;  %v3625_v7 = vld [vmem:[#allocation6 + $0x34] ss:$8 sps:$4 sm:$0xff]   ;;  %v3627_v8 = vld [vmem:[#allocation6 + $0x30] ss:$8 sps:$4 sm:$0xff]  }
  0xef   : > { %670 = vmatpush1.bf16.msra.mxu0 %v3618_v1  ;;  %3413 = vmatpush1.bf16.msra.mxu1 %v3618_v1  ;;  %v3628_v9 = vld [vmem:[#allocation6 + $0x44] ss:$8 sps:$4 sm:$0xff]   ;;  %v3630_v10 = vld [vmem:[#allocation6 + $0x40] ss:$8 sps:$4 sm:$0xff]   ;;  %v3631_v11 = vld [vmem:[#allocation6 + $0x54] ss:$8 sps:$4 sm:$0xff]  }
  0xf0   : > { %671 = vmatprep.subr.bf16.mxu0 %v3619_v3  ;;  %3406 = vmatprep.subr.bf16.mxu1 %v3619_v3  ;;  %v3633_v12 = vld [vmem:[#allocation6 + $0x50] ss:$8 sps:$4 sm:$0xff]   ;;  %v3634_v13 = vld [vmem:[#allocation6 + $0x64] ss:$8 sps:$4 sm:$0xff]   ;;  %v3636_v14 = vld [vmem:[#allocation6 + $0x60] ss:$8 sps:$4 sm:$0xff]  }
  0xf1   : > { %v3637_v15 = vld [vmem:[#allocation6 + $0x74] ss:$8 sps:$4 sm:$0xff]   ;;  %v3639_v16 = vld [vmem:[#allocation6 + $0x70] ss:$8 sps:$4 sm:$0xff]   ;;  %v513_v17 = vld [vmem:[%s4853_s10] sm:$0xff]  ;;  %s6134_s17 = sld [smem:[#allocation44_spill]] }
  0xf2   : > { %v514_v18 = vld [vmem:[%s4853_s10 + $0x8] sm:$0xff]  ;;  %v529_v19 = vld [vmem:[%s4853_s10 + $0x80] sm:$0xff]  ;;  %v516_v26 = vld [vmem:[%s4853_s10 + $0x18] sm:$0xff]  ;;  %s6143_s8 = sld [smem:[#allocation45_spill]]  ;;  %s6147_s1 = sld [smem:[#allocation46_spill]] }
  0xf3   : > { %672 = vmatpush1.bf16.msra.mxu0 %v3621_v4  ;;  %3414 = vmatpush1.bf16.msra.mxu1 %v3621_v4  ;;  %v530_v20 = vld [vmem:[%s4853_s10 + $0x88] sm:$0xff]  ;;  %v545_v22 = vpack.c.bf16 %v514_v18, %v513_v17  ;;  %v3645_v27 = vld [vmem:[#allocation8 + $0x14] ss:$8 sps:$4 sm:$0xff]   ;;  %v3643_v30 = vld [vmem:[#allocation8 + $0x10] ss:$8 sps:$4 sm:$0xff]   ;;  %v546_v32 = vpack.c.bf16 %v516_v26, %v515_v25 }
  0xf4   : > { %673 = vmatprep.subr.bf16.mxu0 %v3622_v5  ;;  %3407 = vmatprep.subr.bf16.mxu1 %v3622_v5  ;;  %v3642_v21 = vld [vmem:[#allocation8 + $0x4] ss:$8 sps:$4 sm:$0xff]   ;;  %v553_v23 = vpack.c.bf16 %v530_v20, %v529_v19  ;;  %v3640_v24 = vld [vmem:[#allocation8] ss:$8 sps:$4 sm:$0xff]   ;;  %v531_v28 = vld [vmem:[%s4853_s10 + $0x90] sm:$0xff] }
  0xf5   : > { %v532_v29 = vld [vmem:[%s4853_s10 + $0x98] sm:$0xff]  ;;  %v3648_v31 = vld [vmem:[#allocation8 + $0x24] ss:$8 sps:$4 sm:$0xff]   ;;  %v3646_v34 = vld [vmem:[#allocation8 + $0x20] ss:$8 sps:$4 sm:$0xff]  }
  0xf6   : > { %v554_v33 = vpack.c.bf16 %v532_v29, %v531_v28  ;;  %v3651_v35 = vld [vmem:[#allocation8 + $0x34] ss:$8 sps:$4 sm:$0xff]   ;;  %v517_v36 = vld [vmem:[%s4853_s10 + $0x20] sm:$0xff]  ;;  %v518_v37 = vld [vmem:[%s4853_s10 + $0x28] sm:$0xff] }
  0xf7   : > { %674 = vmatpush1.bf16.msra.mxu0 %v3624_v6  ;;  %3415 = vmatpush1.bf16.msra.mxu1 %v3624_v6  ;;  %v533_v38 = vld [vmem:[%s4853_s10 + $0xa0] sm:$0xff]  ;;  %v534_v39 = vld [vmem:[%s4853_s10 + $0xa8] sm:$0xff]  ;;  %v3649_v40 = vld [vmem:[#allocation8 + $0x30] ss:$8 sps:$4 sm:$0xff]   ;;  %v547_v42 = vpack.c.bf16 %v518_v37, %v517_v36 }
  0xf8   : > { %675 = vmatprep.subr.bf16.mxu0 %v3625_v7  ;;  %3408 = vmatprep.subr.bf16.mxu1 %v3625_v7  ;;  %v3654_v41 = vld [vmem:[#allocation8 + $0x44] ss:$8 sps:$4 sm:$0xff]   ;;  %v555_v43 = vpack.c.bf16 %v534_v39, %v533_v38  ;;  %v3652_v44 = vld [vmem:[#allocation8 + $0x40] ss:$8 sps:$4 sm:$0xff]   ;;  %v3657_v45 = vld [vmem:[#allocation8 + $0x54] ss:$8 sps:$4 sm:$0xff]  }
  0xf9   : > { %v519_v46 = vld [vmem:[%s4853_s10 + $0x30] sm:$0xff]  ;;  %v520_v47 = vld [vmem:[%s4853_s10 + $0x38] sm:$0xff]  ;;  %v3660_v51 = vld [vmem:[#allocation8 + $0x64] ss:$8 sps:$4 sm:$0xff]  }
  0xfa   : > { %v535_v48 = vld [vmem:[%s4853_s10 + $0xb0] sm:$0xff]  ;;  %v536_v49 = vld [vmem:[%s4853_s10 + $0xb8] sm:$0xff]  ;;  %v548_v52 = vpack.c.bf16 %v520_v47, %v519_v46  ;;  %v3658_v54 = vld [vmem:[#allocation8 + $0x60] ss:$8 sps:$4 sm:$0xff]  }
  0xfb   : > { %676 = vmatpush1.bf16.msra.mxu0 %v3627_v8  ;;  %3416 = vmatpush1.bf16.msra.mxu1 %v3627_v8  ;;  %v3655_v50 = vld [vmem:[#allocation8 + $0x50] ss:$8 sps:$4 sm:$0xff]   ;;  %v556_v53 = vpack.c.bf16 %v536_v49, %v535_v48  ;;  %v3663_v55 = vld [vmem:[#allocation8 + $0x74] ss:$8 sps:$4 sm:$0xff]   ;;  %v521_v56 = vld [vmem:[%s4853_s10 + $0x40] sm:$0xff] }
  0xfc   : > { %677 = vmatprep.subr.bf16.mxu0 %v3628_v9  ;;  %3409 = vmatprep.subr.bf16.mxu1 %v3628_v9  ;;  %v522_v57 = vld [vmem:[%s4853_s10 + $0x48] sm:$0xff]  ;;  %v537_v58 = vld [vmem:[%s4853_s10 + $0xc0] sm:$0xff]  ;;  %v3661_v60 = vld [vmem:[#allocation8 + $0x70] ss:$8 sps:$4 sm:$0xff]  }
  0xfd   : > { %v538_v59 = vld [vmem:[%s4853_s10 + $0xc8] sm:$0xff]  ;;  %v549_v62 = vpack.c.bf16 %v522_v57, %v521_v56  ;;  %v3669_v1 = vld [vmem:[#allocation8 + $0x94] ss:$8 sps:$4 sm:$0xff]   ;;  %v3667_v7 = vld [vmem:[#allocation8 + $0x90] ss:$8 sps:$4 sm:$0xff]  }
  0xfe   : > { %v3666_v61 = vld [vmem:[#allocation8 + $0x84] ss:$8 sps:$4 sm:$0xff]   ;;  %v557_v63 = vpack.c.bf16 %v538_v59, %v537_v58  ;;  %v3664_v0 = vld [vmem:[#allocation8 + $0x80] ss:$8 sps:$4 sm:$0xff]   ;;  %v523_v3 = vld [vmem:[%s4853_s10 + $0x50] sm:$0xff] }
  0xff   : > { %678 = vmatpush1.bf16.msra.mxu0 %v3630_v10  ;;  %3417 = vmatpush1.bf16.msra.mxu1 %v3630_v10  ;;  %v524_v4 = vld [vmem:[%s4853_s10 + $0x58] sm:$0xff]  ;;  %v539_v5 = vld [vmem:[%s4853_s10 + $0xd0] sm:$0xff]  ;;  %v525_v10 = vld [vmem:[%s4853_s10 + $0x60] sm:$0xff] }
 0x100   : > { %679 = vmatprep.subr.bf16.mxu0 %v3631_v11  ;;  %3410 = vmatprep.subr.bf16.mxu1 %v3631_v11  ;;  %v540_v6 = vld [vmem:[%s4853_s10 + $0xd8] sm:$0xff]  ;;  %v550_v8 = vpack.c.bf16 %v524_v4, %v523_v3  ;;  %v526_v11 = vld [vmem:[%s4853_s10 + $0x68] sm:$0xff]  ;;  %v543_v18 = vld [vmem:[%s4853_s10 + $0xf0] sm:$0xff] }
 0x101   : > { %v558_v9 = vpack.c.bf16 %v540_v6, %v539_v5  ;;  %v528_v17 = vld [vmem:[%s4853_s10 + $0x78] sm:$0xff]  ;;  %v3678_v26 = vld [vmem:[#allocation8 + $0xc4] ss:$8 sps:$4 sm:$0xff]   ;;  %v577_v36 = vld [vmem:[%s6134_s17] sm:$0x3] }
 0x102   : > { %v544_v19 = vld [vmem:[%s4853_s10 + $0xf8] sm:$0xff]  ;;  %v3684_v29 = vld [vmem:[#allocation8 + $0xe4] ss:$8 sps:$4 sm:$0xff]  }
 0x103   : > { %680 = vmatpush1.bf16.msra.mxu0 %v3633_v12  ;;  %3418 = vmatpush1.bf16.msra.mxu1 %v3633_v12  ;;  %v541_v12 = vld [vmem:[%s4853_s10 + $0xe0] sm:$0xff]  ;;  %v3673_v25 = vld [vmem:[#allocation8 + $0xb0] ss:$8 sps:$4 sm:$0xff]   ;;  %v3681_v28 = vld [vmem:[#allocation8 + $0xd4] ss:$8 sps:$4 sm:$0xff]  }
 0x104   : > { %681 = vmatprep.subr.bf16.mxu0 %v3634_v13  ;;  %3411 = vmatprep.subr.bf16.mxu1 %v3634_v13  ;;  %v542_v13 = vld [vmem:[%s4853_s10 + $0xe8] sm:$0xff] }
 0x107   : > { %682 = vmatpush1.bf16.msra.mxu0 %v3636_v14  ;;  %3419 = vmatpush1.bf16.msra.mxu1 %v3636_v14  ;;  %v551_v14 = vpack.c.bf16 %v526_v11, %v525_v10 }
 0x108   : > { %683 = vmatprep.subr.bf16.mxu0 %v3637_v15  ;;  %3412 = vmatprep.subr.bf16.mxu1 %v3637_v15  ;;  %v559_v15 = vpack.c.bf16 %v542_v13, %v541_v12 }
 0x10b   : > { %684 = vmatpush1.bf16.msra.mxu0 %v3639_v16  ;;  %3420 = vmatpush1.bf16.msra.mxu1 %v3639_v16  ;;  %v527_v16 = vld [vmem:[%s4853_s10 + $0x70] sm:$0xff] }
 0x10c   : > { %1418 = vmatprep.subr.bf16.mxu1 %v3642_v21  ;;  %v552_v20 = vpack.c.bf16 %v528_v17, %v527_v16  ;;  %v560_v21 = vpack.c.bf16 %v544_v19, %v543_v18 }
 0x10e   : > { %702 = vmatmul.mubr.bf16.vlgmr.msra.gmra.mrb[0].mxu0 %v545_v22  ;;  %782 = vmatmul.mubr.bf16.vlgmr.msra.gmra.mrb[0].mxu1 %v553_v23  ;;  %v3672_v22 = vld [vmem:[#allocation8 + $0xa4] ss:$8 sps:$4 sm:$0xff]   ;;  %v3670_v23 = vld [vmem:[#allocation8 + $0xa0] ss:$8 sps:$4 sm:$0xff]  }
 0x10f   : > { %711 = vmatprep.mubr.bf16.mxu0 %v4454_v2  ;;  %791 = vmatprep.mubr.bf16.mxu1 %v4454_v2 }
 0x110   : > { %1419 = vmatpush1.bf16.msra.mxu1 %v3640_v24  ;;  %v3675_v24 = vld [vmem:[#allocation8 + $0xb4] ss:$8 sps:$4 sm:$0xff]  }
 0x111   : > { %1420 = vmatprep.subr.bf16.mxu1 %v3645_v27  ;;  %v3676_v27 = vld [vmem:[#allocation8 + $0xc0] ss:$8 sps:$4 sm:$0xff]  }
 0x114   : > { %1421 = vmatpush1.bf16.msra.mxu1 %v3643_v30  ;;  %v3682_v30 = vld [vmem:[#allocation8 + $0xe0] ss:$8 sps:$4 sm:$0xff]  }
 0x115   : > { %1422 = vmatprep.subr.bf16.mxu1 %v3648_v31  ;;  %v3687_v31 = vld [vmem:[#allocation8 + $0xf4] ss:$8 sps:$4 sm:$0xff]  }
 0x116   : > { %712 = vmatmul.mubr.bf16.gmra.mrb[4].mxu0 %v546_v32  ;;  %792 = vmatmul.mubr.bf16.gmra.mrb[4].mxu1 %v554_v33  ;;  %v3685_v32 = vld [vmem:[#allocation8 + $0xf0] ss:$8 sps:$4 sm:$0xff]   ;;  %v579_v33 = vlaneseq }
 0x117   : > { %721 = vmatprep.mubr.bf16.mxu0 %v4454_v2  ;;  %801 = vmatprep.mubr.bf16.mxu1 %v4454_v2 }
 0x118   : > { %1423 = vmatpush1.bf16.msra.mxu1 %v3646_v34  ;;  %v4941_v34 = vshrl.u32 %v579_v33, 7 }
 0x119   : > { %1424 = vmatprep.subr.bf16.mxu1 %v3651_v35 }
 0x11a   : > { %6133 = vst [vmem:[#allocation37_spill] sm:$0xff] %v4941_v34  ;;  %v6071_v35 = vsub.s32 0, %v4941_v34  ;;  %v6070_v37 = vsub.s32 1, %v4941_v34 }
 0x11c   : > { %1425 = vmatpush1.bf16.msra.mxu1 %v3649_v40  ;;  %v4950_v38 = vrot.slane %v577_v36, %v6071_v35  ;;  %v4954_v39 = vrot.slane %v577_v36, %v6070_v37 }
 0x11d   : > { %1426 = vmatprep.subr.bf16.mxu1 %v3654_v41 }
 0x11e   : > { %722 = vmatmul.mubr.bf16.gmra.mrb[8].mxu0 %v547_v42  ;;  %802 = vmatmul.mubr.bf16.gmra.mrb[8].mxu1 %v555_v43 }
 0x11f   : > { %731 = vmatprep.mubr.bf16.mxu0 %v4454_v2  ;;  %811 = vmatprep.mubr.bf16.mxu1 %v4454_v2 }
 0x120   : > { %1427 = vmatpush1.bf16.msra.mxu1 %v3652_v44 }
 0x121   : > { %1428 = vmatprep.subr.bf16.mxu1 %v3657_v45 }
 0x124   : > { %1429 = vmatpush1.bf16.msra.mxu1 %v3655_v50 }
 0x125   : > { %1430 = vmatprep.subr.bf16.mxu1 %v3660_v51 }
 0x126   : > { %732 = vmatmul.mubr.bf16.gmra.mrb[12].mxu0 %v548_v52  ;;  %812 = vmatmul.mubr.bf16.gmra.mrb[12].mxu1 %v556_v53 }
 0x127   : > { %741 = vmatprep.mubr.bf16.mxu0 %v4454_v2  ;;  %821 = vmatprep.mubr.bf16.mxu1 %v4454_v2 }
 0x128   : > { %1431 = vmatpush1.bf16.msra.mxu1 %v3658_v54 }
 0x129   : > { %1432 = vmatprep.subr.bf16.mxu1 %v3663_v55 }
 0x12c   : > { %1433 = vmatpush1.bf16.msra.mxu1 %v3661_v60 }
 0x12d   : > { %1434 = vmatprep.subr.bf16.mxu1 %v3666_v61 }
 0x12e   : > { %742 = vmatmul.mubr.bf16.gmra.mrb[16].mxu0 %v549_v62  ;;  %822 = vmatmul.mubr.bf16.gmra.mrb[16].mxu1 %v557_v63 }
 0x12f   : > { %751 = vmatprep.mubr.bf16.mxu0 %v4454_v2  ;;  %831 = vmatprep.mubr.bf16.mxu1 %v4454_v2 }
 0x130   : > { %1435 = vmatpush1.bf16.msra.mxu1 %v3664_v0 }
 0x131   : > { %1436 = vmatprep.subr.bf16.mxu1 %v3669_v1 }
 0x134   : > { %1437 = vmatpush1.bf16.msra.mxu1 %v3667_v7 }
 0x135   : > { %1438 = vmatprep.subr.bf16.mxu1 %v3672_v22 }
 0x136   : > { %752 = vmatmul.mubr.bf16.gmra.mrb[20].mxu0 %v550_v8  ;;  %832 = vmatmul.mubr.bf16.gmra.mrb[20].mxu1 %v558_v9 }
 0x137   : > { %761 = vmatprep.mubr.bf16.mxu0 %v4454_v2  ;;  %841 = vmatprep.mubr.bf16.mxu1 %v4454_v2 }
 0x138   : > { %1439 = vmatpush1.bf16.msra.mxu1 %v3670_v23 }
 0x139   : > { %1440 = vmatprep.subr.bf16.mxu1 %v3675_v24 }
 0x13c   : > { %1441 = vmatpush1.bf16.msra.mxu1 %v3673_v25 }
 0x13d   : > { %1442 = vmatprep.subr.bf16.mxu1 %v3678_v26 }
 0x13e   : > { %762 = vmatmul.mubr.bf16.gmra.mrb[24].mxu0 %v551_v14  ;;  %842 = vmatmul.mubr.bf16.gmra.mrb[24].mxu1 %v559_v15 }
 0x13f   : > { %771 = vmatprep.mubr.bf16.mxu0 %v4454_v2  ;;  %851 = vmatprep.mubr.bf16.mxu1 %v4454_v2  ;;  %v3679_v2 = vld [vmem:[#allocation8 + $0xd0] ss:$8 sps:$4 sm:$0xff]  }
 0x140   : > { %1443 = vmatpush1.bf16.msra.mxu1 %v3676_v27 }
 0x141   : > { %1444 = vmatprep.subr.bf16.mxu1 %v3681_v28 }
 0x144   : > { %1445 = vmatpush1.bf16.msra.mxu1 %v3679_v2 }
 0x145   : > { %1446 = vmatprep.subr.bf16.mxu1 %v3684_v29 }
 0x146   : > { %772 = vmatmul.mubr.bf16.gmra.mrb[28].mxu0 %v552_v20  ;;  %852 = vmatmul.mubr.bf16.gmra.mrb[28].mxu1 %v560_v21 }
 0x148   : > { %1447 = vmatpush1.bf16.msra.mxu1 %v3682_v30 }
 0x149   : > { %1448 = vmatprep.subr.bf16.mxu1 %v3687_v31 }
 0x14c   : > { %1449 = vmatpush1.bf16.msra.mxu1 %v3685_v32 }
 0x1e1   : > { %v703_v40 = vpop.f32.mrb[0].mxu0  ;;  %v783_v41 = vpop.f32.mrb[0].mxu1 }
 0x1e2   : > { %v704_v42 = vadd.f32 %v703_v40, %v4950_v38  ;;  %v705_v43 = vpop.f32.mrb[1].mxu0  ;;  %v784_v44 = vadd.f32 %v783_v41, %v4950_v38  ;;  %v785_v45 = vpop.f32.mrb[1].mxu1 }
 0x1e3   : > { %v706_v46 = vadd.f32 %v705_v43, %v4954_v39  ;;  %v707_v47 = vpop.f32.mrb[2].mxu0  ;;  %v786_v48 = vadd.f32 %v785_v45, %v4954_v39  ;;  %v787_v49 = vpop.f32.mrb[2].mxu1 }
 0x1e4   : > { %v926_v50 = vmul.f32 0.70710677, %v704_v42  ;;  %v708_v51 = vadd.f32 %v707_v47, %v4950_v38  ;;  %v709_v52 = vpop.f32.mrb[3].mxu0  ;;  %v789_v53 = vpop.f32.mrb[3].mxu1  ;;  %v958_v57 = vmul.f32 0.70710677, %v784_v44  ;;  %v788_v60 = vadd.f32 %v787_v49, %v4950_v38 }
 0x1e5   : > { %v927_v54 = vmul.f32 0.70710677, %v706_v46  ;;  %v710_v55 = vadd.f32 %v709_v52, %v4954_v39  ;;  %v959_v59 = vmul.f32 0.70710677, %v786_v48  ;;  %v790_v61 = vadd.f32 %v789_v53, %v4954_v39 }
 0x1e6   : > { %3704 = verf.f32 %v926_v50  ;;  %v928_v56 = vmul.f32 0.70710677, %v708_v51  ;;  %v4964_v0 = vmul.f32 0.5, %v704_v42  ;;  %v960_v4 = vmul.f32 0.70710677, %v788_v60 }
 0x1e7   : > { %3706 = verf.f32 %v927_v54  ;;  %v929_v58 = vmul.f32 0.70710677, %v710_v55  ;;  %v4968_v8 = vmul.f32 0.5, %v784_v44  ;;  %v961_v9 = vmul.f32 0.70710677, %v790_v61 }
 0x1e8   : > { %3708 = verf.f32 %v928_v56  ;;  %v863_v11 = vmul.f32 0.5, %v706_v46  ;;  %v864_v16 = vmul.f32 0.5, %v708_v51  ;;  %v4974_v20 = vmul.f32 0.5, %v786_v48 }
 0x1e9   : > { %3710 = verf.f32 %v929_v58  ;;  %v713_v62 = vpop.f32.mrb[4].mxu0  ;;  %v793_v63 = vpop.f32.mrb[4].mxu1  ;;  %v865_v22 = vmul.f32 0.5, %v710_v55  ;;  %v4978_v26 = vmul.f32 0.5, %v788_v60  ;;  %v4980_v27 = vmul.f32 0.5, %v790_v61 }
 0x1ea   : > { %v714_v1 = vadd.f32 %v713_v62, %v4950_v38  ;;  %v715_v3 = vpop.f32.mrb[5].mxu0  ;;  %3712 = verf.f32 %v958_v57  ;;  %v795_v5 = vpop.f32.mrb[5].mxu1  ;;  %v794_v21 = vadd.f32 %v793_v63, %v4950_v38 }
 0x1eb   : > { %v716_v6 = vadd.f32 %v715_v3, %v4954_v39  ;;  %v717_v7 = vpop.f32.mrb[6].mxu0  ;;  %3714 = verf.f32 %v959_v59  ;;  %v797_v10 = vpop.f32.mrb[6].mxu1  ;;  %v796_v24 = vadd.f32 %v795_v5, %v4954_v39  ;;  %v3689_v3 = vld [vmem:[#allocation9] sm:$0xff]  }
 0x1ec   : > { %v930_v12 = vmul.f32 0.70710677, %v714_v1  ;;  %v718_v13 = vadd.f32 %v717_v7, %v4950_v38  ;;  %v719_v14 = vpop.f32.mrb[7].mxu0  ;;  %3716 = verf.f32 %v960_v4  ;;  %v4971_v15 = vpop.f32.mrb[7].mxu1  ;;  %v962_v28 = vmul.f32 0.70710677, %v794_v21 }
 0x1ed   : > { %v931_v17 = vmul.f32 0.70710677, %v716_v6  ;;  %v720_v18 = vadd.f32 %v719_v14, %v4954_v39  ;;  %3718 = verf.f32 %v961_v9  ;;  %v4982_v30 = vmul.f32 0.5, %v714_v1  ;;  %v3688_v1 = vld [vmem:[#allocation9 + $0x40] sm:$0xff]   ;;  %v3690_v4 = vld [vmem:[#allocation9 + $0x48] sm:$0xff]  }
 0x1ee   : > { %3720 = verf.f32 %v930_v12  ;;  %v932_v19 = vmul.f32 0.70710677, %v718_v13  ;;  %v4984_v31 = vmul.f32 0.5, %v716_v6  ;;  %v4988_v41 = vmul.f32 0.5, %v718_v13  ;;  %3293 = vmatprep.subr.bf16.mxu0 %v3688_v1 }
 0x1ef   : > { %3722 = verf.f32 %v931_v17  ;;  %v933_v23 = vmul.f32 0.70710677, %v720_v18  ;;  %v4990_v42 = vmul.f32 0.5, %v720_v18  ;;  %v4996_v50 = vmul.f32 0.5, %v794_v21  ;;  %3294 = vmatpush3.bf16.msra.mxu0 %v3689_v3 }
 0x1f0   : > { %v3705_v25 = vpop.eup %3704  ;;  %3724 = verf.f32 %v932_v19  ;;  %v963_v51 = vmul.f32 0.70710677, %v796_v24  ;;  %v5001_v57 = vadd.f32 %v797_v10, %v4950_v38  ;;  %3295 = vmatprep.subr.bf16.mxu0 %v3690_v4 }
 0x1f1   : > { %v3707_v2 = vpop.eup %3706  ;;  %v1054_v29 = vadd.f32 1.0, %v3705_v25  ;;  %3726 = verf.f32 %v933_v23  ;;  %v723_v32 = vpop.f32.mrb[8].mxu0 }
 0x1f2   : > { %v4986_v33 = vpop.f32.mrb[8].mxu1  ;;  %v3709_v36 = vpop.eup %3708  ;;  %v1055_v40 = vadd.f32 1.0, %v3707_v2  ;;  %v724_v43 = vadd.f32 %v723_v32, %v4950_v38  ;;  %3728 = verf.f32 %v962_v28  ;;  %v5015_v18 = vmul.f32 0.5, %v5001_v57  ;;  %v3692_v28 = vld [vmem:[#allocation9 + $0x50] sm:$0xff]  }
 0x1f3   : > { %v725_v44 = vpop.f32.mrb[9].mxu0  ;;  %v4993_v45 = vpop.f32.mrb[9].mxu1  ;;  %v1056_v47 = vadd.f32 1.0, %v3709_v36  ;;  %v1118_v60 = vmul.f32 %v1054_v29, %v4964_v0  ;;  %v5012_v0 = vmul.f32 0.5, %v796_v24 }
 0x1f4   : > { %v3711_v46 = vpop.eup %3710  ;;  %v726_v48 = vadd.f32 %v725_v44, %v4954_v39  ;;  %v727_v49 = vpop.f32.mrb[10].mxu0  ;;  %v934_v55 = vmul.f32 0.70710677, %v724_v43  ;;  %v1119_v6 = vmul.f32 %v1055_v40, %v863_v11  ;;  %v3691_v11 = vld [vmem:[#allocation9 + $0x8] sm:$0xff]  }
 0x1f5   : > { %v4998_v52 = vpop.f32.mrb[10].mxu1  ;;  %v3713_v53 = vpop.eup %3712  ;;  %v1057_v54 = vadd.f32 1.0, %v3711_v46  ;;  %v1120_v61 = vmul.f32 %v1056_v47, %v864_v16  ;;  %v728_v63 = vadd.f32 %v727_v49, %v4950_v38  ;;  %3296 = vmatpush3.bf16.msra.mxu0 %v3691_v11 }
 0x1f6   : > { %v729_v56 = vpop.f32.mrb[11].mxu0  ;;  %v5003_v58 = vpop.f32.mrb[11].mxu1  ;;  %v935_v62 = vmul.f32 0.70710677, %v726_v48  ;;  %3730 = verf.f32 %v934_v55  ;;  %v5019_v23 = vmul.f32 0.5, %v726_v48  ;;  %v1086_v40 = vadd.f32 1.0, %v3713_v53  ;;  %3297 = vmatprep.subr.bf16.mxu0 %v3692_v28 }
 0x1f7   : > { %v3715_v59 = vpop.eup %3714  ;;  %v1121_v7 = vmul.f32 %v1057_v54, %v865_v22  ;;  %v730_v9 = vadd.f32 %v729_v56, %v4954_v39  ;;  %v1182_v12 = vpack.c.bf16 %v1120_v61, %v1118_v60  ;;  %v936_v13 = vmul.f32 0.70710677, %v728_v63  ;;  %v3693_v55 = vld [vmem:[#allocation9 + $0x10] sm:$0xff]  }
 0x1f8   : > { %v5007_v5 = vpop.eup %3716  ;;  %3732 = verf.f32 %v935_v62  ;;  %v5017_v22 = vmul.f32 0.5, %v724_v43  ;;  %v5026_v47 = vmul.f32 0.5, %v728_v63  ;;  %v1087_v62 = vadd.f32 1.0, %v3715_v59 }
 0x1f9   : > { %v5010_v10 = vpop.eup %3718  ;;  %v937_v16 = vmul.f32 0.70710677, %v730_v9  ;;  %v1183_v17 = vpack.c.bf16 %v1121_v7, %v1119_v6  ;;  %3734 = verf.f32 %v963_v51  ;;  %v733_v25 = vpop.f32.mrb[12].mxu0  ;;  %v5028_v48 = vmul.f32 0.5, %v730_v9  ;;  %v3694_v6 = vld [vmem:[#allocation9 + $0x58] sm:$0xff]   ;;  %3298 = vmatpush3.bf16.msra.mxu0 %v3693_v55 }
 0x1fa   : > { %v3721_v14 = vpop.eup %3720  ;;  %3736 = verf.f32 %v936_v13  ;;  %v5021_v24 = vpop.f32.mrb[12].mxu1  ;;  %v734_v32 = vadd.f32 %v733_v25, %v4950_v38  ;;  %v1088_v11 = vadd.f32 1.0, %v5007_v5  ;;  %3299 = vmatprep.subr.bf16.mxu0 %v3694_v6 }
 0x1fb   : > { %v3723_v19 = vpop.eup %3722  ;;  %v1058_v21 = vadd.f32 1.0, %v3721_v14  ;;  %3738 = verf.f32 %v937_v16  ;;  %v735_v36 = vpop.f32.mrb[13].mxu0  ;;  %1450 = vmatprep.mubr.bf16.mxu1 %v1183_v17 }
 0x1fc   : > { %v3725_v2 = vpop.eup %3724  ;;  %v1059_v29 = vadd.f32 1.0, %v3723_v19  ;;  %v5024_v44 = vpop.f32.mrb[13].mxu1  ;;  %v736_v49 = vadd.f32 %v735_v36, %v4954_v39  ;;  %1451 = vmatmul.mubr.bf16.vlgmr.msra.gmra.mrb[32].mxu1 %v1182_v12  ;;  %v938_v60 = vmul.f32 0.70710677, %v734_v32  ;;  %v1089_v19 = vadd.f32 1.0, %v5010_v10 }
 0x1fd   : > { %v3727_v43 = vpop.eup %3726  ;;  %v1060_v46 = vadd.f32 1.0, %v3725_v2  ;;  %v737_v51 = vpop.f32.mrb[14].mxu0  ;;  %v1122_v1 = vmul.f32 %v1058_v21, %v4982_v30  ;;  %v5042_v30 = vmul.f32 %v1086_v40, %v4968_v8  ;;  %v5046_v25 = vmul.f32 0.5, %v734_v32 }
 0x1fe   : > { %v5031_v54 = vpop.f32.mrb[14].mxu1  ;;  %v1061_v56 = vadd.f32 1.0, %v3727_v43  ;;  %v739_v61 = vpop.f32.mrb[15].mxu0  ;;  %v939_v3 = vmul.f32 0.70710677, %v736_v49  ;;  %v738_v4 = vadd.f32 %v737_v51, %v4950_v38  ;;  %v1123_v9 = vmul.f32 %v1059_v29, %v4984_v31  ;;  %v3695_v31 = vld [vmem:[#allocation9 + $0x18] sm:$0xff]  }
 0x1ff   : > { %v5033_v53 = vpop.f32.mrb[15].mxu1  ;;  %v1124_v63 = vmul.f32 %v1060_v46, %v4988_v41  ;;  %v3729_v7 = vpop.eup %3728  ;;  %3740 = verf.f32 %v938_v60  ;;  %v740_v59 = vadd.f32 %v739_v61, %v4954_v39  ;;  %v5049_v2 = vmul.f32 %v1087_v62, %v4974_v20  ;;  %v3696_v29 = vld [vmem:[#allocation9 + $0x60] sm:$0xff]   ;;  %3300 = vmatpush3.bf16.msra.mxu0 %v3695_v31 }
 0x200   : > { %v1125_v12 = vmul.f32 %v1061_v56, %v4990_v42  ;;  %3742 = verf.f32 %v939_v3  ;;  %v940_v13 = vmul.f32 0.70710677, %v738_v4  ;;  %v3731_v41 = vpop.eup %3730  ;;  %v5053_v5 = vmul.f32 0.5, %v736_v49  ;;  %v3697_v46 = vld [vmem:[#allocation9 + $0x20] sm:$0xff]   ;;  %3301 = vmatprep.subr.bf16.mxu0 %v3696_v29 }
 0x201   : > { %v1184_v14 = vpack.c.bf16 %v1124_v63, %v1122_v1  ;;  %v941_v16 = vmul.f32 0.70710677, %v740_v59  ;;  %v1062_v42 = vadd.f32 1.0, %v3731_v41  ;;  %v743_v28 = vpop.f32.mrb[16].mxu0  ;;  %v5051_v8 = vpop.f32.mrb[16].mxu1  ;;  %v5058_v55 = vmul.f32 0.5, %v738_v4 }
 0x202   : > { %v1185_v17 = vpack.c.bf16 %v1125_v12, %v1123_v9  ;;  %v3733_v21 = vpop.eup %3732  ;;  %3744 = verf.f32 %v940_v13  ;;  %v744_v10 = vadd.f32 %v743_v28, %v4950_v38  ;;  %v745_v43 = vpop.f32.mrb[17].mxu0  ;;  %v5060_v20 = vmul.f32 0.5, %v740_v59 }
 0x203   : > { %v3735_v36 = vpop.eup %3734  ;;  %v1063_v40 = vadd.f32 1.0, %v3733_v21  ;;  %3746 = verf.f32 %v941_v16  ;;  %v5056_v32 = vpop.f32.mrb[17].mxu1  ;;  %v746_v56 = vadd.f32 %v745_v43, %v4954_v39  ;;  %v964_v49 = vmul.f32 0.70710677, %v5001_v57  ;;  %3302 = vmatpush3.bf16.msra.mxu0 %v3697_v46 }
 0x204   : > { %1460 = vmatprep.mubr.bf16.mxu1 %v1185_v17  ;;  %v3737_v51 = vpop.eup %3736  ;;  %v747_v60 = vpop.f32.mrb[18].mxu0  ;;  %v942_v63 = vmul.f32 0.70710677, %v744_v10  ;;  %v5067_v6 = vmul.f32 %v1088_v11, %v4978_v26  ;;  %v1090_v9 = vadd.f32 1.0, %v3729_v7  ;;  %v1126_v12 = vmul.f32 %v1062_v42, %v5017_v22 }
 0x205   : > { %1461 = vmatmul.mubr.bf16.gmra.mrb[36].mxu1 %v1184_v14  ;;  %v5064_v61 = vpop.f32.mrb[18].mxu1  ;;  %v3739_v62 = vpop.eup %3738  ;;  %v1064_v1 = vadd.f32 1.0, %v3737_v51  ;;  %v943_v13 = vmul.f32 0.70710677, %v746_v56  ;;  %v748_v14 = vadd.f32 %v747_v60, %v4950_v38  ;;  %v1127_v57 = vmul.f32 %v1063_v40, %v5019_v23 }
 0x206   : > { %v749_v3 = vpop.f32.mrb[19].mxu0  ;;  %v5069_v4 = vpop.f32.mrb[19].mxu1  ;;  %v1065_v59 = vadd.f32 1.0, %v3739_v62  ;;  %3748 = verf.f32 %v942_v63  ;;  %v5079_v17 = vadd.f32 %v4971_v15, %v4954_v39  ;;  %v1091_v21 = vadd.f32 1.0, %v3735_v36 }
 0x207   : > { %v1128_v41 = vmul.f32 %v1064_v1, %v5026_v47  ;;  %v750_v16 = vadd.f32 %v749_v3, %v4954_v39  ;;  %3750 = verf.f32 %v943_v13  ;;  %v944_v7 = vmul.f32 0.70710677, %v748_v14 }
 0x208   : > { %v1129_v26 = vmul.f32 %v1065_v59, %v5028_v48  ;;  %3752 = verf.f32 %v964_v49  ;;  %v5082_v28 = vmul.f32 %v1089_v19, %v4980_v27  ;;  %v5085_v48 = vmul.f32 %v1090_v9, %v4996_v50 }
 0x209   : > { %v3741_v22 = vpop.eup %3740  ;;  %v945_v11 = vmul.f32 0.70710677, %v750_v16  ;;  %v1186_v31 = vpack.c.bf16 %v1128_v41, %v1126_v12  ;;  %3754 = verf.f32 %v944_v7  ;;  %v753_v47 = vpop.f32.mrb[20].mxu0  ;;  %v878_v40 = vmul.f32 0.5, %v744_v10 }
 0x20a   : > { %v3743_v23 = vpop.eup %3742  ;;  %v1187_v42 = vpack.c.bf16 %v1129_v26, %v1127_v57  ;;  %v5087_v29 = vpop.f32.mrb[20].mxu1  ;;  %v1066_v15 = vadd.f32 1.0, %v3741_v22  ;;  %v754_v43 = vadd.f32 %v753_v47, %v4950_v38  ;;  %v5092_v49 = vmul.f32 0.5, %v746_v56 }
 0x20b   : > { %3756 = verf.f32 %v945_v11  ;;  %v755_v36 = vpop.f32.mrb[21].mxu0  ;;  %v5090_v51 = vpop.f32.mrb[21].mxu1  ;;  %v1067_v60 = vadd.f32 1.0, %v3743_v23  ;;  %v965_v50 = vmul.f32 0.70710677, %v5079_v17  ;;  %v880_v63 = vmul.f32 0.5, %v748_v14 }
 0x20c   : > { %v3745_v46 = vpop.eup %3744  ;;  %v756_v27 = vadd.f32 %v755_v36, %v4954_v39  ;;  %1470 = vmatprep.mubr.bf16.mxu1 %v1187_v42  ;;  %v757_v19 = vpop.f32.mrb[22].mxu0  ;;  %v946_v3 = vmul.f32 0.70710677, %v754_v43  ;;  %v5099_v12 = vmul.f32 %v1091_v21, %v5012_v0  ;;  %v804_v41 = vadd.f32 %v4986_v33, %v4950_v38 }
 0x20d   : > { %v5096_v62 = vpop.f32.mrb[22].mxu1  ;;  %v3747_v1 = vpop.eup %3746  ;;  %v1068_v10 = vadd.f32 1.0, %v3745_v46  ;;  %1471 = vmatmul.mubr.bf16.gmra.mrb[40].mxu1 %v1186_v31  ;;  %v758_v57 = vadd.f32 %v757_v19, %v4950_v38  ;;  %v1130_v26 = vmul.f32 %v1066_v15, %v5046_v25  ;;  %v1131_v22 = vmul.f32 %v1067_v60, %v5053_v5 }
 0x20e   : > { %v759_v9 = vpop.f32.mrb[23].mxu0  ;;  %v5101_v59 = vpop.f32.mrb[23].mxu1  ;;  %v1069_v56 = vadd.f32 1.0, %v3747_v1  ;;  %v947_v13 = vmul.f32 0.70710677, %v756_v27  ;;  %3758 = verf.f32 %v946_v3  ;;  %v881_v21 = vmul.f32 0.5, %v750_v16 }
 0x20f   : > { %v1132_v7 = vmul.f32 %v1068_v10, %v5058_v55  ;;  %v760_v14 = vadd.f32 %v759_v9, %v4954_v39  ;;  %v948_v11 = vmul.f32 0.70710677, %v758_v57  ;;  %v966_v55 = vmul.f32 0.70710677, %v804_v41 }
 0x210   : > { %v1133_v0 = vmul.f32 %v1069_v56, %v5060_v20  ;;  %3760 = verf.f32 %v947_v13  ;;  %v3749_v31 = vpop.eup %3748  ;;  %v5115_v60 = vmul.f32 0.5, %v5079_v17  ;;  %v806_v16 = vadd.f32 %v4993_v45, %v4954_v39 }
 0x211   : > { %v949_v23 = vmul.f32 0.70710677, %v760_v14  ;;  %v1188_v47 = vpack.c.bf16 %v1132_v7, %v1130_v26  ;;  %3762 = verf.f32 %v965_v50  ;;  %v3751_v42 = vpop.eup %3750  ;;  %v1070_v33 = vadd.f32 1.0, %v3749_v31  ;;  %v763_v25 = vpop.f32.mrb[24].mxu0 }
 0x212   : > { %3764 = verf.f32 %v948_v11  ;;  %v1189_v15 = vpack.c.bf16 %v1133_v0, %v1131_v22  ;;  %v5111_v36 = vpop.f32.mrb[24].mxu1  ;;  %v3753_v46 = vpop.eup %3752  ;;  %v764_v5 = vadd.f32 %v763_v25, %v4950_v38  ;;  %v1071_v1 = vadd.f32 1.0, %v3751_v42 }
 0x213   : > { %3766 = verf.f32 %v949_v23  ;;  %v765_v20 = vpop.f32.mrb[25].mxu0  ;;  %v5119_v19 = vpop.f32.mrb[25].mxu1  ;;  %v5121_v10 = vmul.f32 0.5, %v754_v43  ;;  %v5123_v3 = vmul.f32 0.5, %v756_v27  ;;  %v1134_v17 = vmul.f32 %v1070_v33, %v878_v40 }
 0x214   : > { %v3755_v50 = vpop.eup %3754  ;;  %v766_v9 = vadd.f32 %v765_v20, %v4954_v39  ;;  %1480 = vmatprep.mubr.bf16.mxu1 %v1189_v15  ;;  %v767_v56 = vpop.f32.mrb[26].mxu0  ;;  %v950_v22 = vmul.f32 0.70710677, %v764_v5  ;;  %v5128_v0 = vmul.f32 0.5, %v804_v41  ;;  %3768 = verf.f32 %v966_v55 }
 0x215   : > { %v5126_v13 = vpop.f32.mrb[26].mxu1  ;;  %v3757_v26 = vpop.eup %3756  ;;  %v1072_v7 = vadd.f32 1.0, %v3755_v50  ;;  %1481 = vmatmul.mubr.bf16.gmra.mrb[44].mxu1 %v1188_v47  ;;  %v768_v27 = vadd.f32 %v767_v56, %v4950_v38  ;;  %v1092_v25 = vadd.f32 1.0, %v3753_v46  ;;  %v1135_v40 = vmul.f32 %v1071_v1, %v5092_v49 }
 0x216   : > { %v769_v45 = vpop.f32.mrb[27].mxu0  ;;  %v5130_v11 = vpop.f32.mrb[27].mxu1  ;;  %v1073_v43 = vadd.f32 1.0, %v3757_v26  ;;  %v951_v31 = vmul.f32 0.70710677, %v766_v9  ;;  %3770 = verf.f32 %v950_v22  ;;  %v884_v41 = vmul.f32 0.5, %v758_v57 }
 0x217   : > { %v1136_v23 = vmul.f32 %v1072_v7, %v880_v63  ;;  %v770_v42 = vadd.f32 %v769_v45, %v4954_v39  ;;  %v952_v47 = vmul.f32 0.70710677, %v768_v27  ;;  %v885_v20 = vmul.f32 0.5, %v760_v14 }
 0x218   : > { %v1137_v33 = vmul.f32 %v1073_v43, %v881_v21  ;;  %3772 = verf.f32 %v951_v31  ;;  %v3759_v15 = vpop.eup %3758  ;;  %v5135_v55 = vmul.f32 0.5, %v806_v16  ;;  %v967_v63 = vmul.f32 0.70710677, %v806_v16 }
 0x219   : > { %v953_v50 = vmul.f32 0.70710677, %v770_v42  ;;  %v1190_v37 = vpack.c.bf16 %v1136_v23, %v1134_v17  ;;  %3774 = verf.f32 %v952_v47  ;;  %v773_v35 = vpop.f32.mrb[28].mxu0  ;;  %v5137_v7 = vpop.f32.mrb[28].mxu1  ;;  %v5139_v22 = vmul.f32 0.5, %v764_v5 }
 0x21a   : > { %v3761_v26 = vpop.eup %3760  ;;  %v1191_v56 = vpack.c.bf16 %v1137_v33, %v1135_v40  ;;  %6135 = vst [vmem:[#allocation38_spill] sm:$0xff] %v5137_v7  ;;  %v5141_v49 = vmul.f32 0.5, %v766_v9  ;;  %v774_v57 = vadd.f32 %v773_v35, %v4950_v38  ;;  %v775_v14 = vpop.f32.mrb[29].mxu0  ;;  %v1074_v17 = vadd.f32 1.0, %v3759_v15 }
 0x21b   : > { %v3763_v46 = vpop.eup %3762  ;;  %3776 = verf.f32 %v953_v50  ;;  %v5144_v21 = vpop.f32.mrb[29].mxu1  ;;  %v1075_v45 = vadd.f32 1.0, %v3761_v26  ;;  %v776_v43 = vadd.f32 %v775_v14, %v4954_v39  ;;  %v5148_v31 = vmul.f32 %v1092_v25, %v5015_v18 }
 0x21c   : > { %6136 = vst [vmem:[#allocation39_spill] sm:$0xff] %v5144_v21  ;;  %v3765_v1 = vpop.eup %3764  ;;  %1490 = vmatprep.mubr.bf16.mxu1 %v1191_v56  ;;  %v777_v16 = vpop.f32.mrb[30].mxu0  ;;  %v954_v40 = vmul.f32 0.70710677, %v774_v57  ;;  %v808_v33 = vadd.f32 %v4998_v52, %v4950_v38  ;;  %v810_v47 = vadd.f32 %v5003_v58, %v4954_v39  ;;  %3778 = verf.f32 %v967_v63 }
 0x21d   : > { %v5150_v5 = vpop.f32.mrb[30].mxu1  ;;  %v3767_v9 = vpop.eup %3766  ;;  %v1076_v23 = vadd.f32 1.0, %v3765_v1  ;;  %1491 = vmatmul.mubr.bf16.gmra.mrb[48].mxu1 %v1190_v37  ;;  %v955_v26 = vmul.f32 0.70710677, %v776_v43  ;;  %v778_v18 = vadd.f32 %v777_v16, %v4950_v38  ;;  %v1093_v14 = vadd.f32 1.0, %v3763_v46 }
 0x21e   : > { %6137 = vst [vmem:[#allocation40_spill] sm:$0xff] %v5150_v5  ;;  %v779_v35 = vpop.f32.mrb[31].mxu0  ;;  %v5156_v15 = vpop.f32.mrb[31].mxu1  ;;  %v1077_v50 = vadd.f32 1.0, %v3767_v9  ;;  %3780 = verf.f32 %v954_v40  ;;  %v1139_v1 = vmul.f32 %v1075_v45, %v5123_v3  ;;  %v1138_v58 = vmul.f32 %v1074_v17, %v5121_v10 }
 0x21f   : > { %6138 = vst [vmem:[#allocation41_spill] sm:$0xff] %v5156_v15  ;;  %v1140_v25 = vmul.f32 %v1076_v23, %v884_v41  ;;  %v780_v56 = vadd.f32 %v779_v35, %v4954_v39  ;;  %v3769_v37 = vpop.eup %3768  ;;  %3782 = verf.f32 %v955_v26  ;;  %v956_v52 = vmul.f32 0.70710677, %v778_v18 }
 0x220   : > { %v1141_v34 = vmul.f32 %v1077_v50, %v885_v20  ;;  %v3771_v5 = vpop.eup %3770  ;;  %v888_v15 = vmul.f32 0.5, %v768_v27  ;;  %v889_v9 = vmul.f32 0.5, %v770_v42  ;;  %v5162_v16 = vmul.f32 0.5, %v774_v57 }
 0x221   : > { %v957_v21 = vmul.f32 0.70710677, %v780_v56  ;;  %3784 = verf.f32 %v956_v52  ;;  %v968_v63 = vmul.f32 0.70710677, %v808_v33  ;;  %v1078_v23 = vadd.f32 1.0, %v3771_v5 }
 0x222   : > { %v3773_v7 = vpop.eup %3772  ;;  %v1193_v41 = vpack.c.bf16 %v1141_v34, %v1139_v1  ;;  %v5164_v46 = vmul.f32 0.5, %v776_v43  ;;  %v1192_v3 = vpack.c.bf16 %v1140_v25, %v1138_v58  ;;  %v5167_v40 = vmul.f32 %v1093_v14, %v5115_v60 }
 0x223   : > { %3786 = verf.f32 %v957_v21  ;;  %v3775_v20 = vpop.eup %3774  ;;  %v1079_v45 = vadd.f32 1.0, %v3773_v7  ;;  %v969_v10 = vmul.f32 0.70710677, %v810_v47  ;;  %v1094_v57 = vadd.f32 1.0, %v3769_v37 }
 0x224   : > { %1500 = vmatprep.mubr.bf16.mxu1 %v1193_v41  ;;  %3788 = verf.f32 %v968_v63  ;;  %v1080_v42 = vadd.f32 1.0, %v3775_v20  ;;  %v814_v34 = vadd.f32 %v5021_v24, %v4950_v38  ;;  %v816_v17 = vadd.f32 %v5024_v44, %v4954_v39 }
 0x225   : > { %v3777_v27 = vpop.eup %3776  ;;  %1501 = vmatmul.mubr.bf16.gmra.mrb[52].mxu1 %v1192_v3  ;;  %v892_v43 = vmul.f32 0.5, %v778_v18  ;;  %3790 = verf.f32 %v969_v10  ;;  %v818_v60 = vadd.f32 %v5031_v54, %v4950_v38  ;;  %v1142_v7 = vmul.f32 %v1078_v23, %v5139_v22 }
 0x226   : > { %v1081_v21 = vadd.f32 1.0, %v3777_v27  ;;  %v1144_v5 = vmul.f32 %v1080_v42, %v888_v15  ;;  %v970_v35 = vmul.f32 0.70710677, %v814_v34  ;;  %v820_v50 = vadd.f32 %v5033_v53, %v4954_v39  ;;  %v3779_v26 = vpop.eup %3778 }
 0x227   : > { %v1143_v25 = vmul.f32 %v1079_v45, %v5141_v49  ;;  %v893_v14 = vmul.f32 0.5, %v780_v56  ;;  %v971_v37 = vmul.f32 0.70710677, %v816_v17  ;;  %v5180_v18 = vmul.f32 %v1094_v57, %v5128_v0 }
 0x228   : > { %v1145_v24 = vmul.f32 %v1081_v21, %v889_v9  ;;  %v3781_v44 = vpop.eup %3780  ;;  %v5182_v1 = vmul.f32 0.5, %v808_v33  ;;  %v972_v54 = vmul.f32 0.70710677, %v818_v60  ;;  %v1194_v52 = vpack.c.bf16 %v1144_v5, %v1142_v7 }
 0x229   : > { %v3783_v22 = vpop.eup %3782  ;;  %v1082_v15 = vadd.f32 1.0, %v3781_v44  ;;  %v905_v58 = vmul.f32 0.5, %v810_v47  ;;  %3792 = verf.f32 %v970_v35  ;;  %v973_v63 = vmul.f32 0.70710677, %v820_v50 }
 0x22a   : > { %v1195_v41 = vpack.c.bf16 %v1145_v24, %v1143_v25  ;;  %v1083_v53 = vadd.f32 1.0, %v3783_v22  ;;  %3794 = verf.f32 %v971_v37  ;;  %v824_v49 = vadd.f32 %v5051_v8, %v4950_v38 }
 0x22b   : > { %v3785_v56 = vpop.eup %3784  ;;  %3796 = verf.f32 %v972_v54  ;;  %v826_v0 = vadd.f32 %v5056_v32, %v4954_v39  ;;  %v828_v33 = vadd.f32 %v5064_v61, %v4950_v38  ;;  %v830_v47 = vadd.f32 %v5069_v4, %v4954_v39 }
 0x22c   : > { %1510 = vmatprep.mubr.bf16.mxu1 %v1195_v41  ;;  %v1084_v23 = vadd.f32 1.0, %v3785_v56  ;;  %v1095_v3 = vadd.f32 1.0, %v3779_v26  ;;  %v5192_v20 = vmul.f32 0.5, %v814_v34  ;;  %v5194_v45 = vmul.f32 0.5, %v816_v17 }
 0x22d   : > { %v3787_v9 = vpop.eup %3786  ;;  %1511 = vmatmul.mubr.bf16.gmra.mrb[56].mxu1 %v1194_v52  ;;  %3798 = verf.f32 %v973_v63  ;;  %v974_v27 = vmul.f32 0.70710677, %v824_v49  ;;  %v975_v42 = vmul.f32 0.70710677, %v826_v0  ;;  %v1146_v32 = vmul.f32 %v1082_v15, %v5162_v16 }
 0x22e   : > { %v3789_v8 = vpop.eup %3788  ;;  %v1085_v10 = vadd.f32 1.0, %v3787_v9  ;;  %v1148_v57 = vmul.f32 %v1084_v23, %v892_v43  ;;  %v5197_v61 = vmul.f32 0.5, %v818_v60  ;;  %v976_v21 = vmul.f32 0.70710677, %v828_v33 }
 0x22f   : > { %v3791_v4 = vpop.eup %3790  ;;  %v1147_v7 = vmul.f32 %v1083_v53, %v5164_v46  ;;  %3800 = verf.f32 %v974_v27  ;;  %v977_v34 = vmul.f32 0.70710677, %v830_v47  ;;  %v1096_v17 = vadd.f32 1.0, %v3789_v8 }
 0x230   : > { %v1149_v5 = vmul.f32 %v1085_v10, %v893_v14  ;;  %v1097_v35 = vadd.f32 1.0, %v3791_v4  ;;  %3802 = verf.f32 %v975_v42  ;;  %v1196_v26 = vpack.c.bf16 %v1148_v57, %v1146_v32 }
 0x231   : > { %3804 = verf.f32 %v976_v21  ;;  %v1199_v24 = vpack.c.bf16 %v5082_v28, %v5049_v2  ;;  %v834_v16 = vadd.f32 %v5087_v29, %v4950_v38  ;;  %v5205_v43 = vmul.f32 %v1095_v3, %v5135_v55 }
 0x232   : > { %v1197_v25 = vpack.c.bf16 %v1149_v5, %v1147_v7  ;;  %3806 = verf.f32 %v977_v34  ;;  %v836_v46 = vadd.f32 %v5090_v51, %v4954_v39  ;;  %v838_v60 = vadd.f32 %v5096_v62, %v4950_v38 }
 0x233   : > { %v3793_v14 = vpop.eup %3792  ;;  %v909_v37 = vmul.f32 0.5, %v820_v50  ;;  %v5211_v44 = vmul.f32 0.5, %v824_v49  ;;  %v978_v54 = vmul.f32 0.70710677, %v834_v16  ;;  %v1198_v2 = vpack.c.bf16 %v5067_v6, %v5042_v30 }
 0x234   : > { %1520 = vmatprep.mubr.bf16.mxu1 %v1197_v25  ;;  %v3795_v28 = vpop.eup %3794  ;;  %v911_v29 = vmul.f32 0.5, %v826_v0  ;;  %v5215_v55 = vmul.f32 0.5, %v828_v33  ;;  %v913_v52 = vmul.f32 0.5, %v830_v47  ;;  %v979_v22 = vmul.f32 0.70710677, %v836_v46 }
 0x235   : > { %1521 = vmatmul.mubr.bf16.gmra.mrb[60].mxu1 %v1196_v26  ;;  %v3797_v51 = vpop.eup %3796  ;;  %v5218_v15 = vmul.f32 %v1096_v17, %v5182_v1  ;;  %v5220_v62 = vmul.f32 %v1097_v35, %v905_v58  ;;  %3808 = verf.f32 %v978_v54  ;;  %v980_v50 = vmul.f32 0.70710677, %v838_v60  ;;  %v6140_v35 = vld [vmem:[#allocation39_spill] sm:$0xff]  ;;  %v6141_v26 = vld [vmem:[#allocation40_spill] sm:$0xff] }
 0x236   : > { %1530 = vmatprep.mubr.bf16.mxu1 %v1199_v24  ;;  %v1098_v41 = vadd.f32 1.0, %v3793_v14  ;;  %3810 = verf.f32 %v979_v22  ;;  %v840_v30 = vadd.f32 %v5101_v59, %v4954_v39  ;;  %v1201_v6 = vpack.c.bf16 %v5167_v40, %v5099_v12 }
 0x237   : > { %v3799_v53 = vpop.eup %3798  ;;  %v1099_v63 = vadd.f32 1.0, %v3795_v28  ;;  %v914_v49 = vmul.f32 0.5, %v834_v16  ;;  %3812 = verf.f32 %v980_v50  ;;  %v844_v1 = vadd.f32 %v5111_v36, %v4950_v38 }
 0x238   : > { %v1100_v58 = vadd.f32 1.0, %v3797_v51  ;;  %v981_v56 = vmul.f32 0.70710677, %v840_v30  ;;  %v5230_v0 = vadd.f32 %v5119_v19, %v4954_v39  ;;  %v5234_v33 = vadd.f32 %v5126_v13, %v4950_v38 }
 0x239   : > { %v3801_v59 = vpop.eup %3800  ;;  %v915_v47 = vmul.f32 0.5, %v836_v46  ;;  %v916_v12 = vmul.f32 0.5, %v838_v60  ;;  %v982_v40 = vmul.f32 0.70710677, %v844_v1  ;;  %v1200_v9 = vpack.c.bf16 %v5148_v31, %v5085_v48 }
 0x23a   : > { %v3803_v23 = vpop.eup %3802  ;;  %v5239_v36 = vmul.f32 %v1098_v41, %v5192_v20  ;;  %v1101_v3 = vadd.f32 1.0, %v3799_v53  ;;  %3814 = verf.f32 %v981_v56  ;;  %v983_v19 = vmul.f32 0.70710677, %v5230_v0 }
 0x23b   : > { %v3805_v8 = vpop.eup %3804  ;;  %v5243_v10 = vmul.f32 %v1099_v63, %v5194_v45  ;;  %v1103_v13 = vadd.f32 1.0, %v3803_v23  ;;  %3816 = verf.f32 %v982_v40  ;;  %v984_v27 = vmul.f32 0.70710677, %v5234_v33 }
 0x23c   : > { %v3807_v42 = vpop.eup %3806  ;;  %v5247_v32 = vmul.f32 %v1100_v58, %v5197_v61  ;;  %v1102_v48 = vadd.f32 1.0, %v3801_v59  ;;  %3818 = verf.f32 %v983_v19  ;;  %v850_v31 = vadd.f32 %v5130_v11, %v4954_v39  ;;  %v6139_v61 = vld [vmem:[#allocation38_spill] sm:$0xff] }
 0x23d   : > { %1531 = vmatmul.mubr.bf16.gmra.mrb[64].mxu1 %v1198_v2  ;;  %v1104_v20 = vadd.f32 1.0, %v3805_v8  ;;  %v1105_v57 = vadd.f32 1.0, %v3807_v42  ;;  %3820 = verf.f32 %v984_v27  ;;  %v1203_v45 = vpack.c.bf16 %v5220_v62, %v5205_v43 }
 0x23e   : > { %1540 = vmatprep.mubr.bf16.mxu1 %v1201_v6  ;;  %v5253_v21 = vmul.f32 %v1101_v3, %v909_v37  ;;  %v917_v4 = vmul.f32 0.5, %v840_v30  ;;  %v985_v7 = vmul.f32 0.70710677, %v850_v31  ;;  %v854_v5 = vadd.f32 %v6139_v61, %v4950_v38 }
 0x23f   : > { %v3809_v34 = vpop.eup %3808  ;;  %v5257_v17 = vmul.f32 %v1103_v13, %v911_v29  ;;  %v856_v11 = vadd.f32 %v6140_v35, %v4954_v39  ;;  %v858_v25 = vadd.f32 %v6141_v26, %v4950_v38  ;;  %v1202_v24 = vpack.c.bf16 %v5218_v15, %v5180_v18 }
 0x240   : > { %v3811_v16 = vpop.eup %3810  ;;  %v5265_v43 = vmul.f32 %v1105_v57, %v913_v52  ;;  %v1106_v46 = vadd.f32 1.0, %v3809_v34  ;;  %3822 = verf.f32 %v985_v7  ;;  %v986_v60 = vmul.f32 0.70710677, %v854_v5  ;;  %v6142_v52 = vld [vmem:[#allocation41_spill] sm:$0xff] }
 0x241   : > { %v3813_v14 = vpop.eup %3812  ;;  %v5268_v37 = vmul.f32 %v1102_v48, %v5211_v44  ;;  %v5271_v54 = vmul.f32 %v1104_v20, %v5215_v55  ;;  %v1107_v2 = vadd.f32 1.0, %v3811_v16  ;;  %v987_v28 = vmul.f32 0.70710677, %v856_v11  ;;  %v3700_v16 = vld [vmem:[#allocation9 + $0x70] sm:$0xff]  }
 0x242   : > { %v5273_v29 = vmul.f32 %v1106_v46, %v914_v49  ;;  %v1108_v38 = vadd.f32 1.0, %v3813_v14  ;;  %3824 = verf.f32 %v986_v60  ;;  %v988_v18 = vmul.f32 0.70710677, %v858_v25  ;;  %v3702_v46 = vld [vmem:[#allocation9 + $0x78] sm:$0xff]   ;;  %v1246_v14 = vld [vmem:[%s6143_s8] sm:$0x3] }
 0x243   : > { %v918_v22 = vmul.f32 0.5, %v844_v1  ;;  %3826 = verf.f32 %v987_v28  ;;  %v860_v51 = vadd.f32 %v6142_v52, %v4954_v39  ;;  %v1205_v15 = vpack.c.bf16 %v5253_v21, %v5243_v10  ;;  %v3703_v60 = vld [vmem:[#allocation9 + $0x38] sm:$0xff]  }
 0x244   : > { %v3815_v44 = vpop.eup %3814  ;;  %v1172_v62 = vmul.f32 %v1108_v38, %v916_v12  ;;  %3828 = verf.f32 %v988_v18  ;;  %v1204_v55 = vpack.c.bf16 %v5247_v32, %v5239_v36  ;;  %v1207_v50 = vpack.c.bf16 %v5265_v43, %v5257_v17  ;;  %v3701_v43 = vld [vmem:[#allocation9 + $0x30] sm:$0xff]  }
 0x245   : > { %1541 = vmatmul.mubr.bf16.gmra.mrb[68].mxu1 %v1200_v9  ;;  %v3817_v41 = vpop.eup %3816  ;;  %v1171_v30 = vmul.f32 %v1107_v2, %v915_v47  ;;  %v1109_v6 = vadd.f32 1.0, %v3815_v44  ;;  %v989_v53 = vmul.f32 0.70710677, %v860_v51  ;;  %v1206_v39 = vpack.c.bf16 %v5271_v54, %v5268_v37  ;;  %v6144_v37 = vld [vmem:[#allocation37_spill] sm:$0xff] }
 0x246   : > { %1550 = vmatprep.mubr.bf16.mxu1 %v1203_v45  ;;  %v3819_v63 = vpop.eup %3818  ;;  %v1110_v49 = vadd.f32 1.0, %v3817_v41  ;;  %v920_v1 = vmul.f32 0.5, %v5234_v33  ;;  %v1208_v58 = vpack.c.bf16 %v1172_v62, %v5273_v29  ;;  %v919_v12 = vmul.f32 0.5, %v5230_v0 }
 0x247   : > { %v3821_v56 = vpop.eup %3820  ;;  %v1173_v59 = vmul.f32 %v1109_v6, %v917_v4  ;;  %v1111_v40 = vadd.f32 1.0, %v3819_v63  ;;  %3830 = verf.f32 %v989_v53  ;;  %v921_v23 = vmul.f32 0.5, %v850_v31 }
 0x248   : > { %v1174_v9 = vmul.f32 %v1110_v49, %v918_v22  ;;  %v1112_v47 = vadd.f32 1.0, %v3821_v56  ;;  %v922_v13 = vmul.f32 0.5, %v854_v5  ;;  %v924_v20 = vmul.f32 0.5, %v858_v25  ;;  %v3698_v25 = vld [vmem:[#allocation9 + $0x68] sm:$0xff]  }
 0x249   : > { %v1209_v36 = vpack.c.bf16 %v1173_v59, %v1171_v30  ;;  %v1175_v8 = vmul.f32 %v1111_v40, %v919_v12  ;;  %v923_v57 = vmul.f32 0.5, %v856_v11  ;;  %v925_v7 = vmul.f32 0.5, %v860_v51  ;;  %3303 = vmatprep.subr.bf16.mxu0 %v3698_v25  ;;  %v3699_v11 = vld [vmem:[#allocation9 + $0x28] sm:$0xff]  }
 0x24a   : > { %v3823_v3 = vpop.eup %3822  ;;  %v1176_v19 = vmul.f32 %v1112_v47, %v920_v1  ;;  %3304 = vmatpush3.bf16.msra.mxu0 %v3699_v11  ;;  %v6145_v54 = vsub.s32 0, %v6144_v37  ;;  %v6146_v28 = vsub.s32 1, %v6144_v37 }
 0x24b   : > { %v1113_v10 = vadd.f32 1.0, %v3823_v3  ;;  %3305 = vmatprep.subr.bf16.mxu0 %v3700_v16  ;;  %v4025_v3 = vld [vmem:[%s4853_s10] sm:$0xff] }
 0x24c   : > { %v3825_v27 = vpop.eup %3824  ;;  %v1210_v33 = vpack.c.bf16 %v1176_v19, %v1174_v9  ;;  %v5293_v2 = vrot.slane %v1246_v14, %v6145_v54  ;;  %v5297_v29 = vrot.slane %v1246_v14, %v6146_v28  ;;  %v2291_v19 = vmul.f32 %v4025_v3, %v4025_v3 }
 0x24d   : > { %1551 = vmatmul.mubr.bf16.gmra.mrb[72].mxu1 %v1202_v24  ;;  %v3827_v42 = vpop.eup %3826  ;;  %v1177_v32 = vmul.f32 %v1113_v10, %v921_v23  ;;  %v1114_v48 = vadd.f32 1.0, %v3825_v27  ;;  %v4024_v23 = vld [vmem:[%s4853_s10 + $0x10] sm:$0xff] }
 0x24e   : > { %1560 = vmatprep.mubr.bf16.mxu1 %v1205_v15  ;;  %v3829_v0 = vpop.eup %3828  ;;  %v1115_v45 = vadd.f32 1.0, %v3827_v42  ;;  %3306 = vmatpush3.bf16.msra.mxu0 %v3701_v43 }
 0x24f   : > { %v1178_v21 = vmul.f32 %v1114_v48, %v922_v13  ;;  %v1116_v4 = vadd.f32 1.0, %v3829_v0  ;;  %v1211_v31 = vpack.c.bf16 %v1177_v32, %v1175_v8  ;;  %3307 = vmatprep.subr.bf16.mxu0 %v3702_v46  ;;  %2323 = vadd.xlane.f32.xlu0 %v2291_v19 }
 0x250   : > { %v1179_v17 = vmul.f32 %v1115_v45, %v923_v57 }
 0x251   : > { %v3831_v61 = vpop.eup %3830  ;;  %v1180_v34 = vmul.f32 %v1116_v4, %v924_v20 }
 0x252   : > { %v1117_v35 = vadd.f32 1.0, %v3831_v61  ;;  %3308 = vmatpush3.bf16.msra.mxu0 %v3703_v60  ;;  %v4026_v61 = vld [vmem:[%s4853_s10 + $0x18] sm:$0xff] }
 0x253   : > { %v1212_v5 = vpack.c.bf16 %v1180_v34, %v1178_v21  ;;  %v2294_v34 = vmul.f32 %v4026_v61, %v4026_v61 }
 0x254   : > { %v1181_v26 = vmul.f32 %v1117_v35, %v925_v7 }
 0x255   : > { %1561 = vmatmul.mubr.bf16.gmra.mrb[76].mxu1 %v1204_v55 }
 0x256   : > { %1570 = vmatprep.mubr.bf16.mxu1 %v1207_v50  ;;  %v1213_v24 = vpack.c.bf16 %v1181_v26, %v1179_v17 }
 0x25d   : > { %1571 = vmatmul.mubr.bf16.gmra.mrb[80].mxu1 %v1206_v39 }
 0x25e   : > { %1580 = vmatprep.mubr.bf16.mxu1 %v1209_v36  ;;  %v2293_v36 = vmul.f32 %v4024_v23, %v4024_v23 }
 0x260   : > { %2327 = vadd.xlane.f32.xlu1 %v2293_v36 }
 0x264   : > { %2329 = vadd.xlane.f32.xlu1 %v2294_v34 }
 0x265   : > { %1581 = vmatmul.mubr.bf16.gmra.mrb[84].mxu1 %v1208_v58 }
 0x266   : > { %1590 = vmatprep.mubr.bf16.mxu1 %v1211_v31 }
 0x26d   : > { %1591 = vmatmul.mubr.bf16.gmra.mrb[88].mxu1 %v1210_v33 }
 0x26e   : > { %1600 = vmatprep.mubr.bf16.mxu1 %v1213_v24 }
 0x275   : > { %1601 = vmatmul.mubr.bf16.gmra.mrb[92].mxu1 %v1212_v5 }
 0x2cf   : > { %v1452_v38 = vpop.f32.mrb[32].mxu1 }
 0x2d0   : > { %v1453_v18 = vadd.f32 %v1452_v38, %v5293_v2  ;;  %v1454_v22 = vpop.f32.mrb[33].mxu1 }
 0x2d1   : > { %v1455_v52 = vadd.f32 %v1454_v22, %v5297_v29  ;;  %v1456_v51 = vpop.f32.mrb[34].mxu1 }
 0x2d2   : > { %v1675_v15 = vmul.f32 0.70710677, %v1453_v18  ;;  %v1457_v44 = vadd.f32 %v1456_v51, %v5293_v2  ;;  %v1458_v62 = vpop.f32.mrb[35].mxu1  ;;  %v1611_v27 = vmul.f32 0.5, %v1453_v18  ;;  %v4027_v18 = vld [vmem:[%s4853_s10 + $0x8] sm:$0xff] }
 0x2d3   : > { %v1676_v55 = vmul.f32 0.70710677, %v1455_v52  ;;  %v1459_v50 = vadd.f32 %v1458_v62, %v5297_v29  ;;  %v1612_v48 = vmul.f32 0.5, %v1455_v52  ;;  %v2292_v22 = vmul.f32 %v4027_v18, %v4027_v18  ;;  %v4028_v52 = vld [vmem:[%s4853_s10 + $0x28] sm:$0xff] }
 0x2d4   : > { %3832 = verf.f32 %v1675_v15  ;;  %v1677_v41 = vmul.f32 0.70710677, %v1457_v44  ;;  %v1613_v20 = vmul.f32 0.5, %v1457_v44  ;;  %v2296_v51 = vmul.f32 %v4028_v52, %v4028_v52  ;;  %v4035_v52 = vld [vmem:[%s4853_s10 + $0x50] sm:$0xff] }
 0x2d5   : > { %3834 = verf.f32 %v1676_v55  ;;  %v1678_v30 = vmul.f32 0.70710677, %v1459_v50  ;;  %v1614_v21 = vmul.f32 0.5, %v1459_v50  ;;  %2325 = vadd.xlane.f32.xlu0 %v2292_v22 }
 0x2d6   : > { %3836 = verf.f32 %v1677_v41  ;;  %2333 = vadd.xlane.f32.xlu1 %v2296_v51  ;;  %v2301_v51 = vmul.f32 %v4035_v52, %v4035_v52 }
 0x2d7   : > { %3838 = verf.f32 %v1678_v30 }
 0x2d8   : > { %v1462_v6 = vpop.f32.mrb[36].mxu1 }
 0x2d9   : > { %v5304_v53 = vadd.f32 %v1462_v6, %v5293_v2  ;;  %v1464_v39 = vpop.f32.mrb[37].mxu1 }
 0x2da   : > { %v5307_v63 = vadd.f32 %v1464_v39, %v5297_v29  ;;  %v1466_v49 = vpop.f32.mrb[38].mxu1 }
 0x2db   : > { %v1679_v1 = vmul.f32 0.70710677, %v5304_v53  ;;  %v5311_v58 = vadd.f32 %v1466_v49, %v5293_v2  ;;  %v1468_v56 = vpop.f32.mrb[39].mxu1  ;;  %v1615_v44 = vmul.f32 0.5, %v5304_v53 }
 0x2dc   : > { %v1680_v59 = vmul.f32 0.70710677, %v5307_v63  ;;  %v5315_v12 = vadd.f32 %v1468_v56, %v5297_v29  ;;  %v1616_v62 = vmul.f32 0.5, %v5307_v63 }
 0x2dd   : > { %3840 = verf.f32 %v1679_v1  ;;  %v1681_v40 = vmul.f32 0.70710677, %v5311_v58  ;;  %v1617_v30 = vmul.f32 0.5, %v5311_v58  ;;  %v4029_v1 = vld [vmem:[%s4853_s10 + $0x20] sm:$0xff] }
 0x2de   : > { %3842 = verf.f32 %v1680_v59  ;;  %v1682_v9 = vmul.f32 0.70710677, %v5315_v12  ;;  %v3833_v47 = vpop.eup %3832  ;;  %v2295_v56 = vmul.f32 %v4029_v1, %v4029_v1  ;;  %v1618_v53 = vmul.f32 0.5, %v5315_v12 }
 0x2df   : > { %3844 = verf.f32 %v1681_v40  ;;  %v3835_v8 = vpop.eup %3834  ;;  %v1803_v10 = vadd.f32 1.0, %v3833_v47 }
 0x2e0   : > { %3846 = verf.f32 %v1682_v9  ;;  %v3837_v13 = vpop.eup %3836  ;;  %v1804_v33 = vadd.f32 1.0, %v3835_v8  ;;  %v1472_v42 = vpop.f32.mrb[40].mxu1  ;;  %v4030_v9 = vld [vmem:[%s4853_s10 + $0x38] sm:$0xff]  ;;  %2331 = vadd.xlane.f32.xlu0 %v2295_v56 }
 0x2e1   : > { %v3839_v32 = vpop.eup %3838  ;;  %v1805_v0 = vadd.f32 1.0, %v3837_v13  ;;  %v5322_v57 = vadd.f32 %v1472_v42, %v5293_v2  ;;  %v1474_v45 = vpop.f32.mrb[41].mxu1  ;;  %v1867_v17 = vmul.f32 %v1803_v10, %v1611_v27  ;;  %v2298_v58 = vmul.f32 %v4030_v9, %v4030_v9  ;;  %v4031_v42 = vld [vmem:[%s4853_s10 + $0x30] sm:$0xff] }
 0x2e2   : > { %v1806_v4 = vadd.f32 1.0, %v3839_v32  ;;  %v5325_v31 = vadd.f32 %v1474_v45, %v5297_v29  ;;  %v1476_v7 = vpop.f32.mrb[42].mxu1  ;;  %v1868_v25 = vmul.f32 %v1804_v33, %v1612_v48  ;;  %v2297_v32 = vmul.f32 %v4031_v42, %v4031_v42 }
 0x2e3   : > { %v1869_v35 = vmul.f32 %v1805_v0, %v1613_v20  ;;  %v1683_v5 = vmul.f32 0.70710677, %v5322_v57  ;;  %v5330_v26 = vadd.f32 %v1476_v7, %v5293_v2  ;;  %v1478_v24 = vpop.f32.mrb[43].mxu1  ;;  %2337 = vadd.xlane.f32.xlu1 %v2298_v58  ;;  %v4032_v0 = vld [vmem:[%s4853_s10 + $0x48] sm:$0xff]  ;;  %v1619_v7 = vmul.f32 0.5, %v5322_v57 }
 0x2e4   : > { %v1870_v11 = vmul.f32 %v1806_v4, %v1614_v21  ;;  %v1684_v16 = vmul.f32 0.70710677, %v5325_v31  ;;  %v5334_v43 = vadd.f32 %v1478_v24, %v5297_v29  ;;  %v2300_v45 = vmul.f32 %v4032_v0, %v4032_v0  ;;  %2335 = vadd.xlane.f32.xlu0 %v2297_v32  ;;  %v4038_v32 = vld [vmem:[%s4853_s10 + $0x78] sm:$0xff] }
 0x2e5   : > { %v1931_v46 = vpack.c.bf16 %v1869_v35, %v1867_v17  ;;  %3848 = verf.f32 %v1683_v5  ;;  %v1685_v60 = vmul.f32 0.70710677, %v5330_v26  ;;  %v1620_v35 = vmul.f32 0.5, %v5325_v31  ;;  %v4034_v31 = vld [vmem:[%s4853_s10 + $0x58] sm:$0xff] }
 0x2e6   : > { %3850 = verf.f32 %v1684_v16  ;;  %v1686_v37 = vmul.f32 0.70710677, %v5334_v43  ;;  %v1932_v54 = vpack.c.bf16 %v1870_v11, %v1868_v25  ;;  %v4033_v11 = vld [vmem:[%s4853_s10 + $0x40] sm:$0xff]  ;;  %v1621_v57 = vmul.f32 0.5, %v5330_v26 }
 0x2e7   : > { %v3841_v14 = vpop.eup %3840  ;;  %3852 = verf.f32 %v1685_v60  ;;  %v2299_v16 = vmul.f32 %v4033_v11, %v4033_v11  ;;  %2341 = vadd.xlane.f32.xlu1 %v2300_v45 }
 0x2e8   : > { %v3843_v28 = vpop.eup %3842  ;;  %v1807_v38 = vadd.f32 1.0, %v3841_v14  ;;  %3854 = verf.f32 %v1686_v37  ;;  %v1482_v50 = vpop.f32.mrb[44].mxu1  ;;  %2130 = vmatprep.mubr.bf16.mxu0 %v1932_v54  ;;  %v2302_v54 = vmul.f32 %v4034_v31, %v4034_v31 }
 0x2e9   : > { %v3845_v15 = vpop.eup %3844  ;;  %v1808_v55 = vadd.f32 1.0, %v3843_v28  ;;  %v5344_v39 = vadd.f32 %v1482_v50, %v5293_v2  ;;  %v1484_v49 = vpop.f32.mrb[45].mxu1  ;;  %2131 = vmatmul.mubr.bf16.vlgmr.msra.gmra.mrb[32].mxu0 %v1931_v46  ;;  %v1622_v28 = vmul.f32 0.5, %v5334_v43  ;;  %2339 = vadd.xlane.f32.xlu0 %v2299_v16  ;;  %v4040_v16 = vld [vmem:[%s4853_s10 + $0x88] sm:$0xff] }
 0x2ea   : > { %v3847_v41 = vpop.eup %3846  ;;  %v1809_v6 = vadd.f32 1.0, %v3845_v15  ;;  %v5349_v59 = vadd.f32 %v1484_v49, %v5297_v29  ;;  %v1486_v40 = vpop.f32.mrb[46].mxu1  ;;  %v1871_v47 = vmul.f32 %v1807_v38, %v1615_v44 }
 0x2eb   : > { %v1810_v63 = vadd.f32 1.0, %v3847_v41  ;;  %v1687_v36 = vmul.f32 0.70710677, %v5344_v39  ;;  %v5354_v3 = vadd.f32 %v1486_v40, %v5293_v2  ;;  %v1488_v19 = vpop.f32.mrb[47].mxu1  ;;  %v1872_v8 = vmul.f32 %v1808_v55, %v1616_v62  ;;  %2345 = vadd.xlane.f32.xlu1 %v2302_v54 }
 0x2ec   : > { %v1873_v23 = vmul.f32 %v1809_v6, %v1617_v30  ;;  %v1688_v10 = vmul.f32 0.70710677, %v5349_v59  ;;  %v5358_v13 = vadd.f32 %v1488_v19, %v5297_v29  ;;  %v4036_v6 = vld [vmem:[%s4853_s10 + $0x68] sm:$0xff]  ;;  %v1623_v40 = vmul.f32 0.5, %v5344_v39 }
 0x2ed   : > { %v1874_v12 = vmul.f32 %v1810_v63, %v1618_v53  ;;  %3856 = verf.f32 %v1687_v36  ;;  %v1689_v27 = vmul.f32 0.70710677, %v5354_v3  ;;  %v2304_v49 = vmul.f32 %v4036_v6, %v4036_v6  ;;  %2343 = vadd.xlane.f32.xlu0 %v2301_v51  ;;  %v4041_v51 = vld [vmem:[%s4853_s10 + $0x80] sm:$0xff] }
 0x2ee   : > { %v1933_v33 = vpack.c.bf16 %v1873_v23, %v1871_v47  ;;  %3858 = verf.f32 %v1688_v10  ;;  %v1690_v48 = vmul.f32 0.70710677, %v5358_v13  ;;  %v1624_v58 = vmul.f32 0.5, %v5349_v59 }
 0x2ef   : > { %v1934_v20 = vpack.c.bf16 %v1874_v12, %v1872_v8  ;;  %v3849_v21 = vpop.eup %3848  ;;  %3860 = verf.f32 %v1689_v27  ;;  %v4037_v12 = vld [vmem:[%s4853_s10 + $0x60] sm:$0xff]  ;;  %v1625_v39 = vmul.f32 0.5, %v5354_v3  ;;  %2349 = vadd.xlane.f32.xlu1 %v2304_v49 }
 0x2f0   : > { %v3851_v4 = vpop.eup %3850  ;;  %v1811_v61 = vadd.f32 1.0, %v3849_v21  ;;  %3862 = verf.f32 %v1690_v48  ;;  %v1492_v34 = vpop.f32.mrb[48].mxu1  ;;  %v2303_v10 = vmul.f32 %v4037_v12, %v4037_v12  ;;  %v2306_v48 = vmul.f32 %v4038_v32, %v4038_v32 }
 0x2f1   : > { %2138 = vmatprep.mubr.bf16.mxu0 %v1934_v20  ;;  %v3853_v17 = vpop.eup %3852  ;;  %v1812_v5 = vadd.f32 1.0, %v3851_v4  ;;  %v5367_v24 = vadd.f32 %v1492_v34, %v5293_v2  ;;  %v1494_v25 = vpop.f32.mrb[49].mxu1  ;;  %v1626_v20 = vmul.f32 0.5, %v5358_v13  ;;  %v4039_v4 = vld [vmem:[%s4853_s10 + $0x70] sm:$0xff] }
 0x2f2   : > { %2139 = vmatmul.mubr.bf16.gmra.mrb[36].mxu0 %v1933_v33  ;;  %v3855_v46 = vpop.eup %3854  ;;  %v1813_v60 = vadd.f32 1.0, %v3853_v17  ;;  %v5372_v14 = vadd.f32 %v1494_v25, %v5297_v29  ;;  %v1496_v37 = vpop.f32.mrb[50].mxu1  ;;  %v1875_v15 = vmul.f32 %v1811_v61, %v1619_v7  ;;  %v2305_v7 = vmul.f32 %v4039_v4, %v4039_v4  ;;  %2347 = vadd.xlane.f32.xlu0 %v2303_v10 }
 0x2f3   : > { %v1814_v38 = vadd.f32 1.0, %v3855_v46  ;;  %v1691_v18 = vmul.f32 0.70710677, %v5367_v24  ;;  %v1498_v22 = vpop.f32.mrb[51].mxu1  ;;  %v5380_v62 = vadd.f32 %v1496_v37, %v5293_v2  ;;  %v1876_v55 = vmul.f32 %v1812_v5, %v1620_v35  ;;  %2353 = vadd.xlane.f32.xlu1 %v2306_v48 }
 0x2f4   : > { %v1877_v44 = vmul.f32 %v1813_v60, %v1621_v57  ;;  %v1692_v26 = vmul.f32 0.70710677, %v5372_v14  ;;  %v5383_v41 = vadd.f32 %v1498_v22, %v5297_v29  ;;  %v2308_v46 = vmul.f32 %v4040_v16, %v4040_v16  ;;  %v4047_v16 = vld [vmem:[%s4853_s10 + $0xb0] sm:$0xff] }
 0x2f5   : > { %v1878_v50 = vmul.f32 %v1814_v38, %v1622_v28  ;;  %3864 = verf.f32 %v1691_v18  ;;  %v1693_v43 = vmul.f32 0.70710677, %v5380_v62  ;;  %v1627_v54 = vmul.f32 0.5, %v5367_v24 }
 0x2f6   : > { %3866 = verf.f32 %v1692_v26  ;;  %v1935_v30 = vpack.c.bf16 %v1877_v44, %v1875_v15  ;;  %v1694_v56 = vmul.f32 0.70710677, %v5383_v41  ;;  %v1628_v28 = vmul.f32 0.5, %v5372_v14  ;;  %2351 = vadd.xlane.f32.xlu0 %v2305_v7 }
 0x2f7   : > { %v3857_v1 = vpop.eup %3856  ;;  %v1936_v53 = vpack.c.bf16 %v1878_v50, %v1876_v55  ;;  %3868 = verf.f32 %v1693_v43  ;;  %v2307_v15 = vmul.f32 %v4041_v51, %v4041_v51  ;;  %v1629_v24 = vmul.f32 0.5, %v5380_v62  ;;  %2357 = vadd.xlane.f32.xlu1 %v2308_v46  ;;  %v4042_v50 = vld [vmem:[%s4853_s10 + $0x98] sm:$0xff] }
 0x2f8   : > { %v3859_v63 = vpop.eup %3858  ;;  %v1815_v9 = vadd.f32 1.0, %v3857_v1  ;;  %v1502_v47 = vpop.f32.mrb[52].mxu1  ;;  %3870 = verf.f32 %v1694_v56  ;;  %v2310_v43 = vmul.f32 %v4042_v50, %v4042_v50  ;;  %v1630_v49 = vmul.f32 0.5, %v5383_v41 }
 0x2f9   : > { %v3861_v23 = vpop.eup %3860  ;;  %v1816_v36 = vadd.f32 1.0, %v3859_v63  ;;  %v5391_v19 = vadd.f32 %v1502_v47, %v5293_v2  ;;  %v1504_v8 = vpop.f32.mrb[53].mxu1  ;;  %2146 = vmatprep.mubr.bf16.mxu0 %v1936_v53  ;;  %v4043_v53 = vld [vmem:[%s4853_s10 + $0x90] sm:$0xff] }
 0x2fa   : > { %v3863_v27 = vpop.eup %3862  ;;  %v1817_v33 = vadd.f32 1.0, %v3861_v23  ;;  %v5396_v59 = vadd.f32 %v1504_v8, %v5297_v29  ;;  %v1506_v42 = vpop.f32.mrb[54].mxu1  ;;  %2147 = vmatmul.mubr.bf16.gmra.mrb[40].mxu0 %v1935_v30  ;;  %v1879_v61 = vmul.f32 %v1815_v9, %v1623_v40  ;;  %v2309_v63 = vmul.f32 %v4043_v53, %v4043_v53  ;;  %2355 = vadd.xlane.f32.xlu0 %v2307_v15 }
 0x2fb   : > { %v1818_v0 = vadd.f32 1.0, %v3863_v27  ;;  %v1695_v45 = vmul.f32 0.70710677, %v5391_v19  ;;  %v1508_v21 = vpop.f32.mrb[55].mxu1  ;;  %v5404_v17 = vadd.f32 %v1506_v42, %v5293_v2  ;;  %v1880_v35 = vmul.f32 %v1816_v36, %v1624_v58  ;;  %v4044_v58 = vld [vmem:[%s4853_s10 + $0xa8] sm:$0xff]  ;;  %2361 = vadd.xlane.f32.xlu1 %v2310_v43 }
 0x2fc   : > { %v1881_v3 = vmul.f32 %v1817_v33, %v1625_v39  ;;  %v1696_v34 = vmul.f32 0.70710677, %v5396_v59  ;;  %v5407_v25 = vadd.f32 %v1508_v21, %v5297_v29  ;;  %v2312_v47 = vmul.f32 %v4044_v58, %v4044_v58  ;;  %v4051_v58 = vld [vmem:[%s4853_s10 + $0xd0] sm:$0xff] }
 0x2fd   : > { %v1882_v5 = vmul.f32 %v1818_v0, %v1626_v20  ;;  %3872 = verf.f32 %v1695_v45  ;;  %v1697_v13 = vmul.f32 0.70710677, %v5404_v17  ;;  %v4045_v20 = vld [vmem:[%s4853_s10 + $0xa0] sm:$0xff]  ;;  %v4046_v45 = vld [vmem:[%s4853_s10 + $0xb8] sm:$0xff]  ;;  %v1631_v4 = vmul.f32 0.5, %v5391_v19 }
 0x2fe   : > { %3874 = verf.f32 %v1696_v34  ;;  %v1937_v11 = vpack.c.bf16 %v1881_v3, %v1879_v61  ;;  %v1698_v60 = vmul.f32 0.70710677, %v5407_v25  ;;  %v2311_v0 = vmul.f32 %v4045_v20, %v4045_v20  ;;  %2359 = vadd.xlane.f32.xlu0 %v2309_v63 }
 0x2ff   : > { %v3865_v57 = vpop.eup %3864  ;;  %v1938_v37 = vpack.c.bf16 %v1882_v5, %v1880_v35  ;;  %3876 = verf.f32 %v1697_v13  ;;  %v2314_v21 = vmul.f32 %v4046_v45, %v4046_v45  ;;  %v1632_v35 = vmul.f32 0.5, %v5396_v59  ;;  %2365 = vadd.xlane.f32.xlu1 %v2312_v47 }
 0x300   : > { %v3867_v31 = vpop.eup %3866  ;;  %v1512_v38 = vpop.f32.mrb[56].mxu1  ;;  %v1819_v18 = vadd.f32 1.0, %v3865_v57  ;;  %3878 = verf.f32 %v1698_v60  ;;  %v2313_v19 = vmul.f32 %v4047_v16, %v4047_v16  ;;  %v1633_v57 = vmul.f32 0.5, %v5404_v17 }
 0x301   : > { %v5415_v22 = vadd.f32 %v1512_v38, %v5293_v2  ;;  %v1514_v52 = vpop.f32.mrb[57].mxu1  ;;  %2154 = vmatprep.mubr.bf16.mxu0 %v1938_v37  ;;  %v3869_v44 = vpop.eup %3868  ;;  %v1820_v26 = vadd.f32 1.0, %v3867_v31  ;;  %v1634_v37 = vmul.f32 0.5, %v5407_v25  ;;  %v2317_v47 = vmul.f32 %v4051_v58, %v4051_v58 }
 0x302   : > { %v5420_v14 = vadd.f32 %v1514_v52, %v5297_v29  ;;  %v1516_v55 = vpop.f32.mrb[58].mxu1  ;;  %2155 = vmatmul.mubr.bf16.gmra.mrb[44].mxu0 %v1937_v11  ;;  %v3871_v30 = vpop.eup %3870  ;;  %v1821_v6 = vadd.f32 1.0, %v3869_v44  ;;  %v1883_v23 = vmul.f32 %v1819_v18, %v1627_v54  ;;  %v4048_v18 = vld [vmem:[%s4853_s10 + $0xc8] sm:$0xff]  ;;  %2363 = vadd.xlane.f32.xlu0 %v2311_v0 }
 0x303   : > { %v1699_v1 = vmul.f32 0.70710677, %v5415_v22  ;;  %v1518_v56 = vpop.f32.mrb[59].mxu1  ;;  %v1822_v40 = vadd.f32 1.0, %v3871_v30  ;;  %v5428_v9 = vadd.f32 %v1516_v55, %v5293_v2  ;;  %v1884_v41 = vmul.f32 %v1820_v26, %v1628_v28  ;;  %2369 = vadd.xlane.f32.xlu1 %v2314_v21 }
 0x304   : > { %v1700_v62 = vmul.f32 0.70710677, %v5420_v14  ;;  %v1885_v36 = vmul.f32 %v1821_v6, %v1629_v24  ;;  %v5432_v8 = vadd.f32 %v1518_v56, %v5297_v29  ;;  %v2316_v52 = vmul.f32 %v4048_v18, %v4048_v18  ;;  %v4050_v56 = vld [vmem:[%s4853_s10 + $0xd8] sm:$0xff] }
 0x305   : > { %3880 = verf.f32 %v1699_v1  ;;  %v1886_v12 = vmul.f32 %v1822_v40, %v1630_v49  ;;  %v1701_v10 = vmul.f32 0.70710677, %v5428_v9  ;;  %v4049_v49 = vld [vmem:[%s4853_s10 + $0xc0] sm:$0xff]  ;;  %v2318_v53 = vmul.f32 %v4050_v56, %v4050_v56 }
 0x306   : > { %3882 = verf.f32 %v1700_v62  ;;  %v1702_v39 = vmul.f32 0.70710677, %v5432_v8  ;;  %v1939_v33 = vpack.c.bf16 %v1885_v36, %v1883_v23  ;;  %v2315_v1 = vmul.f32 %v4049_v49, %v4049_v49  ;;  %2367 = vadd.xlane.f32.xlu0 %v2313_v19 }
 0x307   : > { %v3873_v27 = vpop.eup %3872  ;;  %3884 = verf.f32 %v1701_v10  ;;  %v1940_v48 = vpack.c.bf16 %v1886_v12, %v1884_v41  ;;  %v1635_v36 = vmul.f32 0.5, %v5415_v22  ;;  %2373 = vadd.xlane.f32.xlu1 %v2316_v52  ;;  %v1638_v0 = vmul.f32 0.5, %v5432_v8 }
 0x308   : > { %v3875_v42 = vpop.eup %3874  ;;  %v1522_v32 = vpop.f32.mrb[60].mxu1  ;;  %v1823_v7 = vadd.f32 1.0, %v3873_v27  ;;  %3886 = verf.f32 %v1702_v39  ;;  %v5471_v27 = vld [vmem:[%s4853_s10 + $0xe8] sm:$0xff] }
 0x309   : > { %v5440_v61 = vadd.f32 %v1522_v32, %v5293_v2  ;;  %v1524_v3 = vpop.f32.mrb[61].mxu1  ;;  %v3877_v34 = vpop.eup %3876  ;;  %v1824_v5 = vadd.f32 1.0, %v3875_v42  ;;  %2162 = vmatprep.mubr.bf16.mxu0 %v1940_v48  ;;  %v2320_v39 = vmul.f32 %v5471_v27, %v5471_v27  ;;  %v1636_v42 = vmul.f32 0.5, %v5420_v14 }
 0x30a   : > { %v5444_v13 = vadd.f32 %v1524_v3, %v5297_v29  ;;  %v1526_v11 = vpop.f32.mrb[62].mxu1  ;;  %v3879_v46 = vpop.eup %3878  ;;  %v1825_v60 = vadd.f32 1.0, %v3877_v34  ;;  %2163 = vmatmul.mubr.bf16.gmra.mrb[48].mxu0 %v1939_v33  ;;  %v1887_v51 = vmul.f32 %v1823_v7, %v1631_v4  ;;  %v1637_v32 = vmul.f32 0.5, %v5428_v9  ;;  %2371 = vadd.xlane.f32.xlu0 %v2315_v1 }
 0x30b   : > { %v1703_v31 = vmul.f32 0.70710677, %v5440_v61  ;;  %v1528_v59 = vpop.f32.mrb[63].mxu1  ;;  %v1826_v54 = vadd.f32 1.0, %v3879_v46  ;;  %v5452_v38 = vadd.f32 %v1526_v11, %v5293_v2  ;;  %v1888_v25 = vmul.f32 %v1824_v5, %v1632_v35  ;;  %2377 = vadd.xlane.f32.xlu1 %v2318_v53 }
 0x30c   : > { %v1704_v28 = vmul.f32 0.70710677, %v5444_v13  ;;  %v1889_v15 = vmul.f32 %v1825_v60, %v1633_v57  ;;  %v5456_v17 = vadd.f32 %v1528_v59, %v5297_v29  ;;  %v5489_v57 = vld [vmem:[%s4853_s10 + $0xe0] sm:$0xff]  ;;  %v1639_v52 = vmul.f32 0.5, %v5440_v61 }
 0x30d   : > { %3888 = verf.f32 %v1703_v31  ;;  %v1890_v44 = vmul.f32 %v1826_v54, %v1634_v37  ;;  %v1705_v26 = vmul.f32 0.70710677, %v5452_v38  ;;  %v2319_v60 = vmul.f32 %v5489_v57, %v5489_v57  ;;  %v5497_v54 = vld [vmem:[%s4853_s10 + $0xf8] sm:$0xff] }
 0x30e   : > { %3890 = verf.f32 %v1704_v28  ;;  %v1706_v55 = vmul.f32 0.70710677, %v5456_v17  ;;  %v1941_v50 = vpack.c.bf16 %v1889_v15, %v1887_v51  ;;  %2375 = vadd.xlane.f32.xlu0 %v2317_v47  ;;  %v2322_v28 = vmul.f32 %v5497_v54, %v5497_v54 }
 0x30f   : > { %v3881_v24 = vpop.eup %3880  ;;  %3892 = verf.f32 %v1705_v26  ;;  %v1942_v6 = vpack.c.bf16 %v1890_v44, %v1888_v25  ;;  %2381 = vadd.xlane.f32.xlu1 %v2320_v39  ;;  %v5506_v44 = vld [vmem:[%s4853_s10 + $0xf0] sm:$0xff] }
 0x310   : > { %v3883_v43 = vpop.eup %3882  ;;  %v1532_v30 = vpop.f32.mrb[64].mxu1  ;;  %v1827_v63 = vadd.f32 1.0, %v3881_v24  ;;  %3894 = verf.f32 %v1706_v55  ;;  %v2321_v26 = vmul.f32 %v5506_v44, %v5506_v44  ;;  %v1640_v55 = vmul.f32 0.5, %v5444_v13 }
 0x311   : > { %v5463_v40 = vadd.f32 %v1532_v30, %v5293_v2  ;;  %v1534_v62 = vpop.f32.mrb[65].mxu1  ;;  %v3885_v23 = vpop.eup %3884  ;;  %v1828_v41 = vadd.f32 1.0, %v3883_v43  ;;  %2170 = vmatprep.mubr.bf16.mxu0 %v1942_v6  ;;  %v1642_v6 = vmul.f32 0.5, %v5456_v17 }
 0x312   : > { %v5468_v12 = vadd.f32 %v1534_v62, %v5297_v29  ;;  %v1536_v10 = vpop.f32.mrb[66].mxu1  ;;  %v3887_v33 = vpop.eup %3886  ;;  %v1829_v48 = vadd.f32 1.0, %v3885_v23  ;;  %2171 = vmatmul.mubr.bf16.gmra.mrb[52].mxu0 %v1941_v50  ;;  %v1891_v7 = vmul.f32 %v1827_v63, %v1635_v36  ;;  %v1641_v50 = vmul.f32 0.5, %v5452_v38  ;;  %2379 = vadd.xlane.f32.xlu0 %v2319_v60 }
 0x313   : > { %v1707_v22 = vmul.f32 0.70710677, %v5463_v40  ;;  %v1538_v20 = vpop.f32.mrb[67].mxu1  ;;  %v1830_v45 = vadd.f32 1.0, %v3887_v33  ;;  %v5481_v4 = vadd.f32 %v1536_v10, %v5293_v2  ;;  %v1892_v9 = vmul.f32 %v1828_v41, %v1636_v42  ;;  %2385 = vadd.xlane.f32.xlu1 %v2322_v28 }
 0x314   : > { %v1708_v21 = vmul.f32 0.70710677, %v5468_v12  ;;  %v1893_v3 = vmul.f32 %v1829_v48, %v1637_v32  ;;  %v5484_v14 = vadd.f32 %v1538_v20, %v5297_v29  ;;  %v1643_v48 = vmul.f32 0.5, %v5463_v40 }
 0x315   : > { %3896 = verf.f32 %v1707_v22  ;;  %v1894_v34 = vmul.f32 %v1830_v45, %v1638_v0  ;;  %v1709_v35 = vmul.f32 0.70710677, %v5481_v4 }
 0x316   : > { %3898 = verf.f32 %v1708_v21  ;;  %v1710_v5 = vmul.f32 0.70710677, %v5484_v14  ;;  %v1943_v11 = vpack.c.bf16 %v1893_v3, %v1891_v7  ;;  %2383 = vadd.xlane.f32.xlu0 %v2321_v26  ;;  %v1644_v21 = vmul.f32 0.5, %v5468_v12 }
 0x317   : > { %v3889_v8 = vpop.eup %3888  ;;  %3900 = verf.f32 %v1709_v35  ;;  %v1944_v46 = vpack.c.bf16 %v1894_v34, %v1892_v9  ;;  %v1645_v7 = vmul.f32 0.5, %v5481_v4  ;;  %v1646_v35 = vmul.f32 0.5, %v5484_v14 }
 0x318   : > { %v3891_v16 = vpop.eup %3890  ;;  %v1542_v19 = vpop.f32.mrb[68].mxu1  ;;  %v1831_v37 = vadd.f32 1.0, %v3889_v8  ;;  %3902 = verf.f32 %v1710_v5 }
 0x319   : > { %v5494_v31 = vadd.f32 %v1542_v19, %v5293_v2  ;;  %v1544_v59 = vpop.f32.mrb[69].mxu1  ;;  %v3893_v18 = vpop.eup %3892  ;;  %v1832_v51 = vadd.f32 1.0, %v3891_v16  ;;  %2178 = vmatprep.mubr.bf16.mxu0 %v1944_v46 }
 0x31a   : > { %v5503_v15 = vadd.f32 %v1544_v59, %v5297_v29  ;;  %v1546_v25 = vpop.f32.mrb[70].mxu1  ;;  %v3895_v24 = vpop.eup %3894  ;;  %v1833_v43 = vadd.f32 1.0, %v3893_v18  ;;  %2179 = vmatmul.mubr.bf16.gmra.mrb[56].mxu0 %v1943_v11  ;;  %v1895_v53 = vmul.f32 %v1831_v37, %v1639_v52 }
 0x31b   : > { %v1711_v61 = vmul.f32 0.70710677, %v5494_v31  ;;  %v1548_v30 = vpop.f32.mrb[71].mxu1  ;;  %v1834_v49 = vadd.f32 1.0, %v3895_v24  ;;  %v5516_v56 = vadd.f32 %v1546_v25, %v5293_v2  ;;  %v1896_v38 = vmul.f32 %v1832_v51, %v1640_v55 }
 0x31c   : > { %v1712_v1 = vmul.f32 0.70710677, %v5503_v15  ;;  %v1897_v63 = vmul.f32 %v1833_v43, %v1641_v50  ;;  %v5519_v13 = vadd.f32 %v1548_v30, %v5297_v29  ;;  %v1647_v24 = vmul.f32 0.5, %v5494_v31 }
 0x31d   : > { %3904 = verf.f32 %v1711_v61  ;;  %v1898_v62 = vmul.f32 %v1834_v49, %v1642_v6  ;;  %v1713_v58 = vmul.f32 0.70710677, %v5516_v56  ;;  %v1648_v30 = vmul.f32 0.5, %v5503_v15 }
 0x31e   : > { %3906 = verf.f32 %v1712_v1  ;;  %v1714_v47 = vmul.f32 0.70710677, %v5519_v13  ;;  %v1945_v23 = vpack.c.bf16 %v1897_v63, %v1895_v53  ;;  %v1649_v6 = vmul.f32 0.5, %v5516_v56 }
 0x31f   : > { %v3897_v17 = vpop.eup %3896  ;;  %3908 = verf.f32 %v1713_v58  ;;  %v1946_v10 = vpack.c.bf16 %v1898_v62, %v1896_v38  ;;  %v1650_v63 = vmul.f32 0.5, %v5519_v13 }
 0x320   : > { %v3899_v36 = vpop.eup %3898  ;;  %v1552_v41 = vpop.f32.mrb[72].mxu1  ;;  %v1835_v39 = vadd.f32 1.0, %v3897_v17  ;;  %3910 = verf.f32 %v1714_v47 }
 0x321   : > { %v5524_v33 = vadd.f32 %v1552_v41, %v5293_v2  ;;  %v1554_v42 = vpop.f32.mrb[73].mxu1  ;;  %v3901_v32 = vpop.eup %3900  ;;  %v1836_v22 = vadd.f32 1.0, %v3899_v36  ;;  %2186 = vmatprep.mubr.bf16.mxu0 %v1946_v10 }
 0x322   : > { %v5528_v20 = vadd.f32 %v1554_v42, %v5297_v29  ;;  %v1556_v0 = vpop.f32.mrb[74].mxu1  ;;  %v3903_v45 = vpop.eup %3902  ;;  %v1837_v3 = vadd.f32 1.0, %v3901_v32  ;;  %2187 = vmatmul.mubr.bf16.gmra.mrb[60].mxu0 %v1945_v23  ;;  %v1899_v11 = vmul.f32 %v1835_v39, %v1643_v48 }
 0x323   : > { %v1715_v9 = vmul.f32 0.70710677, %v5524_v33  ;;  %v1558_v34 = vpop.f32.mrb[75].mxu1  ;;  %v1838_v8 = vadd.f32 1.0, %v3903_v45  ;;  %v5536_v5 = vadd.f32 %v1556_v0, %v5293_v2  ;;  %v1900_v4 = vmul.f32 %v1836_v22, %v1644_v21 }
 0x324   : > { %v1716_v40 = vmul.f32 0.70710677, %v5528_v20  ;;  %v1901_v16 = vmul.f32 %v1837_v3, %v1645_v7  ;;  %v5539_v12 = vadd.f32 %v1558_v34, %v5297_v29  ;;  %v1651_v45 = vmul.f32 0.5, %v5524_v33 }
 0x325   : > { %3912 = verf.f32 %v1715_v9  ;;  %v1902_v19 = vmul.f32 %v1838_v8, %v1646_v35  ;;  %v1717_v46 = vmul.f32 0.70710677, %v5536_v5  ;;  %v1652_v34 = vmul.f32 0.5, %v5528_v20 }
 0x326   : > { %3914 = verf.f32 %v1716_v40  ;;  %v1718_v14 = vmul.f32 0.70710677, %v5539_v12  ;;  %v1947_v37 = vpack.c.bf16 %v1901_v16, %v1899_v11  ;;  %v1653_v35 = vmul.f32 0.5, %v5536_v5 }
 0x327   : > { %v3905_v60 = vpop.eup %3904  ;;  %3916 = verf.f32 %v1717_v46  ;;  %v1948_v18 = vpack.c.bf16 %v1902_v19, %v1900_v4  ;;  %v1654_v16 = vmul.f32 0.5, %v5539_v12 }
 0x328   : > { %v3907_v59 = vpop.eup %3906  ;;  %v1562_v28 = vpop.f32.mrb[76].mxu1  ;;  %v1839_v52 = vadd.f32 1.0, %v3905_v60  ;;  %3918 = verf.f32 %v1718_v14 }
 0x329   : > { %v5544_v51 = vadd.f32 %v1562_v28, %v5293_v2  ;;  %v1564_v25 = vpop.f32.mrb[77].mxu1  ;;  %v3909_v26 = vpop.eup %3908  ;;  %v1840_v55 = vadd.f32 1.0, %v3907_v59  ;;  %2194 = vmatprep.mubr.bf16.mxu0 %v1948_v18 }
 0x32a   : > { %v5548_v50 = vadd.f32 %v1564_v25, %v5297_v29  ;;  %v1566_v43 = vpop.f32.mrb[78].mxu1  ;;  %v3911_v61 = vpop.eup %3910  ;;  %v1841_v49 = vadd.f32 1.0, %v3909_v26  ;;  %2195 = vmatmul.mubr.bf16.gmra.mrb[64].mxu0 %v1947_v37  ;;  %v1903_v58 = vmul.f32 %v1839_v52, %v1647_v24 }
 0x32b   : > { %v1719_v1 = vmul.f32 0.70710677, %v5544_v51  ;;  %v1568_v53 = vpop.f32.mrb[79].mxu1  ;;  %v1842_v38 = vadd.f32 1.0, %v3911_v61  ;;  %v5556_v62 = vadd.f32 %v1566_v43, %v5293_v2  ;;  %v1904_v56 = vmul.f32 %v1840_v55, %v1648_v30 }
 0x32c   : > { %v1720_v31 = vmul.f32 0.70710677, %v5548_v50  ;;  %v1905_v17 = vmul.f32 %v1841_v49, %v1649_v6  ;;  %v5559_v15 = vadd.f32 %v1568_v53, %v5297_v29  ;;  %v1655_v61 = vmul.f32 0.5, %v5544_v51 }
 0x32d   : > { %3920 = verf.f32 %v1719_v1  ;;  %v1906_v47 = vmul.f32 %v1842_v38, %v1650_v63  ;;  %v1721_v23 = vmul.f32 0.70710677, %v5556_v62  ;;  %v1656_v53 = vmul.f32 0.5, %v5548_v50 }
 0x32e   : > { %3922 = verf.f32 %v1720_v31  ;;  %v1722_v13 = vmul.f32 0.70710677, %v5559_v15  ;;  %v1949_v41 = vpack.c.bf16 %v1905_v17, %v1903_v58  ;;  %v1657_v63 = vmul.f32 0.5, %v5556_v62 }
 0x32f   : > { %v3913_v36 = vpop.eup %3912  ;;  %3924 = verf.f32 %v1721_v23  ;;  %v1950_v42 = vpack.c.bf16 %v1906_v47, %v1904_v56  ;;  %v1658_v17 = vmul.f32 0.5, %v5559_v15 }
 0x330   : > { %v3915_v10 = vpop.eup %3914  ;;  %v1572_v39 = vpop.f32.mrb[80].mxu1  ;;  %v1843_v32 = vadd.f32 1.0, %v3913_v36  ;;  %3926 = verf.f32 %v1722_v13 }
 0x331   : > { %v5564_v48 = vadd.f32 %v1572_v39, %v5293_v2  ;;  %v1574_v22 = vpop.f32.mrb[81].mxu1  ;;  %v3917_v0 = vpop.eup %3916  ;;  %v1844_v21 = vadd.f32 1.0, %v3915_v10  ;;  %2202 = vmatprep.mubr.bf16.mxu0 %v1950_v42 }
 0x332   : > { %v5568_v7 = vadd.f32 %v1574_v22, %v5297_v29  ;;  %v1576_v3 = vpop.f32.mrb[82].mxu1  ;;  %v3919_v9 = vpop.eup %3918  ;;  %v1845_v8 = vadd.f32 1.0, %v3917_v0  ;;  %2203 = vmatmul.mubr.bf16.gmra.mrb[68].mxu0 %v1949_v41  ;;  %v1907_v46 = vmul.f32 %v1843_v32, %v1651_v45 }
 0x333   : > { %v1723_v40 = vmul.f32 0.70710677, %v5564_v48  ;;  %v1578_v11 = vpop.f32.mrb[83].mxu1  ;;  %v1846_v4 = vadd.f32 1.0, %v3919_v9  ;;  %v5576_v19 = vadd.f32 %v1576_v3, %v5293_v2  ;;  %v1908_v5 = vmul.f32 %v1844_v21, %v1652_v34 }
 0x334   : > { %v1724_v33 = vmul.f32 0.70710677, %v5568_v7  ;;  %v1909_v60 = vmul.f32 %v1845_v8, %v1653_v35  ;;  %v5579_v20 = vadd.f32 %v1578_v11, %v5297_v29  ;;  %v1659_v9 = vmul.f32 0.5, %v5564_v48 }
 0x335   : > { %3928 = verf.f32 %v1723_v40  ;;  %v1910_v14 = vmul.f32 %v1846_v4, %v1654_v16  ;;  %v1725_v37 = vmul.f32 0.70710677, %v5576_v19  ;;  %v1660_v11 = vmul.f32 0.5, %v5568_v7 }
 0x336   : > { %3930 = verf.f32 %v1724_v33  ;;  %v1726_v12 = vmul.f32 0.70710677, %v5579_v20  ;;  %v1951_v28 = vpack.c.bf16 %v1909_v60, %v1907_v46  ;;  %v1661_v16 = vmul.f32 0.5, %v5576_v19 }
 0x337   : > { %v3921_v59 = vpop.eup %3920  ;;  %3932 = verf.f32 %v1725_v37  ;;  %v1952_v25 = vpack.c.bf16 %v1910_v14, %v1908_v5  ;;  %v1662_v60 = vmul.f32 0.5, %v5579_v20 }
 0x338   : > { %v3923_v18 = vpop.eup %3922  ;;  %v1582_v52 = vpop.f32.mrb[84].mxu1  ;;  %v1847_v26 = vadd.f32 1.0, %v3921_v59  ;;  %3934 = verf.f32 %v1726_v12 }
 0x339   : > { %v5584_v24 = vadd.f32 %v1582_v52, %v5293_v2  ;;  %v1584_v55 = vpop.f32.mrb[85].mxu1  ;;  %v3925_v43 = vpop.eup %3924  ;;  %v1848_v30 = vadd.f32 1.0, %v3923_v18  ;;  %2210 = vmatprep.mubr.bf16.mxu0 %v1952_v25 }
 0x33a   : > { %v5588_v6 = vadd.f32 %v1584_v55, %v5297_v29  ;;  %v1586_v49 = vpop.f32.mrb[86].mxu1  ;;  %v3927_v1 = vpop.eup %3926  ;;  %v1849_v38 = vadd.f32 1.0, %v3925_v43  ;;  %2211 = vmatmul.mubr.bf16.gmra.mrb[72].mxu0 %v1951_v28  ;;  %v1911_v23 = vmul.f32 %v1847_v26, %v1655_v61 }
 0x33b   : > { %v1727_v31 = vmul.f32 0.70710677, %v5584_v24  ;;  %v1588_v58 = vpop.f32.mrb[87].mxu1  ;;  %v1850_v56 = vadd.f32 1.0, %v3927_v1  ;;  %v5596_v47 = vadd.f32 %v1586_v49, %v5293_v2  ;;  %v1912_v62 = vmul.f32 %v1848_v30, %v1656_v53 }
 0x33c   : > { %v1728_v51 = vmul.f32 0.70710677, %v5588_v6  ;;  %v1913_v36 = vmul.f32 %v1849_v38, %v1657_v63  ;;  %v5599_v50 = vadd.f32 %v1588_v58, %v5297_v29  ;;  %v1663_v1 = vmul.f32 0.5, %v5584_v24 }
 0x33d   : > { %3936 = verf.f32 %v1727_v31  ;;  %v1914_v13 = vmul.f32 %v1850_v56, %v1658_v17  ;;  %v1729_v41 = vmul.f32 0.70710677, %v5596_v47  ;;  %v1664_v58 = vmul.f32 0.5, %v5588_v6 }
 0x33e   : > { %3938 = verf.f32 %v1728_v51  ;;  %v1730_v15 = vmul.f32 0.70710677, %v5599_v50  ;;  %v1953_v39 = vpack.c.bf16 %v1913_v36, %v1911_v23  ;;  %v1665_v17 = vmul.f32 0.5, %v5596_v47 }
 0x33f   : > { %v3929_v10 = vpop.eup %3928  ;;  %3940 = verf.f32 %v1729_v41  ;;  %v1954_v22 = vpack.c.bf16 %v1914_v13, %v1912_v62  ;;  %v1666_v36 = vmul.f32 0.5, %v5599_v50 }
 0x340   : > { %v3931_v42 = vpop.eup %3930  ;;  %v1592_v32 = vpop.f32.mrb[88].mxu1  ;;  %v1851_v0 = vadd.f32 1.0, %v3929_v10  ;;  %3942 = verf.f32 %v1730_v15 }
 0x341   : > { %v5604_v45 = vadd.f32 %v1592_v32, %v5293_v2  ;;  %v1594_v21 = vpop.f32.mrb[89].mxu1  ;;  %v3933_v3 = vpop.eup %3932  ;;  %v1852_v34 = vadd.f32 1.0, %v3931_v42  ;;  %2218 = vmatprep.mubr.bf16.mxu0 %v1954_v22 }
 0x342   : > { %v5608_v35 = vadd.f32 %v1594_v21, %v5297_v29  ;;  %v1596_v8 = vpop.f32.mrb[90].mxu1  ;;  %v3935_v40 = vpop.eup %3934  ;;  %v1853_v4 = vadd.f32 1.0, %v3933_v3  ;;  %2219 = vmatmul.mubr.bf16.gmra.mrb[76].mxu0 %v1953_v39  ;;  %v1915_v37 = vmul.f32 %v1851_v0, %v1659_v9 }
 0x343   : > { %v1731_v33 = vmul.f32 0.70710677, %v5604_v45  ;;  %v1598_v46 = vpop.f32.mrb[91].mxu1  ;;  %v1854_v5 = vadd.f32 1.0, %v3935_v40  ;;  %v1597_v14 = vadd.f32 %v1596_v8, %v5293_v2  ;;  %v1916_v7 = vmul.f32 %v1852_v34, %v1660_v11 }
 0x344   : > { %v1732_v48 = vmul.f32 0.70710677, %v5608_v35  ;;  %v1917_v59 = vmul.f32 %v1853_v4, %v1661_v16  ;;  %v1599_v12 = vadd.f32 %v1598_v46, %v5297_v29  ;;  %v1667_v34 = vmul.f32 0.5, %v5604_v45 }
 0x345   : > { %3944 = verf.f32 %v1731_v33  ;;  %v1918_v28 = vmul.f32 %v1854_v5, %v1662_v60  ;;  %v1733_v19 = vmul.f32 0.70710677, %v1597_v14  ;;  %v1669_v8 = vmul.f32 0.5, %v1597_v14 }
 0x346   : > { %3946 = verf.f32 %v1732_v48  ;;  %v1734_v52 = vmul.f32 0.70710677, %v1599_v12  ;;  %v1955_v25 = vpack.c.bf16 %v1917_v59, %v1915_v37  ;;  %v1668_v40 = vmul.f32 0.5, %v5608_v35 }
 0x347   : > { %v3937_v18 = vpop.eup %3936  ;;  %3948 = verf.f32 %v1733_v19  ;;  %v1956_v55 = vpack.c.bf16 %v1918_v28, %v1916_v7  ;;  %v1670_v11 = vmul.f32 0.5, %v1599_v12 }
 0x348   : > { %v3939_v26 = vpop.eup %3938  ;;  %v1602_v20 = vpop.f32.mrb[92].mxu1  ;;  %v1855_v43 = vadd.f32 1.0, %v3937_v18  ;;  %3950 = verf.f32 %v1734_v52 }
 0x349   : > { %v1603_v61 = vadd.f32 %v1602_v20, %v5293_v2  ;;  %v1604_v30 = vpop.f32.mrb[93].mxu1  ;;  %v3941_v49 = vpop.eup %3940  ;;  %v1856_v53 = vadd.f32 1.0, %v3939_v26  ;;  %2226 = vmatprep.mubr.bf16.mxu0 %v1956_v55 }
 0x34a   : > { %v1605_v63 = vadd.f32 %v1604_v30, %v5297_v29  ;;  %v1606_v38 = vpop.f32.mrb[94].mxu1  ;;  %v3943_v31 = vpop.eup %3942  ;;  %v1857_v56 = vadd.f32 1.0, %v3941_v49  ;;  %2227 = vmatmul.mubr.bf16.gmra.mrb[80].mxu0 %v1955_v25  ;;  %v1919_v41 = vmul.f32 %v1855_v43, %v1663_v1 }
 0x34b   : > { %v1735_v51 = vmul.f32 0.70710677, %v1603_v61  ;;  %v1608_v23 = vpop.f32.mrb[95].mxu1  ;;  %v1858_v62 = vadd.f32 1.0, %v3943_v31  ;;  %v1607_v24 = vadd.f32 %v1606_v38, %v5293_v2  ;;  %v1920_v39 = vmul.f32 %v1856_v53, %v1664_v58  ;;  %v2328_v1 = vpop.xlane.xlu1 %2327 }
 0x34c   : > { %v1736_v13 = vmul.f32 0.70710677, %v1605_v63  ;;  %v1921_v10 = vmul.f32 %v1857_v56, %v1665_v17  ;;  %v1609_v15 = vadd.f32 %v1608_v23, %v5297_v29  ;;  %v1671_v14 = vmul.f32 0.5, %v1603_v61  ;;  %v2324_v38 = vpop.xlane.xlu0 %2323 }
 0x34d   : > { %3952 = verf.f32 %v1735_v51  ;;  %v1922_v42 = vmul.f32 %v1858_v62, %v1666_v36  ;;  %v1737_v6 = vmul.f32 0.70710677, %v1607_v24  ;;  %v1673_v18 = vmul.f32 0.5, %v1607_v24  ;;  %v4056_v24 = vld [vmem:[%s4853_s10 + $0x10] sm:$0xff] }
 0x34e   : > { %3954 = verf.f32 %v1736_v13  ;;  %v1738_v32 = vmul.f32 0.70710677, %v1609_v15  ;;  %v1957_v22 = vpack.c.bf16 %v1921_v10, %v1919_v41  ;;  %v1672_v35 = vmul.f32 0.5, %v1605_v63 }
 0x34f   : > { %v3945_v47 = vpop.eup %3944  ;;  %3956 = verf.f32 %v1737_v6  ;;  %v1958_v21 = vpack.c.bf16 %v1922_v42, %v1920_v39  ;;  %v1674_v12 = vmul.f32 0.5, %v1609_v15  ;;  %v2389_v53 = vmax.f32 %v2328_v1, 1e-24  ;;  %v2330_v61 = vpop.xlane.xlu1 %2329 }
 0x350   : > { %v3947_v0 = vpop.eup %3946  ;;  %v1859_v50 = vadd.f32 1.0, %v3945_v47  ;;  %3958 = verf.f32 %v1738_v32  ;;  %v2387_v31 = vmax.f32 %v2324_v38, 1e-24  ;;  %v2390_v58 = vmax.f32 %v2330_v61, 1e-24  ;;  %v4057_v47 = vld [vmem:[%s4853_s10] sm:$0xff] }
 0x351   : > { %v3949_v3 = vpop.eup %3948  ;;  %v1860_v9 = vadd.f32 1.0, %v3947_v0  ;;  %2234 = vmatprep.mubr.bf16.mxu0 %v1958_v21  ;;  %3960 = vrsqrt.f32 %v2389_v53  ;;  %v4064_v38 = vld [vmem:[%s4853_s10 + $0x48] sm:$0xff]  ;;  %v4065_v61 = vld [vmem:[%s4853_s10 + $0x40] sm:$0xff] }
 0x352   : > { %v3951_v2 = vpop.eup %3950  ;;  %v1861_v29 = vadd.f32 1.0, %v3949_v3  ;;  %2235 = vmatmul.mubr.bf16.gmra.mrb[84].mxu0 %v1957_v22  ;;  %v1923_v4 = vmul.f32 %v1859_v50, %v1667_v34  ;;  %3962 = vrsqrt.f32 %v2387_v31  ;;  %v4058_v22 = vld [vmem:[%s4853_s10 + $0x18] sm:$0xff]  ;;  %v4059_v3 = vld [vmem:[%s4853_s10 + $0x8] sm:$0xff] }
 0x353   : > { %v1862_v16 = vadd.f32 1.0, %v3951_v2  ;;  %v1924_v46 = vmul.f32 %v1860_v9, %v1668_v40  ;;  %3964 = vrsqrt.f32 %v2390_v58 }
 0x354   : > { %v1925_v33 = vmul.f32 %v1861_v29, %v1669_v8 }
 0x355   : > { %v1926_v60 = vmul.f32 %v1862_v16, %v1670_v11 }
 0x356   : > { %v1959_v48 = vpack.c.bf16 %v1925_v33, %v1923_v4 }
 0x357   : > { %v3953_v5 = vpop.eup %3952  ;;  %v1960_v59 = vpack.c.bf16 %v1926_v60, %v1924_v46 }
 0x358   : > { %v3955_v37 = vpop.eup %3954  ;;  %v1863_v7 = vadd.f32 1.0, %v3953_v5  ;;  %v4060_v5 = vld [vmem:[%s4853_s10 + $0x28] sm:$0xff] }
 0x359   : > { %v3957_v28 = vpop.eup %3956  ;;  %v1864_v19 = vadd.f32 1.0, %v3955_v37  ;;  %2242 = vmatprep.mubr.bf16.mxu0 %v1960_v59  ;;  %v4061_v37 = vld [vmem:[%s4853_s10 + $0x20] sm:$0xff] }
 0x35a   : > { %v3959_v45 = vpop.eup %3958  ;;  %v1865_v52 = vadd.f32 1.0, %v3957_v28  ;;  %2243 = vmatmul.mubr.bf16.gmra.mrb[88].mxu0 %v1959_v48  ;;  %v1927_v26 = vmul.f32 %v1863_v7, %v1671_v14 }
 0x35b   : > { %v1866_v25 = vadd.f32 1.0, %v3959_v45  ;;  %v1928_v55 = vmul.f32 %v1864_v19, %v1672_v35  ;;  %v3961_v23 = vpop.eup %3960  ;;  %v4062_v35 = vld [vmem:[%s4853_s10 + $0x38] sm:$0xff] }
 0x35c   : > { %v1929_v20 = vmul.f32 %v1865_v52, %v1673_v18  ;;  %v3963_v13 = vpop.eup %3962  ;;  %v2453_v41 = vmul.f32 %v4056_v24, %v3961_v23 }
 0x35d   : > { %v1930_v43 = vmul.f32 %v1866_v25, %v1674_v12  ;;  %v3965_v39 = vpop.eup %3964  ;;  %v2451_v32 = vmul.f32 %v4057_v47, %v3963_v13  ;;  %v4063_v25 = vld [vmem:[%s4853_s10 + $0x30] sm:$0xff]  ;;  %v4066_v13 = vld [vmem:[%s4853_s10 + $0x58] sm:$0xff] }
 0x35e   : > { %v1961_v30 = vpack.c.bf16 %v1929_v20, %v1927_v26  ;;  %v2454_v0 = vmul.f32 %v4058_v22, %v3965_v39 }
 0x35f   : > { %v1962_v49 = vpack.c.bf16 %v1930_v43, %v1928_v55 }
 0x360   : > { %v2484_v50 = vpack.c.bf16 %v2454_v0, %v2453_v41  ;;  %v4067_v41 = vld [vmem:[%s4853_s10 + $0x50] sm:$0xff]  ;;  %v4068_v0 = vld [vmem:[%s4853_s10 + $0x68] sm:$0xff] }
 0x361   : > { %2250 = vmatprep.mubr.bf16.mxu0 %v1962_v49 }
 0x362   : > { %2251 = vmatmul.mubr.bf16.gmra.mrb[92].mxu0 %v1961_v30  ;;  %v2326_v63 = vpop.xlane.xlu0 %2325  ;;  %2500 = vst [vmem:[#allocation2 + $0x8] sm:$0xff] %v2484_v50  ;;  %v4069_v50 = vld [vmem:[%s4853_s10 + $0x60] sm:$0xff] }
 0x363   : > { %v2388_v17 = vmax.f32 %v2326_v63, 1e-24  ;;  %v2334_v56 = vpop.xlane.xlu1 %2333 }
 0x364   : > { %v2392_v36 = vmax.f32 %v2334_v56, 1e-24 }
 0x365   : > { %3966 = vrsqrt.f32 %v2388_v17 }
 0x366   : > { %3968 = vrsqrt.f32 %v2392_v36 }
 0x36d   : > { %v2332_v51 = vpop.xlane.xlu0 %2331 }
 0x36e   : > { %v2391_v62 = vmax.f32 %v2332_v51, 1e-24 }
 0x36f   : > { %v3967_v21 = vpop.eup %3966 }
 0x370   : > { %3970 = vrsqrt.f32 %v2391_v62  ;;  %v2338_v10 = vpop.xlane.xlu1 %2337  ;;  %v2452_v9 = vmul.f32 %v4059_v3, %v3967_v21  ;;  %v3969_v4 = vpop.eup %3968 }
 0x371   : > { %v2336_v15 = vpop.xlane.xlu0 %2335  ;;  %v2394_v42 = vmax.f32 %v2338_v10, 1e-24  ;;  %v2456_v48 = vmul.f32 %v4060_v5, %v3969_v4 }
 0x372   : > { %v2393_v6 = vmax.f32 %v2336_v15, 1e-24  ;;  %v2483_v40 = vpack.c.bf16 %v2452_v9, %v2451_v32 }
 0x373   : > { %3972 = vrsqrt.f32 %v2394_v42 }
 0x374   : > { %3974 = vrsqrt.f32 %v2393_v6  ;;  %v2342_v2 = vpop.xlane.xlu1 %2341  ;;  %2499 = vst [vmem:[#allocation2] sm:$0xff] %v2483_v40 }
 0x375   : > { %v2396_v8 = vmax.f32 %v2342_v2, 1e-24 }
 0x376   : > { %v2340_v34 = vpop.xlane.xlu0 %2339 }
 0x377   : > { %v2395_v29 = vmax.f32 %v2340_v34, 1e-24  ;;  %3976 = vrsqrt.f32 %v2396_v8 }
 0x378   : > { %v2346_v11 = vpop.xlane.xlu1 %2345 }
 0x379   : > { %3978 = vrsqrt.f32 %v2395_v29  ;;  %v2398_v33 = vmax.f32 %v2346_v11, 1e-24 }
 0x37a   : > { %v2344_v16 = vpop.xlane.xlu0 %2343  ;;  %v3971_v60 = vpop.eup %3970 }
 0x37b   : > { %v2397_v46 = vmax.f32 %v2344_v16, 1e-24  ;;  %v2455_v59 = vmul.f32 %v4061_v37, %v3971_v60  ;;  %3980 = vrsqrt.f32 %v2398_v33  ;;  %v4070_v16 = vld [vmem:[%s4853_s10 + $0x78] sm:$0xff]  ;;  %v4071_v33 = vld [vmem:[%s4853_s10 + $0x70] sm:$0xff] }
 0x37c   : > { %v2350_v7 = vpop.xlane.xlu1 %2349 }
 0x37d   : > { %3982 = vrsqrt.f32 %v2397_v46  ;;  %v3973_v19 = vpop.eup %3972  ;;  %v2485_v45 = vpack.c.bf16 %v2456_v48, %v2455_v59  ;;  %v2400_v14 = vmax.f32 %v2350_v7, 1e-24 }
 0x37e   : > { %v3975_v52 = vpop.eup %3974  ;;  %v2458_v12 = vmul.f32 %v4062_v35, %v3973_v19  ;;  %v4072_v19 = vld [vmem:[%s4853_s10 + $0x88] sm:$0xff] }
 0x37f   : > { %v2348_v28 = vpop.xlane.xlu0 %2347  ;;  %2501 = vst [vmem:[#allocation2 + $0x10] sm:$0xff] %v2485_v45  ;;  %v2457_v26 = vmul.f32 %v4063_v25, %v3975_v52  ;;  %3984 = vrsqrt.f32 %v2400_v14  ;;  %v4073_v14 = vld [vmem:[%s4853_s10 + $0x80] sm:$0xff] }
 0x380   : > { %v2399_v18 = vmax.f32 %v2348_v28, 1e-24  ;;  %v2354_v20 = vpop.xlane.xlu1 %2353 }
 0x381   : > { %v3977_v43 = vpop.eup %3976  ;;  %v2486_v30 = vpack.c.bf16 %v2458_v12, %v2457_v26  ;;  %v2402_v49 = vmax.f32 %v2354_v20, 1e-24 }
 0x382   : > { %3986 = vrsqrt.f32 %v2399_v18  ;;  %v2460_v31 = vmul.f32 %v4064_v38, %v3977_v43  ;;  %v4074_v43 = vld [vmem:[%s4853_s10 + $0x98] sm:$0xff] }
 0x383   : > { %v2352_v55 = vpop.xlane.xlu0 %2351  ;;  %v3979_v53 = vpop.eup %3978  ;;  %2502 = vst [vmem:[#allocation2 + $0x18] sm:$0xff] %v2486_v30  ;;  %3988 = vrsqrt.f32 %v2402_v49  ;;  %v4075_v49 = vld [vmem:[%s4853_s10 + $0x90] sm:$0xff] }
 0x384   : > { %v2401_v1 = vmax.f32 %v2352_v55, 1e-24  ;;  %v2459_v58 = vmul.f32 %v4065_v61, %v3979_v53  ;;  %v2358_v63 = vpop.xlane.xlu1 %2357 }
 0x385   : > { %v3981_v56 = vpop.eup %3980  ;;  %v2404_v23 = vmax.f32 %v2358_v63, 1e-24 }
 0x386   : > { %3990 = vrsqrt.f32 %v2401_v1  ;;  %v2487_v51 = vpack.c.bf16 %v2460_v31, %v2459_v58  ;;  %v2462_v24 = vmul.f32 %v4066_v13, %v3981_v56  ;;  %v4076_v56 = vld [vmem:[%s4853_s10 + $0xa8] sm:$0xff] }
 0x387   : > { %v2356_v17 = vpop.xlane.xlu0 %2355  ;;  %v3983_v62 = vpop.eup %3982  ;;  %3992 = vrsqrt.f32 %v2404_v23  ;;  %v4077_v23 = vld [vmem:[%s4853_s10 + $0xa0] sm:$0xff] }
 0x388   : > { %v2403_v36 = vmax.f32 %v2356_v17, 1e-24  ;;  %2503 = vst [vmem:[#allocation2 + $0x20] sm:$0xff] %v2487_v51  ;;  %v2461_v10 = vmul.f32 %v4067_v41, %v3983_v62  ;;  %v2362_v15 = vpop.xlane.xlu1 %2361 }
 0x389   : > { %v3985_v42 = vpop.eup %3984  ;;  %v2406_v47 = vmax.f32 %v2362_v15, 1e-24 }
 0x38a   : > { %3994 = vrsqrt.f32 %v2403_v36  ;;  %v2488_v6 = vpack.c.bf16 %v2462_v24, %v2461_v10  ;;  %v2464_v21 = vmul.f32 %v4068_v0, %v3985_v42  ;;  %v4078_v42 = vld [vmem:[%s4853_s10 + $0xb8] sm:$0xff] }
 0x38b   : > { %v2360_v39 = vpop.xlane.xlu0 %2359  ;;  %3996 = vrsqrt.f32 %v2406_v47  ;;  %v4079_v47 = vld [vmem:[%s4853_s10 + $0xb0] sm:$0xff] }
 0x38c   : > { %v2405_v32 = vmax.f32 %v2360_v39, 1e-24  ;;  %v3987_v22 = vpop.eup %3986  ;;  %2504 = vst [vmem:[#allocation2 + $0x28] sm:$0xff] %v2488_v6  ;;  %v2366_v9 = vpop.xlane.xlu1 %2365 }
 0x38d   : > { %v2463_v3 = vmul.f32 %v4069_v50, %v3987_v22  ;;  %v3989_v34 = vpop.eup %3988  ;;  %v2408_v29 = vmax.f32 %v2366_v9, 1e-24 }
 0x38e   : > { %3998 = vrsqrt.f32 %v2405_v32  ;;  %v2466_v4 = vmul.f32 %v4070_v16, %v3989_v34  ;;  %v4080_v34 = vld [vmem:[%s4853_s10 + $0xc8] sm:$0xff] }
 0x38f   : > { %v2364_v2 = vpop.xlane.xlu0 %2363  ;;  %v2489_v8 = vpack.c.bf16 %v2464_v21, %v2463_v3  ;;  %4000 = vrsqrt.f32 %v2408_v29  ;;  %v4081_v29 = vld [vmem:[%s4853_s10 + $0xc0] sm:$0xff] }
 0x390   : > { %v2407_v40 = vmax.f32 %v2364_v2, 1e-24  ;;  %v3991_v11 = vpop.eup %3990  ;;  %v2370_v60 = vpop.xlane.xlu1 %2369 }
 0x391   : > { %2505 = vst [vmem:[#allocation2 + $0x30] sm:$0xff] %v2489_v8  ;;  %v2465_v46 = vmul.f32 %v4071_v33, %v3991_v11  ;;  %v3993_v48 = vpop.eup %3992  ;;  %v2410_v59 = vmax.f32 %v2370_v60, 1e-24  ;;  %v4082_v33 = vld [vmem:[%s4853_s10 + $0xd8] sm:$0xff]  ;;  %v4083_v60 = vld [vmem:[%s4853_s10 + $0xd0] sm:$0xff] }
 0x392   : > { %4002 = vrsqrt.f32 %v2407_v40  ;;  %v2468_v45 = vmul.f32 %v4072_v19, %v3993_v48 }
 0x393   : > { %v2368_v5 = vpop.xlane.xlu0 %2367  ;;  %v2490_v37 = vpack.c.bf16 %v2466_v4, %v2465_v46  ;;  %4004 = vrsqrt.f32 %v2410_v59 }
 0x394   : > { %v2409_v7 = vmax.f32 %v2368_v5, 1e-24  ;;  %v3995_v28 = vpop.eup %3994  ;;  %v2374_v52 = vpop.xlane.xlu1 %2373 }
 0x395   : > { %2506 = vst [vmem:[#allocation2 + $0x38] sm:$0xff] %v2490_v37  ;;  %v2467_v18 = vmul.f32 %v4073_v14, %v3995_v28  ;;  %v3997_v12 = vpop.eup %3996  ;;  %v2412_v26 = vmax.f32 %v2374_v52, 1e-24  ;;  %v5660_v14 = vld [vmem:[%s6147_s1] ss:$0 sm:$0xff] }
 0x396   : > { %4006 = vrsqrt.f32 %v2409_v7  ;;  %v2470_v30 = vmul.f32 %v4074_v43, %v3997_v12 }
 0x397   : > { %v2372_v35 = vpop.xlane.xlu0 %2371  ;;  %v2491_v25 = vpack.c.bf16 %v2468_v45, %v2467_v18  ;;  %4008 = vrsqrt.f32 %v2412_v26 }
 0x398   : > { %v2411_v20 = vmax.f32 %v2372_v35, 1e-24  ;;  %v3999_v55 = vpop.eup %3998  ;;  %v2378_v53 = vpop.xlane.xlu1 %2377 }
 0x399   : > { %2507 = vst [vmem:[#allocation2 + $0x40] sm:$0xff] %v2491_v25  ;;  %v2469_v1 = vmul.f32 %v4075_v49, %v3999_v55  ;;  %v4001_v31 = vpop.eup %4000  ;;  %v2414_v58 = vmax.f32 %v2378_v53, 1e-24 }
 0x39a   : > { %4010 = vrsqrt.f32 %v2411_v20  ;;  %v2472_v51 = vmul.f32 %v4076_v56, %v4001_v31 }
 0x39b   : > { %v2376_v38 = vpop.xlane.xlu0 %2375  ;;  %v2492_v61 = vpack.c.bf16 %v2470_v30, %v2469_v1  ;;  %4012 = vrsqrt.f32 %v2414_v58 }
 0x39c   : > { %v2413_v63 = vmax.f32 %v2376_v38, 1e-24  ;;  %v4003_v17 = vpop.eup %4002  ;;  %v2382_v62 = vpop.xlane.xlu1 %2381 }
 0x39d   : > { %2508 = vst [vmem:[#allocation2 + $0x48] sm:$0xff] %v2492_v61  ;;  %v2471_v36 = vmul.f32 %v4077_v23, %v4003_v17  ;;  %v4005_v24 = vpop.eup %4004  ;;  %v2416_v10 = vmax.f32 %v2382_v62, 1e-24 }
 0x39e   : > { %4014 = vrsqrt.f32 %v2413_v63  ;;  %v2474_v6 = vmul.f32 %v4078_v42, %v4005_v24 }
 0x39f   : > { %v2380_v13 = vpop.xlane.xlu0 %2379  ;;  %v2493_v41 = vpack.c.bf16 %v2472_v51, %v2471_v36  ;;  %4016 = vrsqrt.f32 %v2416_v10 }
 0x3a0   : > { %v2415_v15 = vmax.f32 %v2380_v13, 1e-24  ;;  %v4007_v39 = vpop.eup %4006  ;;  %v2386_v22 = vpop.xlane.xlu1 %2385 }
 0x3a1   : > { %2509 = vst [vmem:[#allocation2 + $0x50] sm:$0xff] %v2493_v41  ;;  %v2473_v32 = vmul.f32 %v4079_v47, %v4007_v39  ;;  %v4009_v21 = vpop.eup %4008  ;;  %v2418_v3 = vmax.f32 %v2386_v22, 1e-24 }
 0x3a2   : > { %4018 = vrsqrt.f32 %v2415_v15  ;;  %v2476_v8 = vmul.f32 %v4080_v34, %v4009_v21 }
 0x3a3   : > { %v2384_v0 = vpop.xlane.xlu0 %2383  ;;  %v2494_v50 = vpack.c.bf16 %v2474_v6, %v2473_v32  ;;  %4020 = vrsqrt.f32 %v2418_v3 }
 0x3a4   : > { %v2417_v9 = vmax.f32 %v2384_v0, 1e-24  ;;  %v4011_v2 = vpop.eup %4010 }
 0x3a5   : > { %2510 = vst [vmem:[#allocation2 + $0x58] sm:$0xff] %v2494_v50  ;;  %v2475_v40 = vmul.f32 %v4081_v29, %v4011_v2  ;;  %v4013_v11 = vpop.eup %4012 }
 0x3a6   : > { %4022 = vrsqrt.f32 %v2417_v9  ;;  %v2478_v46 = vmul.f32 %v4082_v33, %v4013_v11 }
 0x3a7   : > { %v2495_v16 = vpack.c.bf16 %v2476_v8, %v2475_v40 }
 0x3a8   : > { %v4015_v4 = vpop.eup %4014 }
 0x3a9   : > { %2511 = vst [vmem:[#allocation2 + $0x60] sm:$0xff] %v2495_v16  ;;  %v2477_v5 = vmul.f32 %v4083_v60, %v4015_v4  ;;  %v4017_v48 = vpop.eup %4016 }
 0x3aa   : > { %v2480_v7 = vmul.f32 %v5471_v27, %v4017_v48 }
 0x3ab   : > { %v2496_v37 = vpack.c.bf16 %v2478_v46, %v2477_v5 }
 0x3ac   : > { %v4019_v59 = vpop.eup %4018 }
 0x3ad   : > { %2512 = vst [vmem:[#allocation2 + $0x68] sm:$0xff] %v2496_v37  ;;  %v2479_v28 = vmul.f32 %v5489_v57, %v4019_v59  ;;  %v4021_v45 = vpop.eup %4020 }
 0x3ae   : > { %v2482_v26 = vmul.f32 %v5497_v54, %v4021_v45 }
 0x3af   : > { %v2497_v52 = vpack.c.bf16 %v2480_v7, %v2479_v28 }
 0x3b0   : > { %v4023_v35 = vpop.eup %4022 }
 0x3b1   : > { %2513 = vst [vmem:[#allocation2 + $0x70] sm:$0xff] %v2497_v52  ;;  %v2481_v57 = vmul.f32 %v5506_v44, %v4023_v35 }
 0x3b3   : > { %v2498_v43 = vpack.c.bf16 %v2482_v26, %v2481_v57 }
 0x3b5   : > { %2514 = vst [vmem:[#allocation2 + $0x78] sm:$0xff] %v2498_v43 }
 0x3bc   : > { %v3309_v19 = vpop.f32.mrb[32].mxu0 }
 0x3bd   : > { %v3310_v18 = vpop.f32.mrb[33].mxu0 }
 0x3be   : > { %v3311_v12 = vadd.f32 %v3310_v18, %v3309_v19  ;;  %v3312_v25 = vpop.f32.mrb[34].mxu0 }
 0x3bf   : > { %v3313_v27 = vpop.f32.mrb[35].mxu0 }
 0x3c0   : > { %v2133_v20 = vadd.f32 %v3311_v12, %v5660_v14  ;;  %v3314_v55 = vadd.f32 %v3313_v27, %v3312_v25 }
 0x3c2   : > { %2259 = vst [vmem:[%s4888_s9] sm:$0xff] %v2133_v20  ;;  %v2136_v30 = vadd.f32 %v3314_v55, %v5660_v14 }
 0x3c4   : > { %2260 = vst [vmem:[%s4888_s9 + $0x8] sm:$0xff] %v2136_v30 }
 0x3c5   : > { %v3315_v49 = vpop.f32.mrb[36].mxu0 }
 0x3c6   : > { %v3316_v1 = vpop.f32.mrb[37].mxu0 }
 0x3c7   : > { %v3317_v53 = vadd.f32 %v3316_v1, %v3315_v49  ;;  %v3318_v54 = vpop.f32.mrb[38].mxu0 }
 0x3c8   : > { %v3319_v38 = vpop.f32.mrb[39].mxu0 }
 0x3c9   : > { %v2141_v31 = vadd.f32 %v3317_v53, %v5660_v14  ;;  %v3320_v44 = vadd.f32 %v3319_v38, %v3318_v54 }
 0x3cb   : > { %2261 = vst [vmem:[%s4888_s9 + $0x10] sm:$0xff] %v2141_v31  ;;  %v2144_v61 = vadd.f32 %v3320_v44, %v5660_v14 }
 0x3cd   : > { %2262 = vst [vmem:[%s4888_s9 + $0x18] sm:$0xff] %v2144_v61  ;;  %v3321_v58 = vpop.f32.mrb[40].mxu0 }
 0x3ce   : > { %v3322_v63 = vpop.f32.mrb[41].mxu0 }
 0x3cf   : > { %v3323_v17 = vadd.f32 %v3322_v63, %v3321_v58  ;;  %v3324_v56 = vpop.f32.mrb[42].mxu0 }
 0x3d0   : > { %v3325_v51 = vpop.f32.mrb[43].mxu0 }
 0x3d1   : > { %v2149_v23 = vadd.f32 %v3323_v17, %v5660_v14  ;;  %v3326_v36 = vadd.f32 %v3325_v51, %v3324_v56 }
 0x3d3   : > { %2263 = vst [vmem:[%s4888_s9 + $0x20] sm:$0xff] %v2149_v23  ;;  %v2152_v62 = vadd.f32 %v3326_v36, %v5660_v14 }
 0x3d5   : > { %2264 = vst [vmem:[%s4888_s9 + $0x28] sm:$0xff] %v2152_v62  ;;  %v3327_v13 = vpop.f32.mrb[44].mxu0 }
 0x3d6   : > { %v3328_v24 = vpop.f32.mrb[45].mxu0 }
 0x3d7   : > { %v3329_v41 = vadd.f32 %v3328_v24, %v3327_v13  ;;  %v3330_v10 = vpop.f32.mrb[46].mxu0 }
 0x3d8   : > { %v3331_v15 = vpop.f32.mrb[47].mxu0 }
 0x3d9   : > { %v2157_v39 = vadd.f32 %v3329_v41, %v5660_v14  ;;  %v3332_v42 = vadd.f32 %v3331_v15, %v3330_v10 }
 0x3db   : > { %2265 = vst [vmem:[%s4888_s9 + $0x30] sm:$0xff] %v2157_v39  ;;  %v2160_v6 = vadd.f32 %v3332_v42, %v5660_v14 }
 0x3dd   : > { %2266 = vst [vmem:[%s4888_s9 + $0x38] sm:$0xff] %v2160_v6  ;;  %v3333_v47 = vpop.f32.mrb[48].mxu0 }
 0x3de   : > { %v3334_v32 = vpop.f32.mrb[49].mxu0 }
 0x3df   : > { %v3335_v22 = vadd.f32 %v3334_v32, %v3333_v47  ;;  %v3336_v0 = vpop.f32.mrb[50].mxu0 }
 0x3e0   : > { %v3337_v21 = vpop.f32.mrb[51].mxu0 }
 0x3e1   : > { %v2165_v50 = vadd.f32 %v3335_v22, %v5660_v14  ;;  %v3338_v3 = vadd.f32 %v3337_v21, %v3336_v0 }
 0x3e3   : > { %2267 = vst [vmem:[%s4888_s9 + $0x40] sm:$0xff] %v2165_v50  ;;  %v2168_v9 = vadd.f32 %v3338_v3, %v5660_v14 }
 0x3e5   : > { %2268 = vst [vmem:[%s4888_s9 + $0x48] sm:$0xff] %v2168_v9  ;;  %v3339_v2 = vpop.f32.mrb[52].mxu0 }
 0x3e6   : > { %v3340_v34 = vpop.f32.mrb[53].mxu0 }
 0x3e7   : > { %v3341_v8 = vadd.f32 %v3340_v34, %v3339_v2  ;;  %v3342_v29 = vpop.f32.mrb[54].mxu0 }
 0x3e8   : > { %v3343_v40 = vpop.f32.mrb[55].mxu0 }
 0x3e9   : > { %v2173_v11 = vadd.f32 %v3341_v8, %v5660_v14  ;;  %v3344_v16 = vadd.f32 %v3343_v40, %v3342_v29 }
 0x3eb   : > { %2269 = vst [vmem:[%s4888_s9 + $0x50] sm:$0xff] %v2173_v11  ;;  %v2176_v4 = vadd.f32 %v3344_v16, %v5660_v14 }
 0x3ed   : > { %2270 = vst [vmem:[%s4888_s9 + $0x58] sm:$0xff] %v2176_v4  ;;  %v3345_v33 = vpop.f32.mrb[56].mxu0 }
 0x3ee   : > { %v3346_v46 = vpop.f32.mrb[57].mxu0 }
 0x3ef   : > { %v3347_v60 = vadd.f32 %v3346_v46, %v3345_v33  ;;  %v3348_v5 = vpop.f32.mrb[58].mxu0 }
 0x3f0   : > { %v3349_v48 = vpop.f32.mrb[59].mxu0 }
 0x3f1   : > { %v2181_v37 = vadd.f32 %v3347_v60, %v5660_v14  ;;  %v3350_v59 = vadd.f32 %v3349_v48, %v3348_v5 }
 0x3f3   : > { %2271 = vst [vmem:[%s4888_s9 + $0x60] sm:$0xff] %v2181_v37  ;;  %v2184_v7 = vadd.f32 %v3350_v59, %v5660_v14 }
 0x3f5   : > { %2272 = vst [vmem:[%s4888_s9 + $0x68] sm:$0xff] %v2184_v7  ;;  %v3351_v28 = vpop.f32.mrb[60].mxu0 }
 0x3f6   : > { %v3352_v19 = vpop.f32.mrb[61].mxu0 }
 0x3f7   : > { %v3353_v45 = vadd.f32 %v3352_v19, %v3351_v28  ;;  %v3354_v18 = vpop.f32.mrb[62].mxu0 }
 0x3f8   : > { %v3355_v52 = vpop.f32.mrb[63].mxu0 }
 0x3f9   : > { %v2189_v35 = vadd.f32 %v3353_v45, %v5660_v14  ;;  %v3356_v12 = vadd.f32 %v3355_v52, %v3354_v18 }
 0x3fb   : > { %2273 = vst [vmem:[%s4888_s9 + $0x70] sm:$0xff] %v2189_v35  ;;  %v2192_v25 = vadd.f32 %v3356_v12, %v5660_v14 }
 0x3fd   : > { %2274 = vst [vmem:[%s4888_s9 + $0x78] sm:$0xff] %v2192_v25  ;;  %v3357_v26 = vpop.f32.mrb[64].mxu0 }
 0x3fe   : > { %v3358_v27 = vpop.f32.mrb[65].mxu0 }
 0x3ff   : > { %v3359_v57 = vadd.f32 %v3358_v27, %v3357_v26  ;;  %v3360_v20 = vpop.f32.mrb[66].mxu0 }
 0x400   : > { %v3361_v55 = vpop.f32.mrb[67].mxu0 }
 0x401   : > { %v2197_v43 = vadd.f32 %v3359_v57, %v5660_v14  ;;  %v3362_v30 = vadd.f32 %v3361_v55, %v3360_v20 }
 0x403   : > { %2275 = vst [vmem:[%s4888_s9 + $0x80] sm:$0xff] %v2197_v43  ;;  %v2200_v49 = vadd.f32 %v3362_v30, %v5660_v14 }
 0x405   : > { %2276 = vst [vmem:[%s4888_s9 + $0x88] sm:$0xff] %v2200_v49  ;;  %v3363_v1 = vpop.f32.mrb[68].mxu0 }
 0x406   : > { %v3364_v53 = vpop.f32.mrb[69].mxu0 }
 0x407   : > { %v3365_v54 = vadd.f32 %v3364_v53, %v3363_v1  ;;  %v3366_v38 = vpop.f32.mrb[70].mxu0 }
 0x408   : > { %v3367_v31 = vpop.f32.mrb[71].mxu0 }
 0x409   : > { %v2205_v44 = vadd.f32 %v3365_v54, %v5660_v14  ;;  %v3368_v61 = vadd.f32 %v3367_v31, %v3366_v38 }
 0x40b   : > { %2277 = vst [vmem:[%s4888_s9 + $0x90] sm:$0xff] %v2205_v44  ;;  %v2208_v58 = vadd.f32 %v3368_v61, %v5660_v14 }
 0x40d   : > { %2278 = vst [vmem:[%s4888_s9 + $0x98] sm:$0xff] %v2208_v58  ;;  %v3369_v63 = vpop.f32.mrb[72].mxu0 }
 0x40e   : > { %v3370_v17 = vpop.f32.mrb[73].mxu0 }
 0x40f   : > { %v3371_v56 = vadd.f32 %v3370_v17, %v3369_v63  ;;  %v3372_v51 = vpop.f32.mrb[74].mxu0 }
 0x410   : > { %v3373_v23 = vpop.f32.mrb[75].mxu0 }
 0x411   : > { %v2213_v36 = vadd.f32 %v3371_v56, %v5660_v14  ;;  %v3374_v62 = vadd.f32 %v3373_v23, %v3372_v51 }
 0x413   : > { %2279 = vst [vmem:[%s4888_s9 + $0xa0] sm:$0xff] %v2213_v36  ;;  %v2216_v13 = vadd.f32 %v3374_v62, %v5660_v14 }
 0x415   : > { %2280 = vst [vmem:[%s4888_s9 + $0xa8] sm:$0xff] %v2216_v13  ;;  %v3375_v24 = vpop.f32.mrb[76].mxu0 }
 0x416   : > { %v3376_v41 = vpop.f32.mrb[77].mxu0 }
 0x417   : > { %v3377_v10 = vadd.f32 %v3376_v41, %v3375_v24  ;;  %v3378_v15 = vpop.f32.mrb[78].mxu0 }
 0x418   : > { %v3379_v39 = vpop.f32.mrb[79].mxu0 }
 0x419   : > { %v2221_v42 = vadd.f32 %v3377_v10, %v5660_v14  ;;  %v3380_v6 = vadd.f32 %v3379_v39, %v3378_v15 }
 0x41b   : > { %2281 = vst [vmem:[%s4888_s9 + $0xb0] sm:$0xff] %v2221_v42  ;;  %v2224_v47 = vadd.f32 %v3380_v6, %v5660_v14 }
 0x41d   : > { %2282 = vst [vmem:[%s4888_s9 + $0xb8] sm:$0xff] %v2224_v47  ;;  %v3381_v32 = vpop.f32.mrb[80].mxu0 }
 0x41e   : > { %v3382_v22 = vpop.f32.mrb[81].mxu0 }
 0x41f   : > { %v3383_v0 = vadd.f32 %v3382_v22, %v3381_v32  ;;  %v3384_v21 = vpop.f32.mrb[82].mxu0 }
 0x420   : > { %v3385_v50 = vpop.f32.mrb[83].mxu0 }
 0x421   : > { %v2229_v3 = vadd.f32 %v3383_v0, %v5660_v14  ;;  %v3386_v9 = vadd.f32 %v3385_v50, %v3384_v21 }
 0x423   : > { %2283 = vst [vmem:[%s4888_s9 + $0xc0] sm:$0xff] %v2229_v3  ;;  %v2232_v2 = vadd.f32 %v3386_v9, %v5660_v14 }
 0x425   : > { %2284 = vst [vmem:[%s4888_s9 + $0xc8] sm:$0xff] %v2232_v2  ;;  %v3387_v34 = vpop.f32.mrb[84].mxu0 }
 0x426   : > { %v3388_v8 = vpop.f32.mrb[85].mxu0 }
 0x427   : > { %v3389_v29 = vadd.f32 %v3388_v8, %v3387_v34  ;;  %v3390_v40 = vpop.f32.mrb[86].mxu0 }
 0x428   : > { %v3391_v11 = vpop.f32.mrb[87].mxu0 }
 0x429   : > { %v2237_v16 = vadd.f32 %v3389_v29, %v5660_v14  ;;  %v3392_v4 = vadd.f32 %v3391_v11, %v3390_v40 }
 0x42b   : > { %2285 = vst [vmem:[%s4888_s9 + $0xd0] sm:$0xff] %v2237_v16  ;;  %v2240_v33 = vadd.f32 %v3392_v4, %v5660_v14 }
 0x42d   : > { %2286 = vst [vmem:[%s4888_s9 + $0xd8] sm:$0xff] %v2240_v33  ;;  %v3393_v46 = vpop.f32.mrb[88].mxu0 }
 0x42e   : > { %v3394_v60 = vpop.f32.mrb[89].mxu0 }
 0x42f   : > { %v3395_v5 = vadd.f32 %v3394_v60, %v3393_v46  ;;  %v3396_v48 = vpop.f32.mrb[90].mxu0 }
 0x430   : > { %v3397_v37 = vpop.f32.mrb[91].mxu0 }
 0x431   : > { %v2245_v59 = vadd.f32 %v3395_v5, %v5660_v14  ;;  %v3398_v7 = vadd.f32 %v3397_v37, %v3396_v48 }
 0x433   : > { %2287 = vst [vmem:[%s4888_s9 + $0xe0] sm:$0xff] %v2245_v59  ;;  %v2248_v28 = vadd.f32 %v3398_v7, %v5660_v14 }
 0x435   : > { %2288 = vst [vmem:[%s4888_s9 + $0xe8] sm:$0xff] %v2248_v28  ;;  %v3399_v19 = vpop.f32.mrb[92].mxu0 }
 0x436   : > { %v3400_v45 = vpop.f32.mrb[93].mxu0 }
 0x437   : > { %v3401_v18 = vadd.f32 %v3400_v45, %v3399_v19  ;;  %v3402_v52 = vpop.f32.mrb[94].mxu0 }
 0x438   : > { %v3403_v35 = vpop.f32.mrb[95].mxu0 }
 0x439   : > { %v2253_v12 = vadd.f32 %v3401_v18, %v5660_v14  ;;  %v3404_v25 = vadd.f32 %v3403_v35, %v3402_v52 }
 0x43b   : > { %2289 = vst [vmem:[%s4888_s9 + $0xf0] sm:$0xff] %v2253_v12  ;;  %v2256_v26 = vadd.f32 %v3404_v25, %v5660_v14 }
 0x43d   : > { %2290 = vst [vmem:[%s4888_s9 + $0xf8] sm:$0xff] %v2256_v26 }
 0x43e PF: > { %v4084_v27 = vld [vmem:[%s4868_s16 + $0x4] ss:$8 sps:$4 sm:$0xff]   ;;  %v4086_v57 = vld [vmem:[%s4868_s16] ss:$8 sps:$4 sm:$0xff]   ;;  %v4455_v20 = vmov 0   ;;  %v2517_v36 = vld [vmem:[#allocation2 + $0x10] sm:$0xff] }
 0x43f   : > { %2659 = vmatprep.mubr.bf16.mxu0 %v4455_v20  ;;  %2739 = vmatprep.mubr.bf16.mxu1 %v4455_v20  ;;  %v4087_v14 = vld [vmem:[%s4868_s16 + $0x14] ss:$8 sps:$4 sm:$0xff]   ;;  %v4089_v55 = vld [vmem:[%s4868_s16 + $0x10] ss:$8 sps:$4 sm:$0xff]   ;;  %v4090_v43 = vld [vmem:[%s4868_s16 + $0x24] ss:$8 sps:$4 sm:$0xff]  }
 0x440   : > { %2627 = vmatprep.subr.bf16.mxu0 %v4084_v27  ;;  %3421 = vmatprep.subr.bf16.mxu1 %v4084_v27  ;;  %v4092_v30 = vld [vmem:[%s4868_s16 + $0x20] ss:$8 sps:$4 sm:$0xff]   ;;  %v4093_v49 = vld [vmem:[%s4868_s16 + $0x34] ss:$8 sps:$4 sm:$0xff]   ;;  %v4095_v1 = vld [vmem:[%s4868_s16 + $0x30] ss:$8 sps:$4 sm:$0xff]  }
 0x441   : > { %2628 = vmatpush1.bf16.msra.mxu0 %v4086_v57  ;;  %3429 = vmatpush1.bf16.msra.mxu1 %v4086_v57  ;;  %v4096_v53 = vld [vmem:[%s4868_s16 + $0x44] ss:$8 sps:$4 sm:$0xff]   ;;  %v4098_v54 = vld [vmem:[%s4868_s16 + $0x40] ss:$8 sps:$4 sm:$0xff]   ;;  %v4099_v38 = vld [vmem:[%s4868_s16 + $0x54] ss:$8 sps:$4 sm:$0xff]  }
 0x442   : > { %2629 = vmatprep.subr.bf16.mxu0 %v4087_v14  ;;  %3422 = vmatprep.subr.bf16.mxu1 %v4087_v14  ;;  %v4101_v31 = vld [vmem:[%s4868_s16 + $0x50] ss:$8 sps:$4 sm:$0xff]   ;;  %v4102_v44 = vld [vmem:[%s4868_s16 + $0x64] ss:$8 sps:$4 sm:$0xff]   ;;  %v4104_v61 = vld [vmem:[%s4868_s16 + $0x60] ss:$8 sps:$4 sm:$0xff]  }
 0x443   : > { %v4105_v58 = vld [vmem:[%s4868_s16 + $0x74] ss:$8 sps:$4 sm:$0xff]   ;;  %v4107_v63 = vld [vmem:[%s4868_s16 + $0x70] ss:$8 sps:$4 sm:$0xff]   ;;  %v2515_v17 = vld [vmem:[#allocation2] sm:$0xff]  ;;  %s6148_s10 = sld [smem:[#allocation27_spill]] }
 0x444   : > { %v2523_v56 = vld [vmem:[#allocation2 + $0x40] sm:$0xff]  ;;  %v2516_v51 = vld [vmem:[#allocation2 + $0x8] sm:$0xff]  ;;  %v2525_v62 = vld [vmem:[#allocation2 + $0x50] sm:$0xff]  ;;  %s2979_s20 = sshll.u32 %s4888_s9, 4  ;;  %s6150_s17 = sld [smem:[#allocation48_spill]]  ;;  %s5767_s20 = int_to_ptr.vmem [resolvable:$true] %s2979_s20 }
 0x445   : > { %2630 = vmatpush1.bf16.msra.mxu0 %v4089_v55  ;;  %3430 = vmatpush1.bf16.msra.mxu1 %v4089_v55  ;;  %v2524_v23 = vld [vmem:[#allocation2 + $0x48] sm:$0xff]  ;;  %v2518_v13 = vld [vmem:[#allocation2 + $0x18] sm:$0xff]  ;;  %v2519_v41 = vld [vmem:[#allocation2 + $0x20] sm:$0xff]  ;;  %s5771_s8 = scalar_lea.sflag [#allocation5], %s424_s0  ;;  %s4252_s13 = scalar_lea.vmem %s5767_s20, 4096 }
 0x446   : > { %2631 = vmatprep.subr.bf16.mxu0 %v4090_v43  ;;  %3423 = vmatprep.subr.bf16.mxu1 %v4090_v43  ;;  %v2526_v24 = vld [vmem:[#allocation2 + $0x58] sm:$0xff]  ;;  %v2527_v10 = vld [vmem:[#allocation2 + $0x60] sm:$0xff]  ;;  %v2520_v15 = vld [vmem:[#allocation2 + $0x28] sm:$0xff]  ;;  %p4253_p7 = scmp.ne.s32.totalorder %s5767_s20, %s4252_s13  ;;  %p6152_p9 = scmp.ne.s32.totalorder %s6111_s12, 0 }
 0x447   : > { %v2528_v39 = vld [vmem:[#allocation2 + $0x68] sm:$0xff]  ;;  %v2521_v42 = vld [vmem:[#allocation2 + $0x30] sm:$0xff]  ;;  %v2522_v47 = vld [vmem:[#allocation2 + $0x38] sm:$0xff]  ;;  %s4456_s23 = smov [#allocation12]  }
 0x448   : > { %v2529_v6 = vld [vmem:[#allocation2 + $0x70] sm:$0xff]  ;;  %v2530_v32 = vld [vmem:[#allocation2 + $0x78] sm:$0xff]  ;;  %p4254_p11 = pnand %p4253_p7, %p6152_p9  ;;  %s4256_s9 = sshll.u32 %s4456_s23, 4  ;;  %s4257_s9 = int_to_ptr.vmem [resolvable:$false] %s4256_s9 }
 0x449   : > { %2632 = vmatpush1.bf16.msra.mxu0 %v4092_v30  ;;  %3431 = vmatpush1.bf16.msra.mxu1 %v4092_v30  ;;  %s3291_s4 = sshll.u32 %s6148_s10, 12  ;;  %s4258_s1 = scalar_lea.vmem %s4257_s9, 8192 }
 0x44a   : > { %2633 = vmatprep.subr.bf16.mxu0 %v4093_v49  ;;  %3424 = vmatprep.subr.bf16.mxu1 %v4093_v49  ;;  %s6151_s29 = smov %s6150_s17  ;;  %s5765_s30 = scalar_lea.hbm %s6150_s17, %s3291_s4 }
 0x44b   : > { %p4255_p10 = pneg %p4254_p11  ;;  %p4259_p12 = scmp.lt.s32.totalorder %s5767_s20, %s4257_s9 }
 0x44c   : > { %p4260_p3 = scmp.lt.s32.totalorder %s4258_s1, %s4252_s13 }
 0x44d   : > { %2634 = vmatpush1.bf16.msra.mxu0 %v4095_v1  ;;  %3432 = vmatpush1.bf16.msra.mxu1 %v4095_v1 }
 0x44e   : > { %2635 = vmatprep.subr.bf16.mxu0 %v4096_v53  ;;  %3425 = vmatprep.subr.bf16.mxu1 %v4096_v53  ;;  %p4261_p4 = por %p4260_p3, %p4259_p12 }
 0x450   : > { %p4262_p8 = pnand %p4261_p4, %p4255_p10 }
 0x451   : > { %2636 = vmatpush1.bf16.msra.mxu0 %v4098_v54  ;;  %3433 = vmatpush1.bf16.msra.mxu1 %v4098_v54 }
 0x452   : > { %2637 = vmatprep.subr.bf16.mxu0 %v4099_v38  ;;  %3426 = vmatprep.subr.bf16.mxu1 %v4099_v38 }
 0x455   : > { %2638 = vmatpush1.bf16.msra.mxu0 %v4101_v31  ;;  %3434 = vmatpush1.bf16.msra.mxu1 %v4101_v31 }
 0x456   : > { %2639 = vmatprep.subr.bf16.mxu0 %v4102_v44  ;;  %3427 = vmatprep.subr.bf16.mxu1 %v4102_v44 }
 0x459   : > { %2640 = vmatpush1.bf16.msra.mxu0 %v4104_v61  ;;  %3435 = vmatpush1.bf16.msra.mxu1 %v4104_v61 }
 0x45a   : > { %2641 = vmatprep.subr.bf16.mxu0 %v4105_v58  ;;  %3428 = vmatprep.subr.bf16.mxu1 %v4105_v58 }
 0x45d   : > { %2642 = vmatpush1.bf16.msra.mxu0 %v4107_v63  ;;  %3436 = vmatpush1.bf16.msra.mxu1 %v4107_v63 }
 0x460   : > { %2660 = vmatmul.mubr.bf16.vlgmr.msra.gmra.mrb[0].mxu0 %v2515_v17  ;;  %2740 = vmatmul.mubr.bf16.vlgmr.msra.gmra.mrb[0].mxu1 %v2523_v56 }
 0x461   : > { %2669 = vmatprep.mubr.bf16.mxu0 %v4455_v20  ;;  %2749 = vmatprep.mubr.bf16.mxu1 %v4455_v20 }
 0x468   : > { %2670 = vmatmul.mubr.bf16.gmra.mrb[4].mxu0 %v2516_v51  ;;  %2750 = vmatmul.mubr.bf16.gmra.mrb[4].mxu1 %v2524_v23 }
 0x469   : > { %2679 = vmatprep.mubr.bf16.mxu0 %v4455_v20  ;;  %2759 = vmatprep.mubr.bf16.mxu1 %v4455_v20 }
 0x470   : > { %2680 = vmatmul.mubr.bf16.gmra.mrb[8].mxu0 %v2517_v36  ;;  %2760 = vmatmul.mubr.bf16.gmra.mrb[8].mxu1 %v2525_v62 }
 0x471   : > { %2689 = vmatprep.mubr.bf16.mxu0 %v4455_v20  ;;  %2769 = vmatprep.mubr.bf16.mxu1 %v4455_v20 }
 0x478   : > { %2690 = vmatmul.mubr.bf16.gmra.mrb[12].mxu0 %v2518_v13  ;;  %2770 = vmatmul.mubr.bf16.gmra.mrb[12].mxu1 %v2526_v24 }
 0x479   : > { %2699 = vmatprep.mubr.bf16.mxu0 %v4455_v20  ;;  %2779 = vmatprep.mubr.bf16.mxu1 %v4455_v20 }
 0x480   : > { %2700 = vmatmul.mubr.bf16.gmra.mrb[16].mxu0 %v2519_v41  ;;  %2780 = vmatmul.mubr.bf16.gmra.mrb[16].mxu1 %v2527_v10 }
 0x481   : > { %2709 = vmatprep.mubr.bf16.mxu0 %v4455_v20  ;;  %2789 = vmatprep.mubr.bf16.mxu1 %v4455_v20 }
 0x488   : > { %2710 = vmatmul.mubr.bf16.gmra.mrb[20].mxu0 %v2520_v15  ;;  %2790 = vmatmul.mubr.bf16.gmra.mrb[20].mxu1 %v2528_v39 }
 0x489   : > { %2719 = vmatprep.mubr.bf16.mxu0 %v4455_v20  ;;  %2799 = vmatprep.mubr.bf16.mxu1 %v4455_v20 }
 0x490   : > { %2720 = vmatmul.mubr.bf16.gmra.mrb[24].mxu0 %v2521_v42  ;;  %2800 = vmatmul.mubr.bf16.gmra.mrb[24].mxu1 %v2529_v6 }
 0x491   : > { %2729 = vmatprep.mubr.bf16.mxu0 %v4455_v20  ;;  %2809 = vmatprep.mubr.bf16.mxu1 %v4455_v20 }
 0x498   : > { %2730 = vmatmul.mubr.bf16.gmra.mrb[28].mxu0 %v2522_v47  ;;  %2810 = vmatmul.mubr.bf16.gmra.mrb[28].mxu1 %v2530_v32 }
 0x499   : > { %4265 = shalt.err (!%p4262_p8)
}
 0x49a   : > { %s4266_s0 = scalar_lea.hbm %s5765_s30, 4096  ;;  %s4270_s25 = scalar_lea.hbm %s6151_s29, 8192 }
 0x49b   : > { %p4267_p2 = scmp.ne.s32.totalorder %s5765_s30, %s4266_s0  ;;  %p4271_p6 = scmp.lt.u32.totalorder %s5765_s30, %s6151_s29 }
 0x49c   : > { %p4272_p5 = scmp.lt.u32.totalorder %s4270_s25, %s4266_s0  ;;  %p4274_p7 = scmp.lt.u32.totalorder %s4266_s0, %s5765_s30 }
 0x49d   : > { %p4268_p0 = pnand %p4267_p2, %p6152_p9 }
 0x49e   : > { %p4273_p13 = por %p4272_p5, %p4271_p6 }
 0x49f   : > { %p4269_p1 = pneg %p4268_p0 }
 0x4a0   : > { %p4275_p11 = por %p4274_p7, %p4273_p13 }
 0x4a2   : > { %p4276_p10 = pnand %p4275_p11, %p4269_p1 }
 0x4a4   : > { %4279 = shalt.err (!%p4276_p10)
}
 0x4a5   : > { %s4457_s13 = smov 128   ;;  %s4458_s23 = smov 8   ;;  %v2822_v22 = vlaneseq  ;;  %v2820_v50 = vld [vmem:[%s503_s11] sm:$0x3] }
 0x4a6   : > { %3453 = dma.vmem_to_hbm [thread:$0]  (%p6152_p9), %s5767_s20, 4096, %s5765_s30, %s5771_s8, %s4457_s13, %s4457_s13, %s4458_s23  }
 0x4a7   : > { %v2823_v0 = vshrl.u32 %v2822_v22, 7  ;;  %s3292_s12 = sshll.u32 %s6148_s10, 7  ;;  %s2998_s10 = sshll.u32 %s4890_s2, 4  ;;  %s5932_s10 = int_to_ptr.vmem [resolvable:$true] %s2998_s10 }
 0x4a8   : > { %s2995_s27 = sadd.s32 %s3292_s12, %s4878_s6  ;;  %s6154_s30 = sld [smem:[#allocation49_spill]] }
 0x4a9   : > { %v2824_v21 = vsub.s32 0, %v2823_v0  ;;  %v2828_v3 = vsub.s32 1, %v2823_v0  ;;  %s3286_s11 = sshll.u32 %s2995_s27, 7  ;;  %s6156_s4 = sld [smem:[#allocation32_spill]] }
 0x4aa   : > { %s5944_s25 = scalar_lea.sflag [#allocation14], %s495_s28  ;;  %s4280_s19 = scalar_lea.vmem %s5932_s10, 8192 }
 0x4ab   : > { %v5800_v9 = vrot.slane %v2820_v50, %v2824_v21  ;;  %v5802_v2 = vrot.slane %v2820_v50, %v2828_v3  ;;  %p4281_p9 = scmp.ne.s32.totalorder %s5932_s10, %s4280_s19  ;;  %s4459_s17 = smov [#allocation13]  }
 0x4ac   : > { %s4284_s13 = sshll.u32 %s4459_s17, 4  ;;  %s4285_s13 = int_to_ptr.vmem [resolvable:$false] %s4284_s13 }
 0x4ad   : > { %s4286_s23 = scalar_lea.vmem %s4285_s13, 16384  ;;  %p4287_p8 = scmp.lt.s32.totalorder %s5932_s10, %s4285_s13 }
 0x4ae   : > { %s5926_s8 = scalar_lea.hbm %s6154_s30, %s3286_s11  ;;  %p4288_p2 = scmp.lt.s32.totalorder %s4286_s23, %s4280_s19 }
 0x4af   : > { %p6157_p12 = scmp.ne.s32.totalorder %s6156_s4, 0 }
 0x4b0   : > { %p4289_p0 = por %p4288_p2, %p4287_p8 }
 0x4b1   : > { %p4282_p3 = pnand %p4281_p9, %p6157_p12 }
 0x4b3   : > { %p4283_p4 = pneg %p4282_p3 }
 0x4b5   : > { %p4290_p1 = pnand %p4289_p0, %p4283_p4 }
 0x533   : > { %v2661_v34 = vpop.f32.mrb[0].mxu0  ;;  %v2741_v8 = vpop.f32.mrb[0].mxu1 }
 0x534   : > { %v2832_v29 = vmul.f32 %v5800_v9, %v2661_v34  ;;  %v2864_v40 = vmul.f32 %v5800_v9, %v2741_v8  ;;  %v2663_v11 = vpop.f32.mrb[1].mxu0  ;;  %v2743_v16 = vpop.f32.mrb[1].mxu1 }
 0x535   : > { %v2833_v4 = vmul.f32 %v5802_v2, %v2663_v11  ;;  %v2865_v33 = vmul.f32 %v5802_v2, %v2743_v16  ;;  %v2665_v46 = vpop.f32.mrb[2].mxu0  ;;  %v2745_v60 = vpop.f32.mrb[2].mxu1 }
 0x536   : > { %2896 = vst [vmem:[%s4890_s2] sm:$0xff] %v2832_v29  ;;  %2928 = vst [vmem:[%s4890_s2 + $0x100] sm:$0xff] %v2864_v40  ;;  %v2834_v5 = vmul.f32 %v5800_v9, %v2665_v46  ;;  %v2866_v48 = vmul.f32 %v5800_v9, %v2745_v60  ;;  %v2667_v37 = vpop.f32.mrb[3].mxu0  ;;  %v2747_v59 = vpop.f32.mrb[3].mxu1 }
 0x537   : > { %2897 = vst [vmem:[%s4890_s2 + $0x8] sm:$0xff] %v2833_v4  ;;  %2929 = vst [vmem:[%s4890_s2 + $0x108] sm:$0xff] %v2865_v33  ;;  %v2835_v7 = vmul.f32 %v5802_v2, %v2667_v37  ;;  %v2867_v28 = vmul.f32 %v5802_v2, %v2747_v59 }
 0x538   : > { %2898 = vst [vmem:[%s4890_s2 + $0x10] sm:$0xff] %v2834_v5  ;;  %2930 = vst [vmem:[%s4890_s2 + $0x110] sm:$0xff] %v2866_v48 }
 0x539   : > { %2899 = vst [vmem:[%s4890_s2 + $0x18] sm:$0xff] %v2835_v7  ;;  %2931 = vst [vmem:[%s4890_s2 + $0x118] sm:$0xff] %v2867_v28 }
 0x53b   : > { %v2671_v19 = vpop.f32.mrb[4].mxu0  ;;  %v2751_v45 = vpop.f32.mrb[4].mxu1 }
 0x53c   : > { %v2836_v18 = vmul.f32 %v5800_v9, %v2671_v19  ;;  %v2868_v52 = vmul.f32 %v5800_v9, %v2751_v45  ;;  %v2673_v35 = vpop.f32.mrb[5].mxu0  ;;  %v2753_v12 = vpop.f32.mrb[5].mxu1 }
 0x53d   : > { %v2837_v25 = vmul.f32 %v5802_v2, %v2673_v35  ;;  %v2869_v26 = vmul.f32 %v5802_v2, %v2753_v12  ;;  %v2675_v27 = vpop.f32.mrb[6].mxu0  ;;  %v2755_v57 = vpop.f32.mrb[6].mxu1 }
 0x53e   : > { %2900 = vst [vmem:[%s4890_s2 + $0x20] sm:$0xff] %v2836_v18  ;;  %2932 = vst [vmem:[%s4890_s2 + $0x120] sm:$0xff] %v2868_v52  ;;  %v2838_v20 = vmul.f32 %v5800_v9, %v2675_v27  ;;  %v2870_v14 = vmul.f32 %v5800_v9, %v2755_v57  ;;  %v2677_v55 = vpop.f32.mrb[7].mxu0  ;;  %v2757_v43 = vpop.f32.mrb[7].mxu1 }
 0x53f   : > { %2901 = vst [vmem:[%s4890_s2 + $0x28] sm:$0xff] %v2837_v25  ;;  %2933 = vst [vmem:[%s4890_s2 + $0x128] sm:$0xff] %v2869_v26  ;;  %v2839_v30 = vmul.f32 %v5802_v2, %v2677_v55  ;;  %v2871_v49 = vmul.f32 %v5802_v2, %v2757_v43 }
 0x540   : > { %2902 = vst [vmem:[%s4890_s2 + $0x30] sm:$0xff] %v2838_v20  ;;  %2934 = vst [vmem:[%s4890_s2 + $0x130] sm:$0xff] %v2870_v14 }
 0x541   : > { %2903 = vst [vmem:[%s4890_s2 + $0x38] sm:$0xff] %v2839_v30  ;;  %2935 = vst [vmem:[%s4890_s2 + $0x138] sm:$0xff] %v2871_v49 }
 0x543   : > { %v2681_v1 = vpop.f32.mrb[8].mxu0  ;;  %v2761_v53 = vpop.f32.mrb[8].mxu1 }
 0x544   : > { %v2840_v54 = vmul.f32 %v5800_v9, %v2681_v1  ;;  %v2872_v38 = vmul.f32 %v5800_v9, %v2761_v53  ;;  %v2683_v31 = vpop.f32.mrb[9].mxu0  ;;  %v2763_v44 = vpop.f32.mrb[9].mxu1 }
 0x545   : > { %v2841_v61 = vmul.f32 %v5802_v2, %v2683_v31  ;;  %v2873_v58 = vmul.f32 %v5802_v2, %v2763_v44  ;;  %v2685_v63 = vpop.f32.mrb[10].mxu0  ;;  %v2765_v17 = vpop.f32.mrb[10].mxu1 }
 0x546   : > { %2904 = vst [vmem:[%s4890_s2 + $0x40] sm:$0xff] %v2840_v54  ;;  %2936 = vst [vmem:[%s4890_s2 + $0x140] sm:$0xff] %v2872_v38  ;;  %v2842_v56 = vmul.f32 %v5800_v9, %v2685_v63  ;;  %v2874_v51 = vmul.f32 %v5800_v9, %v2765_v17  ;;  %v2687_v23 = vpop.f32.mrb[11].mxu0  ;;  %v2767_v36 = vpop.f32.mrb[11].mxu1 }
 0x547   : > { %2905 = vst [vmem:[%s4890_s2 + $0x48] sm:$0xff] %v2841_v61  ;;  %2937 = vst [vmem:[%s4890_s2 + $0x148] sm:$0xff] %v2873_v58  ;;  %v2843_v62 = vmul.f32 %v5802_v2, %v2687_v23  ;;  %v2875_v13 = vmul.f32 %v5802_v2, %v2767_v36 }
 0x548   : > { %2906 = vst [vmem:[%s4890_s2 + $0x50] sm:$0xff] %v2842_v56  ;;  %2938 = vst [vmem:[%s4890_s2 + $0x150] sm:$0xff] %v2874_v51 }
 0x549   : > { %2907 = vst [vmem:[%s4890_s2 + $0x58] sm:$0xff] %v2843_v62  ;;  %2939 = vst [vmem:[%s4890_s2 + $0x158] sm:$0xff] %v2875_v13 }
 0x54b   : > { %v2691_v24 = vpop.f32.mrb[12].mxu0  ;;  %v2771_v41 = vpop.f32.mrb[12].mxu1 }
 0x54c   : > { %v2844_v10 = vmul.f32 %v5800_v9, %v2691_v24  ;;  %v2876_v15 = vmul.f32 %v5800_v9, %v2771_v41  ;;  %v2693_v39 = vpop.f32.mrb[13].mxu0  ;;  %v2773_v42 = vpop.f32.mrb[13].mxu1 }
 0x54d   : > { %v2845_v6 = vmul.f32 %v5802_v2, %v2693_v39  ;;  %v2877_v47 = vmul.f32 %v5802_v2, %v2773_v42  ;;  %v2695_v32 = vpop.f32.mrb[14].mxu0  ;;  %v2775_v22 = vpop.f32.mrb[14].mxu1 }
 0x54e   : > { %2908 = vst [vmem:[%s4890_s2 + $0x60] sm:$0xff] %v2844_v10  ;;  %2940 = vst [vmem:[%s4890_s2 + $0x160] sm:$0xff] %v2876_v15  ;;  %v2846_v0 = vmul.f32 %v5800_v9, %v2695_v32  ;;  %v2878_v21 = vmul.f32 %v5800_v9, %v2775_v22  ;;  %v2697_v50 = vpop.f32.mrb[15].mxu0  ;;  %v2777_v3 = vpop.f32.mrb[15].mxu1 }
 0x54f   : > { %2909 = vst [vmem:[%s4890_s2 + $0x68] sm:$0xff] %v2845_v6  ;;  %2941 = vst [vmem:[%s4890_s2 + $0x168] sm:$0xff] %v2877_v47  ;;  %v2847_v34 = vmul.f32 %v5802_v2, %v2697_v50  ;;  %v2879_v8 = vmul.f32 %v5802_v2, %v2777_v3 }
 0x550   : > { %2910 = vst [vmem:[%s4890_s2 + $0x70] sm:$0xff] %v2846_v0  ;;  %2942 = vst [vmem:[%s4890_s2 + $0x170] sm:$0xff] %v2878_v21 }
 0x551   : > { %2911 = vst [vmem:[%s4890_s2 + $0x78] sm:$0xff] %v2847_v34  ;;  %2943 = vst [vmem:[%s4890_s2 + $0x178] sm:$0xff] %v2879_v8 }
 0x553   : > { %v2701_v29 = vpop.f32.mrb[16].mxu0  ;;  %v2781_v40 = vpop.f32.mrb[16].mxu1 }
 0x554   : > { %v2848_v11 = vmul.f32 %v5800_v9, %v2701_v29  ;;  %v2880_v16 = vmul.f32 %v5800_v9, %v2781_v40  ;;  %v2703_v4 = vpop.f32.mrb[17].mxu0  ;;  %v2783_v33 = vpop.f32.mrb[17].mxu1 }
 0x555   : > { %v2849_v46 = vmul.f32 %v5802_v2, %v2703_v4  ;;  %v2881_v60 = vmul.f32 %v5802_v2, %v2783_v33  ;;  %v2705_v5 = vpop.f32.mrb[18].mxu0  ;;  %v2785_v48 = vpop.f32.mrb[18].mxu1 }
 0x556   : > { %2912 = vst [vmem:[%s4890_s2 + $0x80] sm:$0xff] %v2848_v11  ;;  %2944 = vst [vmem:[%s4890_s2 + $0x180] sm:$0xff] %v2880_v16  ;;  %v2850_v37 = vmul.f32 %v5800_v9, %v2705_v5  ;;  %v2882_v59 = vmul.f32 %v5800_v9, %v2785_v48  ;;  %v2707_v7 = vpop.f32.mrb[19].mxu0  ;;  %v2787_v28 = vpop.f32.mrb[19].mxu1 }
 0x557   : > { %2913 = vst [vmem:[%s4890_s2 + $0x88] sm:$0xff] %v2849_v46  ;;  %2945 = vst [vmem:[%s4890_s2 + $0x188] sm:$0xff] %v2881_v60  ;;  %v2851_v19 = vmul.f32 %v5802_v2, %v2707_v7  ;;  %v2883_v45 = vmul.f32 %v5802_v2, %v2787_v28 }
 0x558   : > { %2914 = vst [vmem:[%s4890_s2 + $0x90] sm:$0xff] %v2850_v37  ;;  %2946 = vst [vmem:[%s4890_s2 + $0x190] sm:$0xff] %v2882_v59 }
 0x559   : > { %2915 = vst [vmem:[%s4890_s2 + $0x98] sm:$0xff] %v2851_v19  ;;  %2947 = vst [vmem:[%s4890_s2 + $0x198] sm:$0xff] %v2883_v45 }
 0x55b   : > { %v2711_v18 = vpop.f32.mrb[20].mxu0  ;;  %v2791_v52 = vpop.f32.mrb[20].mxu1 }
 0x55c   : > { %v2852_v35 = vmul.f32 %v5800_v9, %v2711_v18  ;;  %v2884_v12 = vmul.f32 %v5800_v9, %v2791_v52  ;;  %v2713_v25 = vpop.f32.mrb[21].mxu0  ;;  %v2793_v26 = vpop.f32.mrb[21].mxu1 }
 0x55d   : > { %v2853_v27 = vmul.f32 %v5802_v2, %v2713_v25  ;;  %v2885_v57 = vmul.f32 %v5802_v2, %v2793_v26  ;;  %v2715_v20 = vpop.f32.mrb[22].mxu0  ;;  %v2795_v14 = vpop.f32.mrb[22].mxu1 }
 0x55e   : > { %2916 = vst [vmem:[%s4890_s2 + $0xa0] sm:$0xff] %v2852_v35  ;;  %2948 = vst [vmem:[%s4890_s2 + $0x1a0] sm:$0xff] %v2884_v12  ;;  %v2854_v55 = vmul.f32 %v5800_v9, %v2715_v20  ;;  %v2886_v43 = vmul.f32 %v5800_v9, %v2795_v14  ;;  %v2717_v30 = vpop.f32.mrb[23].mxu0  ;;  %v2797_v49 = vpop.f32.mrb[23].mxu1 }
 0x55f   : > { %2917 = vst [vmem:[%s4890_s2 + $0xa8] sm:$0xff] %v2853_v27  ;;  %2949 = vst [vmem:[%s4890_s2 + $0x1a8] sm:$0xff] %v2885_v57  ;;  %v2855_v1 = vmul.f32 %v5802_v2, %v2717_v30  ;;  %v2887_v53 = vmul.f32 %v5802_v2, %v2797_v49 }
 0x560   : > { %2918 = vst [vmem:[%s4890_s2 + $0xb0] sm:$0xff] %v2854_v55  ;;  %2950 = vst [vmem:[%s4890_s2 + $0x1b0] sm:$0xff] %v2886_v43 }
 0x561   : > { %2919 = vst [vmem:[%s4890_s2 + $0xb8] sm:$0xff] %v2855_v1  ;;  %2951 = vst [vmem:[%s4890_s2 + $0x1b8] sm:$0xff] %v2887_v53 }
 0x563   : > { %v2721_v54 = vpop.f32.mrb[24].mxu0  ;;  %v2801_v38 = vpop.f32.mrb[24].mxu1 }
 0x564   : > { %v2856_v31 = vmul.f32 %v5800_v9, %v2721_v54  ;;  %v2888_v44 = vmul.f32 %v5800_v9, %v2801_v38  ;;  %v2723_v61 = vpop.f32.mrb[25].mxu0  ;;  %v2803_v58 = vpop.f32.mrb[25].mxu1 }
 0x565   : > { %v2857_v63 = vmul.f32 %v5802_v2, %v2723_v61  ;;  %v2889_v17 = vmul.f32 %v5802_v2, %v2803_v58  ;;  %v2725_v56 = vpop.f32.mrb[26].mxu0  ;;  %v2805_v51 = vpop.f32.mrb[26].mxu1 }
 0x566   : > { %2920 = vst [vmem:[%s4890_s2 + $0xc0] sm:$0xff] %v2856_v31  ;;  %2952 = vst [vmem:[%s4890_s2 + $0x1c0] sm:$0xff] %v2888_v44  ;;  %v2858_v23 = vmul.f32 %v5800_v9, %v2725_v56  ;;  %v2890_v36 = vmul.f32 %v5800_v9, %v2805_v51  ;;  %v2727_v62 = vpop.f32.mrb[27].mxu0  ;;  %v2807_v13 = vpop.f32.mrb[27].mxu1 }
 0x567   : > { %2921 = vst [vmem:[%s4890_s2 + $0xc8] sm:$0xff] %v2857_v63  ;;  %2953 = vst [vmem:[%s4890_s2 + $0x1c8] sm:$0xff] %v2889_v17  ;;  %v2859_v24 = vmul.f32 %v5802_v2, %v2727_v62  ;;  %v2891_v41 = vmul.f32 %v5802_v2, %v2807_v13 }
 0x568   : > { %2922 = vst [vmem:[%s4890_s2 + $0xd0] sm:$0xff] %v2858_v23  ;;  %2954 = vst [vmem:[%s4890_s2 + $0x1d0] sm:$0xff] %v2890_v36 }
 0x569   : > { %2923 = vst [vmem:[%s4890_s2 + $0xd8] sm:$0xff] %v2859_v24  ;;  %2955 = vst [vmem:[%s4890_s2 + $0x1d8] sm:$0xff] %v2891_v41 }
 0x56b   : > { %v2731_v10 = vpop.f32.mrb[28].mxu0  ;;  %v2811_v15 = vpop.f32.mrb[28].mxu1 }
 0x56c   : > { %v2860_v39 = vmul.f32 %v5800_v9, %v2731_v10  ;;  %v2892_v42 = vmul.f32 %v5800_v9, %v2811_v15  ;;  %v2733_v6 = vpop.f32.mrb[29].mxu0  ;;  %v2813_v47 = vpop.f32.mrb[29].mxu1 }
 0x56d   : > { %v2861_v32 = vmul.f32 %v5802_v2, %v2733_v6  ;;  %v2893_v22 = vmul.f32 %v5802_v2, %v2813_v47  ;;  %v2735_v0 = vpop.f32.mrb[30].mxu0  ;;  %v2815_v21 = vpop.f32.mrb[30].mxu1 }
 0x56e   : > { %2924 = vst [vmem:[%s4890_s2 + $0xe0] sm:$0xff] %v2860_v39  ;;  %2956 = vst [vmem:[%s4890_s2 + $0x1e0] sm:$0xff] %v2892_v42  ;;  %v2862_v50 = vmul.f32 %v5800_v9, %v2735_v0  ;;  %v2894_v3 = vmul.f32 %v5800_v9, %v2815_v21  ;;  %v2737_v34 = vpop.f32.mrb[31].mxu0  ;;  %v2817_v8 = vpop.f32.mrb[31].mxu1 }
 0x56f   : > { %2925 = vst [vmem:[%s4890_s2 + $0xe8] sm:$0xff] %v2861_v32  ;;  %2957 = vst [vmem:[%s4890_s2 + $0x1e8] sm:$0xff] %v2893_v22  ;;  %v2863_v29 = vmul.f32 %v5802_v2, %v2737_v34  ;;  %v2895_v40 = vmul.f32 %v5802_v2, %v2817_v8 }
 0x570   : > { %2926 = vst [vmem:[%s4890_s2 + $0xf0] sm:$0xff] %v2862_v50  ;;  %2958 = vst [vmem:[%s4890_s2 + $0x1f0] sm:$0xff] %v2894_v3 }
 0x571   : > { %2927 = vst [vmem:[%s4890_s2 + $0xf8] sm:$0xff] %v2863_v29  ;;  %2959 = vst [vmem:[%s4890_s2 + $0x1f8] sm:$0xff] %v2895_v40 }
 0x572   : > { %4293 = shalt.err (!%p4290_p1)
}
 0x573   : > { %s4294_s28 = scalar_lea.hbm %s5926_s8, 8192  ;;  %s4298_s1 = scalar_lea.hbm %s6154_s30, 32768 }
 0x574   : > { %p4295_p6 = scmp.ne.s32.totalorder %s5926_s8, %s4294_s28  ;;  %p4299_p7 = scmp.lt.u32.totalorder %s5926_s8, %s6154_s30 }
 0x575   : > { %p4300_p11 = scmp.lt.u32.totalorder %s4298_s1, %s4294_s28  ;;  %p4302_p9 = scmp.lt.u32.totalorder %s4294_s28, %s5926_s8 }
 0x576   : > { %p4296_p5 = pnand %p4295_p6, %p6157_p12 }
 0x577   : > { %p4301_p10 = por %p4300_p11, %p4299_p7 }
 0x578   : > { %p4297_p13 = pneg %p4296_p5 }
 0x579   : > { %p4303_p3 = por %p4302_p9, %p4301_p10 }
 0x57b   : > { %p4304_p4 = pnand %p4303_p3, %p4297_p13 }
 0x57d   : > { %4307 = shalt.err (!%p4304_p4)
}
 0x57e   : > { %s4460_s27 = smov 256   ;;  %s4461_s11 = smov 512  }
 0x57f   : > { %s4462_s6 = smov 16  }
 0x580   : > { %3454 = dma.vmem_to_hbm [thread:$0]  (%p6157_p12), %s5932_s10, 8192, %s5926_s8, %s5944_s25, %s4460_s27, %s4461_s11, %s4462_s6  }
 0x581 PF: > { %s6158_s20 = sld [smem:[#allocation24_spill]]  ;;  %s6159_s0 = sld [smem:[#allocation31_spill]] }
 0x582   : > { %p3488_p8 = scmp.ge.s32.totalorder %s4442_s26, 2 }
 0x587   : > { %s3013_s19 = sand.u32 1, %s6158_s20   ;;  %p6160_p2 = scmp.ne.s32.totalorder %s6159_s0, 0 }
 0x588   : > { %s3014_s17 = scalar_lea.sflag [#allocation5], %s3013_s19 }
 0x589   : > { %p3475_p0 = pnand %p3488_p8, %p6160_p2 }
 0x58b   : > { %4381 = dma.done.wait (!%p3475_p0), %s3014_s17, 4096  }
 0x58c   : > { %4383 = vsyncadd (!%p3475_p0), %s3014_s17, 4294963200  ;;  %s6161_s13 = sld [smem:[#allocation21_spill]] }
 0x58d   : > { %s6162_s23 = sld [smem:[#allocation33_spill]] }
 0x592   : > { %s3022_s28 = sand.u32 1, %s6161_s13  }
 0x593   : > { %p6163_p1 = scmp.ne.s32.totalorder %s6162_s23, 0  ;;  %s3023_s2 = scalar_lea.sflag [#allocation14], %s3022_s28 }
 0x595   : > { %p3478_p6 = pnand %p3488_p8, %p6163_p1 }
 0x597   : > { %4385 = dma.done.wait (!%p3478_p6), %s3023_s2, 8192  }
 0x598   : > { %4387 = vsyncadd (!%p3478_p6), %s3023_s2, 4294959104  ;;  %s32_s26 = sadd.s32 1, %s4442_s26   ;;  %s6165_s13 = sld [smem:[#allocation22_spill]] }
 0x599   : > { %p5976_p12 = scmp.ge.s32.totalorder %s32_s26, 6   ;;  %s6166_s8 = smov %s4715_s14 }
 0x59a   : > { %s6167_s16 = sld [smem:[#allocation23_spill]]  ;;  %s6168_s4 = sld [smem:[#allocation36_spill]] }
 0x59b   : > { %s6169_s19 = sld [smem:[#allocation25_spill]]  ;;  %s6170_s23 = sld [smem:[#allocation28_spill]] }
 0x59c   : > { %s6171_s25 = sld [smem:[#allocation34_spill]]  ;;  %s6172_s9 = sld [smem:[#allocation35_spill]] }
 0x59d   : > { %s6173_s14 = smov %s4398_s15  ;;  %s6174_s15 = smov %s6166_s8 }
 0x59e   : > { %s6175_s17 = smov %s4410_s18  ;;  %s6177_s20 = smov %s4422_s21 }
 0x59f   : > { %s6178_s21 = smov %s4712_s22  ;;  %s6179_s22 = smov %s4434_s24 }
 0x5a0   : > { %s6176_s18 = smov %s6168_s4  ;;  %31 = sbr.rel (!%p5976_p12) target bundleno = 23 (0x17), region = 148 }
 0x5a2   : > { %s6180_s24 = smov %s6171_s25  ;;  %s6181_s25 = smov %s6172_s9 }
 0x5a7   :  { %3028 = vsyncpa [#allocation4], 1 }
 0x5a8   :  { %3030 = vsyncpa [#allocation4 + $0x1], 1 }
 0x5a9   :  { %3031 = vsyncpa [#allocation7], 1 }
 0x5aa   :  { %3032 = vsyncpa [#allocation10], 1 }
 0x5ab   :  { %3033 = vsyncpa [#allocation5], 1 }
 0x5ac   :  { %3035 = vsyncpa [#allocation5 + $0x1], 1 }
 0x5ad   :  { %3036 = vsyncpa [#allocation14], 1 }
 0x5ae   :  { %3038 = vsyncpa [#allocation14 + $0x1], 1 }

// kernel: tpu_custom_call.1
= control target key start
LH: loop header
LB: loop body
LE: loop exit
PB: predicated region body
PF: predicated region fallthrough
CT: control target
= control target key end

     0   :  { %s6023_s0 = inlined_call_operand.hbm [shape: f32[512,128], index: 0, kind: input, shape index: {}]   ;;  %s6024_s1 = inlined_call_operand.hbm [shape: bf16[128,256], index: 1, kind: input, shape index: {}]   ;;  %s6025_s2 = inlined_call_operand.vmem [shape: f32[1,256], index: 2, kind: input, shape index: {}]   ;;  %s6026_s3 = inlined_call_operand.hbm [shape: bf16[256,256], index: 3, kind: input, shape index: {}]   ;;  %s6027_s4 = inlined_call_operand.vmem [shape: f32[1,256], index: 4, kind: input, shape index: {}]   ;;  %s6028_s5 = inlined_call_operand.hbm [shape: bf16[256,128], index: 5, kind: input, shape index: {}]   ;;  %s6029_s6 = inlined_call_operand.vmem [shape: f32[1,128], index: 6, kind: input, shape index: {}]   ;;  %s6030_s7 = inlined_call_operand.hbm [shape: bf16[128,512], index: 7, kind: input, shape index: {}]   ;;  %s6031_s8 = inlined_call_operand.vmem [shape: f32[1,512], index: 8, kind: input, shape index: {}]   ;;  %s6032_s9 = inlined_call_operand.hbm [shape: f32[512,128], index: 9, kind: output, shape index: {0}]   ;;  %s6033_s10 = inlined_call_operand.hbm [shape: f32[512,512], index: 10, kind: output, shape index: {1}]  }
   0x1   :  { %6074 = sst [smem:[#allocation42_spill]] %s6023_s0 }
   0x2   :  { %6075 = sst [smem:[#allocation43_spill]] %s6024_s1 }
   0x3   :  { %6076 = sst [smem:[#allocation44_spill]] %s6025_s2 }
   0x4   :  { %6077 = sst [smem:[#allocation45_spill]] %s6027_s4 }
   0x5   :  { %6078 = sst [smem:[#allocation46_spill]] %s6029_s6 }
   0x6   :  { %6079 = sst [smem:[#allocation47_spill]] %s6031_s8 }
   0x7   :  { %6080 = sst [smem:[#allocation48_spill]] %s6032_s9 }
   0x8   :  { %6081 = sst [smem:[#allocation49_spill]] %s6033_s10 }
   0x9   :  { %16 = vsyncpa [#allocation4], 0 }
   0xa   :  { %18 = vsyncpa [#allocation4 + $0x1], 0 }
   0xb   :  { %19 = vsyncpa [#allocation7], 0 }
   0xc   :  { %20 = vsyncpa [#allocation10], 0 }
   0xd   :  { %21 = vsyncpa [#allocation5], 0 }
   0xe   :  { %23 = vsyncpa [#allocation5 + $0x1], 0 }
   0xf   :  { %24 = vsyncpa [#allocation14], 0 }
  0x10   :  { %26 = vsyncpa [#allocation14 + $0x1], 0  ;;  %s4518_s13 = smov 0   ;;  %s4520_s14 = smov 0  }
  0x11   :  { %s4522_s15 = smov 0   ;;  %s4524_s16 = smov 0  }
  0x12   :  { %s4526_s17 = smov 0   ;;  %s4528_s18 = smov 0  }
  0x13   :  { %s4530_s19 = smov 0   ;;  %s4532_s20 = smov 0  }
  0x14   :  { %s4534_s21 = smov 0   ;;  %s4536_s22 = smov 0  }
  0x15   :  { %s4538_s23 = smov 0   ;;  %s4540_s24 = smov 0  }
  0x16   :  { %s4542_s25 = smov 0   ;;  %s4544_s26 = smov 0  }
  0x17 LB: > { %6082 = sst [smem:[#allocation21_spill]] %s4390_s13  ;;  %s4587_s27 = sadd.s32 4294967295, %s4442_s26   ;;  %s4442_s26 = sphi %s4544_s26, %s32_s26   ;;  %s4438_s25 = sphi %s4542_s25, %s6181_s25   ;;  %s4434_s24 = sphi %s4540_s24, %s6180_s24   ;;  %s4430_s23 = sphi %s4538_s23, %s6170_s23   ;;  %s4426_s22 = sphi %s4536_s22, %s6179_s22   ;;  %s4422_s21 = sphi %s4534_s21, %s6178_s21   ;;  %s4418_s20 = sphi %s4532_s20, %s6177_s20   ;;  %s4414_s19 = sphi %s4530_s19, %s6169_s19   ;;  %s4410_s18 = sphi %s4528_s18, %s6176_s18   ;;  %s4406_s17 = sphi %s4526_s17, %s6175_s17   ;;  %s4402_s16 = sphi %s4524_s16, %s6167_s16   ;;  %s4398_s15 = sphi %s4522_s15, %s6174_s15   ;;  %s4394_s14 = sphi %s4520_s14, %s6173_s14   ;;  %s4390_s13 = sphi %s4518_s13, %s6165_s13  }
  0x18   : > { %6083 = sst [smem:[#allocation22_spill]] %s4394_s14  ;;  %s3176_s28 = sadd.s32 4294967294, %s4442_s26  }
  0x19   : > { %6084 = sst [smem:[#allocation23_spill]] %s4406_s17  ;;  %p64_p0 = scmp.ne.s32.totalorder %s4418_s20, %s4414_s19 }
  0x1a   : > { %6085 = sst [smem:[#allocation24_spill]] %s4414_s19  ;;  %p6043_p1 = scmp.eq.s32.totalorder %s4587_s27, 0 }
  0x1b   : > { %6086 = sst [smem:[#allocation25_spill]] %s4418_s20  ;;  %p216_p3 = scmp.ne.s32.totalorder %s4406_s17, %s4402_s16 }
  0x1c   : > { %6087 = sst [smem:[#allocation26_spill]] %s4426_s22  ;;  %p4598_p4 = por %p6043_p1, %p64_p0 }
  0x1d   : > { %6088 = sst [smem:[#allocation27_spill]] %s4430_s23  ;;  %p6044_p5 = scmp.eq.s32.totalorder %s4587_s27, 3 }
  0x1e   : > { %6089 = sst [smem:[#allocation28_spill]] %s4438_s25  ;;  %p4605_p6 = por %p216_p3, %p6043_p1 }
  0x1f   : > { %s6090_s29 = scalar_select %p4598_p4, 1, 0 }
  0x20   : > { %s6092_s30 = scalar_select %p4605_p6, 1, 0 }
  0x21   : > { %6091 = sst [smem:[#allocation29_spill]] %s6090_s29  ;;  %p272_p7 = scmp.eq.s32.totalorder %s3176_s28, 3 }
  0x22   : > { %6093 = sst [smem:[#allocation30_spill]] %s6092_s30  ;;  %p293_p8 = scmp.ne.s32.totalorder %s4398_s15, %s4394_s14 }
  0x23   : > { %p299_p9 = scmp.ne.s32.totalorder %s4394_s14, %s4390_s13  ;;  %p4613_p10 = por %p272_p7, %p64_p0 }
  0x24   : > { %p3177_p11 = scmp.ge.s32.totalorder %s4442_s26, 1  ;;  %p4620_p12 = por %p293_p8, %p6044_p5 }
  0x25   : > { %s6094_s11 = scalar_select %p4613_p10, 1, 0 }
  0x26   : > { %s6096_s12 = scalar_select %p4620_p12, 1, 0 }
  0x27   : > { %6095 = sst [smem:[#allocation31_spill]] %s6094_s11  ;;  %p4624_p13 = por %p299_p9, %p272_p7 }
  0x28   : > { %6097 = sst [smem:[#allocation32_spill]] %s6096_s12  ;;  %p307_p3 = scmp.lt.s32.totalorder %s4442_s26, 5 }
  0x29   : > { %s6098_s16 = scalar_select %p4624_p13, 1, 0 }
  0x2a   : > { %p4629_p2 = pnand %p3177_p11, %p307_p3  ;;  %s4444_s28 = smov [#allocation6]  }
  0x2b   : > { %6099 = sst [smem:[#allocation33_spill]] %s6098_s16  ;;  %s319_s13 = sshll.u32 %s4444_s28, 4  ;;  %s320_s13 = int_to_ptr.vmem [resolvable:$true] %s319_s13 }
  0x2c   : > { %s6100_s19 = scalar_select %p4629_p2, 1, 0 }
  0x2d   : > { %p3457_p0 = pneg %p4629_p2  ;;  %s6102_s1 = sld [smem:[#allocation43_spill]] }
  0x2f   : > { %p4637_p8 = pnand %p3457_p0, %p6043_p1 }
  0x31   : > { %s6101_s11 = scalar_select %p4637_p8, 1, 0 }
  0x32   : > { %p4649_p9 = pneg %p4637_p8 }
  0x33   : > { %s4108_s16 = scalar_lea.hbm %s6102_s1, 2048 }
  0x34   : > { %p4109_p7 = scmp.ne.s32.totalorder %s6102_s1, %s4108_s16  ;;  %p4115_p0 = scmp.lt.u32.totalorder %s4108_s16, %s6102_s1 }
  0x36   : > { %p4111_p11 = pnand %p4649_p9, %p4109_p7 }
  0x38   : > { %p4112_p3 = pneg %p4111_p11 }
  0x3a   : > { %p4117_p1 = pnand %p4115_p0, %p4112_p3 }
  0x3c   : > { %4120 = shalt.err (!%p4117_p1)
}
  0x3d   : > { %s4121_s10 = scalar_lea.vmem %s320_s13, 2048  ;;  %p4129_p12 = scmp.lt.s32.totalorder %s320_s13, %s320_s13 }
  0x3e   : > { %p4122_p5 = scmp.ne.s32.totalorder %s320_s13, %s4121_s10  ;;  %p4130_p6 = scmp.lt.s32.totalorder %s4121_s10, %s4121_s10 }
  0x40   : > { %p4124_p13 = pnand %p4122_p5, %p4649_p9  ;;  %p4131_p4 = por %p4130_p6, %p4129_p12 }
  0x42   : > { %p4125_p10 = pneg %p4124_p13 }
  0x44   : > { %p4132_p2 = pnand %p4131_p4, %p4125_p10 }
  0x46   : > { %4135 = shalt.err (!%p4132_p2)
}
  0x47   : > { %s6049_s9 = smov 128   ;;  %s6051_s4 = smov 8  }
  0x48   : > { %3460 = dma.hbm_to_vmem [thread:$0]  (!%p4637_p8), %s6102_s1, 2048, %s320_s13, [#allocation7], %s6049_s9, %s6049_s9, %s6051_s4  }
  0x49   : > { %s41_s12 = sadd.s32 1, %s4434_s24  ;;  %s44_s16 = sadd.s32 1, %s4438_s25 }
  0x4a   : > { %p42_p1 = scmp.ge.s32.totalorder %s41_s12, 2  ;;  %s51_s10 = sadd.s32 1, %s4422_s21 }
  0x4b   : > { %p58_p2 = scmp.ne.s32.totalorder %s4422_s21, %s4418_s20  ;;  %p59_p4 = scmp.eq.s32.totalorder %s4442_s26, 0 }
  0x4c   : > { %s6183_s12 = smov (%p42_p1, %s41_s12), 0  ;;  %s6185_s16 = smov (!%p42_p1, %s44_s16), %s4438_s25 }
  0x4d   : > { %6104 = sst [smem:[#allocation34_spill]] %s6183_s12  ;;  %p4680_p5 = por %p59_p4, %p58_p2 }
  0x4e   : > { %s200_s6 = ssub.s32 %s4434_s24, %s6183_s12  ;;  %p46_p6 = scmp.ge.s32.totalorder %s6185_s16, 2 }
  0x4f   : > { %p201_p10 = scmp.eq.s32.totalorder %s200_s6, 0  ;;  %s203_s23 = sadd.s32 1, %s4410_s18 }
  0x50   : > { %p6106_p12 = scmp.ne.s32.totalorder %s4410_s18, %s4406_s17  ;;  %s6187_s16 = smov (%p46_p6, %s6185_s16), 0 }
  0x51   : > { %6108 = sst [smem:[#allocation35_spill]] %s6187_s16  ;;  %s48_s1 = ssub.s32 %s4438_s25, %s6187_s16 }
  0x52   : > { %p4690_p13 = por %p6106_p12, %p59_p4  ;;  %p6110_p7 = scmp.eq.s32.totalorder %s4587_s27, 3 }
  0x53   : > { %s4697_s4 = scalar_select %p201_p10, %s4410_s18, %s203_s23  }
  0x54   : > { %p4706_p11 = por %p6110_p7, %p58_p2  ;;  %p49_p3 = scmp.eq.s32.totalorder %s48_s1, 0 }
  0x55   : > { %6109 = sst [smem:[#allocation36_spill]] %s4697_s4  ;;  %s280_s2 = sor.u32 %s200_s6, %s48_s1 }
  0x56   : > { %s6111_s12 = scalar_select %p4706_p11, 1, 0 }
  0x57   : > { %p281_p0 = scmp.eq.s32.totalorder %s280_s2, 0  ;;  %s283_s8 = sadd.s32 1, %s4398_s15 }
  0x58   : > { %s4712_s22 = scalar_select %p49_p3, %s4422_s21, %s51_s10  }
  0x59   : > { %s4715_s14 = scalar_select %p281_p0, %s4398_s15, %s283_s8  }
  0x5a   : > { %p3484_p1 = scmp.lt.s32.totalorder %s4442_s26, 4  ;;  %s368_s23 = sand.u32 1, %s4442_s26  }
  0x5b   : > { %s370_s4 = sand.u32 1, %s4422_s21   ;;  %s3289_s30 = sshll.u32 %s4438_s25, 12 }
  0x5c   : > { %s3182_s16 = sshll.u32 %s370_s4, 8  ;;  %s6112_s0 = sld [smem:[#allocation42_spill]] }
  0x5d   : > { %s372_s1 = scalar_lea.vmem [#allocation3], %s3182_s16  ;;  %p4728_p2 = pnand %p3484_p1, %p4680_p5 }
  0x5e   : > { %s379_s2 = sshll.u32 %s372_s1, 4  ;;  %p4736_p4 = pnand %p3484_p1, %p4690_p13  ;;  %s4732_s2 = int_to_ptr.vmem [resolvable:$true] %s379_s2 }
  0x5f   : > { %s4740_s29 = scalar_lea.sflag [#allocation4], %s368_s23  ;;  %p4138_p10 = pneg %p4728_p2 }
  0x60   : > { %s6114_s17 = scalar_select %p4736_p4, 1, 0 }
  0x62   : > { %s4724_s20 = scalar_lea.hbm %s6112_s0, %s3289_s30  ;;  %s4141_s10 = scalar_lea.hbm %s6112_s0, 8192 }
  0x63   : > { %s4136_s30 = scalar_lea.hbm %s4724_s20, 4096  ;;  %p4142_p13 = scmp.lt.u32.totalorder %s4724_s20, %s6112_s0 }
  0x64   : > { %p4137_p6 = scmp.ne.s32.totalorder %s4724_s20, %s4136_s30  ;;  %p4143_p7 = scmp.lt.u32.totalorder %s4141_s10, %s4136_s30 }
  0x65   : > { %p4145_p0 = scmp.lt.u32.totalorder %s4136_s30, %s4724_s20 }
  0x66   : > { %p4139_p5 = pnand %p4138_p10, %p4137_p6  ;;  %p4144_p3 = por %p4143_p7, %p4142_p13 }
  0x68   : > { %p4140_p12 = pneg %p4139_p5  ;;  %p4146_p1 = por %p4145_p0, %p4144_p3 }
  0x6a   : > { %p4147_p11 = pnand %p4146_p1, %p4140_p12 }
  0x6c   : > { %4150 = shalt.err (!%p4147_p11)
}
  0x6d   : > { %s4151_s6 = scalar_lea.vmem %s4732_s2, 4096  ;;  %s4447_s23 = smov [#allocation3]  }
  0x6e   : > { %p4152_p6 = scmp.ne.s32.totalorder %s4732_s2, %s4151_s6  ;;  %s4156_s1 = sshll.u32 %s4447_s23, 4  ;;  %s4157_s1 = int_to_ptr.vmem [resolvable:$false] %s4156_s1 }
  0x6f   : > { %s4158_s4 = scalar_lea.vmem %s4157_s1, 8192  ;;  %p4159_p8 = scmp.lt.s32.totalorder %s4732_s2, %s4157_s1 }
  0x70   : > { %p4154_p5 = pnand %p4152_p6, %p4138_p10  ;;  %p4160_p13 = scmp.lt.s32.totalorder %s4158_s4, %s4151_s6 }
  0x72   : > { %p4155_p4 = pneg %p4154_p5  ;;  %p4161_p7 = por %p4160_p13, %p4159_p8 }
  0x74   : > { %p4162_p3 = pnand %p4161_p7, %p4155_p4 }
  0x76   : > { %4165 = shalt.err (!%p4162_p3)
}
  0x77   : > { %s6115_s30 = smov 8   ;;  %s6116_s16 = smov 128  }
  0x78   : > { %3470 = dma.hbm_to_vmem [thread:$0]  (!%p4728_p2), %s4724_s20, 4096, %s4732_s2, %s4740_s29, %s6116_s16, %s6116_s16, %s6115_s30  }
  0x79   : > { %s4448_s10 = smov [#allocation8]   ;;  %s4166_s6 = scalar_lea.hbm %s6026_s3, 4096 }
  0x7a   : > { %s335_s13 = sshll.u32 %s4448_s10, 4  ;;  %p4167_p8 = scmp.ne.s32.totalorder %s6026_s3, %s4166_s6  ;;  %s336_s13 = int_to_ptr.vmem [resolvable:$true] %s335_s13 }
  0x7b   : > { %p4173_p10 = scmp.lt.u32.totalorder %s4166_s6, %s6026_s3 }
  0x7c   : > { %p4169_p11 = pnand %p4167_p8, %p4649_p9 }
  0x7e   : > { %p4170_p4 = pneg %p4169_p11 }
  0x80   : > { %p4175_p12 = pnand %p4173_p10, %p4170_p4 }
  0x82   : > { %4178 = shalt.err (!%p4175_p12)
}
  0x83   : > { %s4179_s20 = scalar_lea.vmem %s336_s13, 4096  ;;  %p4187_p6 = scmp.lt.s32.totalorder %s336_s13, %s336_s13 }
  0x84   : > { %p4180_p2 = scmp.ne.s32.totalorder %s336_s13, %s4179_s20  ;;  %p4188_p5 = scmp.lt.s32.totalorder %s4179_s20, %s4179_s20 }
  0x86   : > { %p4182_p0 = pnand %p4180_p2, %p4649_p9  ;;  %p4189_p13 = por %p4188_p5, %p4187_p6 }
  0x88   : > { %p4183_p1 = pneg %p4182_p0 }
  0x8a   : > { %p4190_p7 = pnand %p4189_p13, %p4183_p1 }
  0x8c   : > { %4193 = shalt.err (!%p4190_p7)
}
  0x8d   : > { %p6117_p3 = scmp.ne.s32.totalorder %s6101_s11, 0  ;;  %s4449_s10 = smov [#allocation9]  }
  0x8e   : > { %s351_s9 = sshll.u32 %s4449_s10, 4  ;;  %s4194_s1 = scalar_lea.hbm %s6028_s5, 2048  ;;  %s352_s9 = int_to_ptr.vmem [resolvable:$true] %s351_s9 }
  0x8f   : > { %3463 = dma.hbm_to_vmem [thread:$0]  (!%p6117_p3), %s6026_s3, 4096, %s336_s13, [#allocation7], %s6116_s16, %s6116_s16, %s6115_s30  }
  0x90   : > { %p4195_p8 = scmp.ne.s32.totalorder %s6028_s5, %s4194_s1  ;;  %p4201_p10 = scmp.lt.u32.totalorder %s4194_s1, %s6028_s5 }
  0x92   : > { %p4197_p11 = pnand %p4195_p8, %p4649_p9 }
  0x94   : > { %p4198_p4 = pneg %p4197_p11 }
  0x96   : > { %p4203_p12 = pnand %p4201_p10, %p4198_p4 }
  0x98   : > { %4206 = shalt.err (!%p4203_p12)
}
  0x99   : > { %s4207_s13 = scalar_lea.vmem %s352_s9, 2048  ;;  %p4215_p6 = scmp.lt.s32.totalorder %s352_s9, %s352_s9 }
  0x9a   : > { %p4208_p2 = scmp.ne.s32.totalorder %s352_s9, %s4207_s13  ;;  %p4216_p5 = scmp.lt.s32.totalorder %s4207_s13, %s4207_s13 }
  0x9c   : > { %p4210_p0 = pnand %p4208_p2, %p4649_p9  ;;  %p4217_p13 = por %p4216_p5, %p4215_p6 }
  0x9e   : > { %p4211_p1 = pneg %p4210_p0 }
  0xa0   : > { %p4218_p7 = pnand %p4217_p13, %p4211_p1 }
  0xa2   : > { %4221 = shalt.err (!%p4218_p7)
}
  0xa3   : > { %s4450_s0 = smov 64   ;;  %s4451_s25 = smov 4  }
  0xa4   : > { %3466 = dma.hbm_to_vmem [thread:$0]  (!%p6117_p3), %s6028_s5, 2048, %s352_s9, [#allocation10], %s4450_s0, %s4450_s0, %s4451_s25  }
  0xa5   : > { %s391_s28 = sand.u32 1, %s4410_s18   ;;  %s3290_s23 = sshll.u32 %s4434_s24, 7 }
  0xa6   : > { %s3185_s6 = sshll.u32 %s391_s28, 7  ;;  %s4815_s8 = scalar_lea.hbm %s6030_s7, %s3290_s23 }
  0xa7   : > { %s393_s20 = scalar_lea.vmem [#allocation11], %s3185_s6  ;;  %s4222_s11 = scalar_lea.hbm %s4815_s8, 2048 }
  0xa8   : > { %s400_s13 = sshll.u32 %s393_s20, 4  ;;  %p4223_p9 = scmp.ne.s32.totalorder %s4815_s8, %s4222_s11  ;;  %s4817_s13 = int_to_ptr.vmem [resolvable:$true] %s400_s13 }
  0xa9   : > { %p6118_p8 = scmp.ne.s32.totalorder %s6114_s17, 0  ;;  %s4227_s25 = scalar_lea.hbm %s6030_s7, 4096 }
  0xaa   : > { %p4228_p10 = scmp.lt.u32.totalorder %s4815_s8, %s6030_s7  ;;  %p4229_p12 = scmp.lt.u32.totalorder %s4227_s25, %s4222_s11 }
  0xab   : > { %p4224_p3 = pneg %p6118_p8  ;;  %p4231_p0 = scmp.lt.u32.totalorder %s4222_s11, %s4815_s8 }
  0xac   : > { %p4230_p2 = por %p4229_p12, %p4228_p10 }
  0xad   : > { %p4225_p11 = pnand %p4224_p3, %p4223_p9 }
  0xae   : > { %p4232_p1 = por %p4231_p0, %p4230_p2 }
  0xaf   : > { %p4226_p4 = pneg %p4225_p11 }
  0xb1   : > { %p4233_p6 = pnand %p4232_p1, %p4226_p4 }
  0xb3   : > { %4236 = shalt.err (!%p4233_p6)
}
  0xb4   : > { %s4237_s28 = scalar_lea.vmem %s4817_s13, 2048  ;;  %s4452_s23 = smov [#allocation11]  }
  0xb5   : > { %p4238_p5 = scmp.ne.s32.totalorder %s4817_s13, %s4237_s28  ;;  %s4242_s6 = sshll.u32 %s4452_s23, 4  ;;  %s4243_s6 = int_to_ptr.vmem [resolvable:$false] %s4242_s6 }
  0xb6   : > { %s4244_s1 = scalar_lea.vmem %s4243_s6, 4096  ;;  %p4245_p9 = scmp.lt.s32.totalorder %s4817_s13, %s4243_s6 }
  0xb7   : > { %p4240_p13 = pnand %p4238_p5, %p4224_p3  ;;  %p4246_p11 = scmp.lt.s32.totalorder %s4244_s1, %s4237_s28 }
  0xb9   : > { %p4241_p7 = pneg %p4240_p13  ;;  %p4247_p10 = por %p4246_p11, %p4245_p9 }
  0xbb   : > { %p4248_p12 = pnand %p4247_p10, %p4241_p7 }
  0xbd   : > { %4251 = shalt.err (!%p4248_p12)
}
  0xbe   : > { %s4453_s4 = smov 256   ;;  %p6119_p3 = scmp.ne.s32.totalorder %s6100_s19, 0 }
  0xbf   : > { %3473 = dma.hbm_to_vmem [thread:$0]  (!%p6118_p8), %s4815_s8, 2048, %s4817_s13, %s4740_s29, %s4453_s4, %s6116_s16, %s6115_s30  }
  0xc0   : > { %420 = sbr.rel (%p6119_p3) target bundleno = 1409 (0x581), region = 56  ;;  %s6120_s20 = sld [smem:[#allocation25_spill]] (!%p6119_p3) }
  0xc1   : > { %s6121_s11 = sld [smem:[#allocation29_spill]] (!%p6119_p3)  ;;  %s422_s9 = sand.u32 (!%p6119_p3), 1, %s4587_s27  }
  0xc2   : > { %s423_s2 = scalar_lea.sflag (!%p6119_p3), [#allocation4], %s422_s9 }
  0xc6   : > { %s424_s0 = sand.u32 (!%p6119_p3), 1, %s6120_s20  }
  0xc7   : > { %s3189_s25 = sshll.u32 %s424_s0, 8  ;;  %p6122_p4 = scmp.ne.s32.totalorder %s6121_s11, 0 }
  0xc8   : > { %s4853_s10 = scalar_lea.vmem [#allocation3], %s3189_s25 }
  0xc9   : > { %4365 = dma.done.wait (%p6122_p4), %s423_s2, 4096  }
  0xca   : > { %4367 = vsyncadd (%p6122_p4), %s423_s2, 4294963200  ;;  %p6123_p8 = scmp.eq.s32.totalorder %s4587_s27, 0 }
  0xcc   : > { %4369 = dma.done.wait (%p6123_p8), [#allocation7], 6144   ;;  %p6124_p2 = pmov %p6123_p8 }
  0xce   : > { %4371 = vsyncadd (%p6124_p2), [#allocation7], 4294961152  ;;  %p6125_p0 = pmov %p6124_p2 }
  0xd0   : > { %4373 = dma.done.wait (%p6125_p0), [#allocation10], 2048   ;;  %p6126_p1 = pmov %p6125_p0 }
  0xd1   : > { %s6127_s19 = sld [smem:[#allocation23_spill]]  ;;  %s6128_s17 = sld [smem:[#allocation30_spill]] }
  0xd2   : > { %4375 = vsyncadd (%p6126_p1), [#allocation10], 4294965248 }
  0xd7   : > { %s445_s29 = sand.u32 1, %s6127_s19   ;;  %p6129_p6 = scmp.ne.s32.totalorder %s6128_s17, 0 }
  0xd8   : > { %s3193_s30 = sshll.u32 %s445_s29, 7 }
  0xd9   : > { %s4868_s16 = scalar_lea.vmem [#allocation11], %s3193_s30 }
  0xda   : > { %4377 = dma.done.wait (%p6129_p6), %s423_s2, 2048  }
  0xdb   : > { %4379 = vsyncadd (%p6129_p6), %s423_s2, 4294965248  ;;  %s6130_s8 = sld [smem:[#allocation22_spill]]  ;;  %s6131_s13 = sld [smem:[#allocation26_spill]] }
  0xdc   : > { %s6132_s20 = sld [smem:[#allocation47_spill]]  ;;  %s4888_s9 = scalar_lea.vmem [#allocation12], %s3189_s25 }
  0xe1   : > { %s495_s28 = sand.u32 1, %s6130_s8   ;;  %s4878_s6 = sshll.u32 %s6131_s13, 1 }
  0xe2   : > { %s3195_s23 = sshll.u32 %s495_s28, 9  ;;  %p501_p5 = scmp.lt.s32.totalorder %s4878_s6, 3 }
  0xe3   : > { %s4890_s2 = scalar_lea.vmem [#allocation13], %s3195_s23  ;;  %p3197_p13 = scmp.ne.s32.totalorder %s6131_s13, 0 }
  0xe4   : > { %s4882_s27 = scalar_select %p501_p5, %s4878_s6, 3 }
  0xe5   : > { %512 = sbr.rel (%p3197_p13) target bundleno = 1086 (0x43e), region = 80 }
  0xe6   : > { %s503_s11 = scalar_lea.vmem %s6132_s20, %s4882_s27 }
  0xec   : > { %v3616_v0 = vld [vmem:[#allocation6 + $0x4] ss:$8 sps:$4 sm:$0xff]   ;;  %v3618_v1 = vld [vmem:[#allocation6] ss:$8 sps:$4 sm:$0xff]   ;;  %v4454_v2 = vmov 0   ;;  %v515_v25 = vld [vmem:[%s4853_s10 + $0x10] sm:$0xff] }
  0xed   : > { %701 = vmatprep.mubr.bf16.mxu0 %v4454_v2  ;;  %781 = vmatprep.mubr.bf16.mxu1 %v4454_v2  ;;  %v3619_v3 = vld [vmem:[#allocation6 + $0x14] ss:$8 sps:$4 sm:$0xff]   ;;  %v3621_v4 = vld [vmem:[#allocation6 + $0x10] ss:$8 sps:$4 sm:$0xff]   ;;  %v3622_v5 = vld [vmem:[#allocation6 + $0x24] ss:$8 sps:$4 sm:$0xff]  }
  0xee   : > { %669 = vmatprep.subr.bf16.mxu0 %v3616_v0  ;;  %3405 = vmatprep.subr.bf16.mxu1 %v3616_v0  ;;  %v3624_v6 = vld [vmem:[#allocation6 + $0x20] ss:$8 sps:$4 sm:$0xff]   ;;  %v3625_v7 = vld [vmem:[#allocation6 + $0x34] ss:$8 sps:$4 sm:$0xff]   ;;  %v3627_v8 = vld [vmem:[#allocation6 + $0x30] ss:$8 sps:$4 sm:$0xff]  }
  0xef   : > { %670 = vmatpush1.bf16.msra.mxu0 %v3618_v1  ;;  %3413 = vmatpush1.bf16.msra.mxu1 %v3618_v1  ;;  %v3628_v9 = vld [vmem:[#allocation6 + $0x44] ss:$8 sps:$4 sm:$0xff]   ;;  %v3630_v10 = vld [vmem:[#allocation6 + $0x40] ss:$8 sps:$4 sm:$0xff]   ;;  %v3631_v11 = vld [vmem:[#allocation6 + $0x54] ss:$8 sps:$4 sm:$0xff]  }
  0xf0   : > { %671 = vmatprep.subr.bf16.mxu0 %v3619_v3  ;;  %3406 = vmatprep.subr.bf16.mxu1 %v3619_v3  ;;  %v3633_v12 = vld [vmem:[#allocation6 + $0x50] ss:$8 sps:$4 sm:$0xff]   ;;  %v3634_v13 = vld [vmem:[#allocation6 + $0x64] ss:$8 sps:$4 sm:$0xff]   ;;  %v3636_v14 = vld [vmem:[#allocation6 + $0x60] ss:$8 sps:$4 sm:$0xff]  }
  0xf1   : > { %v3637_v15 = vld [vmem:[#allocation6 + $0x74] ss:$8 sps:$4 sm:$0xff]   ;;  %v3639_v16 = vld [vmem:[#allocation6 + $0x70] ss:$8 sps:$4 sm:$0xff]   ;;  %v513_v17 = vld [vmem:[%s4853_s10] sm:$0xff]  ;;  %s6134_s17 = sld [smem:[#allocation44_spill]] }
  0xf2   : > { %v514_v18 = vld [vmem:[%s4853_s10 + $0x8] sm:$0xff]  ;;  %v529_v19 = vld [vmem:[%s4853_s10 + $0x80] sm:$0xff]  ;;  %v516_v26 = vld [vmem:[%s4853_s10 + $0x18] sm:$0xff]  ;;  %s6143_s8 = sld [smem:[#allocation45_spill]]  ;;  %s6147_s1 = sld [smem:[#allocation46_spill]] }
  0xf3   : > { %672 = vmatpush1.bf16.msra.mxu0 %v3621_v4  ;;  %3414 = vmatpush1.bf16.msra.mxu1 %v3621_v4  ;;  %v530_v20 = vld [vmem:[%s4853_s10 + $0x88] sm:$0xff]  ;;  %v545_v22 = vpack.c.bf16 %v514_v18, %v513_v17  ;;  %v3645_v27 = vld [vmem:[#allocation8 + $0x14] ss:$8 sps:$4 sm:$0xff]   ;;  %v3643_v30 = vld [vmem:[#allocation8 + $0x10] ss:$8 sps:$4 sm:$0xff]   ;;  %v546_v32 = vpack.c.bf16 %v516_v26, %v515_v25 }
  0xf4   : > { %673 = vmatprep.subr.bf16.mxu0 %v3622_v5  ;;  %3407 = vmatprep.subr.bf16.mxu1 %v3622_v5  ;;  %v3642_v21 = vld [vmem:[#allocation8 + $0x4] ss:$8 sps:$4 sm:$0xff]   ;;  %v553_v23 = vpack.c.bf16 %v530_v20, %v529_v19  ;;  %v3640_v24 = vld [vmem:[#allocation8] ss:$8 sps:$4 sm:$0xff]   ;;  %v531_v28 = vld [vmem:[%s4853_s10 + $0x90] sm:$0xff] }
  0xf5   : > { %v532_v29 = vld [vmem:[%s4853_s10 + $0x98] sm:$0xff]  ;;  %v3648_v31 = vld [vmem:[#allocation8 + $0x24] ss:$8 sps:$4 sm:$0xff]   ;;  %v3646_v34 = vld [vmem:[#allocation8 + $0x20] ss:$8 sps:$4 sm:$0xff]  }
  0xf6   : > { %v554_v33 = vpack.c.bf16 %v532_v29, %v531_v28  ;;  %v3651_v35 = vld [vmem:[#allocation8 + $0x34] ss:$8 sps:$4 sm:$0xff]   ;;  %v517_v36 = vld [vmem:[%s4853_s10 + $0x20] sm:$0xff]  ;;  %v518_v37 = vld [vmem:[%s4853_s10 + $0x28] sm:$0xff] }
  0xf7   : > { %674 = vmatpush1.bf16.msra.mxu0 %v3624_v6  ;;  %3415 = vmatpush1.bf16.msra.mxu1 %v3624_v6  ;;  %v533_v38 = vld [vmem:[%s4853_s10 + $0xa0] sm:$0xff]  ;;  %v534_v39 = vld [vmem:[%s4853_s10 + $0xa8] sm:$0xff]  ;;  %v3649_v40 = vld [vmem:[#allocation8 + $0x30] ss:$8 sps:$4 sm:$0xff]   ;;  %v547_v42 = vpack.c.bf16 %v518_v37, %v517_v36 }
  0xf8   : > { %675 = vmatprep.subr.bf16.mxu0 %v3625_v7  ;;  %3408 = vmatprep.subr.bf16.mxu1 %v3625_v7  ;;  %v3654_v41 = vld [vmem:[#allocation8 + $0x44] ss:$8 sps:$4 sm:$0xff]   ;;  %v555_v43 = vpack.c.bf16 %v534_v39, %v533_v38  ;;  %v3652_v44 = vld [vmem:[#allocation8 + $0x40] ss:$8 sps:$4 sm:$0xff]   ;;  %v3657_v45 = vld [vmem:[#allocation8 + $0x54] ss:$8 sps:$4 sm:$0xff]  }
  0xf9   : > { %v519_v46 = vld [vmem:[%s4853_s10 + $0x30] sm:$0xff]  ;;  %v520_v47 = vld [vmem:[%s4853_s10 + $0x38] sm:$0xff]  ;;  %v3660_v51 = vld [vmem:[#allocation8 + $0x64] ss:$8 sps:$4 sm:$0xff]  }
  0xfa   : > { %v535_v48 = vld [vmem:[%s4853_s10 + $0xb0] sm:$0xff]  ;;  %v536_v49 = vld [vmem:[%s4853_s10 + $0xb8] sm:$0xff]  ;;  %v548_v52 = vpack.c.bf16 %v520_v47, %v519_v46  ;;  %v3658_v54 = vld [vmem:[#allocation8 + $0x60] ss:$8 sps:$4 sm:$0xff]  }
  0xfb   : > { %676 = vmatpush1.bf16.msra.mxu0 %v3627_v8  ;;  %3416 = vmatpush1.bf16.msra.mxu1 %v3627_v8  ;;  %v3655_v50 = vld [vmem:[#allocation8 + $0x50] ss:$8 sps:$4 sm:$0xff]   ;;  %v556_v53 = vpack.c.bf16 %v536_v49, %v535_v48  ;;  %v3663_v55 = vld [vmem:[#allocation8 + $0x74] ss:$8 sps:$4 sm:$0xff]   ;;  %v521_v56 = vld [vmem:[%s4853_s10 + $0x40] sm:$0xff] }
  0xfc   : > { %677 = vmatprep.subr.bf16.mxu0 %v3628_v9  ;;  %3409 = vmatprep.subr.bf16.mxu1 %v3628_v9  ;;  %v522_v57 = vld [vmem:[%s4853_s10 + $0x48] sm:$0xff]  ;;  %v537_v58 = vld [vmem:[%s4853_s10 + $0xc0] sm:$0xff]  ;;  %v3661_v60 = vld [vmem:[#allocation8 + $0x70] ss:$8 sps:$4 sm:$0xff]  }
  0xfd   : > { %v538_v59 = vld [vmem:[%s4853_s10 + $0xc8] sm:$0xff]  ;;  %v549_v62 = vpack.c.bf16 %v522_v57, %v521_v56  ;;  %v3669_v1 = vld [vmem:[#allocation8 + $0x94] ss:$8 sps:$4 sm:$0xff]   ;;  %v3667_v7 = vld [vmem:[#allocation8 + $0x90] ss:$8 sps:$4 sm:$0xff]  }
  0xfe   : > { %v3666_v61 = vld [vmem:[#allocation8 + $0x84] ss:$8 sps:$4 sm:$0xff]   ;;  %v557_v63 = vpack.c.bf16 %v538_v59, %v537_v58  ;;  %v3664_v0 = vld [vmem:[#allocation8 + $0x80] ss:$8 sps:$4 sm:$0xff]   ;;  %v523_v3 = vld [vmem:[%s4853_s10 + $0x50] sm:$0xff] }
  0xff   : > { %678 = vmatpush1.bf16.msra.mxu0 %v3630_v10  ;;  %3417 = vmatpush1.bf16.msra.mxu1 %v3630_v10  ;;  %v524_v4 = vld [vmem:[%s4853_s10 + $0x58] sm:$0xff]  ;;  %v539_v5 = vld [vmem:[%s4853_s10 + $0xd0] sm:$0xff]  ;;  %v525_v10 = vld [vmem:[%s4853_s10 + $0x60] sm:$0xff] }
 0x100   : > { %679 = vmatprep.subr.bf16.mxu0 %v3631_v11  ;;  %3410 = vmatprep.subr.bf16.mxu1 %v3631_v11  ;;  %v540_v6 = vld [vmem:[%s4853_s10 + $0xd8] sm:$0xff]  ;;  %v550_v8 = vpack.c.bf16 %v524_v4, %v523_v3  ;;  %v526_v11 = vld [vmem:[%s4853_s10 + $0x68] sm:$0xff]  ;;  %v543_v18 = vld [vmem:[%s4853_s10 + $0xf0] sm:$0xff] }
 0x101   : > { %v558_v9 = vpack.c.bf16 %v540_v6, %v539_v5  ;;  %v528_v17 = vld [vmem:[%s4853_s10 + $0x78] sm:$0xff]  ;;  %v3678_v26 = vld [vmem:[#allocation8 + $0xc4] ss:$8 sps:$4 sm:$0xff]   ;;  %v577_v36 = vld [vmem:[%s6134_s17] sm:$0x3] }
 0x102   : > { %v544_v19 = vld [vmem:[%s4853_s10 + $0xf8] sm:$0xff]  ;;  %v3684_v29 = vld [vmem:[#allocation8 + $0xe4] ss:$8 sps:$4 sm:$0xff]  }
 0x103   : > { %680 = vmatpush1.bf16.msra.mxu0 %v3633_v12  ;;  %3418 = vmatpush1.bf16.msra.mxu1 %v3633_v12  ;;  %v541_v12 = vld [vmem:[%s4853_s10 + $0xe0] sm:$0xff]  ;;  %v3673_v25 = vld [vmem:[#allocation8 + $0xb0] ss:$8 sps:$4 sm:$0xff]   ;;  %v3681_v28 = vld [vmem:[#allocation8 + $0xd4] ss:$8 sps:$4 sm:$0xff]  }
 0x104   : > { %681 = vmatprep.subr.bf16.mxu0 %v3634_v13  ;;  %3411 = vmatprep.subr.bf16.mxu1 %v3634_v13  ;;  %v542_v13 = vld [vmem:[%s4853_s10 + $0xe8] sm:$0xff] }
 0x107   : > { %682 = vmatpush1.bf16.msra.mxu0 %v3636_v14  ;;  %3419 = vmatpush1.bf16.msra.mxu1 %v3636_v14  ;;  %v551_v14 = vpack.c.bf16 %v526_v11, %v525_v10 }
 0x108   : > { %683 = vmatprep.subr.bf16.mxu0 %v3637_v15  ;;  %3412 = vmatprep.subr.bf16.mxu1 %v3637_v15  ;;  %v559_v15 = vpack.c.bf16 %v542_v13, %v541_v12 }
 0x10b   : > { %684 = vmatpush1.bf16.msra.mxu0 %v3639_v16  ;;  %3420 = vmatpush1.bf16.msra.mxu1 %v3639_v16  ;;  %v527_v16 = vld [vmem:[%s4853_s10 + $0x70] sm:$0xff] }
 0x10c   : > { %1418 = vmatprep.subr.bf16.mxu1 %v3642_v21  ;;  %v552_v20 = vpack.c.bf16 %v528_v17, %v527_v16  ;;  %v560_v21 = vpack.c.bf16 %v544_v19, %v543_v18 }
 0x10e   : > { %702 = vmatmul.mubr.bf16.vlgmr.msra.gmra.mrb[0].mxu0 %v545_v22  ;;  %782 = vmatmul.mubr.bf16.vlgmr.msra.gmra.mrb[0].mxu1 %v553_v23  ;;  %v3672_v22 = vld [vmem:[#allocation8 + $0xa4] ss:$8 sps:$4 sm:$0xff]   ;;  %v3670_v23 = vld [vmem:[#allocation8 + $0xa0] ss:$8 sps:$4 sm:$0xff]  }
 0x10f   : > { %711 = vmatprep.mubr.bf16.mxu0 %v4454_v2  ;;  %791 = vmatprep.mubr.bf16.mxu1 %v4454_v2 }
 0x110   : > { %1419 = vmatpush1.bf16.msra.mxu1 %v3640_v24  ;;  %v3675_v24 = vld [vmem:[#allocation8 + $0xb4] ss:$8 sps:$4 sm:$0xff]  }
 0x111   : > { %1420 = vmatprep.subr.bf16.mxu1 %v3645_v27  ;;  %v3676_v27 = vld [vmem:[#allocation8 + $0xc0] ss:$8 sps:$4 sm:$0xff]  }
 0x114   : > { %1421 = vmatpush1.bf16.msra.mxu1 %v3643_v30  ;;  %v3682_v30 = vld [vmem:[#allocation8 + $0xe0] ss:$8 sps:$4 sm:$0xff]  }
 0x115   : > { %1422 = vmatprep.subr.bf16.mxu1 %v3648_v31  ;;  %v3687_v31 = vld [vmem:[#allocation8 + $0xf4] ss:$8 sps:$4 sm:$0xff]  }
 0x116   : > { %712 = vmatmul.mubr.bf16.gmra.mrb[4].mxu0 %v546_v32  ;;  %792 = vmatmul.mubr.bf16.gmra.mrb[4].mxu1 %v554_v33  ;;  %v3685_v32 = vld [vmem:[#allocation8 + $0xf0] ss:$8 sps:$4 sm:$0xff]   ;;  %v579_v33 = vlaneseq }
 0x117   : > { %721 = vmatprep.mubr.bf16.mxu0 %v4454_v2  ;;  %801 = vmatprep.mubr.bf16.mxu1 %v4454_v2 }
 0x118   : > { %1423 = vmatpush1.bf16.msra.mxu1 %v3646_v34  ;;  %v4941_v34 = vshrl.u32 %v579_v33, 7 }
 0x119   : > { %1424 = vmatprep.subr.bf16.mxu1 %v3651_v35 }
 0x11a   : > { %6133 = vst [vmem:[#allocation37_spill] sm:$0xff] %v4941_v34  ;;  %v6071_v35 = vsub.s32 0, %v4941_v34  ;;  %v6070_v37 = vsub.s32 1, %v4941_v34 }
 0x11c   : > { %1425 = vmatpush1.bf16.msra.mxu1 %v3649_v40  ;;  %v4950_v38 = vrot.slane %v577_v36, %v6071_v35  ;;  %v4954_v39 = vrot.slane %v577_v36, %v6070_v37 }
 0x11d   : > { %1426 = vmatprep.subr.bf16.mxu1 %v3654_v41 }
 0x11e   : > { %722 = vmatmul.mubr.bf16.gmra.mrb[8].mxu0 %v547_v42  ;;  %802 = vmatmul.mubr.bf16.gmra.mrb[8].mxu1 %v555_v43 }
 0x11f   : > { %731 = vmatprep.mubr.bf16.mxu0 %v4454_v2  ;;  %811 = vmatprep.mubr.bf16.mxu1 %v4454_v2 }
 0x120   : > { %1427 = vmatpush1.bf16.msra.mxu1 %v3652_v44 }
 0x121   : > { %1428 = vmatprep.subr.bf16.mxu1 %v3657_v45 }
 0x124   : > { %1429 = vmatpush1.bf16.msra.mxu1 %v3655_v50 }
 0x125   : > { %1430 = vmatprep.subr.bf16.mxu1 %v3660_v51 }
 0x126   : > { %732 = vmatmul.mubr.bf16.gmra.mrb[12].mxu0 %v548_v52  ;;  %812 = vmatmul.mubr.bf16.gmra.mrb[12].mxu1 %v556_v53 }
 0x127   : > { %741 = vmatprep.mubr.bf16.mxu0 %v4454_v2  ;;  %821 = vmatprep.mubr.bf16.mxu1 %v4454_v2 }
 0x128   : > { %1431 = vmatpush1.bf16.msra.mxu1 %v3658_v54 }
 0x129   : > { %1432 = vmatprep.subr.bf16.mxu1 %v3663_v55 }
 0x12c   : > { %1433 = vmatpush1.bf16.msra.mxu1 %v3661_v60 }
 0x12d   : > { %1434 = vmatprep.subr.bf16.mxu1 %v3666_v61 }
 0x12e   : > { %742 = vmatmul.mubr.bf16.gmra.mrb[16].mxu0 %v549_v62  ;;  %822 = vmatmul.mubr.bf16.gmra.mrb[16].mxu1 %v557_v63 }
 0x12f   : > { %751 = vmatprep.mubr.bf16.mxu0 %v4454_v2  ;;  %831 = vmatprep.mubr.bf16.mxu1 %v4454_v2 }
 0x130   : > { %1435 = vmatpush1.bf16.msra.mxu1 %v3664_v0 }
 0x131   : > { %1436 = vmatprep.subr.bf16.mxu1 %v3669_v1 }
 0x134   : > { %1437 = vmatpush1.bf16.msra.mxu1 %v3667_v7 }
 0x135   : > { %1438 = vmatprep.subr.bf16.mxu1 %v3672_v22 }
 0x136   : > { %752 = vmatmul.mubr.bf16.gmra.mrb[20].mxu0 %v550_v8  ;;  %832 = vmatmul.mubr.bf16.gmra.mrb[20].mxu1 %v558_v9 }
 0x137   : > { %761 = vmatprep.mubr.bf16.mxu0 %v4454_v2  ;;  %841 = vmatprep.mubr.bf16.mxu1 %v4454_v2 }
 0x138   : > { %1439 = vmatpush1.bf16.msra.mxu1 %v3670_v23 }
 0x139   : > { %1440 = vmatprep.subr.bf16.mxu1 %v3675_v24 }
 0x13c   : > { %1441 = vmatpush1.bf16.msra.mxu1 %v3673_v25 }
 0x13d   : > { %1442 = vmatprep.subr.bf16.mxu1 %v3678_v26 }
 0x13e   : > { %762 = vmatmul.mubr.bf16.gmra.mrb[24].mxu0 %v551_v14  ;;  %842 = vmatmul.mubr.bf16.gmra.mrb[24].mxu1 %v559_v15 }
 0x13f   : > { %771 = vmatprep.mubr.bf16.mxu0 %v4454_v2  ;;  %851 = vmatprep.mubr.bf16.mxu1 %v4454_v2  ;;  %v3679_v2 = vld [vmem:[#allocation8 + $0xd0] ss:$8 sps:$4 sm:$0xff]  }
 0x140   : > { %1443 = vmatpush1.bf16.msra.mxu1 %v3676_v27 }
 0x141   : > { %1444 = vmatprep.subr.bf16.mxu1 %v3681_v28 }
 0x144   : > { %1445 = vmatpush1.bf16.msra.mxu1 %v3679_v2 }
 0x145   : > { %1446 = vmatprep.subr.bf16.mxu1 %v3684_v29 }
 0x146   : > { %772 = vmatmul.mubr.bf16.gmra.mrb[28].mxu0 %v552_v20  ;;  %852 = vmatmul.mubr.bf16.gmra.mrb[28].mxu1 %v560_v21 }
 0x148   : > { %1447 = vmatpush1.bf16.msra.mxu1 %v3682_v30 }
 0x149   : > { %1448 = vmatprep.subr.bf16.mxu1 %v3687_v31 }
 0x14c   : > { %1449 = vmatpush1.bf16.msra.mxu1 %v3685_v32 }
 0x1e1   : > { %v703_v40 = vpop.f32.mrb[0].mxu0  ;;  %v783_v41 = vpop.f32.mrb[0].mxu1 }
 0x1e2   : > { %v704_v42 = vadd.f32 %v703_v40, %v4950_v38  ;;  %v705_v43 = vpop.f32.mrb[1].mxu0  ;;  %v784_v44 = vadd.f32 %v783_v41, %v4950_v38  ;;  %v785_v45 = vpop.f32.mrb[1].mxu1 }
 0x1e3   : > { %v706_v46 = vadd.f32 %v705_v43, %v4954_v39  ;;  %v707_v47 = vpop.f32.mrb[2].mxu0  ;;  %v786_v48 = vadd.f32 %v785_v45, %v4954_v39  ;;  %v787_v49 = vpop.f32.mrb[2].mxu1 }
 0x1e4   : > { %v926_v50 = vmul.f32 0.70710677, %v704_v42  ;;  %v708_v51 = vadd.f32 %v707_v47, %v4950_v38  ;;  %v709_v52 = vpop.f32.mrb[3].mxu0  ;;  %v789_v53 = vpop.f32.mrb[3].mxu1  ;;  %v958_v57 = vmul.f32 0.70710677, %v784_v44  ;;  %v788_v60 = vadd.f32 %v787_v49, %v4950_v38 }
 0x1e5   : > { %v927_v54 = vmul.f32 0.70710677, %v706_v46  ;;  %v710_v55 = vadd.f32 %v709_v52, %v4954_v39  ;;  %v959_v59 = vmul.f32 0.70710677, %v786_v48  ;;  %v790_v61 = vadd.f32 %v789_v53, %v4954_v39 }
 0x1e6   : > { %3704 = verf.f32 %v926_v50  ;;  %v928_v56 = vmul.f32 0.70710677, %v708_v51  ;;  %v4964_v0 = vmul.f32 0.5, %v704_v42  ;;  %v960_v4 = vmul.f32 0.70710677, %v788_v60 }
 0x1e7   : > { %3706 = verf.f32 %v927_v54  ;;  %v929_v58 = vmul.f32 0.70710677, %v710_v55  ;;  %v4968_v8 = vmul.f32 0.5, %v784_v44  ;;  %v961_v9 = vmul.f32 0.70710677, %v790_v61 }
 0x1e8   : > { %3708 = verf.f32 %v928_v56  ;;  %v863_v11 = vmul.f32 0.5, %v706_v46  ;;  %v864_v16 = vmul.f32 0.5, %v708_v51  ;;  %v4974_v20 = vmul.f32 0.5, %v786_v48 }
 0x1e9   : > { %3710 = verf.f32 %v929_v58  ;;  %v713_v62 = vpop.f32.mrb[4].mxu0  ;;  %v793_v63 = vpop.f32.mrb[4].mxu1  ;;  %v865_v22 = vmul.f32 0.5, %v710_v55  ;;  %v4978_v26 = vmul.f32 0.5, %v788_v60  ;;  %v4980_v27 = vmul.f32 0.5, %v790_v61 }
 0x1ea   : > { %v714_v1 = vadd.f32 %v713_v62, %v4950_v38  ;;  %v715_v3 = vpop.f32.mrb[5].mxu0  ;;  %3712 = verf.f32 %v958_v57  ;;  %v795_v5 = vpop.f32.mrb[5].mxu1  ;;  %v794_v21 = vadd.f32 %v793_v63, %v4950_v38 }
 0x1eb   : > { %v716_v6 = vadd.f32 %v715_v3, %v4954_v39  ;;  %v717_v7 = vpop.f32.mrb[6].mxu0  ;;  %3714 = verf.f32 %v959_v59  ;;  %v797_v10 = vpop.f32.mrb[6].mxu1  ;;  %v796_v24 = vadd.f32 %v795_v5, %v4954_v39  ;;  %v3689_v3 = vld [vmem:[#allocation9] sm:$0xff]  }
 0x1ec   : > { %v930_v12 = vmul.f32 0.70710677, %v714_v1  ;;  %v718_v13 = vadd.f32 %v717_v7, %v4950_v38  ;;  %v719_v14 = vpop.f32.mrb[7].mxu0  ;;  %3716 = verf.f32 %v960_v4  ;;  %v4971_v15 = vpop.f32.mrb[7].mxu1  ;;  %v962_v28 = vmul.f32 0.70710677, %v794_v21 }
 0x1ed   : > { %v931_v17 = vmul.f32 0.70710677, %v716_v6  ;;  %v720_v18 = vadd.f32 %v719_v14, %v4954_v39  ;;  %3718 = verf.f32 %v961_v9  ;;  %v4982_v30 = vmul.f32 0.5, %v714_v1  ;;  %v3688_v1 = vld [vmem:[#allocation9 + $0x40] sm:$0xff]   ;;  %v3690_v4 = vld [vmem:[#allocation9 + $0x48] sm:$0xff]  }
 0x1ee   : > { %3720 = verf.f32 %v930_v12  ;;  %v932_v19 = vmul.f32 0.70710677, %v718_v13  ;;  %v4984_v31 = vmul.f32 0.5, %v716_v6  ;;  %v4988_v41 = vmul.f32 0.5, %v718_v13  ;;  %3293 = vmatprep.subr.bf16.mxu0 %v3688_v1 }
 0x1ef   : > { %3722 = verf.f32 %v931_v17  ;;  %v933_v23 = vmul.f32 0.70710677, %v720_v18  ;;  %v4990_v42 = vmul.f32 0.5, %v720_v18  ;;  %v4996_v50 = vmul.f32 0.5, %v794_v21  ;;  %3294 = vmatpush3.bf16.msra.mxu0 %v3689_v3 }
 0x1f0   : > { %v3705_v25 = vpop.eup %3704  ;;  %3724 = verf.f32 %v932_v19  ;;  %v963_v51 = vmul.f32 0.70710677, %v796_v24  ;;  %v5001_v57 = vadd.f32 %v797_v10, %v4950_v38  ;;  %3295 = vmatprep.subr.bf16.mxu0 %v3690_v4 }
 0x1f1   : > { %v3707_v2 = vpop.eup %3706  ;;  %v1054_v29 = vadd.f32 1.0, %v3705_v25  ;;  %3726 = verf.f32 %v933_v23  ;;  %v723_v32 = vpop.f32.mrb[8].mxu0 }
 0x1f2   : > { %v4986_v33 = vpop.f32.mrb[8].mxu1  ;;  %v3709_v36 = vpop.eup %3708  ;;  %v1055_v40 = vadd.f32 1.0, %v3707_v2  ;;  %v724_v43 = vadd.f32 %v723_v32, %v4950_v38  ;;  %3728 = verf.f32 %v962_v28  ;;  %v5015_v18 = vmul.f32 0.5, %v5001_v57  ;;  %v3692_v28 = vld [vmem:[#allocation9 + $0x50] sm:$0xff]  }
 0x1f3   : > { %v725_v44 = vpop.f32.mrb[9].mxu0  ;;  %v4993_v45 = vpop.f32.mrb[9].mxu1  ;;  %v1056_v47 = vadd.f32 1.0, %v3709_v36  ;;  %v1118_v60 = vmul.f32 %v1054_v29, %v4964_v0  ;;  %v5012_v0 = vmul.f32 0.5, %v796_v24 }
 0x1f4   : > { %v3711_v46 = vpop.eup %3710  ;;  %v726_v48 = vadd.f32 %v725_v44, %v4954_v39  ;;  %v727_v49 = vpop.f32.mrb[10].mxu0  ;;  %v934_v55 = vmul.f32 0.70710677, %v724_v43  ;;  %v1119_v6 = vmul.f32 %v1055_v40, %v863_v11  ;;  %v3691_v11 = vld [vmem:[#allocation9 + $0x8] sm:$0xff]  }
 0x1f5   : > { %v4998_v52 = vpop.f32.mrb[10].mxu1  ;;  %v3713_v53 = vpop.eup %3712  ;;  %v1057_v54 = vadd.f32 1.0, %v3711_v46  ;;  %v1120_v61 = vmul.f32 %v1056_v47, %v864_v16  ;;  %v728_v63 = vadd.f32 %v727_v49, %v4950_v38  ;;  %3296 = vmatpush3.bf16.msra.mxu0 %v3691_v11 }
 0x1f6   : > { %v729_v56 = vpop.f32.mrb[11].mxu0  ;;  %v5003_v58 = vpop.f32.mrb[11].mxu1  ;;  %v935_v62 = vmul.f32 0.70710677, %v726_v48  ;;  %3730 = verf.f32 %v934_v55  ;;  %v5019_v23 = vmul.f32 0.5, %v726_v48  ;;  %v1086_v40 = vadd.f32 1.0, %v3713_v53  ;;  %3297 = vmatprep.subr.bf16.mxu0 %v3692_v28 }
 0x1f7   : > { %v3715_v59 = vpop.eup %3714  ;;  %v1121_v7 = vmul.f32 %v1057_v54, %v865_v22  ;;  %v730_v9 = vadd.f32 %v729_v56, %v4954_v39  ;;  %v1182_v12 = vpack.c.bf16 %v1120_v61, %v1118_v60  ;;  %v936_v13 = vmul.f32 0.70710677, %v728_v63  ;;  %v3693_v55 = vld [vmem:[#allocation9 + $0x10] sm:$0xff]  }
 0x1f8   : > { %v5007_v5 = vpop.eup %3716  ;;  %3732 = verf.f32 %v935_v62  ;;  %v5017_v22 = vmul.f32 0.5, %v724_v43  ;;  %v5026_v47 = vmul.f32 0.5, %v728_v63  ;;  %v1087_v62 = vadd.f32 1.0, %v3715_v59 }
 0x1f9   : > { %v5010_v10 = vpop.eup %3718  ;;  %v937_v16 = vmul.f32 0.70710677, %v730_v9  ;;  %v1183_v17 = vpack.c.bf16 %v1121_v7, %v1119_v6  ;;  %3734 = verf.f32 %v963_v51  ;;  %v733_v25 = vpop.f32.mrb[12].mxu0  ;;  %v5028_v48 = vmul.f32 0.5, %v730_v9  ;;  %v3694_v6 = vld [vmem:[#allocation9 + $0x58] sm:$0xff]   ;;  %3298 = vmatpush3.bf16.msra.mxu0 %v3693_v55 }
 0x1fa   : > { %v3721_v14 = vpop.eup %3720  ;;  %3736 = verf.f32 %v936_v13  ;;  %v5021_v24 = vpop.f32.mrb[12].mxu1  ;;  %v734_v32 = vadd.f32 %v733_v25, %v4950_v38  ;;  %v1088_v11 = vadd.f32 1.0, %v5007_v5  ;;  %3299 = vmatprep.subr.bf16.mxu0 %v3694_v6 }
 0x1fb   : > { %v3723_v19 = vpop.eup %3722  ;;  %v1058_v21 = vadd.f32 1.0, %v3721_v14  ;;  %3738 = verf.f32 %v937_v16  ;;  %v735_v36 = vpop.f32.mrb[13].mxu0  ;;  %1450 = vmatprep.mubr.bf16.mxu1 %v1183_v17 }
 0x1fc   : > { %v3725_v2 = vpop.eup %3724  ;;  %v1059_v29 = vadd.f32 1.0, %v3723_v19  ;;  %v5024_v44 = vpop.f32.mrb[13].mxu1  ;;  %v736_v49 = vadd.f32 %v735_v36, %v4954_v39  ;;  %1451 = vmatmul.mubr.bf16.vlgmr.msra.gmra.mrb[32].mxu1 %v1182_v12  ;;  %v938_v60 = vmul.f32 0.70710677, %v734_v32  ;;  %v1089_v19 = vadd.f32 1.0, %v5010_v10 }
 0x1fd   : > { %v3727_v43 = vpop.eup %3726  ;;  %v1060_v46 = vadd.f32 1.0, %v3725_v2  ;;  %v737_v51 = vpop.f32.mrb[14].mxu0  ;;  %v1122_v1 = vmul.f32 %v1058_v21, %v4982_v30  ;;  %v5042_v30 = vmul.f32 %v1086_v40, %v4968_v8  ;;  %v5046_v25 = vmul.f32 0.5, %v734_v32 }
 0x1fe   : > { %v5031_v54 = vpop.f32.mrb[14].mxu1  ;;  %v1061_v56 = vadd.f32 1.0, %v3727_v43  ;;  %v739_v61 = vpop.f32.mrb[15].mxu0  ;;  %v939_v3 = vmul.f32 0.70710677, %v736_v49  ;;  %v738_v4 = vadd.f32 %v737_v51, %v4950_v38  ;;  %v1123_v9 = vmul.f32 %v1059_v29, %v4984_v31  ;;  %v3695_v31 = vld [vmem:[#allocation9 + $0x18] sm:$0xff]  }
 0x1ff   : > { %v5033_v53 = vpop.f32.mrb[15].mxu1  ;;  %v1124_v63 = vmul.f32 %v1060_v46, %v4988_v41  ;;  %v3729_v7 = vpop.eup %3728  ;;  %3740 = verf.f32 %v938_v60  ;;  %v740_v59 = vadd.f32 %v739_v61, %v4954_v39  ;;  %v5049_v2 = vmul.f32 %v1087_v62, %v4974_v20  ;;  %v3696_v29 = vld [vmem:[#allocation9 + $0x60] sm:$0xff]   ;;  %3300 = vmatpush3.bf16.msra.mxu0 %v3695_v31 }
 0x200   : > { %v1125_v12 = vmul.f32 %v1061_v56, %v4990_v42  ;;  %3742 = verf.f32 %v939_v3  ;;  %v940_v13 = vmul.f32 0.70710677, %v738_v4  ;;  %v3731_v41 = vpop.eup %3730  ;;  %v5053_v5 = vmul.f32 0.5, %v736_v49  ;;  %v3697_v46 = vld [vmem:[#allocation9 + $0x20] sm:$0xff]   ;;  %3301 = vmatprep.subr.bf16.mxu0 %v3696_v29 }
 0x201   : > { %v1184_v14 = vpack.c.bf16 %v1124_v63, %v1122_v1  ;;  %v941_v16 = vmul.f32 0.70710677, %v740_v59  ;;  %v1062_v42 = vadd.f32 1.0, %v3731_v41  ;;  %v743_v28 = vpop.f32.mrb[16].mxu0  ;;  %v5051_v8 = vpop.f32.mrb[16].mxu1  ;;  %v5058_v55 = vmul.f32 0.5, %v738_v4 }
 0x202   : > { %v1185_v17 = vpack.c.bf16 %v1125_v12, %v1123_v9  ;;  %v3733_v21 = vpop.eup %3732  ;;  %3744 = verf.f32 %v940_v13  ;;  %v744_v10 = vadd.f32 %v743_v28, %v4950_v38  ;;  %v745_v43 = vpop.f32.mrb[17].mxu0  ;;  %v5060_v20 = vmul.f32 0.5, %v740_v59 }
 0x203   : > { %v3735_v36 = vpop.eup %3734  ;;  %v1063_v40 = vadd.f32 1.0, %v3733_v21  ;;  %3746 = verf.f32 %v941_v16  ;;  %v5056_v32 = vpop.f32.mrb[17].mxu1  ;;  %v746_v56 = vadd.f32 %v745_v43, %v4954_v39  ;;  %v964_v49 = vmul.f32 0.70710677, %v5001_v57  ;;  %3302 = vmatpush3.bf16.msra.mxu0 %v3697_v46 }
 0x204   : > { %1460 = vmatprep.mubr.bf16.mxu1 %v1185_v17  ;;  %v3737_v51 = vpop.eup %3736  ;;  %v747_v60 = vpop.f32.mrb[18].mxu0  ;;  %v942_v63 = vmul.f32 0.70710677, %v744_v10  ;;  %v5067_v6 = vmul.f32 %v1088_v11, %v4978_v26  ;;  %v1090_v9 = vadd.f32 1.0, %v3729_v7  ;;  %v1126_v12 = vmul.f32 %v1062_v42, %v5017_v22 }
 0x205   : > { %1461 = vmatmul.mubr.bf16.gmra.mrb[36].mxu1 %v1184_v14  ;;  %v5064_v61 = vpop.f32.mrb[18].mxu1  ;;  %v3739_v62 = vpop.eup %3738  ;;  %v1064_v1 = vadd.f32 1.0, %v3737_v51  ;;  %v943_v13 = vmul.f32 0.70710677, %v746_v56  ;;  %v748_v14 = vadd.f32 %v747_v60, %v4950_v38  ;;  %v1127_v57 = vmul.f32 %v1063_v40, %v5019_v23 }
 0x206   : > { %v749_v3 = vpop.f32.mrb[19].mxu0  ;;  %v5069_v4 = vpop.f32.mrb[19].mxu1  ;;  %v1065_v59 = vadd.f32 1.0, %v3739_v62  ;;  %3748 = verf.f32 %v942_v63  ;;  %v5079_v17 = vadd.f32 %v4971_v15, %v4954_v39  ;;  %v1091_v21 = vadd.f32 1.0, %v3735_v36 }
 0x207   : > { %v1128_v41 = vmul.f32 %v1064_v1, %v5026_v47  ;;  %v750_v16 = vadd.f32 %v749_v3, %v4954_v39  ;;  %3750 = verf.f32 %v943_v13  ;;  %v944_v7 = vmul.f32 0.70710677, %v748_v14 }
 0x208   : > { %v1129_v26 = vmul.f32 %v1065_v59, %v5028_v48  ;;  %3752 = verf.f32 %v964_v49  ;;  %v5082_v28 = vmul.f32 %v1089_v19, %v4980_v27  ;;  %v5085_v48 = vmul.f32 %v1090_v9, %v4996_v50 }
 0x209   : > { %v3741_v22 = vpop.eup %3740  ;;  %v945_v11 = vmul.f32 0.70710677, %v750_v16  ;;  %v1186_v31 = vpack.c.bf16 %v1128_v41, %v1126_v12  ;;  %3754 = verf.f32 %v944_v7  ;;  %v753_v47 = vpop.f32.mrb[20].mxu0  ;;  %v878_v40 = vmul.f32 0.5, %v744_v10 }
 0x20a   : > { %v3743_v23 = vpop.eup %3742  ;;  %v1187_v42 = vpack.c.bf16 %v1129_v26, %v1127_v57  ;;  %v5087_v29 = vpop.f32.mrb[20].mxu1  ;;  %v1066_v15 = vadd.f32 1.0, %v3741_v22  ;;  %v754_v43 = vadd.f32 %v753_v47, %v4950_v38  ;;  %v5092_v49 = vmul.f32 0.5, %v746_v56 }
 0x20b   : > { %3756 = verf.f32 %v945_v11  ;;  %v755_v36 = vpop.f32.mrb[21].mxu0  ;;  %v5090_v51 = vpop.f32.mrb[21].mxu1  ;;  %v1067_v60 = vadd.f32 1.0, %v3743_v23  ;;  %v965_v50 = vmul.f32 0.70710677, %v5079_v17  ;;  %v880_v63 = vmul.f32 0.5, %v748_v14 }
 0x20c   : > { %v3745_v46 = vpop.eup %3744  ;;  %v756_v27 = vadd.f32 %v755_v36, %v4954_v39  ;;  %1470 = vmatprep.mubr.bf16.mxu1 %v1187_v42  ;;  %v757_v19 = vpop.f32.mrb[22].mxu0  ;;  %v946_v3 = vmul.f32 0.70710677, %v754_v43  ;;  %v5099_v12 = vmul.f32 %v1091_v21, %v5012_v0  ;;  %v804_v41 = vadd.f32 %v4986_v33, %v4950_v38 }
 0x20d   : > { %v5096_v62 = vpop.f32.mrb[22].mxu1  ;;  %v3747_v1 = vpop.eup %3746  ;;  %v1068_v10 = vadd.f32 1.0, %v3745_v46  ;;  %1471 = vmatmul.mubr.bf16.gmra.mrb[40].mxu1 %v1186_v31  ;;  %v758_v57 = vadd.f32 %v757_v19, %v4950_v38  ;;  %v1130_v26 = vmul.f32 %v1066_v15, %v5046_v25  ;;  %v1131_v22 = vmul.f32 %v1067_v60, %v5053_v5 }
 0x20e   : > { %v759_v9 = vpop.f32.mrb[23].mxu0  ;;  %v5101_v59 = vpop.f32.mrb[23].mxu1  ;;  %v1069_v56 = vadd.f32 1.0, %v3747_v1  ;;  %v947_v13 = vmul.f32 0.70710677, %v756_v27  ;;  %3758 = verf.f32 %v946_v3  ;;  %v881_v21 = vmul.f32 0.5, %v750_v16 }
 0x20f   : > { %v1132_v7 = vmul.f32 %v1068_v10, %v5058_v55  ;;  %v760_v14 = vadd.f32 %v759_v9, %v4954_v39  ;;  %v948_v11 = vmul.f32 0.70710677, %v758_v57  ;;  %v966_v55 = vmul.f32 0.70710677, %v804_v41 }
 0x210   : > { %v1133_v0 = vmul.f32 %v1069_v56, %v5060_v20  ;;  %3760 = verf.f32 %v947_v13  ;;  %v3749_v31 = vpop.eup %3748  ;;  %v5115_v60 = vmul.f32 0.5, %v5079_v17  ;;  %v806_v16 = vadd.f32 %v4993_v45, %v4954_v39 }
 0x211   : > { %v949_v23 = vmul.f32 0.70710677, %v760_v14  ;;  %v1188_v47 = vpack.c.bf16 %v1132_v7, %v1130_v26  ;;  %3762 = verf.f32 %v965_v50  ;;  %v3751_v42 = vpop.eup %3750  ;;  %v1070_v33 = vadd.f32 1.0, %v3749_v31  ;;  %v763_v25 = vpop.f32.mrb[24].mxu0 }
 0x212   : > { %3764 = verf.f32 %v948_v11  ;;  %v1189_v15 = vpack.c.bf16 %v1133_v0, %v1131_v22  ;;  %v5111_v36 = vpop.f32.mrb[24].mxu1  ;;  %v3753_v46 = vpop.eup %3752  ;;  %v764_v5 = vadd.f32 %v763_v25, %v4950_v38  ;;  %v1071_v1 = vadd.f32 1.0, %v3751_v42 }
 0x213   : > { %3766 = verf.f32 %v949_v23  ;;  %v765_v20 = vpop.f32.mrb[25].mxu0  ;;  %v5119_v19 = vpop.f32.mrb[25].mxu1  ;;  %v5121_v10 = vmul.f32 0.5, %v754_v43  ;;  %v5123_v3 = vmul.f32 0.5, %v756_v27  ;;  %v1134_v17 = vmul.f32 %v1070_v33, %v878_v40 }
 0x214   : > { %v3755_v50 = vpop.eup %3754  ;;  %v766_v9 = vadd.f32 %v765_v20, %v4954_v39  ;;  %1480 = vmatprep.mubr.bf16.mxu1 %v1189_v15  ;;  %v767_v56 = vpop.f32.mrb[26].mxu0  ;;  %v950_v22 = vmul.f32 0.70710677, %v764_v5  ;;  %v5128_v0 = vmul.f32 0.5, %v804_v41  ;;  %3768 = verf.f32 %v966_v55 }
 0x215   : > { %v5126_v13 = vpop.f32.mrb[26].mxu1  ;;  %v3757_v26 = vpop.eup %3756  ;;  %v1072_v7 = vadd.f32 1.0, %v3755_v50  ;;  %1481 = vmatmul.mubr.bf16.gmra.mrb[44].mxu1 %v1188_v47  ;;  %v768_v27 = vadd.f32 %v767_v56, %v4950_v38  ;;  %v1092_v25 = vadd.f32 1.0, %v3753_v46  ;;  %v1135_v40 = vmul.f32 %v1071_v1, %v5092_v49 }
 0x216   : > { %v769_v45 = vpop.f32.mrb[27].mxu0  ;;  %v5130_v11 = vpop.f32.mrb[27].mxu1  ;;  %v1073_v43 = vadd.f32 1.0, %v3757_v26  ;;  %v951_v31 = vmul.f32 0.70710677, %v766_v9  ;;  %3770 = verf.f32 %v950_v22  ;;  %v884_v41 = vmul.f32 0.5, %v758_v57 }
 0x217   : > { %v1136_v23 = vmul.f32 %v1072_v7, %v880_v63  ;;  %v770_v42 = vadd.f32 %v769_v45, %v4954_v39  ;;  %v952_v47 = vmul.f32 0.70710677, %v768_v27  ;;  %v885_v20 = vmul.f32 0.5, %v760_v14 }
 0x218   : > { %v1137_v33 = vmul.f32 %v1073_v43, %v881_v21  ;;  %3772 = verf.f32 %v951_v31  ;;  %v3759_v15 = vpop.eup %3758  ;;  %v5135_v55 = vmul.f32 0.5, %v806_v16  ;;  %v967_v63 = vmul.f32 0.70710677, %v806_v16 }
 0x219   : > { %v953_v50 = vmul.f32 0.70710677, %v770_v42  ;;  %v1190_v37 = vpack.c.bf16 %v1136_v23, %v1134_v17  ;;  %3774 = verf.f32 %v952_v47  ;;  %v773_v35 = vpop.f32.mrb[28].mxu0  ;;  %v5137_v7 = vpop.f32.mrb[28].mxu1  ;;  %v5139_v22 = vmul.f32 0.5, %v764_v5 }
 0x21a   : > { %v3761_v26 = vpop.eup %3760  ;;  %v1191_v56 = vpack.c.bf16 %v1137_v33, %v1135_v40  ;;  %6135 = vst [vmem:[#allocation38_spill] sm:$0xff] %v5137_v7  ;;  %v5141_v49 = vmul.f32 0.5, %v766_v9  ;;  %v774_v57 = vadd.f32 %v773_v35, %v4950_v38  ;;  %v775_v14 = vpop.f32.mrb[29].mxu0  ;;  %v1074_v17 = vadd.f32 1.0, %v3759_v15 }
 0x21b   : > { %v3763_v46 = vpop.eup %3762  ;;  %3776 = verf.f32 %v953_v50  ;;  %v5144_v21 = vpop.f32.mrb[29].mxu1  ;;  %v1075_v45 = vadd.f32 1.0, %v3761_v26  ;;  %v776_v43 = vadd.f32 %v775_v14, %v4954_v39  ;;  %v5148_v31 = vmul.f32 %v1092_v25, %v5015_v18 }
 0x21c   : > { %6136 = vst [vmem:[#allocation39_spill] sm:$0xff] %v5144_v21  ;;  %v3765_v1 = vpop.eup %3764  ;;  %1490 = vmatprep.mubr.bf16.mxu1 %v1191_v56  ;;  %v777_v16 = vpop.f32.mrb[30].mxu0  ;;  %v954_v40 = vmul.f32 0.70710677, %v774_v57  ;;  %v808_v33 = vadd.f32 %v4998_v52, %v4950_v38  ;;  %v810_v47 = vadd.f32 %v5003_v58, %v4954_v39  ;;  %3778 = verf.f32 %v967_v63 }
 0x21d   : > { %v5150_v5 = vpop.f32.mrb[30].mxu1  ;;  %v3767_v9 = vpop.eup %3766  ;;  %v1076_v23 = vadd.f32 1.0, %v3765_v1  ;;  %1491 = vmatmul.mubr.bf16.gmra.mrb[48].mxu1 %v1190_v37  ;;  %v955_v26 = vmul.f32 0.70710677, %v776_v43  ;;  %v778_v18 = vadd.f32 %v777_v16, %v4950_v38  ;;  %v1093_v14 = vadd.f32 1.0, %v3763_v46 }
 0x21e   : > { %6137 = vst [vmem:[#allocation40_spill] sm:$0xff] %v5150_v5  ;;  %v779_v35 = vpop.f32.mrb[31].mxu0  ;;  %v5156_v15 = vpop.f32.mrb[31].mxu1  ;;  %v1077_v50 = vadd.f32 1.0, %v3767_v9  ;;  %3780 = verf.f32 %v954_v40  ;;  %v1139_v1 = vmul.f32 %v1075_v45, %v5123_v3  ;;  %v1138_v58 = vmul.f32 %v1074_v17, %v5121_v10 }
 0x21f   : > { %6138 = vst [vmem:[#allocation41_spill] sm:$0xff] %v5156_v15  ;;  %v1140_v25 = vmul.f32 %v1076_v23, %v884_v41  ;;  %v780_v56 = vadd.f32 %v779_v35, %v4954_v39  ;;  %v3769_v37 = vpop.eup %3768  ;;  %3782 = verf.f32 %v955_v26  ;;  %v956_v52 = vmul.f32 0.70710677, %v778_v18 }
 0x220   : > { %v1141_v34 = vmul.f32 %v1077_v50, %v885_v20  ;;  %v3771_v5 = vpop.eup %3770  ;;  %v888_v15 = vmul.f32 0.5, %v768_v27  ;;  %v889_v9 = vmul.f32 0.5, %v770_v42  ;;  %v5162_v16 = vmul.f32 0.5, %v774_v57 }
 0x221   : > { %v957_v21 = vmul.f32 0.70710677, %v780_v56  ;;  %3784 = verf.f32 %v956_v52  ;;  %v968_v63 = vmul.f32 0.70710677, %v808_v33  ;;  %v1078_v23 = vadd.f32 1.0, %v3771_v5 }
 0x222   : > { %v3773_v7 = vpop.eup %3772  ;;  %v1193_v41 = vpack.c.bf16 %v1141_v34, %v1139_v1  ;;  %v5164_v46 = vmul.f32 0.5, %v776_v43  ;;  %v1192_v3 = vpack.c.bf16 %v1140_v25, %v1138_v58  ;;  %v5167_v40 = vmul.f32 %v1093_v14, %v5115_v60 }
 0x223   : > { %3786 = verf.f32 %v957_v21  ;;  %v3775_v20 = vpop.eup %3774  ;;  %v1079_v45 = vadd.f32 1.0, %v3773_v7  ;;  %v969_v10 = vmul.f32 0.70710677, %v810_v47  ;;  %v1094_v57 = vadd.f32 1.0, %v3769_v37 }
 0x224   : > { %1500 = vmatprep.mubr.bf16.mxu1 %v1193_v41  ;;  %3788 = verf.f32 %v968_v63  ;;  %v1080_v42 = vadd.f32 1.0, %v3775_v20  ;;  %v814_v34 = vadd.f32 %v5021_v24, %v4950_v38  ;;  %v816_v17 = vadd.f32 %v5024_v44, %v4954_v39 }
 0x225   : > { %v3777_v27 = vpop.eup %3776  ;;  %1501 = vmatmul.mubr.bf16.gmra.mrb[52].mxu1 %v1192_v3  ;;  %v892_v43 = vmul.f32 0.5, %v778_v18  ;;  %3790 = verf.f32 %v969_v10  ;;  %v818_v60 = vadd.f32 %v5031_v54, %v4950_v38  ;;  %v1142_v7 = vmul.f32 %v1078_v23, %v5139_v22 }
 0x226   : > { %v1081_v21 = vadd.f32 1.0, %v3777_v27  ;;  %v1144_v5 = vmul.f32 %v1080_v42, %v888_v15  ;;  %v970_v35 = vmul.f32 0.70710677, %v814_v34  ;;  %v820_v50 = vadd.f32 %v5033_v53, %v4954_v39  ;;  %v3779_v26 = vpop.eup %3778 }
 0x227   : > { %v1143_v25 = vmul.f32 %v1079_v45, %v5141_v49  ;;  %v893_v14 = vmul.f32 0.5, %v780_v56  ;;  %v971_v37 = vmul.f32 0.70710677, %v816_v17  ;;  %v5180_v18 = vmul.f32 %v1094_v57, %v5128_v0 }
 0x228   : > { %v1145_v24 = vmul.f32 %v1081_v21, %v889_v9  ;;  %v3781_v44 = vpop.eup %3780  ;;  %v5182_v1 = vmul.f32 0.5, %v808_v33  ;;  %v972_v54 = vmul.f32 0.70710677, %v818_v60  ;;  %v1194_v52 = vpack.c.bf16 %v1144_v5, %v1142_v7 }
 0x229   : > { %v3783_v22 = vpop.eup %3782  ;;  %v1082_v15 = vadd.f32 1.0, %v3781_v44  ;;  %v905_v58 = vmul.f32 0.5, %v810_v47  ;;  %3792 = verf.f32 %v970_v35  ;;  %v973_v63 = vmul.f32 0.70710677, %v820_v50 }
 0x22a   : > { %v1195_v41 = vpack.c.bf16 %v1145_v24, %v1143_v25  ;;  %v1083_v53 = vadd.f32 1.0, %v3783_v22  ;;  %3794 = verf.f32 %v971_v37  ;;  %v824_v49 = vadd.f32 %v5051_v8, %v4950_v38 }
 0x22b   : > { %v3785_v56 = vpop.eup %3784  ;;  %3796 = verf.f32 %v972_v54  ;;  %v826_v0 = vadd.f32 %v5056_v32, %v4954_v39  ;;  %v828_v33 = vadd.f32 %v5064_v61, %v4950_v38  ;;  %v830_v47 = vadd.f32 %v5069_v4, %v4954_v39 }
 0x22c   : > { %1510 = vmatprep.mubr.bf16.mxu1 %v1195_v41  ;;  %v1084_v23 = vadd.f32 1.0, %v3785_v56  ;;  %v1095_v3 = vadd.f32 1.0, %v3779_v26  ;;  %v5192_v20 = vmul.f32 0.5, %v814_v34  ;;  %v5194_v45 = vmul.f32 0.5, %v816_v17 }
 0x22d   : > { %v3787_v9 = vpop.eup %3786  ;;  %1511 = vmatmul.mubr.bf16.gmra.mrb[56].mxu1 %v1194_v52  ;;  %3798 = verf.f32 %v973_v63  ;;  %v974_v27 = vmul.f32 0.70710677, %v824_v49  ;;  %v975_v42 = vmul.f32 0.70710677, %v826_v0  ;;  %v1146_v32 = vmul.f32 %v1082_v15, %v5162_v16 }
 0x22e   : > { %v3789_v8 = vpop.eup %3788  ;;  %v1085_v10 = vadd.f32 1.0, %v3787_v9  ;;  %v1148_v57 = vmul.f32 %v1084_v23, %v892_v43  ;;  %v5197_v61 = vmul.f32 0.5, %v818_v60  ;;  %v976_v21 = vmul.f32 0.70710677, %v828_v33 }
 0x22f   : > { %v3791_v4 = vpop.eup %3790  ;;  %v1147_v7 = vmul.f32 %v1083_v53, %v5164_v46  ;;  %3800 = verf.f32 %v974_v27  ;;  %v977_v34 = vmul.f32 0.70710677, %v830_v47  ;;  %v1096_v17 = vadd.f32 1.0, %v3789_v8 }
 0x230   : > { %v1149_v5 = vmul.f32 %v1085_v10, %v893_v14  ;;  %v1097_v35 = vadd.f32 1.0, %v3791_v4  ;;  %3802 = verf.f32 %v975_v42  ;;  %v1196_v26 = vpack.c.bf16 %v1148_v57, %v1146_v32 }
 0x231   : > { %3804 = verf.f32 %v976_v21  ;;  %v1199_v24 = vpack.c.bf16 %v5082_v28, %v5049_v2  ;;  %v834_v16 = vadd.f32 %v5087_v29, %v4950_v38  ;;  %v5205_v43 = vmul.f32 %v1095_v3, %v5135_v55 }
 0x232   : > { %v1197_v25 = vpack.c.bf16 %v1149_v5, %v1147_v7  ;;  %3806 = verf.f32 %v977_v34  ;;  %v836_v46 = vadd.f32 %v5090_v51, %v4954_v39  ;;  %v838_v60 = vadd.f32 %v5096_v62, %v4950_v38 }
 0x233   : > { %v3793_v14 = vpop.eup %3792  ;;  %v909_v37 = vmul.f32 0.5, %v820_v50  ;;  %v5211_v44 = vmul.f32 0.5, %v824_v49  ;;  %v978_v54 = vmul.f32 0.70710677, %v834_v16  ;;  %v1198_v2 = vpack.c.bf16 %v5067_v6, %v5042_v30 }
 0x234   : > { %1520 = vmatprep.mubr.bf16.mxu1 %v1197_v25  ;;  %v3795_v28 = vpop.eup %3794  ;;  %v911_v29 = vmul.f32 0.5, %v826_v0  ;;  %v5215_v55 = vmul.f32 0.5, %v828_v33  ;;  %v913_v52 = vmul.f32 0.5, %v830_v47  ;;  %v979_v22 = vmul.f32 0.70710677, %v836_v46 }
 0x235   : > { %1521 = vmatmul.mubr.bf16.gmra.mrb[60].mxu1 %v1196_v26  ;;  %v3797_v51 = vpop.eup %3796  ;;  %v5218_v15 = vmul.f32 %v1096_v17, %v5182_v1  ;;  %v5220_v62 = vmul.f32 %v1097_v35, %v905_v58  ;;  %3808 = verf.f32 %v978_v54  ;;  %v980_v50 = vmul.f32 0.70710677, %v838_v60  ;;  %v6140_v35 = vld [vmem:[#allocation39_spill] sm:$0xff]  ;;  %v6141_v26 = vld [vmem:[#allocation40_spill] sm:$0xff] }
 0x236   : > { %1530 = vmatprep.mubr.bf16.mxu1 %v1199_v24  ;;  %v1098_v41 = vadd.f32 1.0, %v3793_v14  ;;  %3810 = verf.f32 %v979_v22  ;;  %v840_v30 = vadd.f32 %v5101_v59, %v4954_v39  ;;  %v1201_v6 = vpack.c.bf16 %v5167_v40, %v5099_v12 }
 0x237   : > { %v3799_v53 = vpop.eup %3798  ;;  %v1099_v63 = vadd.f32 1.0, %v3795_v28  ;;  %v914_v49 = vmul.f32 0.5, %v834_v16  ;;  %3812 = verf.f32 %v980_v50  ;;  %v844_v1 = vadd.f32 %v5111_v36, %v4950_v38 }
 0x238   : > { %v1100_v58 = vadd.f32 1.0, %v3797_v51  ;;  %v981_v56 = vmul.f32 0.70710677, %v840_v30  ;;  %v5230_v0 = vadd.f32 %v5119_v19, %v4954_v39  ;;  %v5234_v33 = vadd.f32 %v5126_v13, %v4950_v38 }
 0x239   : > { %v3801_v59 = vpop.eup %3800  ;;  %v915_v47 = vmul.f32 0.5, %v836_v46  ;;  %v916_v12 = vmul.f32 0.5, %v838_v60  ;;  %v982_v40 = vmul.f32 0.70710677, %v844_v1  ;;  %v1200_v9 = vpack.c.bf16 %v5148_v31, %v5085_v48 }
 0x23a   : > { %v3803_v23 = vpop.eup %3802  ;;  %v5239_v36 = vmul.f32 %v1098_v41, %v5192_v20  ;;  %v1101_v3 = vadd.f32 1.0, %v3799_v53  ;;  %3814 = verf.f32 %v981_v56  ;;  %v983_v19 = vmul.f32 0.70710677, %v5230_v0 }
 0x23b   : > { %v3805_v8 = vpop.eup %3804  ;;  %v5243_v10 = vmul.f32 %v1099_v63, %v5194_v45  ;;  %v1103_v13 = vadd.f32 1.0, %v3803_v23  ;;  %3816 = verf.f32 %v982_v40  ;;  %v984_v27 = vmul.f32 0.70710677, %v5234_v33 }
 0x23c   : > { %v3807_v42 = vpop.eup %3806  ;;  %v5247_v32 = vmul.f32 %v1100_v58, %v5197_v61  ;;  %v1102_v48 = vadd.f32 1.0, %v3801_v59  ;;  %3818 = verf.f32 %v983_v19  ;;  %v850_v31 = vadd.f32 %v5130_v11, %v4954_v39  ;;  %v6139_v61 = vld [vmem:[#allocation38_spill] sm:$0xff] }
 0x23d   : > { %1531 = vmatmul.mubr.bf16.gmra.mrb[64].mxu1 %v1198_v2  ;;  %v1104_v20 = vadd.f32 1.0, %v3805_v8  ;;  %v1105_v57 = vadd.f32 1.0, %v3807_v42  ;;  %3820 = verf.f32 %v984_v27  ;;  %v1203_v45 = vpack.c.bf16 %v5220_v62, %v5205_v43 }
 0x23e   : > { %1540 = vmatprep.mubr.bf16.mxu1 %v1201_v6  ;;  %v5253_v21 = vmul.f32 %v1101_v3, %v909_v37  ;;  %v917_v4 = vmul.f32 0.5, %v840_v30  ;;  %v985_v7 = vmul.f32 0.70710677, %v850_v31  ;;  %v854_v5 = vadd.f32 %v6139_v61, %v4950_v38 }
 0x23f   : > { %v3809_v34 = vpop.eup %3808  ;;  %v5257_v17 = vmul.f32 %v1103_v13, %v911_v29  ;;  %v856_v11 = vadd.f32 %v6140_v35, %v4954_v39  ;;  %v858_v25 = vadd.f32 %v6141_v26, %v4950_v38  ;;  %v1202_v24 = vpack.c.bf16 %v5218_v15, %v5180_v18 }
 0x240   : > { %v3811_v16 = vpop.eup %3810  ;;  %v5265_v43 = vmul.f32 %v1105_v57, %v913_v52  ;;  %v1106_v46 = vadd.f32 1.0, %v3809_v34  ;;  %3822 = verf.f32 %v985_v7  ;;  %v986_v60 = vmul.f32 0.70710677, %v854_v5  ;;  %v6142_v52 = vld [vmem:[#allocation41_spill] sm:$0xff] }
 0x241   : > { %v3813_v14 = vpop.eup %3812  ;;  %v5268_v37 = vmul.f32 %v1102_v48, %v5211_v44  ;;  %v5271_v54 = vmul.f32 %v1104_v20, %v5215_v55  ;;  %v1107_v2 = vadd.f32 1.0, %v3811_v16  ;;  %v987_v28 = vmul.f32 0.70710677, %v856_v11  ;;  %v3700_v16 = vld [vmem:[#allocation9 + $0x70] sm:$0xff]  }
 0x242   : > { %v5273_v29 = vmul.f32 %v1106_v46, %v914_v49  ;;  %v1108_v38 = vadd.f32 1.0, %v3813_v14  ;;  %3824 = verf.f32 %v986_v60  ;;  %v988_v18 = vmul.f32 0.70710677, %v858_v25  ;;  %v3702_v46 = vld [vmem:[#allocation9 + $0x78] sm:$0xff]   ;;  %v1246_v14 = vld [vmem:[%s6143_s8] sm:$0x3] }
 0x243   : > { %v918_v22 = vmul.f32 0.5, %v844_v1  ;;  %3826 = verf.f32 %v987_v28  ;;  %v860_v51 = vadd.f32 %v6142_v52, %v4954_v39  ;;  %v1205_v15 = vpack.c.bf16 %v5253_v21, %v5243_v10  ;;  %v3703_v60 = vld [vmem:[#allocation9 + $0x38] sm:$0xff]  }
 0x244   : > { %v3815_v44 = vpop.eup %3814  ;;  %v1172_v62 = vmul.f32 %v1108_v38, %v916_v12  ;;  %3828 = verf.f32 %v988_v18  ;;  %v1204_v55 = vpack.c.bf16 %v5247_v32, %v5239_v36  ;;  %v1207_v50 = vpack.c.bf16 %v5265_v43, %v5257_v17  ;;  %v3701_v43 = vld [vmem:[#allocation9 + $0x30] sm:$0xff]  }
 0x245   : > { %1541 = vmatmul.mubr.bf16.gmra.mrb[68].mxu1 %v1200_v9  ;;  %v3817_v41 = vpop.eup %3816  ;;  %v1171_v30 = vmul.f32 %v1107_v2, %v915_v47  ;;  %v1109_v6 = vadd.f32 1.0, %v3815_v44  ;;  %v989_v53 = vmul.f32 0.70710677, %v860_v51  ;;  %v1206_v39 = vpack.c.bf16 %v5271_v54, %v5268_v37  ;;  %v6144_v37 = vld [vmem:[#allocation37_spill] sm:$0xff] }
 0x246   : > { %1550 = vmatprep.mubr.bf16.mxu1 %v1203_v45  ;;  %v3819_v63 = vpop.eup %3818  ;;  %v1110_v49 = vadd.f32 1.0, %v3817_v41  ;;  %v920_v1 = vmul.f32 0.5, %v5234_v33  ;;  %v1208_v58 = vpack.c.bf16 %v1172_v62, %v5273_v29  ;;  %v919_v12 = vmul.f32 0.5, %v5230_v0 }
 0x247   : > { %v3821_v56 = vpop.eup %3820  ;;  %v1173_v59 = vmul.f32 %v1109_v6, %v917_v4  ;;  %v1111_v40 = vadd.f32 1.0, %v3819_v63  ;;  %3830 = verf.f32 %v989_v53  ;;  %v921_v23 = vmul.f32 0.5, %v850_v31 }
 0x248   : > { %v1174_v9 = vmul.f32 %v1110_v49, %v918_v22  ;;  %v1112_v47 = vadd.f32 1.0, %v3821_v56  ;;  %v922_v13 = vmul.f32 0.5, %v854_v5  ;;  %v924_v20 = vmul.f32 0.5, %v858_v25  ;;  %v3698_v25 = vld [vmem:[#allocation9 + $0x68] sm:$0xff]  }
 0x249   : > { %v1209_v36 = vpack.c.bf16 %v1173_v59, %v1171_v30  ;;  %v1175_v8 = vmul.f32 %v1111_v40, %v919_v12  ;;  %v923_v57 = vmul.f32 0.5, %v856_v11  ;;  %v925_v7 = vmul.f32 0.5, %v860_v51  ;;  %3303 = vmatprep.subr.bf16.mxu0 %v3698_v25  ;;  %v3699_v11 = vld [vmem:[#allocation9 + $0x28] sm:$0xff]  }
 0x24a   : > { %v3823_v3 = vpop.eup %3822  ;;  %v1176_v19 = vmul.f32 %v1112_v47, %v920_v1  ;;  %3304 = vmatpush3.bf16.msra.mxu0 %v3699_v11  ;;  %v6145_v54 = vsub.s32 0, %v6144_v37  ;;  %v6146_v28 = vsub.s32 1, %v6144_v37 }
 0x24b   : > { %v1113_v10 = vadd.f32 1.0, %v3823_v3  ;;  %3305 = vmatprep.subr.bf16.mxu0 %v3700_v16  ;;  %v4025_v3 = vld [vmem:[%s4853_s10] sm:$0xff] }
 0x24c   : > { %v3825_v27 = vpop.eup %3824  ;;  %v1210_v33 = vpack.c.bf16 %v1176_v19, %v1174_v9  ;;  %v5293_v2 = vrot.slane %v1246_v14, %v6145_v54  ;;  %v5297_v29 = vrot.slane %v1246_v14, %v6146_v28  ;;  %v2291_v19 = vmul.f32 %v4025_v3, %v4025_v3 }
 0x24d   : > { %1551 = vmatmul.mubr.bf16.gmra.mrb[72].mxu1 %v1202_v24  ;;  %v3827_v42 = vpop.eup %3826  ;;  %v1177_v32 = vmul.f32 %v1113_v10, %v921_v23  ;;  %v1114_v48 = vadd.f32 1.0, %v3825_v27  ;;  %v4024_v23 = vld [vmem:[%s4853_s10 + $0x10] sm:$0xff] }
 0x24e   : > { %1560 = vmatprep.mubr.bf16.mxu1 %v1205_v15  ;;  %v3829_v0 = vpop.eup %3828  ;;  %v1115_v45 = vadd.f32 1.0, %v3827_v42  ;;  %3306 = vmatpush3.bf16.msra.mxu0 %v3701_v43 }
 0x24f   : > { %v1178_v21 = vmul.f32 %v1114_v48, %v922_v13  ;;  %v1116_v4 = vadd.f32 1.0, %v3829_v0  ;;  %v1211_v31 = vpack.c.bf16 %v1177_v32, %v1175_v8  ;;  %3307 = vmatprep.subr.bf16.mxu0 %v3702_v46  ;;  %2323 = vadd.xlane.f32.xlu0 %v2291_v19 }
 0x250   : > { %v1179_v17 = vmul.f32 %v1115_v45, %v923_v57 }
 0x251   : > { %v3831_v61 = vpop.eup %3830  ;;  %v1180_v34 = vmul.f32 %v1116_v4, %v924_v20 }
 0x252   : > { %v1117_v35 = vadd.f32 1.0, %v3831_v61  ;;  %3308 = vmatpush3.bf16.msra.mxu0 %v3703_v60  ;;  %v4026_v61 = vld [vmem:[%s4853_s10 + $0x18] sm:$0xff] }
 0x253   : > { %v1212_v5 = vpack.c.bf16 %v1180_v34, %v1178_v21  ;;  %v2294_v34 = vmul.f32 %v4026_v61, %v4026_v61 }
 0x254   : > { %v1181_v26 = vmul.f32 %v1117_v35, %v925_v7 }
 0x255   : > { %1561 = vmatmul.mubr.bf16.gmra.mrb[76].mxu1 %v1204_v55 }
 0x256   : > { %1570 = vmatprep.mubr.bf16.mxu1 %v1207_v50  ;;  %v1213_v24 = vpack.c.bf16 %v1181_v26, %v1179_v17 }
 0x25d   : > { %1571 = vmatmul.mubr.bf16.gmra.mrb[80].mxu1 %v1206_v39 }
 0x25e   : > { %1580 = vmatprep.mubr.bf16.mxu1 %v1209_v36  ;;  %v2293_v36 = vmul.f32 %v4024_v23, %v4024_v23 }
 0x260   : > { %2327 = vadd.xlane.f32.xlu1 %v2293_v36 }
 0x264   : > { %2329 = vadd.xlane.f32.xlu1 %v2294_v34 }
 0x265   : > { %1581 = vmatmul.mubr.bf16.gmra.mrb[84].mxu1 %v1208_v58 }
 0x266   : > { %1590 = vmatprep.mubr.bf16.mxu1 %v1211_v31 }
 0x26d   : > { %1591 = vmatmul.mubr.bf16.gmra.mrb[88].mxu1 %v1210_v33 }
 0x26e   : > { %1600 = vmatprep.mubr.bf16.mxu1 %v1213_v24 }
 0x275   : > { %1601 = vmatmul.mubr.bf16.gmra.mrb[92].mxu1 %v1212_v5 }
 0x2cf   : > { %v1452_v38 = vpop.f32.mrb[32].mxu1 }
 0x2d0   : > { %v1453_v18 = vadd.f32 %v1452_v38, %v5293_v2  ;;  %v1454_v22 = vpop.f32.mrb[33].mxu1 }
 0x2d1   : > { %v1455_v52 = vadd.f32 %v1454_v22, %v5297_v29  ;;  %v1456_v51 = vpop.f32.mrb[34].mxu1 }
 0x2d2   : > { %v1675_v15 = vmul.f32 0.70710677, %v1453_v18  ;;  %v1457_v44 = vadd.f32 %v1456_v51, %v5293_v2  ;;  %v1458_v62 = vpop.f32.mrb[35].mxu1  ;;  %v1611_v27 = vmul.f32 0.5, %v1453_v18  ;;  %v4027_v18 = vld [vmem:[%s4853_s10 + $0x8] sm:$0xff] }
 0x2d3   : > { %v1676_v55 = vmul.f32 0.70710677, %v1455_v52  ;;  %v1459_v50 = vadd.f32 %v1458_v62, %v5297_v29  ;;  %v1612_v48 = vmul.f32 0.5, %v1455_v52  ;;  %v2292_v22 = vmul.f32 %v4027_v18, %v4027_v18  ;;  %v4028_v52 = vld [vmem:[%s4853_s10 + $0x28] sm:$0xff] }
 0x2d4   : > { %3832 = verf.f32 %v1675_v15  ;;  %v1677_v41 = vmul.f32 0.70710677, %v1457_v44  ;;  %v1613_v20 = vmul.f32 0.5, %v1457_v44  ;;  %v2296_v51 = vmul.f32 %v4028_v52, %v4028_v52  ;;  %v4035_v52 = vld [vmem:[%s4853_s10 + $0x50] sm:$0xff] }
 0x2d5   : > { %3834 = verf.f32 %v1676_v55  ;;  %v1678_v30 = vmul.f32 0.70710677, %v1459_v50  ;;  %v1614_v21 = vmul.f32 0.5, %v1459_v50  ;;  %2325 = vadd.xlane.f32.xlu0 %v2292_v22 }
 0x2d6   : > { %3836 = verf.f32 %v1677_v41  ;;  %2333 = vadd.xlane.f32.xlu1 %v2296_v51  ;;  %v2301_v51 = vmul.f32 %v4035_v52, %v4035_v52 }
 0x2d7   : > { %3838 = verf.f32 %v1678_v30 }
 0x2d8   : > { %v1462_v6 = vpop.f32.mrb[36].mxu1 }
 0x2d9   : > { %v5304_v53 = vadd.f32 %v1462_v6, %v5293_v2  ;;  %v1464_v39 = vpop.f32.mrb[37].mxu1 }
 0x2da   : > { %v5307_v63 = vadd.f32 %v1464_v39, %v5297_v29  ;;  %v1466_v49 = vpop.f32.mrb[38].mxu1 }
 0x2db   : > { %v1679_v1 = vmul.f32 0.70710677, %v5304_v53  ;;  %v5311_v58 = vadd.f32 %v1466_v49, %v5293_v2  ;;  %v1468_v56 = vpop.f32.mrb[39].mxu1  ;;  %v1615_v44 = vmul.f32 0.5, %v5304_v53 }
 0x2dc   : > { %v1680_v59 = vmul.f32 0.70710677, %v5307_v63  ;;  %v5315_v12 = vadd.f32 %v1468_v56, %v5297_v29  ;;  %v1616_v62 = vmul.f32 0.5, %v5307_v63 }
 0x2dd   : > { %3840 = verf.f32 %v1679_v1  ;;  %v1681_v40 = vmul.f32 0.70710677, %v5311_v58  ;;  %v1617_v30 = vmul.f32 0.5, %v5311_v58  ;;  %v4029_v1 = vld [vmem:[%s4853_s10 + $0x20] sm:$0xff] }
 0x2de   : > { %3842 = verf.f32 %v1680_v59  ;;  %v1682_v9 = vmul.f32 0.70710677, %v5315_v12  ;;  %v3833_v47 = vpop.eup %3832  ;;  %v2295_v56 = vmul.f32 %v4029_v1, %v4029_v1  ;;  %v1618_v53 = vmul.f32 0.5, %v5315_v12 }
 0x2df   : > { %3844 = verf.f32 %v1681_v40  ;;  %v3835_v8 = vpop.eup %3834  ;;  %v1803_v10 = vadd.f32 1.0, %v3833_v47 }
 0x2e0   : > { %3846 = verf.f32 %v1682_v9  ;;  %v3837_v13 = vpop.eup %3836  ;;  %v1804_v33 = vadd.f32 1.0, %v3835_v8  ;;  %v1472_v42 = vpop.f32.mrb[40].mxu1  ;;  %v4030_v9 = vld [vmem:[%s4853_s10 + $0x38] sm:$0xff]  ;;  %2331 = vadd.xlane.f32.xlu0 %v2295_v56 }
 0x2e1   : > { %v3839_v32 = vpop.eup %3838  ;;  %v1805_v0 = vadd.f32 1.0, %v3837_v13  ;;  %v5322_v57 = vadd.f32 %v1472_v42, %v5293_v2  ;;  %v1474_v45 = vpop.f32.mrb[41].mxu1  ;;  %v1867_v17 = vmul.f32 %v1803_v10, %v1611_v27  ;;  %v2298_v58 = vmul.f32 %v4030_v9, %v4030_v9  ;;  %v4031_v42 = vld [vmem:[%s4853_s10 + $0x30] sm:$0xff] }
 0x2e2   : > { %v1806_v4 = vadd.f32 1.0, %v3839_v32  ;;  %v5325_v31 = vadd.f32 %v1474_v45, %v5297_v29  ;;  %v1476_v7 = vpop.f32.mrb[42].mxu1  ;;  %v1868_v25 = vmul.f32 %v1804_v33, %v1612_v48  ;;  %v2297_v32 = vmul.f32 %v4031_v42, %v4031_v42 }
 0x2e3   : > { %v1869_v35 = vmul.f32 %v1805_v0, %v1613_v20  ;;  %v1683_v5 = vmul.f32 0.70710677, %v5322_v57  ;;  %v5330_v26 = vadd.f32 %v1476_v7, %v5293_v2  ;;  %v1478_v24 = vpop.f32.mrb[43].mxu1  ;;  %2337 = vadd.xlane.f32.xlu1 %v2298_v58  ;;  %v4032_v0 = vld [vmem:[%s4853_s10 + $0x48] sm:$0xff]  ;;  %v1619_v7 = vmul.f32 0.5, %v5322_v57 }
 0x2e4   : > { %v1870_v11 = vmul.f32 %v1806_v4, %v1614_v21  ;;  %v1684_v16 = vmul.f32 0.70710677, %v5325_v31  ;;  %v5334_v43 = vadd.f32 %v1478_v24, %v5297_v29  ;;  %v2300_v45 = vmul.f32 %v4032_v0, %v4032_v0  ;;  %2335 = vadd.xlane.f32.xlu0 %v2297_v32  ;;  %v4038_v32 = vld [vmem:[%s4853_s10 + $0x78] sm:$0xff] }
 0x2e5   : > { %v1931_v46 = vpack.c.bf16 %v1869_v35, %v1867_v17  ;;  %3848 = verf.f32 %v1683_v5  ;;  %v1685_v60 = vmul.f32 0.70710677, %v5330_v26  ;;  %v1620_v35 = vmul.f32 0.5, %v5325_v31  ;;  %v4034_v31 = vld [vmem:[%s4853_s10 + $0x58] sm:$0xff] }
 0x2e6   : > { %3850 = verf.f32 %v1684_v16  ;;  %v1686_v37 = vmul.f32 0.70710677, %v5334_v43  ;;  %v1932_v54 = vpack.c.bf16 %v1870_v11, %v1868_v25  ;;  %v4033_v11 = vld [vmem:[%s4853_s10 + $0x40] sm:$0xff]  ;;  %v1621_v57 = vmul.f32 0.5, %v5330_v26 }
 0x2e7   : > { %v3841_v14 = vpop.eup %3840  ;;  %3852 = verf.f32 %v1685_v60  ;;  %v2299_v16 = vmul.f32 %v4033_v11, %v4033_v11  ;;  %2341 = vadd.xlane.f32.xlu1 %v2300_v45 }
 0x2e8   : > { %v3843_v28 = vpop.eup %3842  ;;  %v1807_v38 = vadd.f32 1.0, %v3841_v14  ;;  %3854 = verf.f32 %v1686_v37  ;;  %v1482_v50 = vpop.f32.mrb[44].mxu1  ;;  %2130 = vmatprep.mubr.bf16.mxu0 %v1932_v54  ;;  %v2302_v54 = vmul.f32 %v4034_v31, %v4034_v31 }
 0x2e9   : > { %v3845_v15 = vpop.eup %3844  ;;  %v1808_v55 = vadd.f32 1.0, %v3843_v28  ;;  %v5344_v39 = vadd.f32 %v1482_v50, %v5293_v2  ;;  %v1484_v49 = vpop.f32.mrb[45].mxu1  ;;  %2131 = vmatmul.mubr.bf16.vlgmr.msra.gmra.mrb[32].mxu0 %v1931_v46  ;;  %v1622_v28 = vmul.f32 0.5, %v5334_v43  ;;  %2339 = vadd.xlane.f32.xlu0 %v2299_v16  ;;  %v4040_v16 = vld [vmem:[%s4853_s10 + $0x88] sm:$0xff] }
 0x2ea   : > { %v3847_v41 = vpop.eup %3846  ;;  %v1809_v6 = vadd.f32 1.0, %v3845_v15  ;;  %v5349_v59 = vadd.f32 %v1484_v49, %v5297_v29  ;;  %v1486_v40 = vpop.f32.mrb[46].mxu1  ;;  %v1871_v47 = vmul.f32 %v1807_v38, %v1615_v44 }
 0x2eb   : > { %v1810_v63 = vadd.f32 1.0, %v3847_v41  ;;  %v1687_v36 = vmul.f32 0.70710677, %v5344_v39  ;;  %v5354_v3 = vadd.f32 %v1486_v40, %v5293_v2  ;;  %v1488_v19 = vpop.f32.mrb[47].mxu1  ;;  %v1872_v8 = vmul.f32 %v1808_v55, %v1616_v62  ;;  %2345 = vadd.xlane.f32.xlu1 %v2302_v54 }
 0x2ec   : > { %v1873_v23 = vmul.f32 %v1809_v6, %v1617_v30  ;;  %v1688_v10 = vmul.f32 0.70710677, %v5349_v59  ;;  %v5358_v13 = vadd.f32 %v1488_v19, %v5297_v29  ;;  %v4036_v6 = vld [vmem:[%s4853_s10 + $0x68] sm:$0xff]  ;;  %v1623_v40 = vmul.f32 0.5, %v5344_v39 }
 0x2ed   : > { %v1874_v12 = vmul.f32 %v1810_v63, %v1618_v53  ;;  %3856 = verf.f32 %v1687_v36  ;;  %v1689_v27 = vmul.f32 0.70710677, %v5354_v3  ;;  %v2304_v49 = vmul.f32 %v4036_v6, %v4036_v6  ;;  %2343 = vadd.xlane.f32.xlu0 %v2301_v51  ;;  %v4041_v51 = vld [vmem:[%s4853_s10 + $0x80] sm:$0xff] }
 0x2ee   : > { %v1933_v33 = vpack.c.bf16 %v1873_v23, %v1871_v47  ;;  %3858 = verf.f32 %v1688_v10  ;;  %v1690_v48 = vmul.f32 0.70710677, %v5358_v13  ;;  %v1624_v58 = vmul.f32 0.5, %v5349_v59 }
 0x2ef   : > { %v1934_v20 = vpack.c.bf16 %v1874_v12, %v1872_v8  ;;  %v3849_v21 = vpop.eup %3848  ;;  %3860 = verf.f32 %v1689_v27  ;;  %v4037_v12 = vld [vmem:[%s4853_s10 + $0x60] sm:$0xff]  ;;  %v1625_v39 = vmul.f32 0.5, %v5354_v3  ;;  %2349 = vadd.xlane.f32.xlu1 %v2304_v49 }
 0x2f0   : > { %v3851_v4 = vpop.eup %3850  ;;  %v1811_v61 = vadd.f32 1.0, %v3849_v21  ;;  %3862 = verf.f32 %v1690_v48  ;;  %v1492_v34 = vpop.f32.mrb[48].mxu1  ;;  %v2303_v10 = vmul.f32 %v4037_v12, %v4037_v12  ;;  %v2306_v48 = vmul.f32 %v4038_v32, %v4038_v32 }
 0x2f1   : > { %2138 = vmatprep.mubr.bf16.mxu0 %v1934_v20  ;;  %v3853_v17 = vpop.eup %3852  ;;  %v1812_v5 = vadd.f32 1.0, %v3851_v4  ;;  %v5367_v24 = vadd.f32 %v1492_v34, %v5293_v2  ;;  %v1494_v25 = vpop.f32.mrb[49].mxu1  ;;  %v1626_v20 = vmul.f32 0.5, %v5358_v13  ;;  %v4039_v4 = vld [vmem:[%s4853_s10 + $0x70] sm:$0xff] }
 0x2f2   : > { %2139 = vmatmul.mubr.bf16.gmra.mrb[36].mxu0 %v1933_v33  ;;  %v3855_v46 = vpop.eup %3854  ;;  %v1813_v60 = vadd.f32 1.0, %v3853_v17  ;;  %v5372_v14 = vadd.f32 %v1494_v25, %v5297_v29  ;;  %v1496_v37 = vpop.f32.mrb[50].mxu1  ;;  %v1875_v15 = vmul.f32 %v1811_v61, %v1619_v7  ;;  %v2305_v7 = vmul.f32 %v4039_v4, %v4039_v4  ;;  %2347 = vadd.xlane.f32.xlu0 %v2303_v10 }
 0x2f3   : > { %v1814_v38 = vadd.f32 1.0, %v3855_v46  ;;  %v1691_v18 = vmul.f32 0.70710677, %v5367_v24  ;;  %v1498_v22 = vpop.f32.mrb[51].mxu1  ;;  %v5380_v62 = vadd.f32 %v1496_v37, %v5293_v2  ;;  %v1876_v55 = vmul.f32 %v1812_v5, %v1620_v35  ;;  %2353 = vadd.xlane.f32.xlu1 %v2306_v48 }
 0x2f4   : > { %v1877_v44 = vmul.f32 %v1813_v60, %v1621_v57  ;;  %v1692_v26 = vmul.f32 0.70710677, %v5372_v14  ;;  %v5383_v41 = vadd.f32 %v1498_v22, %v5297_v29  ;;  %v2308_v46 = vmul.f32 %v4040_v16, %v4040_v16  ;;  %v4047_v16 = vld [vmem:[%s4853_s10 + $0xb0] sm:$0xff] }
 0x2f5   : > { %v1878_v50 = vmul.f32 %v1814_v38, %v1622_v28  ;;  %3864 = verf.f32 %v1691_v18  ;;  %v1693_v43 = vmul.f32 0.70710677, %v5380_v62  ;;  %v1627_v54 = vmul.f32 0.5, %v5367_v24 }
 0x2f6   : > { %3866 = verf.f32 %v1692_v26  ;;  %v1935_v30 = vpack.c.bf16 %v1877_v44, %v1875_v15  ;;  %v1694_v56 = vmul.f32 0.70710677, %v5383_v41  ;;  %v1628_v28 = vmul.f32 0.5, %v5372_v14  ;;  %2351 = vadd.xlane.f32.xlu0 %v2305_v7 }
 0x2f7   : > { %v3857_v1 = vpop.eup %3856  ;;  %v1936_v53 = vpack.c.bf16 %v1878_v50, %v1876_v55  ;;  %3868 = verf.f32 %v1693_v43  ;;  %v2307_v15 = vmul.f32 %v4041_v51, %v4041_v51  ;;  %v1629_v24 = vmul.f32 0.5, %v5380_v62  ;;  %2357 = vadd.xlane.f32.xlu1 %v2308_v46  ;;  %v4042_v50 = vld [vmem:[%s4853_s10 + $0x98] sm:$0xff] }
 0x2f8   : > { %v3859_v63 = vpop.eup %3858  ;;  %v1815_v9 = vadd.f32 1.0, %v3857_v1  ;;  %v1502_v47 = vpop.f32.mrb[52].mxu1  ;;  %3870 = verf.f32 %v1694_v56  ;;  %v2310_v43 = vmul.f32 %v4042_v50, %v4042_v50  ;;  %v1630_v49 = vmul.f32 0.5, %v5383_v41 }
 0x2f9   : > { %v3861_v23 = vpop.eup %3860  ;;  %v1816_v36 = vadd.f32 1.0, %v3859_v63  ;;  %v5391_v19 = vadd.f32 %v1502_v47, %v5293_v2  ;;  %v1504_v8 = vpop.f32.mrb[53].mxu1  ;;  %2146 = vmatprep.mubr.bf16.mxu0 %v1936_v53  ;;  %v4043_v53 = vld [vmem:[%s4853_s10 + $0x90] sm:$0xff] }
 0x2fa   : > { %v3863_v27 = vpop.eup %3862  ;;  %v1817_v33 = vadd.f32 1.0, %v3861_v23  ;;  %v5396_v59 = vadd.f32 %v1504_v8, %v5297_v29  ;;  %v1506_v42 = vpop.f32.mrb[54].mxu1  ;;  %2147 = vmatmul.mubr.bf16.gmra.mrb[40].mxu0 %v1935_v30  ;;  %v1879_v61 = vmul.f32 %v1815_v9, %v1623_v40  ;;  %v2309_v63 = vmul.f32 %v4043_v53, %v4043_v53  ;;  %2355 = vadd.xlane.f32.xlu0 %v2307_v15 }
 0x2fb   : > { %v1818_v0 = vadd.f32 1.0, %v3863_v27  ;;  %v1695_v45 = vmul.f32 0.70710677, %v5391_v19  ;;  %v1508_v21 = vpop.f32.mrb[55].mxu1  ;;  %v5404_v17 = vadd.f32 %v1506_v42, %v5293_v2  ;;  %v1880_v35 = vmul.f32 %v1816_v36, %v1624_v58  ;;  %v4044_v58 = vld [vmem:[%s4853_s10 + $0xa8] sm:$0xff]  ;;  %2361 = vadd.xlane.f32.xlu1 %v2310_v43 }
 0x2fc   : > { %v1881_v3 = vmul.f32 %v1817_v33, %v1625_v39  ;;  %v1696_v34 = vmul.f32 0.70710677, %v5396_v59  ;;  %v5407_v25 = vadd.f32 %v1508_v21, %v5297_v29  ;;  %v2312_v47 = vmul.f32 %v4044_v58, %v4044_v58  ;;  %v4051_v58 = vld [vmem:[%s4853_s10 + $0xd0] sm:$0xff] }
 0x2fd   : > { %v1882_v5 = vmul.f32 %v1818_v0, %v1626_v20  ;;  %3872 = verf.f32 %v1695_v45  ;;  %v1697_v13 = vmul.f32 0.70710677, %v5404_v17  ;;  %v4045_v20 = vld [vmem:[%s4853_s10 + $0xa0] sm:$0xff]  ;;  %v4046_v45 = vld [vmem:[%s4853_s10 + $0xb8] sm:$0xff]  ;;  %v1631_v4 = vmul.f32 0.5, %v5391_v19 }
 0x2fe   : > { %3874 = verf.f32 %v1696_v34  ;;  %v1937_v11 = vpack.c.bf16 %v1881_v3, %v1879_v61  ;;  %v1698_v60 = vmul.f32 0.70710677, %v5407_v25  ;;  %v2311_v0 = vmul.f32 %v4045_v20, %v4045_v20  ;;  %2359 = vadd.xlane.f32.xlu0 %v2309_v63 }
 0x2ff   : > { %v3865_v57 = vpop.eup %3864  ;;  %v1938_v37 = vpack.c.bf16 %v1882_v5, %v1880_v35  ;;  %3876 = verf.f32 %v1697_v13  ;;  %v2314_v21 = vmul.f32 %v4046_v45, %v4046_v45  ;;  %v1632_v35 = vmul.f32 0.5, %v5396_v59  ;;  %2365 = vadd.xlane.f32.xlu1 %v2312_v47 }
 0x300   : > { %v3867_v31 = vpop.eup %3866  ;;  %v1512_v38 = vpop.f32.mrb[56].mxu1  ;;  %v1819_v18 = vadd.f32 1.0, %v3865_v57  ;;  %3878 = verf.f32 %v1698_v60  ;;  %v2313_v19 = vmul.f32 %v4047_v16, %v4047_v16  ;;  %v1633_v57 = vmul.f32 0.5, %v5404_v17 }
 0x301   : > { %v5415_v22 = vadd.f32 %v1512_v38, %v5293_v2  ;;  %v1514_v52 = vpop.f32.mrb[57].mxu1  ;;  %2154 = vmatprep.mubr.bf16.mxu0 %v1938_v37  ;;  %v3869_v44 = vpop.eup %3868  ;;  %v1820_v26 = vadd.f32 1.0, %v3867_v31  ;;  %v1634_v37 = vmul.f32 0.5, %v5407_v25  ;;  %v2317_v47 = vmul.f32 %v4051_v58, %v4051_v58 }
 0x302   : > { %v5420_v14 = vadd.f32 %v1514_v52, %v5297_v29  ;;  %v1516_v55 = vpop.f32.mrb[58].mxu1  ;;  %2155 = vmatmul.mubr.bf16.gmra.mrb[44].mxu0 %v1937_v11  ;;  %v3871_v30 = vpop.eup %3870  ;;  %v1821_v6 = vadd.f32 1.0, %v3869_v44  ;;  %v1883_v23 = vmul.f32 %v1819_v18, %v1627_v54  ;;  %v4048_v18 = vld [vmem:[%s4853_s10 + $0xc8] sm:$0xff]  ;;  %2363 = vadd.xlane.f32.xlu0 %v2311_v0 }
 0x303   : > { %v1699_v1 = vmul.f32 0.70710677, %v5415_v22  ;;  %v1518_v56 = vpop.f32.mrb[59].mxu1  ;;  %v1822_v40 = vadd.f32 1.0, %v3871_v30  ;;  %v5428_v9 = vadd.f32 %v1516_v55, %v5293_v2  ;;  %v1884_v41 = vmul.f32 %v1820_v26, %v1628_v28  ;;  %2369 = vadd.xlane.f32.xlu1 %v2314_v21 }
 0x304   : > { %v1700_v62 = vmul.f32 0.70710677, %v5420_v14  ;;  %v1885_v36 = vmul.f32 %v1821_v6, %v1629_v24  ;;  %v5432_v8 = vadd.f32 %v1518_v56, %v5297_v29  ;;  %v2316_v52 = vmul.f32 %v4048_v18, %v4048_v18  ;;  %v4050_v56 = vld [vmem:[%s4853_s10 + $0xd8] sm:$0xff] }
 0x305   : > { %3880 = verf.f32 %v1699_v1  ;;  %v1886_v12 = vmul.f32 %v1822_v40, %v1630_v49  ;;  %v1701_v10 = vmul.f32 0.70710677, %v5428_v9  ;;  %v4049_v49 = vld [vmem:[%s4853_s10 + $0xc0] sm:$0xff]  ;;  %v2318_v53 = vmul.f32 %v4050_v56, %v4050_v56 }
 0x306   : > { %3882 = verf.f32 %v1700_v62  ;;  %v1702_v39 = vmul.f32 0.70710677, %v5432_v8  ;;  %v1939_v33 = vpack.c.bf16 %v1885_v36, %v1883_v23  ;;  %v2315_v1 = vmul.f32 %v4049_v49, %v4049_v49  ;;  %2367 = vadd.xlane.f32.xlu0 %v2313_v19 }
 0x307   : > { %v3873_v27 = vpop.eup %3872  ;;  %3884 = verf.f32 %v1701_v10  ;;  %v1940_v48 = vpack.c.bf16 %v1886_v12, %v1884_v41  ;;  %v1635_v36 = vmul.f32 0.5, %v5415_v22  ;;  %2373 = vadd.xlane.f32.xlu1 %v2316_v52  ;;  %v1638_v0 = vmul.f32 0.5, %v5432_v8 }
 0x308   : > { %v3875_v42 = vpop.eup %3874  ;;  %v1522_v32 = vpop.f32.mrb[60].mxu1  ;;  %v1823_v7 = vadd.f32 1.0, %v3873_v27  ;;  %3886 = verf.f32 %v1702_v39  ;;  %v5471_v27 = vld [vmem:[%s4853_s10 + $0xe8] sm:$0xff] }
 0x309   : > { %v5440_v61 = vadd.f32 %v1522_v32, %v5293_v2  ;;  %v1524_v3 = vpop.f32.mrb[61].mxu1  ;;  %v3877_v34 = vpop.eup %3876  ;;  %v1824_v5 = vadd.f32 1.0, %v3875_v42  ;;  %2162 = vmatprep.mubr.bf16.mxu0 %v1940_v48  ;;  %v2320_v39 = vmul.f32 %v5471_v27, %v5471_v27  ;;  %v1636_v42 = vmul.f32 0.5, %v5420_v14 }
 0x30a   : > { %v5444_v13 = vadd.f32 %v1524_v3, %v5297_v29  ;;  %v1526_v11 = vpop.f32.mrb[62].mxu1  ;;  %v3879_v46 = vpop.eup %3878  ;;  %v1825_v60 = vadd.f32 1.0, %v3877_v34  ;;  %2163 = vmatmul.mubr.bf16.gmra.mrb[48].mxu0 %v1939_v33  ;;  %v1887_v51 = vmul.f32 %v1823_v7, %v1631_v4  ;;  %v1637_v32 = vmul.f32 0.5, %v5428_v9  ;;  %2371 = vadd.xlane.f32.xlu0 %v2315_v1 }
 0x30b   : > { %v1703_v31 = vmul.f32 0.70710677, %v5440_v61  ;;  %v1528_v59 = vpop.f32.mrb[63].mxu1  ;;  %v1826_v54 = vadd.f32 1.0, %v3879_v46  ;;  %v5452_v38 = vadd.f32 %v1526_v11, %v5293_v2  ;;  %v1888_v25 = vmul.f32 %v1824_v5, %v1632_v35  ;;  %2377 = vadd.xlane.f32.xlu1 %v2318_v53 }
 0x30c   : > { %v1704_v28 = vmul.f32 0.70710677, %v5444_v13  ;;  %v1889_v15 = vmul.f32 %v1825_v60, %v1633_v57  ;;  %v5456_v17 = vadd.f32 %v1528_v59, %v5297_v29  ;;  %v5489_v57 = vld [vmem:[%s4853_s10 + $0xe0] sm:$0xff]  ;;  %v1639_v52 = vmul.f32 0.5, %v5440_v61 }
 0x30d   : > { %3888 = verf.f32 %v1703_v31  ;;  %v1890_v44 = vmul.f32 %v1826_v54, %v1634_v37  ;;  %v1705_v26 = vmul.f32 0.70710677, %v5452_v38  ;;  %v2319_v60 = vmul.f32 %v5489_v57, %v5489_v57  ;;  %v5497_v54 = vld [vmem:[%s4853_s10 + $0xf8] sm:$0xff] }
 0x30e   : > { %3890 = verf.f32 %v1704_v28  ;;  %v1706_v55 = vmul.f32 0.70710677, %v5456_v17  ;;  %v1941_v50 = vpack.c.bf16 %v1889_v15, %v1887_v51  ;;  %2375 = vadd.xlane.f32.xlu0 %v2317_v47  ;;  %v2322_v28 = vmul.f32 %v5497_v54, %v5497_v54 }
 0x30f   : > { %v3881_v24 = vpop.eup %3880  ;;  %3892 = verf.f32 %v1705_v26  ;;  %v1942_v6 = vpack.c.bf16 %v1890_v44, %v1888_v25  ;;  %2381 = vadd.xlane.f32.xlu1 %v2320_v39  ;;  %v5506_v44 = vld [vmem:[%s4853_s10 + $0xf0] sm:$0xff] }
 0x310   : > { %v3883_v43 = vpop.eup %3882  ;;  %v1532_v30 = vpop.f32.mrb[64].mxu1  ;;  %v1827_v63 = vadd.f32 1.0, %v3881_v24  ;;  %3894 = verf.f32 %v1706_v55  ;;  %v2321_v26 = vmul.f32 %v5506_v44, %v5506_v44  ;;  %v1640_v55 = vmul.f32 0.5, %v5444_v13 }
 0x311   : > { %v5463_v40 = vadd.f32 %v1532_v30, %v5293_v2  ;;  %v1534_v62 = vpop.f32.mrb[65].mxu1  ;;  %v3885_v23 = vpop.eup %3884  ;;  %v1828_v41 = vadd.f32 1.0, %v3883_v43  ;;  %2170 = vmatprep.mubr.bf16.mxu0 %v1942_v6  ;;  %v1642_v6 = vmul.f32 0.5, %v5456_v17 }
 0x312   : > { %v5468_v12 = vadd.f32 %v1534_v62, %v5297_v29  ;;  %v1536_v10 = vpop.f32.mrb[66].mxu1  ;;  %v3887_v33 = vpop.eup %3886  ;;  %v1829_v48 = vadd.f32 1.0, %v3885_v23  ;;  %2171 = vmatmul.mubr.bf16.gmra.mrb[52].mxu0 %v1941_v50  ;;  %v1891_v7 = vmul.f32 %v1827_v63, %v1635_v36  ;;  %v1641_v50 = vmul.f32 0.5, %v5452_v38  ;;  %2379 = vadd.xlane.f32.xlu0 %v2319_v60 }
 0x313   : > { %v1707_v22 = vmul.f32 0.70710677, %v5463_v40  ;;  %v1538_v20 = vpop.f32.mrb[67].mxu1  ;;  %v1830_v45 = vadd.f32 1.0, %v3887_v33  ;;  %v5481_v4 = vadd.f32 %v1536_v10, %v5293_v2  ;;  %v1892_v9 = vmul.f32 %v1828_v41, %v1636_v42  ;;  %2385 = vadd.xlane.f32.xlu1 %v2322_v28 }
 0x314   : > { %v1708_v21 = vmul.f32 0.70710677, %v5468_v12  ;;  %v1893_v3 = vmul.f32 %v1829_v48, %v1637_v32  ;;  %v5484_v14 = vadd.f32 %v1538_v20, %v5297_v29  ;;  %v1643_v48 = vmul.f32 0.5, %v5463_v40 }
 0x315   : > { %3896 = verf.f32 %v1707_v22  ;;  %v1894_v34 = vmul.f32 %v1830_v45, %v1638_v0  ;;  %v1709_v35 = vmul.f32 0.70710677, %v5481_v4 }
 0x316   : > { %3898 = verf.f32 %v1708_v21  ;;  %v1710_v5 = vmul.f32 0.70710677, %v5484_v14  ;;  %v1943_v11 = vpack.c.bf16 %v1893_v3, %v1891_v7  ;;  %2383 = vadd.xlane.f32.xlu0 %v2321_v26  ;;  %v1644_v21 = vmul.f32 0.5, %v5468_v12 }
 0x317   : > { %v3889_v8 = vpop.eup %3888  ;;  %3900 = verf.f32 %v1709_v35  ;;  %v1944_v46 = vpack.c.bf16 %v1894_v34, %v1892_v9  ;;  %v1645_v7 = vmul.f32 0.5, %v5481_v4  ;;  %v1646_v35 = vmul.f32 0.5, %v5484_v14 }
 0x318   : > { %v3891_v16 = vpop.eup %3890  ;;  %v1542_v19 = vpop.f32.mrb[68].mxu1  ;;  %v1831_v37 = vadd.f32 1.0, %v3889_v8  ;;  %3902 = verf.f32 %v1710_v5 }
 0x319   : > { %v5494_v31 = vadd.f32 %v1542_v19, %v5293_v2  ;;  %v1544_v59 = vpop.f32.mrb[69].mxu1  ;;  %v3893_v18 = vpop.eup %3892  ;;  %v1832_v51 = vadd.f32 1.0, %v3891_v16  ;;  %2178 = vmatprep.mubr.bf16.mxu0 %v1944_v46 }
 0x31a   : > { %v5503_v15 = vadd.f32 %v1544_v59, %v5297_v29  ;;  %v1546_v25 = vpop.f32.mrb[70].mxu1  ;;  %v3895_v24 = vpop.eup %3894  ;;  %v1833_v43 = vadd.f32 1.0, %v3893_v18  ;;  %2179 = vmatmul.mubr.bf16.gmra.mrb[56].mxu0 %v1943_v11  ;;  %v1895_v53 = vmul.f32 %v1831_v37, %v1639_v52 }
 0x31b   : > { %v1711_v61 = vmul.f32 0.70710677, %v5494_v31  ;;  %v1548_v30 = vpop.f32.mrb[71].mxu1  ;;  %v1834_v49 = vadd.f32 1.0, %v3895_v24  ;;  %v5516_v56 = vadd.f32 %v1546_v25, %v5293_v2  ;;  %v1896_v38 = vmul.f32 %v1832_v51, %v1640_v55 }
 0x31c   : > { %v1712_v1 = vmul.f32 0.70710677, %v5503_v15  ;;  %v1897_v63 = vmul.f32 %v1833_v43, %v1641_v50  ;;  %v5519_v13 = vadd.f32 %v1548_v30, %v5297_v29  ;;  %v1647_v24 = vmul.f32 0.5, %v5494_v31 }
 0x31d   : > { %3904 = verf.f32 %v1711_v61  ;;  %v1898_v62 = vmul.f32 %v1834_v49, %v1642_v6  ;;  %v1713_v58 = vmul.f32 0.70710677, %v5516_v56  ;;  %v1648_v30 = vmul.f32 0.5, %v5503_v15 }
 0x31e   : > { %3906 = verf.f32 %v1712_v1  ;;  %v1714_v47 = vmul.f32 0.70710677, %v5519_v13  ;;  %v1945_v23 = vpack.c.bf16 %v1897_v63, %v1895_v53  ;;  %v1649_v6 = vmul.f32 0.5, %v5516_v56 }
 0x31f   : > { %v3897_v17 = vpop.eup %3896  ;;  %3908 = verf.f32 %v1713_v58  ;;  %v1946_v10 = vpack.c.bf16 %v1898_v62, %v1896_v38  ;;  %v1650_v63 = vmul.f32 0.5, %v5519_v13 }
 0x320   : > { %v3899_v36 = vpop.eup %3898  ;;  %v1552_v41 = vpop.f32.mrb[72].mxu1  ;;  %v1835_v39 = vadd.f32 1.0, %v3897_v17  ;;  %3910 = verf.f32 %v1714_v47 }
 0x321   : > { %v5524_v33 = vadd.f32 %v1552_v41, %v5293_v2  ;;  %v1554_v42 = vpop.f32.mrb[73].mxu1  ;;  %v3901_v32 = vpop.eup %3900  ;;  %v1836_v22 = vadd.f32 1.0, %v3899_v36  ;;  %2186 = vmatprep.mubr.bf16.mxu0 %v1946_v10 }
 0x322   : > { %v5528_v20 = vadd.f32 %v1554_v42, %v5297_v29  ;;  %v1556_v0 = vpop.f32.mrb[74].mxu1  ;;  %v3903_v45 = vpop.eup %3902  ;;  %v1837_v3 = vadd.f32 1.0, %v3901_v32  ;;  %2187 = vmatmul.mubr.bf16.gmra.mrb[60].mxu0 %v1945_v23  ;;  %v1899_v11 = vmul.f32 %v1835_v39, %v1643_v48 }
 0x323   : > { %v1715_v9 = vmul.f32 0.70710677, %v5524_v33  ;;  %v1558_v34 = vpop.f32.mrb[75].mxu1  ;;  %v1838_v8 = vadd.f32 1.0, %v3903_v45  ;;  %v5536_v5 = vadd.f32 %v1556_v0, %v5293_v2  ;;  %v1900_v4 = vmul.f32 %v1836_v22, %v1644_v21 }
 0x324   : > { %v1716_v40 = vmul.f32 0.70710677, %v5528_v20  ;;  %v1901_v16 = vmul.f32 %v1837_v3, %v1645_v7  ;;  %v5539_v12 = vadd.f32 %v1558_v34, %v5297_v29  ;;  %v1651_v45 = vmul.f32 0.5, %v5524_v33 }
 0x325   : > { %3912 = verf.f32 %v1715_v9  ;;  %v1902_v19 = vmul.f32 %v1838_v8, %v1646_v35  ;;  %v1717_v46 = vmul.f32 0.70710677, %v5536_v5  ;;  %v1652_v34 = vmul.f32 0.5, %v5528_v20 }
 0x326   : > { %3914 = verf.f32 %v1716_v40  ;;  %v1718_v14 = vmul.f32 0.70710677, %v5539_v12  ;;  %v1947_v37 = vpack.c.bf16 %v1901_v16, %v1899_v11  ;;  %v1653_v35 = vmul.f32 0.5, %v5536_v5 }
 0x327   : > { %v3905_v60 = vpop.eup %3904  ;;  %3916 = verf.f32 %v1717_v46  ;;  %v1948_v18 = vpack.c.bf16 %v1902_v19, %v1900_v4  ;;  %v1654_v16 = vmul.f32 0.5, %v5539_v12 }
 0x328   : > { %v3907_v59 = vpop.eup %3906  ;;  %v1562_v28 = vpop.f32.mrb[76].mxu1  ;;  %v1839_v52 = vadd.f32 1.0, %v3905_v60  ;;  %3918 = verf.f32 %v1718_v14 }
 0x329   : > { %v5544_v51 = vadd.f32 %v1562_v28, %v5293_v2  ;;  %v1564_v25 = vpop.f32.mrb[77].mxu1  ;;  %v3909_v26 = vpop.eup %3908  ;;  %v1840_v55 = vadd.f32 1.0, %v3907_v59  ;;  %2194 = vmatprep.mubr.bf16.mxu0 %v1948_v18 }
 0x32a   : > { %v5548_v50 = vadd.f32 %v1564_v25, %v5297_v29  ;;  %v1566_v43 = vpop.f32.mrb[78].mxu1  ;;  %v3911_v61 = vpop.eup %3910  ;;  %v1841_v49 = vadd.f32 1.0, %v3909_v26  ;;  %2195 = vmatmul.mubr.bf16.gmra.mrb[64].mxu0 %v1947_v37  ;;  %v1903_v58 = vmul.f32 %v1839_v52, %v1647_v24 }
 0x32b   : > { %v1719_v1 = vmul.f32 0.70710677, %v5544_v51  ;;  %v1568_v53 = vpop.f32.mrb[79].mxu1  ;;  %v1842_v38 = vadd.f32 1.0, %v3911_v61  ;;  %v5556_v62 = vadd.f32 %v1566_v43, %v5293_v2  ;;  %v1904_v56 = vmul.f32 %v1840_v55, %v1648_v30 }
 0x32c   : > { %v1720_v31 = vmul.f32 0.70710677, %v5548_v50  ;;  %v1905_v17 = vmul.f32 %v1841_v49, %v1649_v6  ;;  %v5559_v15 = vadd.f32 %v1568_v53, %v5297_v29  ;;  %v1655_v61 = vmul.f32 0.5, %v5544_v51 }
 0x32d   : > { %3920 = verf.f32 %v1719_v1  ;;  %v1906_v47 = vmul.f32 %v1842_v38, %v1650_v63  ;;  %v1721_v23 = vmul.f32 0.70710677, %v5556_v62  ;;  %v1656_v53 = vmul.f32 0.5, %v5548_v50 }
 0x32e   : > { %3922 = verf.f32 %v1720_v31  ;;  %v1722_v13 = vmul.f32 0.70710677, %v5559_v15  ;;  %v1949_v41 = vpack.c.bf16 %v1905_v17, %v1903_v58  ;;  %v1657_v63 = vmul.f32 0.5, %v5556_v62 }
 0x32f   : > { %v3913_v36 = vpop.eup %3912  ;;  %3924 = verf.f32 %v1721_v23  ;;  %v1950_v42 = vpack.c.bf16 %v1906_v47, %v1904_v56  ;;  %v1658_v17 = vmul.f32 0.5, %v5559_v15 }
 0x330   : > { %v3915_v10 = vpop.eup %3914  ;;  %v1572_v39 = vpop.f32.mrb[80].mxu1  ;;  %v1843_v32 = vadd.f32 1.0, %v3913_v36  ;;  %3926 = verf.f32 %v1722_v13 }
 0x331   : > { %v5564_v48 = vadd.f32 %v1572_v39, %v5293_v2  ;;  %v1574_v22 = vpop.f32.mrb[81].mxu1  ;;  %v3917_v0 = vpop.eup %3916  ;;  %v1844_v21 = vadd.f32 1.0, %v3915_v10  ;;  %2202 = vmatprep.mubr.bf16.mxu0 %v1950_v42 }
 0x332   : > { %v5568_v7 = vadd.f32 %v1574_v22, %v5297_v29  ;;  %v1576_v3 = vpop.f32.mrb[82].mxu1  ;;  %v3919_v9 = vpop.eup %3918  ;;  %v1845_v8 = vadd.f32 1.0, %v3917_v0  ;;  %2203 = vmatmul.mubr.bf16.gmra.mrb[68].mxu0 %v1949_v41  ;;  %v1907_v46 = vmul.f32 %v1843_v32, %v1651_v45 }
 0x333   : > { %v1723_v40 = vmul.f32 0.70710677, %v5564_v48  ;;  %v1578_v11 = vpop.f32.mrb[83].mxu1  ;;  %v1846_v4 = vadd.f32 1.0, %v3919_v9  ;;  %v5576_v19 = vadd.f32 %v1576_v3, %v5293_v2  ;;  %v1908_v5 = vmul.f32 %v1844_v21, %v1652_v34 }
 0x334   : > { %v1724_v33 = vmul.f32 0.70710677, %v5568_v7  ;;  %v1909_v60 = vmul.f32 %v1845_v8, %v1653_v35  ;;  %v5579_v20 = vadd.f32 %v1578_v11, %v5297_v29  ;;  %v1659_v9 = vmul.f32 0.5, %v5564_v48 }
 0x335   : > { %3928 = verf.f32 %v1723_v40  ;;  %v1910_v14 = vmul.f32 %v1846_v4, %v1654_v16  ;;  %v1725_v37 = vmul.f32 0.70710677, %v5576_v19  ;;  %v1660_v11 = vmul.f32 0.5, %v5568_v7 }
 0x336   : > { %3930 = verf.f32 %v1724_v33  ;;  %v1726_v12 = vmul.f32 0.70710677, %v5579_v20  ;;  %v1951_v28 = vpack.c.bf16 %v1909_v60, %v1907_v46  ;;  %v1661_v16 = vmul.f32 0.5, %v5576_v19 }
 0x337   : > { %v3921_v59 = vpop.eup %3920  ;;  %3932 = verf.f32 %v1725_v37  ;;  %v1952_v25 = vpack.c.bf16 %v1910_v14, %v1908_v5  ;;  %v1662_v60 = vmul.f32 0.5, %v5579_v20 }
 0x338   : > { %v3923_v18 = vpop.eup %3922  ;;  %v1582_v52 = vpop.f32.mrb[84].mxu1  ;;  %v1847_v26 = vadd.f32 1.0, %v3921_v59  ;;  %3934 = verf.f32 %v1726_v12 }
 0x339   : > { %v5584_v24 = vadd.f32 %v1582_v52, %v5293_v2  ;;  %v1584_v55 = vpop.f32.mrb[85].mxu1  ;;  %v3925_v43 = vpop.eup %3924  ;;  %v1848_v30 = vadd.f32 1.0, %v3923_v18  ;;  %2210 = vmatprep.mubr.bf16.mxu0 %v1952_v25 }
 0x33a   : > { %v5588_v6 = vadd.f32 %v1584_v55, %v5297_v29  ;;  %v1586_v49 = vpop.f32.mrb[86].mxu1  ;;  %v3927_v1 = vpop.eup %3926  ;;  %v1849_v38 = vadd.f32 1.0, %v3925_v43  ;;  %2211 = vmatmul.mubr.bf16.gmra.mrb[72].mxu0 %v1951_v28  ;;  %v1911_v23 = vmul.f32 %v1847_v26, %v1655_v61 }
 0x33b   : > { %v1727_v31 = vmul.f32 0.70710677, %v5584_v24  ;;  %v1588_v58 = vpop.f32.mrb[87].mxu1  ;;  %v1850_v56 = vadd.f32 1.0, %v3927_v1  ;;  %v5596_v47 = vadd.f32 %v1586_v49, %v5293_v2  ;;  %v1912_v62 = vmul.f32 %v1848_v30, %v1656_v53 }
 0x33c   : > { %v1728_v51 = vmul.f32 0.70710677, %v5588_v6  ;;  %v1913_v36 = vmul.f32 %v1849_v38, %v1657_v63  ;;  %v5599_v50 = vadd.f32 %v1588_v58, %v5297_v29  ;;  %v1663_v1 = vmul.f32 0.5, %v5584_v24 }
 0x33d   : > { %3936 = verf.f32 %v1727_v31  ;;  %v1914_v13 = vmul.f32 %v1850_v56, %v1658_v17  ;;  %v1729_v41 = vmul.f32 0.70710677, %v5596_v47  ;;  %v1664_v58 = vmul.f32 0.5, %v5588_v6 }
 0x33e   : > { %3938 = verf.f32 %v1728_v51  ;;  %v1730_v15 = vmul.f32 0.70710677, %v5599_v50  ;;  %v1953_v39 = vpack.c.bf16 %v1913_v36, %v1911_v23  ;;  %v1665_v17 = vmul.f32 0.5, %v5596_v47 }
 0x33f   : > { %v3929_v10 = vpop.eup %3928  ;;  %3940 = verf.f32 %v1729_v41  ;;  %v1954_v22 = vpack.c.bf16 %v1914_v13, %v1912_v62  ;;  %v1666_v36 = vmul.f32 0.5, %v5599_v50 }
 0x340   : > { %v3931_v42 = vpop.eup %3930  ;;  %v1592_v32 = vpop.f32.mrb[88].mxu1  ;;  %v1851_v0 = vadd.f32 1.0, %v3929_v10  ;;  %3942 = verf.f32 %v1730_v15 }
 0x341   : > { %v5604_v45 = vadd.f32 %v1592_v32, %v5293_v2  ;;  %v1594_v21 = vpop.f32.mrb[89].mxu1  ;;  %v3933_v3 = vpop.eup %3932  ;;  %v1852_v34 = vadd.f32 1.0, %v3931_v42  ;;  %2218 = vmatprep.mubr.bf16.mxu0 %v1954_v22 }
 0x342   : > { %v5608_v35 = vadd.f32 %v1594_v21, %v5297_v29  ;;  %v1596_v8 = vpop.f32.mrb[90].mxu1  ;;  %v3935_v40 = vpop.eup %3934  ;;  %v1853_v4 = vadd.f32 1.0, %v3933_v3  ;;  %2219 = vmatmul.mubr.bf16.gmra.mrb[76].mxu0 %v1953_v39  ;;  %v1915_v37 = vmul.f32 %v1851_v0, %v1659_v9 }
 0x343   : > { %v1731_v33 = vmul.f32 0.70710677, %v5604_v45  ;;  %v1598_v46 = vpop.f32.mrb[91].mxu1  ;;  %v1854_v5 = vadd.f32 1.0, %v3935_v40  ;;  %v1597_v14 = vadd.f32 %v1596_v8, %v5293_v2  ;;  %v1916_v7 = vmul.f32 %v1852_v34, %v1660_v11 }
 0x344   : > { %v1732_v48 = vmul.f32 0.70710677, %v5608_v35  ;;  %v1917_v59 = vmul.f32 %v1853_v4, %v1661_v16  ;;  %v1599_v12 = vadd.f32 %v1598_v46, %v5297_v29  ;;  %v1667_v34 = vmul.f32 0.5, %v5604_v45 }
 0x345   : > { %3944 = verf.f32 %v1731_v33  ;;  %v1918_v28 = vmul.f32 %v1854_v5, %v1662_v60  ;;  %v1733_v19 = vmul.f32 0.70710677, %v1597_v14  ;;  %v1669_v8 = vmul.f32 0.5, %v1597_v14 }
 0x346   : > { %3946 = verf.f32 %v1732_v48  ;;  %v1734_v52 = vmul.f32 0.70710677, %v1599_v12  ;;  %v1955_v25 = vpack.c.bf16 %v1917_v59, %v1915_v37  ;;  %v1668_v40 = vmul.f32 0.5, %v5608_v35 }
 0x347   : > { %v3937_v18 = vpop.eup %3936  ;;  %3948 = verf.f32 %v1733_v19  ;;  %v1956_v55 = vpack.c.bf16 %v1918_v28, %v1916_v7  ;;  %v1670_v11 = vmul.f32 0.5, %v1599_v12 }
 0x348   : > { %v3939_v26 = vpop.eup %3938  ;;  %v1602_v20 = vpop.f32.mrb[92].mxu1  ;;  %v1855_v43 = vadd.f32 1.0, %v3937_v18  ;;  %3950 = verf.f32 %v1734_v52 }
 0x349   : > { %v1603_v61 = vadd.f32 %v1602_v20, %v5293_v2  ;;  %v1604_v30 = vpop.f32.mrb[93].mxu1  ;;  %v3941_v49 = vpop.eup %3940  ;;  %v1856_v53 = vadd.f32 1.0, %v3939_v26  ;;  %2226 = vmatprep.mubr.bf16.mxu0 %v1956_v55 }
 0x34a   : > { %v1605_v63 = vadd.f32 %v1604_v30, %v5297_v29  ;;  %v1606_v38 = vpop.f32.mrb[94].mxu1  ;;  %v3943_v31 = vpop.eup %3942  ;;  %v1857_v56 = vadd.f32 1.0, %v3941_v49  ;;  %2227 = vmatmul.mubr.bf16.gmra.mrb[80].mxu0 %v1955_v25  ;;  %v1919_v41 = vmul.f32 %v1855_v43, %v1663_v1 }
 0x34b   : > { %v1735_v51 = vmul.f32 0.70710677, %v1603_v61  ;;  %v1608_v23 = vpop.f32.mrb[95].mxu1  ;;  %v1858_v62 = vadd.f32 1.0, %v3943_v31  ;;  %v1607_v24 = vadd.f32 %v1606_v38, %v5293_v2  ;;  %v1920_v39 = vmul.f32 %v1856_v53, %v1664_v58  ;;  %v2328_v1 = vpop.xlane.xlu1 %2327 }
 0x34c   : > { %v1736_v13 = vmul.f32 0.70710677, %v1605_v63  ;;  %v1921_v10 = vmul.f32 %v1857_v56, %v1665_v17  ;;  %v1609_v15 = vadd.f32 %v1608_v23, %v5297_v29  ;;  %v1671_v14 = vmul.f32 0.5, %v1603_v61  ;;  %v2324_v38 = vpop.xlane.xlu0 %2323 }
 0x34d   : > { %3952 = verf.f32 %v1735_v51  ;;  %v1922_v42 = vmul.f32 %v1858_v62, %v1666_v36  ;;  %v1737_v6 = vmul.f32 0.70710677, %v1607_v24  ;;  %v1673_v18 = vmul.f32 0.5, %v1607_v24  ;;  %v4056_v24 = vld [vmem:[%s4853_s10 + $0x10] sm:$0xff] }
 0x34e   : > { %3954 = verf.f32 %v1736_v13  ;;  %v1738_v32 = vmul.f32 0.70710677, %v1609_v15  ;;  %v1957_v22 = vpack.c.bf16 %v1921_v10, %v1919_v41  ;;  %v1672_v35 = vmul.f32 0.5, %v1605_v63 }
 0x34f   : > { %v3945_v47 = vpop.eup %3944  ;;  %3956 = verf.f32 %v1737_v6  ;;  %v1958_v21 = vpack.c.bf16 %v1922_v42, %v1920_v39  ;;  %v1674_v12 = vmul.f32 0.5, %v1609_v15  ;;  %v2389_v53 = vmax.f32 %v2328_v1, 1e-24  ;;  %v2330_v61 = vpop.xlane.xlu1 %2329 }
 0x350   : > { %v3947_v0 = vpop.eup %3946  ;;  %v1859_v50 = vadd.f32 1.0, %v3945_v47  ;;  %3958 = verf.f32 %v1738_v32  ;;  %v2387_v31 = vmax.f32 %v2324_v38, 1e-24  ;;  %v2390_v58 = vmax.f32 %v2330_v61, 1e-24  ;;  %v4057_v47 = vld [vmem:[%s4853_s10] sm:$0xff] }
 0x351   : > { %v3949_v3 = vpop.eup %3948  ;;  %v1860_v9 = vadd.f32 1.0, %v3947_v0  ;;  %2234 = vmatprep.mubr.bf16.mxu0 %v1958_v21  ;;  %3960 = vrsqrt.f32 %v2389_v53  ;;  %v4064_v38 = vld [vmem:[%s4853_s10 + $0x48] sm:$0xff]  ;;  %v4065_v61 = vld [vmem:[%s4853_s10 + $0x40] sm:$0xff] }
 0x352   : > { %v3951_v2 = vpop.eup %3950  ;;  %v1861_v29 = vadd.f32 1.0, %v3949_v3  ;;  %2235 = vmatmul.mubr.bf16.gmra.mrb[84].mxu0 %v1957_v22  ;;  %v1923_v4 = vmul.f32 %v1859_v50, %v1667_v34  ;;  %3962 = vrsqrt.f32 %v2387_v31  ;;  %v4058_v22 = vld [vmem:[%s4853_s10 + $0x18] sm:$0xff]  ;;  %v4059_v3 = vld [vmem:[%s4853_s10 + $0x8] sm:$0xff] }
 0x353   : > { %v1862_v16 = vadd.f32 1.0, %v3951_v2  ;;  %v1924_v46 = vmul.f32 %v1860_v9, %v1668_v40  ;;  %3964 = vrsqrt.f32 %v2390_v58 }
 0x354   : > { %v1925_v33 = vmul.f32 %v1861_v29, %v1669_v8 }
 0x355   : > { %v1926_v60 = vmul.f32 %v1862_v16, %v1670_v11 }
 0x356   : > { %v1959_v48 = vpack.c.bf16 %v1925_v33, %v1923_v4 }
 0x357   : > { %v3953_v5 = vpop.eup %3952  ;;  %v1960_v59 = vpack.c.bf16 %v1926_v60, %v1924_v46 }
 0x358   : > { %v3955_v37 = vpop.eup %3954  ;;  %v1863_v7 = vadd.f32 1.0, %v3953_v5  ;;  %v4060_v5 = vld [vmem:[%s4853_s10 + $0x28] sm:$0xff] }
 0x359   : > { %v3957_v28 = vpop.eup %3956  ;;  %v1864_v19 = vadd.f32 1.0, %v3955_v37  ;;  %2242 = vmatprep.mubr.bf16.mxu0 %v1960_v59  ;;  %v4061_v37 = vld [vmem:[%s4853_s10 + $0x20] sm:$0xff] }
 0x35a   : > { %v3959_v45 = vpop.eup %3958  ;;  %v1865_v52 = vadd.f32 1.0, %v3957_v28  ;;  %2243 = vmatmul.mubr.bf16.gmra.mrb[88].mxu0 %v1959_v48  ;;  %v1927_v26 = vmul.f32 %v1863_v7, %v1671_v14 }
 0x35b   : > { %v1866_v25 = vadd.f32 1.0, %v3959_v45  ;;  %v1928_v55 = vmul.f32 %v1864_v19, %v1672_v35  ;;  %v3961_v23 = vpop.eup %3960  ;;  %v4062_v35 = vld [vmem:[%s4853_s10 + $0x38] sm:$0xff] }
 0x35c   : > { %v1929_v20 = vmul.f32 %v1865_v52, %v1673_v18  ;;  %v3963_v13 = vpop.eup %3962  ;;  %v2453_v41 = vmul.f32 %v4056_v24, %v3961_v23 }
 0x35d   : > { %v1930_v43 = vmul.f32 %v1866_v25, %v1674_v12  ;;  %v3965_v39 = vpop.eup %3964  ;;  %v2451_v32 = vmul.f32 %v4057_v47, %v3963_v13  ;;  %v4063_v25 = vld [vmem:[%s4853_s10 + $0x30] sm:$0xff]  ;;  %v4066_v13 = vld [vmem:[%s4853_s10 + $0x58] sm:$0xff] }
 0x35e   : > { %v1961_v30 = vpack.c.bf16 %v1929_v20, %v1927_v26  ;;  %v2454_v0 = vmul.f32 %v4058_v22, %v3965_v39 }
 0x35f   : > { %v1962_v49 = vpack.c.bf16 %v1930_v43, %v1928_v55 }
 0x360   : > { %v2484_v50 = vpack.c.bf16 %v2454_v0, %v2453_v41  ;;  %v4067_v41 = vld [vmem:[%s4853_s10 + $0x50] sm:$0xff]  ;;  %v4068_v0 = vld [vmem:[%s4853_s10 + $0x68] sm:$0xff] }
 0x361   : > { %2250 = vmatprep.mubr.bf16.mxu0 %v1962_v49 }
 0x362   : > { %2251 = vmatmul.mubr.bf16.gmra.mrb[92].mxu0 %v1961_v30  ;;  %v2326_v63 = vpop.xlane.xlu0 %2325  ;;  %2500 = vst [vmem:[#allocation2 + $0x8] sm:$0xff] %v2484_v50  ;;  %v4069_v50 = vld [vmem:[%s4853_s10 + $0x60] sm:$0xff] }
 0x363   : > { %v2388_v17 = vmax.f32 %v2326_v63, 1e-24  ;;  %v2334_v56 = vpop.xlane.xlu1 %2333 }
 0x364   : > { %v2392_v36 = vmax.f32 %v2334_v56, 1e-24 }
 0x365   : > { %3966 = vrsqrt.f32 %v2388_v17 }
 0x366   : > { %3968 = vrsqrt.f32 %v2392_v36 }
 0x36d   : > { %v2332_v51 = vpop.xlane.xlu0 %2331 }
 0x36e   : > { %v2391_v62 = vmax.f32 %v2332_v51, 1e-24 }
 0x36f   : > { %v3967_v21 = vpop.eup %3966 }
 0x370   : > { %3970 = vrsqrt.f32 %v2391_v62  ;;  %v2338_v10 = vpop.xlane.xlu1 %2337  ;;  %v2452_v9 = vmul.f32 %v4059_v3, %v3967_v21  ;;  %v3969_v4 = vpop.eup %3968 }
 0x371   : > { %v2336_v15 = vpop.xlane.xlu0 %2335  ;;  %v2394_v42 = vmax.f32 %v2338_v10, 1e-24  ;;  %v2456_v48 = vmul.f32 %v4060_v5, %v3969_v4 }
 0x372   : > { %v2393_v6 = vmax.f32 %v2336_v15, 1e-24  ;;  %v2483_v40 = vpack.c.bf16 %v2452_v9, %v2451_v32 }
 0x373   : > { %3972 = vrsqrt.f32 %v2394_v42 }
 0x374   : > { %3974 = vrsqrt.f32 %v2393_v6  ;;  %v2342_v2 = vpop.xlane.xlu1 %2341  ;;  %2499 = vst [vmem:[#allocation2] sm:$0xff] %v2483_v40 }
 0x375   : > { %v2396_v8 = vmax.f32 %v2342_v2, 1e-24 }
 0x376   : > { %v2340_v34 = vpop.xlane.xlu0 %2339 }
 0x377   : > { %v2395_v29 = vmax.f32 %v2340_v34, 1e-24  ;;  %3976 = vrsqrt.f32 %v2396_v8 }
 0x378   : > { %v2346_v11 = vpop.xlane.xlu1 %2345 }
 0x379   : > { %3978 = vrsqrt.f32 %v2395_v29  ;;  %v2398_v33 = vmax.f32 %v2346_v11, 1e-24 }
 0x37a   : > { %v2344_v16 = vpop.xlane.xlu0 %2343  ;;  %v3971_v60 = vpop.eup %3970 }
 0x37b   : > { %v2397_v46 = vmax.f32 %v2344_v16, 1e-24  ;;  %v2455_v59 = vmul.f32 %v4061_v37, %v3971_v60  ;;  %3980 = vrsqrt.f32 %v2398_v33  ;;  %v4070_v16 = vld [vmem:[%s4853_s10 + $0x78] sm:$0xff]  ;;  %v4071_v33 = vld [vmem:[%s4853_s10 + $0x70] sm:$0xff] }
 0x37c   : > { %v2350_v7 = vpop.xlane.xlu1 %2349 }
 0x37d   : > { %3982 = vrsqrt.f32 %v2397_v46  ;;  %v3973_v19 = vpop.eup %3972  ;;  %v2485_v45 = vpack.c.bf16 %v2456_v48, %v2455_v59  ;;  %v2400_v14 = vmax.f32 %v2350_v7, 1e-24 }
 0x37e   : > { %v3975_v52 = vpop.eup %3974  ;;  %v2458_v12 = vmul.f32 %v4062_v35, %v3973_v19  ;;  %v4072_v19 = vld [vmem:[%s4853_s10 + $0x88] sm:$0xff] }
 0x37f   : > { %v2348_v28 = vpop.xlane.xlu0 %2347  ;;  %2501 = vst [vmem:[#allocation2 + $0x10] sm:$0xff] %v2485_v45  ;;  %v2457_v26 = vmul.f32 %v4063_v25, %v3975_v52  ;;  %3984 = vrsqrt.f32 %v2400_v14  ;;  %v4073_v14 = vld [vmem:[%s4853_s10 + $0x80] sm:$0xff] }
 0x380   : > { %v2399_v18 = vmax.f32 %v2348_v28, 1e-24  ;;  %v2354_v20 = vpop.xlane.xlu1 %2353 }
 0x381   : > { %v3977_v43 = vpop.eup %3976  ;;  %v2486_v30 = vpack.c.bf16 %v2458_v12, %v2457_v26  ;;  %v2402_v49 = vmax.f32 %v2354_v20, 1e-24 }
 0x382   : > { %3986 = vrsqrt.f32 %v2399_v18  ;;  %v2460_v31 = vmul.f32 %v4064_v38, %v3977_v43  ;;  %v4074_v43 = vld [vmem:[%s4853_s10 + $0x98] sm:$0xff] }
 0x383   : > { %v2352_v55 = vpop.xlane.xlu0 %2351  ;;  %v3979_v53 = vpop.eup %3978  ;;  %2502 = vst [vmem:[#allocation2 + $0x18] sm:$0xff] %v2486_v30  ;;  %3988 = vrsqrt.f32 %v2402_v49  ;;  %v4075_v49 = vld [vmem:[%s4853_s10 + $0x90] sm:$0xff] }
 0x384   : > { %v2401_v1 = vmax.f32 %v2352_v55, 1e-24  ;;  %v2459_v58 = vmul.f32 %v4065_v61, %v3979_v53  ;;  %v2358_v63 = vpop.xlane.xlu1 %2357 }
 0x385   : > { %v3981_v56 = vpop.eup %3980  ;;  %v2404_v23 = vmax.f32 %v2358_v63, 1e-24 }
 0x386   : > { %3990 = vrsqrt.f32 %v2401_v1  ;;  %v2487_v51 = vpack.c.bf16 %v2460_v31, %v2459_v58  ;;  %v2462_v24 = vmul.f32 %v4066_v13, %v3981_v56  ;;  %v4076_v56 = vld [vmem:[%s4853_s10 + $0xa8] sm:$0xff] }
 0x387   : > { %v2356_v17 = vpop.xlane.xlu0 %2355  ;;  %v3983_v62 = vpop.eup %3982  ;;  %3992 = vrsqrt.f32 %v2404_v23  ;;  %v4077_v23 = vld [vmem:[%s4853_s10 + $0xa0] sm:$0xff] }
 0x388   : > { %v2403_v36 = vmax.f32 %v2356_v17, 1e-24  ;;  %2503 = vst [vmem:[#allocation2 + $0x20] sm:$0xff] %v2487_v51  ;;  %v2461_v10 = vmul.f32 %v4067_v41, %v3983_v62  ;;  %v2362_v15 = vpop.xlane.xlu1 %2361 }
 0x389   : > { %v3985_v42 = vpop.eup %3984  ;;  %v2406_v47 = vmax.f32 %v2362_v15, 1e-24 }
 0x38a   : > { %3994 = vrsqrt.f32 %v2403_v36  ;;  %v2488_v6 = vpack.c.bf16 %v2462_v24, %v2461_v10  ;;  %v2464_v21 = vmul.f32 %v4068_v0, %v3985_v42  ;;  %v4078_v42 = vld [vmem:[%s4853_s10 + $0xb8] sm:$0xff] }
 0x38b   : > { %v2360_v39 = vpop.xlane.xlu0 %2359  ;;  %3996 = vrsqrt.f32 %v2406_v47  ;;  %v4079_v47 = vld [vmem:[%s4853_s10 + $0xb0] sm:$0xff] }
 0x38c   : > { %v2405_v32 = vmax.f32 %v2360_v39, 1e-24  ;;  %v3987_v22 = vpop.eup %3986  ;;  %2504 = vst [vmem:[#allocation2 + $0x28] sm:$0xff] %v2488_v6  ;;  %v2366_v9 = vpop.xlane.xlu1 %2365 }
 0x38d   : > { %v2463_v3 = vmul.f32 %v4069_v50, %v3987_v22  ;;  %v3989_v34 = vpop.eup %3988  ;;  %v2408_v29 = vmax.f32 %v2366_v9, 1e-24 }
 0x38e   : > { %3998 = vrsqrt.f32 %v2405_v32  ;;  %v2466_v4 = vmul.f32 %v4070_v16, %v3989_v34  ;;  %v4080_v34 = vld [vmem:[%s4853_s10 + $0xc8] sm:$0xff] }
 0x38f   : > { %v2364_v2 = vpop.xlane.xlu0 %2363  ;;  %v2489_v8 = vpack.c.bf16 %v2464_v21, %v2463_v3  ;;  %4000 = vrsqrt.f32 %v2408_v29  ;;  %v4081_v29 = vld [vmem:[%s4853_s10 + $0xc0] sm:$0xff] }
 0x390   : > { %v2407_v40 = vmax.f32 %v2364_v2, 1e-24  ;;  %v3991_v11 = vpop.eup %3990  ;;  %v2370_v60 = vpop.xlane.xlu1 %2369 }
 0x391   : > { %2505 = vst [vmem:[#allocation2 + $0x30] sm:$0xff] %v2489_v8  ;;  %v2465_v46 = vmul.f32 %v4071_v33, %v3991_v11  ;;  %v3993_v48 = vpop.eup %3992  ;;  %v2410_v59 = vmax.f32 %v2370_v60, 1e-24  ;;  %v4082_v33 = vld [vmem:[%s4853_s10 + $0xd8] sm:$0xff]  ;;  %v4083_v60 = vld [vmem:[%s4853_s10 + $0xd0] sm:$0xff] }
 0x392   : > { %4002 = vrsqrt.f32 %v2407_v40  ;;  %v2468_v45 = vmul.f32 %v4072_v19, %v3993_v48 }
 0x393   : > { %v2368_v5 = vpop.xlane.xlu0 %2367  ;;  %v2490_v37 = vpack.c.bf16 %v2466_v4, %v2465_v46  ;;  %4004 = vrsqrt.f32 %v2410_v59 }
 0x394   : > { %v2409_v7 = vmax.f32 %v2368_v5, 1e-24  ;;  %v3995_v28 = vpop.eup %3994  ;;  %v2374_v52 = vpop.xlane.xlu1 %2373 }
 0x395   : > { %2506 = vst [vmem:[#allocation2 + $0x38] sm:$0xff] %v2490_v37  ;;  %v2467_v18 = vmul.f32 %v4073_v14, %v3995_v28  ;;  %v3997_v12 = vpop.eup %3996  ;;  %v2412_v26 = vmax.f32 %v2374_v52, 1e-24  ;;  %v5660_v14 = vld [vmem:[%s6147_s1] ss:$0 sm:$0xff] }
 0x396   : > { %4006 = vrsqrt.f32 %v2409_v7  ;;  %v2470_v30 = vmul.f32 %v4074_v43, %v3997_v12 }
 0x397   : > { %v2372_v35 = vpop.xlane.xlu0 %2371  ;;  %v2491_v25 = vpack.c.bf16 %v2468_v45, %v2467_v18  ;;  %4008 = vrsqrt.f32 %v2412_v26 }
 0x398   : > { %v2411_v20 = vmax.f32 %v2372_v35, 1e-24  ;;  %v3999_v55 = vpop.eup %3998  ;;  %v2378_v53 = vpop.xlane.xlu1 %2377 }
 0x399   : > { %2507 = vst [vmem:[#allocation2 + $0x40] sm:$0xff] %v2491_v25  ;;  %v2469_v1 = vmul.f32 %v4075_v49, %v3999_v55  ;;  %v4001_v31 = vpop.eup %4000  ;;  %v2414_v58 = vmax.f32 %v2378_v53, 1e-24 }
 0x39a   : > { %4010 = vrsqrt.f32 %v2411_v20  ;;  %v2472_v51 = vmul.f32 %v4076_v56, %v4001_v31 }
 0x39b   : > { %v2376_v38 = vpop.xlane.xlu0 %2375  ;;  %v2492_v61 = vpack.c.bf16 %v2470_v30, %v2469_v1  ;;  %4012 = vrsqrt.f32 %v2414_v58 }
 0x39c   : > { %v2413_v63 = vmax.f32 %v2376_v38, 1e-24  ;;  %v4003_v17 = vpop.eup %4002  ;;  %v2382_v62 = vpop.xlane.xlu1 %2381 }
 0x39d   : > { %2508 = vst [vmem:[#allocation2 + $0x48] sm:$0xff] %v2492_v61  ;;  %v2471_v36 = vmul.f32 %v4077_v23, %v4003_v17  ;;  %v4005_v24 = vpop.eup %4004  ;;  %v2416_v10 = vmax.f32 %v2382_v62, 1e-24 }
 0x39e   : > { %4014 = vrsqrt.f32 %v2413_v63  ;;  %v2474_v6 = vmul.f32 %v4078_v42, %v4005_v24 }
 0x39f   : > { %v2380_v13 = vpop.xlane.xlu0 %2379  ;;  %v2493_v41 = vpack.c.bf16 %v2472_v51, %v2471_v36  ;;  %4016 = vrsqrt.f32 %v2416_v10 }
 0x3a0   : > { %v2415_v15 = vmax.f32 %v2380_v13, 1e-24  ;;  %v4007_v39 = vpop.eup %4006  ;;  %v2386_v22 = vpop.xlane.xlu1 %2385 }
 0x3a1   : > { %2509 = vst [vmem:[#allocation2 + $0x50] sm:$0xff] %v2493_v41  ;;  %v2473_v32 = vmul.f32 %v4079_v47, %v4007_v39  ;;  %v4009_v21 = vpop.eup %4008  ;;  %v2418_v3 = vmax.f32 %v2386_v22, 1e-24 }
 0x3a2   : > { %4018 = vrsqrt.f32 %v2415_v15  ;;  %v2476_v8 = vmul.f32 %v4080_v34, %v4009_v21 }
 0x3a3   : > { %v2384_v0 = vpop.xlane.xlu0 %2383  ;;  %v2494_v50 = vpack.c.bf16 %v2474_v6, %v2473_v32  ;;  %4020 = vrsqrt.f32 %v2418_v3 }
 0x3a4   : > { %v2417_v9 = vmax.f32 %v2384_v0, 1e-24  ;;  %v4011_v2 = vpop.eup %4010 }
 0x3a5   : > { %2510 = vst [vmem:[#allocation2 + $0x58] sm:$0xff] %v2494_v50  ;;  %v2475_v40 = vmul.f32 %v4081_v29, %v4011_v2  ;;  %v4013_v11 = vpop.eup %4012 }
 0x3a6   : > { %4022 = vrsqrt.f32 %v2417_v9  ;;  %v2478_v46 = vmul.f32 %v4082_v33, %v4013_v11 }
 0x3a7   : > { %v2495_v16 = vpack.c.bf16 %v2476_v8, %v2475_v40 }
 0x3a8   : > { %v4015_v4 = vpop.eup %4014 }
 0x3a9   : > { %2511 = vst [vmem:[#allocation2 + $0x60] sm:$0xff] %v2495_v16  ;;  %v2477_v5 = vmul.f32 %v4083_v60, %v4015_v4  ;;  %v4017_v48 = vpop.eup %4016 }
 0x3aa   : > { %v2480_v7 = vmul.f32 %v5471_v27, %v4017_v48 }
 0x3ab   : > { %v2496_v37 = vpack.c.bf16 %v2478_v46, %v2477_v5 }
 0x3ac   : > { %v4019_v59 = vpop.eup %4018 }
 0x3ad   : > { %2512 = vst [vmem:[#allocation2 + $0x68] sm:$0xff] %v2496_v37  ;;  %v2479_v28 = vmul.f32 %v5489_v57, %v4019_v59  ;;  %v4021_v45 = vpop.eup %4020 }
 0x3ae   : > { %v2482_v26 = vmul.f32 %v5497_v54, %v4021_v45 }
 0x3af   : > { %v2497_v52 = vpack.c.bf16 %v2480_v7, %v2479_v28 }
 0x3b0   : > { %v4023_v35 = vpop.eup %4022 }
 0x3b1   : > { %2513 = vst [vmem:[#allocation2 + $0x70] sm:$0xff] %v2497_v52  ;;  %v2481_v57 = vmul.f32 %v5506_v44, %v4023_v35 }
 0x3b3   : > { %v2498_v43 = vpack.c.bf16 %v2482_v26, %v2481_v57 }
 0x3b5   : > { %2514 = vst [vmem:[#allocation2 + $0x78] sm:$0xff] %v2498_v43 }
 0x3bc   : > { %v3309_v19 = vpop.f32.mrb[32].mxu0 }
 0x3bd   : > { %v3310_v18 = vpop.f32.mrb[33].mxu0 }
 0x3be   : > { %v3311_v12 = vadd.f32 %v3310_v18, %v3309_v19  ;;  %v3312_v25 = vpop.f32.mrb[34].mxu0 }
 0x3bf   : > { %v3313_v27 = vpop.f32.mrb[35].mxu0 }
 0x3c0   : > { %v2133_v20 = vadd.f32 %v3311_v12, %v5660_v14  ;;  %v3314_v55 = vadd.f32 %v3313_v27, %v3312_v25 }
 0x3c2   : > { %2259 = vst [vmem:[%s4888_s9] sm:$0xff] %v2133_v20  ;;  %v2136_v30 = vadd.f32 %v3314_v55, %v5660_v14 }
 0x3c4   : > { %2260 = vst [vmem:[%s4888_s9 + $0x8] sm:$0xff] %v2136_v30 }
 0x3c5   : > { %v3315_v49 = vpop.f32.mrb[36].mxu0 }
 0x3c6   : > { %v3316_v1 = vpop.f32.mrb[37].mxu0 }
 0x3c7   : > { %v3317_v53 = vadd.f32 %v3316_v1, %v3315_v49  ;;  %v3318_v54 = vpop.f32.mrb[38].mxu0 }
 0x3c8   : > { %v3319_v38 = vpop.f32.mrb[39].mxu0 }
 0x3c9   : > { %v2141_v31 = vadd.f32 %v3317_v53, %v5660_v14  ;;  %v3320_v44 = vadd.f32 %v3319_v38, %v3318_v54 }
 0x3cb   : > { %2261 = vst [vmem:[%s4888_s9 + $0x10] sm:$0xff] %v2141_v31  ;;  %v2144_v61 = vadd.f32 %v3320_v44, %v5660_v14 }
 0x3cd   : > { %2262 = vst [vmem:[%s4888_s9 + $0x18] sm:$0xff] %v2144_v61  ;;  %v3321_v58 = vpop.f32.mrb[40].mxu0 }
 0x3ce   : > { %v3322_v63 = vpop.f32.mrb[41].mxu0 }
 0x3cf   : > { %v3323_v17 = vadd.f32 %v3322_v63, %v3321_v58  ;;  %v3324_v56 = vpop.f32.mrb[42].mxu0 }
 0x3d0   : > { %v3325_v51 = vpop.f32.mrb[43].mxu0 }
 0x3d1   : > { %v2149_v23 = vadd.f32 %v3323_v17, %v5660_v14  ;;  %v3326_v36 = vadd.f32 %v3325_v51, %v3324_v56 }
 0x3d3   : > { %2263 = vst [vmem:[%s4888_s9 + $0x20] sm:$0xff] %v2149_v23  ;;  %v2152_v62 = vadd.f32 %v3326_v36, %v5660_v14 }
 0x3d5   : > { %2264 = vst [vmem:[%s4888_s9 + $0x28] sm:$0xff] %v2152_v62  ;;  %v3327_v13 = vpop.f32.mrb[44].mxu0 }
 0x3d6   : > { %v3328_v24 = vpop.f32.mrb[45].mxu0 }
 0x3d7   : > { %v3329_v41 = vadd.f32 %v3328_v24, %v3327_v13  ;;  %v3330_v10 = vpop.f32.mrb[46].mxu0 }
 0x3d8   : > { %v3331_v15 = vpop.f32.mrb[47].mxu0 }
 0x3d9   : > { %v2157_v39 = vadd.f32 %v3329_v41, %v5660_v14  ;;  %v3332_v42 = vadd.f32 %v3331_v15, %v3330_v10 }
 0x3db   : > { %2265 = vst [vmem:[%s4888_s9 + $0x30] sm:$0xff] %v2157_v39  ;;  %v2160_v6 = vadd.f32 %v3332_v42, %v5660_v14 }
 0x3dd   : > { %2266 = vst [vmem:[%s4888_s9 + $0x38] sm:$0xff] %v2160_v6  ;;  %v3333_v47 = vpop.f32.mrb[48].mxu0 }
 0x3de   : > { %v3334_v32 = vpop.f32.mrb[49].mxu0 }
 0x3df   : > { %v3335_v22 = vadd.f32 %v3334_v32, %v3333_v47  ;;  %v3336_v0 = vpop.f32.mrb[50].mxu0 }
 0x3e0   : > { %v3337_v21 = vpop.f32.mrb[51].mxu0 }
 0x3e1   : > { %v2165_v50 = vadd.f32 %v3335_v22, %v5660_v14  ;;  %v3338_v3 = vadd.f32 %v3337_v21, %v3336_v0 }
 0x3e3   : > { %2267 = vst [vmem:[%s4888_s9 + $0x40] sm:$0xff] %v2165_v50  ;;  %v2168_v9 = vadd.f32 %v3338_v3, %v5660_v14 }
 0x3e5   : > { %2268 = vst [vmem:[%s4888_s9 + $0x48] sm:$0xff] %v2168_v9  ;;  %v3339_v2 = vpop.f32.mrb[52].mxu0 }
 0x3e6   : > { %v3340_v34 = vpop.f32.mrb[53].mxu0 }
 0x3e7   : > { %v3341_v8 = vadd.f32 %v3340_v34, %v3339_v2  ;;  %v3342_v29 = vpop.f32.mrb[54].mxu0 }
 0x3e8   : > { %v3343_v40 = vpop.f32.mrb[55].mxu0 }
 0x3e9   : > { %v2173_v11 = vadd.f32 %v3341_v8, %v5660_v14  ;;  %v3344_v16 = vadd.f32 %v3343_v40, %v3342_v29 }
 0x3eb   : > { %2269 = vst [vmem:[%s4888_s9 + $0x50] sm:$0xff] %v2173_v11  ;;  %v2176_v4 = vadd.f32 %v3344_v16, %v5660_v14 }
 0x3ed   : > { %2270 = vst [vmem:[%s4888_s9 + $0x58] sm:$0xff] %v2176_v4  ;;  %v3345_v33 = vpop.f32.mrb[56].mxu0 }
 0x3ee   : > { %v3346_v46 = vpop.f32.mrb[57].mxu0 }
 0x3ef   : > { %v3347_v60 = vadd.f32 %v3346_v46, %v3345_v33  ;;  %v3348_v5 = vpop.f32.mrb[58].mxu0 }
 0x3f0   : > { %v3349_v48 = vpop.f32.mrb[59].mxu0 }
 0x3f1   : > { %v2181_v37 = vadd.f32 %v3347_v60, %v5660_v14  ;;  %v3350_v59 = vadd.f32 %v3349_v48, %v3348_v5 }
 0x3f3   : > { %2271 = vst [vmem:[%s4888_s9 + $0x60] sm:$0xff] %v2181_v37  ;;  %v2184_v7 = vadd.f32 %v3350_v59, %v5660_v14 }
 0x3f5   : > { %2272 = vst [vmem:[%s4888_s9 + $0x68] sm:$0xff] %v2184_v7  ;;  %v3351_v28 = vpop.f32.mrb[60].mxu0 }
 0x3f6   : > { %v3352_v19 = vpop.f32.mrb[61].mxu0 }
 0x3f7   : > { %v3353_v45 = vadd.f32 %v3352_v19, %v3351_v28  ;;  %v3354_v18 = vpop.f32.mrb[62].mxu0 }
 0x3f8   : > { %v3355_v52 = vpop.f32.mrb[63].mxu0 }
 0x3f9   : > { %v2189_v35 = vadd.f32 %v3353_v45, %v5660_v14  ;;  %v3356_v12 = vadd.f32 %v3355_v52, %v3354_v18 }
 0x3fb   : > { %2273 = vst [vmem:[%s4888_s9 + $0x70] sm:$0xff] %v2189_v35  ;;  %v2192_v25 = vadd.f32 %v3356_v12, %v5660_v14 }
 0x3fd   : > { %2274 = vst [vmem:[%s4888_s9 + $0x78] sm:$0xff] %v2192_v25  ;;  %v3357_v26 = vpop.f32.mrb[64].mxu0 }
 0x3fe   : > { %v3358_v27 = vpop.f32.mrb[65].mxu0 }
 0x3ff   : > { %v3359_v57 = vadd.f32 %v3358_v27, %v3357_v26  ;;  %v3360_v20 = vpop.f32.mrb[66].mxu0 }
 0x400   : > { %v3361_v55 = vpop.f32.mrb[67].mxu0 }
 0x401   : > { %v2197_v43 = vadd.f32 %v3359_v57, %v5660_v14  ;;  %v3362_v30 = vadd.f32 %v3361_v55, %v3360_v20 }
 0x403   : > { %2275 = vst [vmem:[%s4888_s9 + $0x80] sm:$0xff] %v2197_v43  ;;  %v2200_v49 = vadd.f32 %v3362_v30, %v5660_v14 }
 0x405   : > { %2276 = vst [vmem:[%s4888_s9 + $0x88] sm:$0xff] %v2200_v49  ;;  %v3363_v1 = vpop.f32.mrb[68].mxu0 }
 0x406   : > { %v3364_v53 = vpop.f32.mrb[69].mxu0 }
 0x407   : > { %v3365_v54 = vadd.f32 %v3364_v53, %v3363_v1  ;;  %v3366_v38 = vpop.f32.mrb[70].mxu0 }
 0x408   : > { %v3367_v31 = vpop.f32.mrb[71].mxu0 }
 0x409   : > { %v2205_v44 = vadd.f32 %v3365_v54, %v5660_v14  ;;  %v3368_v61 = vadd.f32 %v3367_v31, %v3366_v38 }
 0x40b   : > { %2277 = vst [vmem:[%s4888_s9 + $0x90] sm:$0xff] %v2205_v44  ;;  %v2208_v58 = vadd.f32 %v3368_v61, %v5660_v14 }
 0x40d   : > { %2278 = vst [vmem:[%s4888_s9 + $0x98] sm:$0xff] %v2208_v58  ;;  %v3369_v63 = vpop.f32.mrb[72].mxu0 }
 0x40e   : > { %v3370_v17 = vpop.f32.mrb[73].mxu0 }
 0x40f   : > { %v3371_v56 = vadd.f32 %v3370_v17, %v3369_v63  ;;  %v3372_v51 = vpop.f32.mrb[74].mxu0 }
 0x410   : > { %v3373_v23 = vpop.f32.mrb[75].mxu0 }
 0x411   : > { %v2213_v36 = vadd.f32 %v3371_v56, %v5660_v14  ;;  %v3374_v62 = vadd.f32 %v3373_v23, %v3372_v51 }
 0x413   : > { %2279 = vst [vmem:[%s4888_s9 + $0xa0] sm:$0xff] %v2213_v36  ;;  %v2216_v13 = vadd.f32 %v3374_v62, %v5660_v14 }
 0x415   : > { %2280 = vst [vmem:[%s4888_s9 + $0xa8] sm:$0xff] %v2216_v13  ;;  %v3375_v24 = vpop.f32.mrb[76].mxu0 }
 0x416   : > { %v3376_v41 = vpop.f32.mrb[77].mxu0 }
 0x417   : > { %v3377_v10 = vadd.f32 %v3376_v41, %v3375_v24  ;;  %v3378_v15 = vpop.f32.mrb[78].mxu0 }
 0x418   : > { %v3379_v39 = vpop.f32.mrb[79].mxu0 }
 0x419   : > { %v2221_v42 = vadd.f32 %v3377_v10, %v5660_v14  ;;  %v3380_v6 = vadd.f32 %v3379_v39, %v3378_v15 }
 0x41b   : > { %2281 = vst [vmem:[%s4888_s9 + $0xb0] sm:$0xff] %v2221_v42  ;;  %v2224_v47 = vadd.f32 %v3380_v6, %v5660_v14 }
 0x41d   : > { %2282 = vst [vmem:[%s4888_s9 + $0xb8] sm:$0xff] %v2224_v47  ;;  %v3381_v32 = vpop.f32.mrb[80].mxu0 }
 0x41e   : > { %v3382_v22 = vpop.f32.mrb[81].mxu0 }
 0x41f   : > { %v3383_v0 = vadd.f32 %v3382_v22, %v3381_v32  ;;  %v3384_v21 = vpop.f32.mrb[82].mxu0 }
 0x420   : > { %v3385_v50 = vpop.f32.mrb[83].mxu0 }
 0x421   : > { %v2229_v3 = vadd.f32 %v3383_v0, %v5660_v14  ;;  %v3386_v9 = vadd.f32 %v3385_v50, %v3384_v21 }
 0x423   : > { %2283 = vst [vmem:[%s4888_s9 + $0xc0] sm:$0xff] %v2229_v3  ;;  %v2232_v2 = vadd.f32 %v3386_v9, %v5660_v14 }
 0x425   : > { %2284 = vst [vmem:[%s4888_s9 + $0xc8] sm:$0xff] %v2232_v2  ;;  %v3387_v34 = vpop.f32.mrb[84].mxu0 }
 0x426   : > { %v3388_v8 = vpop.f32.mrb[85].mxu0 }
 0x427   : > { %v3389_v29 = vadd.f32 %v3388_v8, %v3387_v34  ;;  %v3390_v40 = vpop.f32.mrb[86].mxu0 }
 0x428   : > { %v3391_v11 = vpop.f32.mrb[87].mxu0 }
 0x429   : > { %v2237_v16 = vadd.f32 %v3389_v29, %v5660_v14  ;;  %v3392_v4 = vadd.f32 %v3391_v11, %v3390_v40 }
 0x42b   : > { %2285 = vst [vmem:[%s4888_s9 + $0xd0] sm:$0xff] %v2237_v16  ;;  %v2240_v33 = vadd.f32 %v3392_v4, %v5660_v14 }
 0x42d   : > { %2286 = vst [vmem:[%s4888_s9 + $0xd8] sm:$0xff] %v2240_v33  ;;  %v3393_v46 = vpop.f32.mrb[88].mxu0 }
 0x42e   : > { %v3394_v60 = vpop.f32.mrb[89].mxu0 }
 0x42f   : > { %v3395_v5 = vadd.f32 %v3394_v60, %v3393_v46  ;;  %v3396_v48 = vpop.f32.mrb[90].mxu0 }
 0x430   : > { %v3397_v37 = vpop.f32.mrb[91].mxu0 }
 0x431   : > { %v2245_v59 = vadd.f32 %v3395_v5, %v5660_v14  ;;  %v3398_v7 = vadd.f32 %v3397_v37, %v3396_v48 }
 0x433   : > { %2287 = vst [vmem:[%s4888_s9 + $0xe0] sm:$0xff] %v2245_v59  ;;  %v2248_v28 = vadd.f32 %v3398_v7, %v5660_v14 }
 0x435   : > { %2288 = vst [vmem:[%s4888_s9 + $0xe8] sm:$0xff] %v2248_v28  ;;  %v3399_v19 = vpop.f32.mrb[92].mxu0 }
 0x436   : > { %v3400_v45 = vpop.f32.mrb[93].mxu0 }
 0x437   : > { %v3401_v18 = vadd.f32 %v3400_v45, %v3399_v19  ;;  %v3402_v52 = vpop.f32.mrb[94].mxu0 }
 0x438   : > { %v3403_v35 = vpop.f32.mrb[95].mxu0 }
 0x439   : > { %v2253_v12 = vadd.f32 %v3401_v18, %v5660_v14  ;;  %v3404_v25 = vadd.f32 %v3403_v35, %v3402_v52 }
 0x43b   : > { %2289 = vst [vmem:[%s4888_s9 + $0xf0] sm:$0xff] %v2253_v12  ;;  %v2256_v26 = vadd.f32 %v3404_v25, %v5660_v14 }
 0x43d   : > { %2290 = vst [vmem:[%s4888_s9 + $0xf8] sm:$0xff] %v2256_v26 }
 0x43e PF: > { %v4084_v27 = vld [vmem:[%s4868_s16 + $0x4] ss:$8 sps:$4 sm:$0xff]   ;;  %v4086_v57 = vld [vmem:[%s4868_s16] ss:$8 sps:$4 sm:$0xff]   ;;  %v4455_v20 = vmov 0   ;;  %v2517_v36 = vld [vmem:[#allocation2 + $0x10] sm:$0xff] }
 0x43f   : > { %2659 = vmatprep.mubr.bf16.mxu0 %v4455_v20  ;;  %2739 = vmatprep.mubr.bf16.mxu1 %v4455_v20  ;;  %v4087_v14 = vld [vmem:[%s4868_s16 + $0x14] ss:$8 sps:$4 sm:$0xff]   ;;  %v4089_v55 = vld [vmem:[%s4868_s16 + $0x10] ss:$8 sps:$4 sm:$0xff]   ;;  %v4090_v43 = vld [vmem:[%s4868_s16 + $0x24] ss:$8 sps:$4 sm:$0xff]  }
 0x440   : > { %2627 = vmatprep.subr.bf16.mxu0 %v4084_v27  ;;  %3421 = vmatprep.subr.bf16.mxu1 %v4084_v27  ;;  %v4092_v30 = vld [vmem:[%s4868_s16 + $0x20] ss:$8 sps:$4 sm:$0xff]   ;;  %v4093_v49 = vld [vmem:[%s4868_s16 + $0x34] ss:$8 sps:$4 sm:$0xff]   ;;  %v4095_v1 = vld [vmem:[%s4868_s16 + $0x30] ss:$8 sps:$4 sm:$0xff]  }
 0x441   : > { %2628 = vmatpush1.bf16.msra.mxu0 %v4086_v57  ;;  %3429 = vmatpush1.bf16.msra.mxu1 %v4086_v57  ;;  %v4096_v53 = vld [vmem:[%s4868_s16 + $0x44] ss:$8 sps:$4 sm:$0xff]   ;;  %v4098_v54 = vld [vmem:[%s4868_s16 + $0x40] ss:$8 sps:$4 sm:$0xff]   ;;  %v4099_v38 = vld [vmem:[%s4868_s16 + $0x54] ss:$8 sps:$4 sm:$0xff]  }
 0x442   : > { %2629 = vmatprep.subr.bf16.mxu0 %v4087_v14  ;;  %3422 = vmatprep.subr.bf16.mxu1 %v4087_v14  ;;  %v4101_v31 = vld [vmem:[%s4868_s16 + $0x50] ss:$8 sps:$4 sm:$0xff]   ;;  %v4102_v44 = vld [vmem:[%s4868_s16 + $0x64] ss:$8 sps:$4 sm:$0xff]   ;;  %v4104_v61 = vld [vmem:[%s4868_s16 + $0x60] ss:$8 sps:$4 sm:$0xff]  }
 0x443   : > { %v4105_v58 = vld [vmem:[%s4868_s16 + $0x74] ss:$8 sps:$4 sm:$0xff]   ;;  %v4107_v63 = vld [vmem:[%s4868_s16 + $0x70] ss:$8 sps:$4 sm:$0xff]   ;;  %v2515_v17 = vld [vmem:[#allocation2] sm:$0xff]  ;;  %s6148_s10 = sld [smem:[#allocation27_spill]] }
 0x444   : > { %v2523_v56 = vld [vmem:[#allocation2 + $0x40] sm:$0xff]  ;;  %v2516_v51 = vld [vmem:[#allocation2 + $0x8] sm:$0xff]  ;;  %v2525_v62 = vld [vmem:[#allocation2 + $0x50] sm:$0xff]  ;;  %s2979_s20 = sshll.u32 %s4888_s9, 4  ;;  %s6150_s17 = sld [smem:[#allocation48_spill]]  ;;  %s5767_s20 = int_to_ptr.vmem [resolvable:$true] %s2979_s20 }
 0x445   : > { %2630 = vmatpush1.bf16.msra.mxu0 %v4089_v55  ;;  %3430 = vmatpush1.bf16.msra.mxu1 %v4089_v55  ;;  %v2524_v23 = vld [vmem:[#allocation2 + $0x48] sm:$0xff]  ;;  %v2518_v13 = vld [vmem:[#allocation2 + $0x18] sm:$0xff]  ;;  %v2519_v41 = vld [vmem:[#allocation2 + $0x20] sm:$0xff]  ;;  %s5771_s8 = scalar_lea.sflag [#allocation5], %s424_s0  ;;  %s4252_s13 = scalar_lea.vmem %s5767_s20, 4096 }
 0x446   : > { %2631 = vmatprep.subr.bf16.mxu0 %v4090_v43  ;;  %3423 = vmatprep.subr.bf16.mxu1 %v4090_v43  ;;  %v2526_v24 = vld [vmem:[#allocation2 + $0x58] sm:$0xff]  ;;  %v2527_v10 = vld [vmem:[#allocation2 + $0x60] sm:$0xff]  ;;  %v2520_v15 = vld [vmem:[#allocation2 + $0x28] sm:$0xff]  ;;  %p4253_p7 = scmp.ne.s32.totalorder %s5767_s20, %s4252_s13  ;;  %p6152_p9 = scmp.ne.s32.totalorder %s6111_s12, 0 }
 0x447   : > { %v2528_v39 = vld [vmem:[#allocation2 + $0x68] sm:$0xff]  ;;  %v2521_v42 = vld [vmem:[#allocation2 + $0x30] sm:$0xff]  ;;  %v2522_v47 = vld [vmem:[#allocation2 + $0x38] sm:$0xff]  ;;  %s4456_s23 = smov [#allocation12]  }
 0x448   : > { %v2529_v6 = vld [vmem:[#allocation2 + $0x70] sm:$0xff]  ;;  %v2530_v32 = vld [vmem:[#allocation2 + $0x78] sm:$0xff]  ;;  %p4254_p11 = pnand %p4253_p7, %p6152_p9  ;;  %s4256_s9 = sshll.u32 %s4456_s23, 4  ;;  %s4257_s9 = int_to_ptr.vmem [resolvable:$false] %s4256_s9 }
 0x449   : > { %2632 = vmatpush1.bf16.msra.mxu0 %v4092_v30  ;;  %3431 = vmatpush1.bf16.msra.mxu1 %v4092_v30  ;;  %s3291_s4 = sshll.u32 %s6148_s10, 12  ;;  %s4258_s1 = scalar_lea.vmem %s4257_s9, 8192 }
 0x44a   : > { %2633 = vmatprep.subr.bf16.mxu0 %v4093_v49  ;;  %3424 = vmatprep.subr.bf16.mxu1 %v4093_v49  ;;  %s6151_s29 = smov %s6150_s17  ;;  %s5765_s30 = scalar_lea.hbm %s6150_s17, %s3291_s4 }
 0x44b   : > { %p4255_p10 = pneg %p4254_p11  ;;  %p4259_p12 = scmp.lt.s32.totalorder %s5767_s20, %s4257_s9 }
 0x44c   : > { %p4260_p3 = scmp.lt.s32.totalorder %s4258_s1, %s4252_s13 }
 0x44d   : > { %2634 = vmatpush1.bf16.msra.mxu0 %v4095_v1  ;;  %3432 = vmatpush1.bf16.msra.mxu1 %v4095_v1 }
 0x44e   : > { %2635 = vmatprep.subr.bf16.mxu0 %v4096_v53  ;;  %3425 = vmatprep.subr.bf16.mxu1 %v4096_v53  ;;  %p4261_p4 = por %p4260_p3, %p4259_p12 }
 0x450   : > { %p4262_p8 = pnand %p4261_p4, %p4255_p10 }
 0x451   : > { %2636 = vmatpush1.bf16.msra.mxu0 %v4098_v54  ;;  %3433 = vmatpush1.bf16.msra.mxu1 %v4098_v54 }
 0x452   : > { %2637 = vmatprep.subr.bf16.mxu0 %v4099_v38  ;;  %3426 = vmatprep.subr.bf16.mxu1 %v4099_v38 }
 0x455   : > { %2638 = vmatpush1.bf16.msra.mxu0 %v4101_v31  ;;  %3434 = vmatpush1.bf16.msra.mxu1 %v4101_v31 }
 0x456   : > { %2639 = vmatprep.subr.bf16.mxu0 %v4102_v44  ;;  %3427 = vmatprep.subr.bf16.mxu1 %v4102_v44 }
 0x459   : > { %2640 = vmatpush1.bf16.msra.mxu0 %v4104_v61  ;;  %3435 = vmatpush1.bf16.msra.mxu1 %v4104_v61 }
 0x45a   : > { %2641 = vmatprep.subr.bf16.mxu0 %v4105_v58  ;;  %3428 = vmatprep.subr.bf16.mxu1 %v4105_v58 }
 0x45d   : > { %2642 = vmatpush1.bf16.msra.mxu0 %v4107_v63  ;;  %3436 = vmatpush1.bf16.msra.mxu1 %v4107_v63 }
 0x460   : > { %2660 = vmatmul.mubr.bf16.vlgmr.msra.gmra.mrb[0].mxu0 %v2515_v17  ;;  %2740 = vmatmul.mubr.bf16.vlgmr.msra.gmra.mrb[0].mxu1 %v2523_v56 }
 0x461   : > { %2669 = vmatprep.mubr.bf16.mxu0 %v4455_v20  ;;  %2749 = vmatprep.mubr.bf16.mxu1 %v4455_v20 }
 0x468   : > { %2670 = vmatmul.mubr.bf16.gmra.mrb[4].mxu0 %v2516_v51  ;;  %2750 = vmatmul.mubr.bf16.gmra.mrb[4].mxu1 %v2524_v23 }
 0x469   : > { %2679 = vmatprep.mubr.bf16.mxu0 %v4455_v20  ;;  %2759 = vmatprep.mubr.bf16.mxu1 %v4455_v20 }
 0x470   : > { %2680 = vmatmul.mubr.bf16.gmra.mrb[8].mxu0 %v2517_v36  ;;  %2760 = vmatmul.mubr.bf16.gmra.mrb[8].mxu1 %v2525_v62 }
 0x471   : > { %2689 = vmatprep.mubr.bf16.mxu0 %v4455_v20  ;;  %2769 = vmatprep.mubr.bf16.mxu1 %v4455_v20 }
 0x478   : > { %2690 = vmatmul.mubr.bf16.gmra.mrb[12].mxu0 %v2518_v13  ;;  %2770 = vmatmul.mubr.bf16.gmra.mrb[12].mxu1 %v2526_v24 }
 0x479   : > { %2699 = vmatprep.mubr.bf16.mxu0 %v4455_v20  ;;  %2779 = vmatprep.mubr.bf16.mxu1 %v4455_v20 }
 0x480   : > { %2700 = vmatmul.mubr.bf16.gmra.mrb[16].mxu0 %v2519_v41  ;;  %2780 = vmatmul.mubr.bf16.gmra.mrb[16].mxu1 %v2527_v10 }
 0x481   : > { %2709 = vmatprep.mubr.bf16.mxu0 %v4455_v20  ;;  %2789 = vmatprep.mubr.bf16.mxu1 %v4455_v20 }
 0x488   : > { %2710 = vmatmul.mubr.bf16.gmra.mrb[20].mxu0 %v2520_v15  ;;  %2790 = vmatmul.mubr.bf16.gmra.mrb[20].mxu1 %v2528_v39 }
 0x489   : > { %2719 = vmatprep.mubr.bf16.mxu0 %v4455_v20  ;;  %2799 = vmatprep.mubr.bf16.mxu1 %v4455_v20 }
 0x490   : > { %2720 = vmatmul.mubr.bf16.gmra.mrb[24].mxu0 %v2521_v42  ;;  %2800 = vmatmul.mubr.bf16.gmra.mrb[24].mxu1 %v2529_v6 }
 0x491   : > { %2729 = vmatprep.mubr.bf16.mxu0 %v4455_v20  ;;  %2809 = vmatprep.mubr.bf16.mxu1 %v4455_v20 }
 0x498   : > { %2730 = vmatmul.mubr.bf16.gmra.mrb[28].mxu0 %v2522_v47  ;;  %2810 = vmatmul.mubr.bf16.gmra.mrb[28].mxu1 %v2530_v32 }
 0x499   : > { %4265 = shalt.err (!%p4262_p8)
}
 0x49a   : > { %s4266_s0 = scalar_lea.hbm %s5765_s30, 4096  ;;  %s4270_s25 = scalar_lea.hbm %s6151_s29, 8192 }
 0x49b   : > { %p4267_p2 = scmp.ne.s32.totalorder %s5765_s30, %s4266_s0  ;;  %p4271_p6 = scmp.lt.u32.totalorder %s5765_s30, %s6151_s29 }
 0x49c   : > { %p4272_p5 = scmp.lt.u32.totalorder %s4270_s25, %s4266_s0  ;;  %p4274_p7 = scmp.lt.u32.totalorder %s4266_s0, %s5765_s30 }
 0x49d   : > { %p4268_p0 = pnand %p4267_p2, %p6152_p9 }
 0x49e   : > { %p4273_p13 = por %p4272_p5, %p4271_p6 }
 0x49f   : > { %p4269_p1 = pneg %p4268_p0 }
 0x4a0   : > { %p4275_p11 = por %p4274_p7, %p4273_p13 }
 0x4a2   : > { %p4276_p10 = pnand %p4275_p11, %p4269_p1 }
 0x4a4   : > { %4279 = shalt.err (!%p4276_p10)
}
 0x4a5   : > { %s4457_s13 = smov 128   ;;  %s4458_s23 = smov 8   ;;  %v2822_v22 = vlaneseq  ;;  %v2820_v50 = vld [vmem:[%s503_s11] sm:$0x3] }
 0x4a6   : > { %3453 = dma.vmem_to_hbm [thread:$0]  (%p6152_p9), %s5767_s20, 4096, %s5765_s30, %s5771_s8, %s4457_s13, %s4457_s13, %s4458_s23  }
 0x4a7   : > { %v2823_v0 = vshrl.u32 %v2822_v22, 7  ;;  %s3292_s12 = sshll.u32 %s6148_s10, 7  ;;  %s2998_s10 = sshll.u32 %s4890_s2, 4  ;;  %s5932_s10 = int_to_ptr.vmem [resolvable:$true] %s2998_s10 }
 0x4a8   : > { %s2995_s27 = sadd.s32 %s3292_s12, %s4878_s6  ;;  %s6154_s30 = sld [smem:[#allocation49_spill]] }
 0x4a9   : > { %v2824_v21 = vsub.s32 0, %v2823_v0  ;;  %v2828_v3 = vsub.s32 1, %v2823_v0  ;;  %s3286_s11 = sshll.u32 %s2995_s27, 7  ;;  %s6156_s4 = sld [smem:[#allocation32_spill]] }
 0x4aa   : > { %s5944_s25 = scalar_lea.sflag [#allocation14], %s495_s28  ;;  %s4280_s19 = scalar_lea.vmem %s5932_s10, 8192 }
 0x4ab   : > { %v5800_v9 = vrot.slane %v2820_v50, %v2824_v21  ;;  %v5802_v2 = vrot.slane %v2820_v50, %v2828_v3  ;;  %p4281_p9 = scmp.ne.s32.totalorder %s5932_s10, %s4280_s19  ;;  %s4459_s17 = smov [#allocation13]  }
 0x4ac   : > { %s4284_s13 = sshll.u32 %s4459_s17, 4  ;;  %s4285_s13 = int_to_ptr.vmem [resolvable:$false] %s4284_s13 }
 0x4ad   : > { %s4286_s23 = scalar_lea.vmem %s4285_s13, 16384  ;;  %p4287_p8 = scmp.lt.s32.totalorder %s5932_s10, %s4285_s13 }
 0x4ae   : > { %s5926_s8 = scalar_lea.hbm %s6154_s30, %s3286_s11  ;;  %p4288_p2 = scmp.lt.s32.totalorder %s4286_s23, %s4280_s19 }
 0x4af   : > { %p6157_p12 = scmp.ne.s32.totalorder %s6156_s4, 0 }
 0x4b0   : > { %p4289_p0 = por %p4288_p2, %p4287_p8 }
 0x4b1   : > { %p4282_p3 = pnand %p4281_p9, %p6157_p12 }
 0x4b3   : > { %p4283_p4 = pneg %p4282_p3 }
 0x4b5   : > { %p4290_p1 = pnand %p4289_p0, %p4283_p4 }
 0x533   : > { %v2661_v34 = vpop.f32.mrb[0].mxu0  ;;  %v2741_v8 = vpop.f32.mrb[0].mxu1 }
 0x534   : > { %v2832_v29 = vmul.f32 %v5800_v9, %v2661_v34  ;;  %v2864_v40 = vmul.f32 %v5800_v9, %v2741_v8  ;;  %v2663_v11 = vpop.f32.mrb[1].mxu0  ;;  %v2743_v16 = vpop.f32.mrb[1].mxu1 }
 0x535   : > { %v2833_v4 = vmul.f32 %v5802_v2, %v2663_v11  ;;  %v2865_v33 = vmul.f32 %v5802_v2, %v2743_v16  ;;  %v2665_v46 = vpop.f32.mrb[2].mxu0  ;;  %v2745_v60 = vpop.f32.mrb[2].mxu1 }
 0x536   : > { %2896 = vst [vmem:[%s4890_s2] sm:$0xff] %v2832_v29  ;;  %2928 = vst [vmem:[%s4890_s2 + $0x100] sm:$0xff] %v2864_v40  ;;  %v2834_v5 = vmul.f32 %v5800_v9, %v2665_v46  ;;  %v2866_v48 = vmul.f32 %v5800_v9, %v2745_v60  ;;  %v2667_v37 = vpop.f32.mrb[3].mxu0  ;;  %v2747_v59 = vpop.f32.mrb[3].mxu1 }
 0x537   : > { %2897 = vst [vmem:[%s4890_s2 + $0x8] sm:$0xff] %v2833_v4  ;;  %2929 = vst [vmem:[%s4890_s2 + $0x108] sm:$0xff] %v2865_v33  ;;  %v2835_v7 = vmul.f32 %v5802_v2, %v2667_v37  ;;  %v2867_v28 = vmul.f32 %v5802_v2, %v2747_v59 }
 0x538   : > { %2898 = vst [vmem:[%s4890_s2 + $0x10] sm:$0xff] %v2834_v5  ;;  %2930 = vst [vmem:[%s4890_s2 + $0x110] sm:$0xff] %v2866_v48 }
 0x539   : > { %2899 = vst [vmem:[%s4890_s2 + $0x18] sm:$0xff] %v2835_v7  ;;  %2931 = vst [vmem:[%s4890_s2 + $0x118] sm:$0xff] %v2867_v28 }
 0x53b   : > { %v2671_v19 = vpop.f32.mrb[4].mxu0  ;;  %v2751_v45 = vpop.f32.mrb[4].mxu1 }
 0x53c   : > { %v2836_v18 = vmul.f32 %v5800_v9, %v2671_v19  ;;  %v2868_v52 = vmul.f32 %v5800_v9, %v2751_v45  ;;  %v2673_v35 = vpop.f32.mrb[5].mxu0  ;;  %v2753_v12 = vpop.f32.mrb[5].mxu1 }
 0x53d   : > { %v2837_v25 = vmul.f32 %v5802_v2, %v2673_v35  ;;  %v2869_v26 = vmul.f32 %v5802_v2, %v2753_v12  ;;  %v2675_v27 = vpop.f32.mrb[6].mxu0  ;;  %v2755_v57 = vpop.f32.mrb[6].mxu1 }
 0x53e   : > { %2900 = vst [vmem:[%s4890_s2 + $0x20] sm:$0xff] %v2836_v18  ;;  %2932 = vst [vmem:[%s4890_s2 + $0x120] sm:$0xff] %v2868_v52  ;;  %v2838_v20 = vmul.f32 %v5800_v9, %v2675_v27  ;;  %v2870_v14 = vmul.f32 %v5800_v9, %v2755_v57  ;;  %v2677_v55 = vpop.f32.mrb[7].mxu0  ;;  %v2757_v43 = vpop.f32.mrb[7].mxu1 }
 0x53f   : > { %2901 = vst [vmem:[%s4890_s2 + $0x28] sm:$0xff] %v2837_v25  ;;  %2933 = vst [vmem:[%s4890_s2 + $0x128] sm:$0xff] %v2869_v26  ;;  %v2839_v30 = vmul.f32 %v5802_v2, %v2677_v55  ;;  %v2871_v49 = vmul.f32 %v5802_v2, %v2757_v43 }
 0x540   : > { %2902 = vst [vmem:[%s4890_s2 + $0x30] sm:$0xff] %v2838_v20  ;;  %2934 = vst [vmem:[%s4890_s2 + $0x130] sm:$0xff] %v2870_v14 }
 0x541   : > { %2903 = vst [vmem:[%s4890_s2 + $0x38] sm:$0xff] %v2839_v30  ;;  %2935 = vst [vmem:[%s4890_s2 + $0x138] sm:$0xff] %v2871_v49 }
 0x543   : > { %v2681_v1 = vpop.f32.mrb[8].mxu0  ;;  %v2761_v53 = vpop.f32.mrb[8].mxu1 }
 0x544   : > { %v2840_v54 = vmul.f32 %v5800_v9, %v2681_v1  ;;  %v2872_v38 = vmul.f32 %v5800_v9, %v2761_v53  ;;  %v2683_v31 = vpop.f32.mrb[9].mxu0  ;;  %v2763_v44 = vpop.f32.mrb[9].mxu1 }
 0x545   : > { %v2841_v61 = vmul.f32 %v5802_v2, %v2683_v31  ;;  %v2873_v58 = vmul.f32 %v5802_v2, %v2763_v44  ;;  %v2685_v63 = vpop.f32.mrb[10].mxu0  ;;  %v2765_v17 = vpop.f32.mrb[10].mxu1 }
 0x546   : > { %2904 = vst [vmem:[%s4890_s2 + $0x40] sm:$0xff] %v2840_v54  ;;  %2936 = vst [vmem:[%s4890_s2 + $0x140] sm:$0xff] %v2872_v38  ;;  %v2842_v56 = vmul.f32 %v5800_v9, %v2685_v63  ;;  %v2874_v51 = vmul.f32 %v5800_v9, %v2765_v17  ;;  %v2687_v23 = vpop.f32.mrb[11].mxu0  ;;  %v2767_v36 = vpop.f32.mrb[11].mxu1 }
 0x547   : > { %2905 = vst [vmem:[%s4890_s2 + $0x48] sm:$0xff] %v2841_v61  ;;  %2937 = vst [vmem:[%s4890_s2 + $0x148] sm:$0xff] %v2873_v58  ;;  %v2843_v62 = vmul.f32 %v5802_v2, %v2687_v23  ;;  %v2875_v13 = vmul.f32 %v5802_v2, %v2767_v36 }
 0x548   : > { %2906 = vst [vmem:[%s4890_s2 + $0x50] sm:$0xff] %v2842_v56  ;;  %2938 = vst [vmem:[%s4890_s2 + $0x150] sm:$0xff] %v2874_v51 }
 0x549   : > { %2907 = vst [vmem:[%s4890_s2 + $0x58] sm:$0xff] %v2843_v62  ;;  %2939 = vst [vmem:[%s4890_s2 + $0x158] sm:$0xff] %v2875_v13 }
 0x54b   : > { %v2691_v24 = vpop.f32.mrb[12].mxu0  ;;  %v2771_v41 = vpop.f32.mrb[12].mxu1 }
 0x54c   : > { %v2844_v10 = vmul.f32 %v5800_v9, %v2691_v24  ;;  %v2876_v15 = vmul.f32 %v5800_v9, %v2771_v41  ;;  %v2693_v39 = vpop.f32.mrb[13].mxu0  ;;  %v2773_v42 = vpop.f32.mrb[13].mxu1 }
 0x54d   : > { %v2845_v6 = vmul.f32 %v5802_v2, %v2693_v39  ;;  %v2877_v47 = vmul.f32 %v5802_v2, %v2773_v42  ;;  %v2695_v32 = vpop.f32.mrb[14].mxu0  ;;  %v2775_v22 = vpop.f32.mrb[14].mxu1 }
 0x54e   : > { %2908 = vst [vmem:[%s4890_s2 + $0x60] sm:$0xff] %v2844_v10  ;;  %2940 = vst [vmem:[%s4890_s2 + $0x160] sm:$0xff] %v2876_v15  ;;  %v2846_v0 = vmul.f32 %v5800_v9, %v2695_v32  ;;  %v2878_v21 = vmul.f32 %v5800_v9, %v2775_v22  ;;  %v2697_v50 = vpop.f32.mrb[15].mxu0  ;;  %v2777_v3 = vpop.f32.mrb[15].mxu1 }
 0x54f   : > { %2909 = vst [vmem:[%s4890_s2 + $0x68] sm:$0xff] %v2845_v6  ;;  %2941 = vst [vmem:[%s4890_s2 + $0x168] sm:$0xff] %v2877_v47  ;;  %v2847_v34 = vmul.f32 %v5802_v2, %v2697_v50  ;;  %v2879_v8 = vmul.f32 %v5802_v2, %v2777_v3 }
 0x550   : > { %2910 = vst [vmem:[%s4890_s2 + $0x70] sm:$0xff] %v2846_v0  ;;  %2942 = vst [vmem:[%s4890_s2 + $0x170] sm:$0xff] %v2878_v21 }
 0x551   : > { %2911 = vst [vmem:[%s4890_s2 + $0x78] sm:$0xff] %v2847_v34  ;;  %2943 = vst [vmem:[%s4890_s2 + $0x178] sm:$0xff] %v2879_v8 }
 0x553   : > { %v2701_v29 = vpop.f32.mrb[16].mxu0  ;;  %v2781_v40 = vpop.f32.mrb[16].mxu1 }
 0x554   : > { %v2848_v11 = vmul.f32 %v5800_v9, %v2701_v29  ;;  %v2880_v16 = vmul.f32 %v5800_v9, %v2781_v40  ;;  %v2703_v4 = vpop.f32.mrb[17].mxu0  ;;  %v2783_v33 = vpop.f32.mrb[17].mxu1 }
 0x555   : > { %v2849_v46 = vmul.f32 %v5802_v2, %v2703_v4  ;;  %v2881_v60 = vmul.f32 %v5802_v2, %v2783_v33  ;;  %v2705_v5 = vpop.f32.mrb[18].mxu0  ;;  %v2785_v48 = vpop.f32.mrb[18].mxu1 }
 0x556   : > { %2912 = vst [vmem:[%s4890_s2 + $0x80] sm:$0xff] %v2848_v11  ;;  %2944 = vst [vmem:[%s4890_s2 + $0x180] sm:$0xff] %v2880_v16  ;;  %v2850_v37 = vmul.f32 %v5800_v9, %v2705_v5  ;;  %v2882_v59 = vmul.f32 %v5800_v9, %v2785_v48  ;;  %v2707_v7 = vpop.f32.mrb[19].mxu0  ;;  %v2787_v28 = vpop.f32.mrb[19].mxu1 }
 0x557   : > { %2913 = vst [vmem:[%s4890_s2 + $0x88] sm:$0xff] %v2849_v46  ;;  %2945 = vst [vmem:[%s4890_s2 + $0x188] sm:$0xff] %v2881_v60  ;;  %v2851_v19 = vmul.f32 %v5802_v2, %v2707_v7  ;;  %v2883_v45 = vmul.f32 %v5802_v2, %v2787_v28 }
 0x558   : > { %2914 = vst [vmem:[%s4890_s2 + $0x90] sm:$0xff] %v2850_v37  ;;  %2946 = vst [vmem:[%s4890_s2 + $0x190] sm:$0xff] %v2882_v59 }
 0x559   : > { %2915 = vst [vmem:[%s4890_s2 + $0x98] sm:$0xff] %v2851_v19  ;;  %2947 = vst [vmem:[%s4890_s2 + $0x198] sm:$0xff] %v2883_v45 }
 0x55b   : > { %v2711_v18 = vpop.f32.mrb[20].mxu0  ;;  %v2791_v52 = vpop.f32.mrb[20].mxu1 }
 0x55c   : > { %v2852_v35 = vmul.f32 %v5800_v9, %v2711_v18  ;;  %v2884_v12 = vmul.f32 %v5800_v9, %v2791_v52  ;;  %v2713_v25 = vpop.f32.mrb[21].mxu0  ;;  %v2793_v26 = vpop.f32.mrb[21].mxu1 }
 0x55d   : > { %v2853_v27 = vmul.f32 %v5802_v2, %v2713_v25  ;;  %v2885_v57 = vmul.f32 %v5802_v2, %v2793_v26  ;;  %v2715_v20 = vpop.f32.mrb[22].mxu0  ;;  %v2795_v14 = vpop.f32.mrb[22].mxu1 }
 0x55e   : > { %2916 = vst [vmem:[%s4890_s2 + $0xa0] sm:$0xff] %v2852_v35  ;;  %2948 = vst [vmem:[%s4890_s2 + $0x1a0] sm:$0xff] %v2884_v12  ;;  %v2854_v55 = vmul.f32 %v5800_v9, %v2715_v20  ;;  %v2886_v43 = vmul.f32 %v5800_v9, %v2795_v14  ;;  %v2717_v30 = vpop.f32.mrb[23].mxu0  ;;  %v2797_v49 = vpop.f32.mrb[23].mxu1 }
 0x55f   : > { %2917 = vst [vmem:[%s4890_s2 + $0xa8] sm:$0xff] %v2853_v27  ;;  %2949 = vst [vmem:[%s4890_s2 + $0x1a8] sm:$0xff] %v2885_v57  ;;  %v2855_v1 = vmul.f32 %v5802_v2, %v2717_v30  ;;  %v2887_v53 = vmul.f32 %v5802_v2, %v2797_v49 }
 0x560   : > { %2918 = vst [vmem:[%s4890_s2 + $0xb0] sm:$0xff] %v2854_v55  ;;  %2950 = vst [vmem:[%s4890_s2 + $0x1b0] sm:$0xff] %v2886_v43 }
 0x561   : > { %2919 = vst [vmem:[%s4890_s2 + $0xb8] sm:$0xff] %v2855_v1  ;;  %2951 = vst [vmem:[%s4890_s2 + $0x1b8] sm:$0xff] %v2887_v53 }
 0x563   : > { %v2721_v54 = vpop.f32.mrb[24].mxu0  ;;  %v2801_v38 = vpop.f32.mrb[24].mxu1 }
 0x564   : > { %v2856_v31 = vmul.f32 %v5800_v9, %v2721_v54  ;;  %v2888_v44 = vmul.f32 %v5800_v9, %v2801_v38  ;;  %v2723_v61 = vpop.f32.mrb[25].mxu0  ;;  %v2803_v58 = vpop.f32.mrb[25].mxu1 }
 0x565   : > { %v2857_v63 = vmul.f32 %v5802_v2, %v2723_v61  ;;  %v2889_v17 = vmul.f32 %v5802_v2, %v2803_v58  ;;  %v2725_v56 = vpop.f32.mrb[26].mxu0  ;;  %v2805_v51 = vpop.f32.mrb[26].mxu1 }
 0x566   : > { %2920 = vst [vmem:[%s4890_s2 + $0xc0] sm:$0xff] %v2856_v31  ;;  %2952 = vst [vmem:[%s4890_s2 + $0x1c0] sm:$0xff] %v2888_v44  ;;  %v2858_v23 = vmul.f32 %v5800_v9, %v2725_v56  ;;  %v2890_v36 = vmul.f32 %v5800_v9, %v2805_v51  ;;  %v2727_v62 = vpop.f32.mrb[27].mxu0  ;;  %v2807_v13 = vpop.f32.mrb[27].mxu1 }
 0x567   : > { %2921 = vst [vmem:[%s4890_s2 + $0xc8] sm:$0xff] %v2857_v63  ;;  %2953 = vst [vmem:[%s4890_s2 + $0x1c8] sm:$0xff] %v2889_v17  ;;  %v2859_v24 = vmul.f32 %v5802_v2, %v2727_v62  ;;  %v2891_v41 = vmul.f32 %v5802_v2, %v2807_v13 }
 0x568   : > { %2922 = vst [vmem:[%s4890_s2 + $0xd0] sm:$0xff] %v2858_v23  ;;  %2954 = vst [vmem:[%s4890_s2 + $0x1d0] sm:$0xff] %v2890_v36 }
 0x569   : > { %2923 = vst [vmem:[%s4890_s2 + $0xd8] sm:$0xff] %v2859_v24  ;;  %2955 = vst [vmem:[%s4890_s2 + $0x1d8] sm:$0xff] %v2891_v41 }
 0x56b   : > { %v2731_v10 = vpop.f32.mrb[28].mxu0  ;;  %v2811_v15 = vpop.f32.mrb[28].mxu1 }
 0x56c   : > { %v2860_v39 = vmul.f32 %v5800_v9, %v2731_v10  ;;  %v2892_v42 = vmul.f32 %v5800_v9, %v2811_v15  ;;  %v2733_v6 = vpop.f32.mrb[29].mxu0  ;;  %v2813_v47 = vpop.f32.mrb[29].mxu1 }
 0x56d   : > { %v2861_v32 = vmul.f32 %v5802_v2, %v2733_v6  ;;  %v2893_v22 = vmul.f32 %v5802_v2, %v2813_v47  ;;  %v2735_v0 = vpop.f32.mrb[30].mxu0  ;;  %v2815_v21 = vpop.f32.mrb[30].mxu1 }
 0x56e   : > { %2924 = vst [vmem:[%s4890_s2 + $0xe0] sm:$0xff] %v2860_v39  ;;  %2956 = vst [vmem:[%s4890_s2 + $0x1e0] sm:$0xff] %v2892_v42  ;;  %v2862_v50 = vmul.f32 %v5800_v9, %v2735_v0  ;;  %v2894_v3 = vmul.f32 %v5800_v9, %v2815_v21  ;;  %v2737_v34 = vpop.f32.mrb[31].mxu0  ;;  %v2817_v8 = vpop.f32.mrb[31].mxu1 }
 0x56f   : > { %2925 = vst [vmem:[%s4890_s2 + $0xe8] sm:$0xff] %v2861_v32  ;;  %2957 = vst [vmem:[%s4890_s2 + $0x1e8] sm:$0xff] %v2893_v22  ;;  %v2863_v29 = vmul.f32 %v5802_v2, %v2737_v34  ;;  %v2895_v40 = vmul.f32 %v5802_v2, %v2817_v8 }
 0x570   : > { %2926 = vst [vmem:[%s4890_s2 + $0xf0] sm:$0xff] %v2862_v50  ;;  %2958 = vst [vmem:[%s4890_s2 + $0x1f0] sm:$0xff] %v2894_v3 }
 0x571   : > { %2927 = vst [vmem:[%s4890_s2 + $0xf8] sm:$0xff] %v2863_v29  ;;  %2959 = vst [vmem:[%s4890_s2 + $0x1f8] sm:$0xff] %v2895_v40 }
 0x572   : > { %4293 = shalt.err (!%p4290_p1)
}
 0x573   : > { %s4294_s28 = scalar_lea.hbm %s5926_s8, 8192  ;;  %s4298_s1 = scalar_lea.hbm %s6154_s30, 32768 }
 0x574   : > { %p4295_p6 = scmp.ne.s32.totalorder %s5926_s8, %s4294_s28  ;;  %p4299_p7 = scmp.lt.u32.totalorder %s5926_s8, %s6154_s30 }
 0x575   : > { %p4300_p11 = scmp.lt.u32.totalorder %s4298_s1, %s4294_s28  ;;  %p4302_p9 = scmp.lt.u32.totalorder %s4294_s28, %s5926_s8 }
 0x576   : > { %p4296_p5 = pnand %p4295_p6, %p6157_p12 }
 0x577   : > { %p4301_p10 = por %p4300_p11, %p4299_p7 }
 0x578   : > { %p4297_p13 = pneg %p4296_p5 }
 0x579   : > { %p4303_p3 = por %p4302_p9, %p4301_p10 }
 0x57b   : > { %p4304_p4 = pnand %p4303_p3, %p4297_p13 }
 0x57d   : > { %4307 = shalt.err (!%p4304_p4)
}
 0x57e   : > { %s4460_s27 = smov 256   ;;  %s4461_s11 = smov 512  }
 0x57f   : > { %s4462_s6 = smov 16  }
 0x580   : > { %3454 = dma.vmem_to_hbm [thread:$0]  (%p6157_p12), %s5932_s10, 8192, %s5926_s8, %s5944_s25, %s4460_s27, %s4461_s11, %s4462_s6  }
 0x581 PF: > { %s6158_s20 = sld [smem:[#allocation24_spill]]  ;;  %s6159_s0 = sld [smem:[#allocation31_spill]] }
 0x582   : > { %p3488_p8 = scmp.ge.s32.totalorder %s4442_s26, 2 }
 0x587   : > { %s3013_s19 = sand.u32 1, %s6158_s20   ;;  %p6160_p2 = scmp.ne.s32.totalorder %s6159_s0, 0 }
 0x588   : > { %s3014_s17 = scalar_lea.sflag [#allocation5], %s3013_s19 }
 0x589   : > { %p3475_p0 = pnand %p3488_p8, %p6160_p2 }
 0x58b   : > { %4381 = dma.done.wait (!%p3475_p0), %s3014_s17, 4096  }
 0x58c   : > { %4383 = vsyncadd (!%p3475_p0), %s3014_s17, 4294963200  ;;  %s6161_s13 = sld [smem:[#allocation21_spill]] }
 0x58d   : > { %s6162_s23 = sld [smem:[#allocation33_spill]] }
 0x592   : > { %s3022_s28 = sand.u32 1, %s6161_s13  }
 0x593   : > { %p6163_p1 = scmp.ne.s32.totalorder %s6162_s23, 0  ;;  %s3023_s2 = scalar_lea.sflag [#allocation14], %s3022_s28 }
 0x595   : > { %p3478_p6 = pnand %p3488_p8, %p6163_p1 }
 0x597   : > { %4385 = dma.done.wait (!%p3478_p6), %s3023_s2, 8192  }
 0x598   : > { %4387 = vsyncadd (!%p3478_p6), %s3023_s2, 4294959104  ;;  %s32_s26 = sadd.s32 1, %s4442_s26   ;;  %s6165_s13 = sld [smem:[#allocation22_spill]] }
 0x599   : > { %p5976_p12 = scmp.ge.s32.totalorder %s32_s26, 6   ;;  %s6166_s8 = smov %s4715_s14 }
 0x59a   : > { %s6167_s16 = sld [smem:[#allocation23_spill]]  ;;  %s6168_s4 = sld [smem:[#allocation36_spill]] }
 0x59b   : > { %s6169_s19 = sld [smem:[#allocation25_spill]]  ;;  %s6170_s23 = sld [smem:[#allocation28_spill]] }
 0x59c   : > { %s6171_s25 = sld [smem:[#allocation34_spill]]  ;;  %s6172_s9 = sld [smem:[#allocation35_spill]] }
 0x59d   : > { %s6173_s14 = smov %s4398_s15  ;;  %s6174_s15 = smov %s6166_s8 }
 0x59e   : > { %s6175_s17 = smov %s4410_s18  ;;  %s6177_s20 = smov %s4422_s21 }
 0x59f   : > { %s6178_s21 = smov %s4712_s22  ;;  %s6179_s22 = smov %s4434_s24 }
 0x5a0   : > { %s6176_s18 = smov %s6168_s4  ;;  %31 = sbr.rel (!%p5976_p12) target bundleno = 23 (0x17), region = 148 }
 0x5a2   : > { %s6180_s24 = smov %s6171_s25  ;;  %s6181_s25 = smov %s6172_s9 }
 0x5a7   :  { %3028 = vsyncpa [#allocation4], 1 }
 0x5a8   :  { %3030 = vsyncpa [#allocation4 + $0x1], 1 }
 0x5a9   :  { %3031 = vsyncpa [#allocation7], 1 }
 0x5aa   :  { %3032 = vsyncpa [#allocation10], 1 }
 0x5ab   :  { %3033 = vsyncpa [#allocation5], 1 }
 0x5ac   :  { %3035 = vsyncpa [#allocation5 + $0x1], 1 }
 0x5ad   :  { %3036 = vsyncpa [#allocation14], 1 }
 0x5ae   :  { %3038 = vsyncpa [#allocation14 + $0x1], 1 }

</bundles_post_ra>
